<compile_context>
chip_gen: v5e
topology: v5e:2x2
jax: 0.10.0
libtpu: 0.0.40
codegen_flags: <defaults>
</compile_context>

<pallas_src>
import functools

import jax
import jax.numpy as jnp
from jax import lax
from jax.experimental import pallas as pl
from jax.experimental.pallas import tpu as pltpu


def _round_up(x, m):
    return (x + m - 1) // m * m


# ----------------------------- Pallas kernels --------------------------------

def _conv_kernel(p_ref, w_ref, b_ref, o_ref, *, act):
    # p_ref: (TM, K) bf16 im2col patches, w_ref: (K, Cp) bf16, b_ref: (1, Cp) f32
    y = jnp.dot(p_ref[...], w_ref[...], preferred_element_type=jnp.float32)
    y = y + b_ref[...]
    if act == "relu":
        y = jnp.maximum(y, 0.0)
    o_ref[...] = y


def _conv_kernel_crelu(p_ref, w_ref, b_ref, o_ref):
    # CReLU: relu(cat([y, -y], channel)) == cat(relu(y), relu(-y)); written as a
    # single lane-dense (TM, 2*Cp) tile (2*Cp == 128 for both CReLU layers).
    y = jnp.dot(p_ref[...], w_ref[...], preferred_element_type=jnp.float32)
    y = y + b_ref[...]
    o_ref[...] = jnp.concatenate([jnp.maximum(y, 0.0), jnp.maximum(-y, 0.0)], axis=-1)


def _choose_tm(M):
    # Largest tile <= 1024 that divides M exactly (M here is 2048/128/32/8/2);
    # falls back to a single full-extent block (allowed: equals full array dim).
    for tm in (1024, 512, 256, 128, 64, 32, 16, 8):
        if M % tm == 0:
            return tm
    return M


def _pallas_conv_mm(patches, w, shift, act):
    # patches: (M, K), w: (K, Cp) bf16 with Cp lane-padded, shift: (1, Cp) f32.
    M, K = patches.shape
    Cp = w.shape[1]
    patches = patches.astype(jnp.bfloat16)
    TM = _choose_tm(M)
    grid = (M // TM,)
    in_specs = [
        pl.BlockSpec((TM, K), lambda i: (i, 0)),
        pl.BlockSpec((K, Cp), lambda i: (0, 0)),
        pl.BlockSpec((1, Cp), lambda i: (0, 0)),
    ]
    cparams = pltpu.CompilerParams(dimension_semantics=("parallel",))
    if act == "crelu":
        out_shape = jax.ShapeDtypeStruct((M, 2 * Cp), jnp.float32)
        out_specs = pl.BlockSpec((TM, 2 * Cp), lambda i: (i, 0))
        return pl.pallas_call(
            _conv_kernel_crelu, out_shape=out_shape, grid=grid,
            in_specs=in_specs, out_specs=out_specs, compiler_params=cparams,
        )(patches, w, shift)
    out_shape = jax.ShapeDtypeStruct((M, Cp), jnp.float32)
    out_specs = pl.BlockSpec((TM, Cp), lambda i: (i, 0))
    return pl.pallas_call(
        functools.partial(_conv_kernel, act=act), out_shape=out_shape, grid=grid,
        in_specs=in_specs, out_specs=out_specs, compiler_params=cparams,
    )(patches, w, shift)


# --------------------------- conv / pooling glue ------------------------------

def _im2col(x, kh, kw, stride, pad):
    # x: [N, H, W, C] -> patches [N*Ho*Wo, kh*kw*C], K ordered as (dy, dx, cin)
    N, H, W, C = x.shape
    xp = jnp.pad(x, ((0, 0), (pad, pad), (pad, pad), (0, 0)))
    Ho = (H + 2 * pad - kh) // stride + 1
    Wo = (W + 2 * pad - kw) // stride + 1
    cols = []
    for dy in range(kh):
        for dx in range(kw):
            sl = lax.slice(
                xp, (0, dy, dx, 0),
                (N, dy + (Ho - 1) * stride + 1, dx + (Wo - 1) * stride + 1, C),
                (1, stride, stride, 1))
            cols.append(sl)
    patches = jnp.stack(cols, axis=3).reshape(N * Ho * Wo, kh * kw * C)
    return patches, (N, Ho, Wo)


def conv_layer(x, p, act):
    kh, kw, stride, pad = p["kh"], p["kw"], p["stride"], p["pad"]
    cout = p["cout"]
    if kh == 1 and kw == 1 and stride == 1 and pad == 0:
        N, H, W, C = x.shape
        patches, (Ho, Wo) = x.reshape(N * H * W, C), (H, W)
    else:
        patches, (N, Ho, Wo) = _im2col(x, kh, kw, stride, pad)
    Cp = p["w"].shape[1]
    if act == "crelu":
        y = _pallas_conv_mm(patches, p["w"], p["shift"], "crelu")  # (M, 2*Cp)
        y = y.reshape(N, Ho, Wo, 2 * Cp)
        if cout == Cp:          # conv2: 64 + 64 channels, no slicing needed
            return y
        return jnp.concatenate([y[..., :cout], y[..., Cp:Cp + cout]], axis=-1)
    y = _pallas_conv_mm(patches, p["w"], p["shift"], act).reshape(N, Ho, Wo, Cp)
    if cout != Cp:
        y = y[..., :cout]
    return y


# TODO(synk): 3x3 max/avg pooling stays in XLA (lax.reduce_window) — tiny tensors, not hot path.
def _max_pool_3x3_s2_p1(x):
    return lax.reduce_window(x, -jnp.inf, lax.max, (1, 3, 3, 1), (1, 2, 2, 1),
                             ((0, 0), (1, 1), (1, 1), (0, 0)))


def _avg_pool_3x3_s1_p1(x):
    s = lax.reduce_window(x, 0.0, lax.add, (1, 3, 3, 1), (1, 1, 1, 1),
                          ((0, 0), (1, 1), (1, 1), (0, 0)))
    return s / 9.0  # PyTorch avg_pool2d default count_include_pad=True


# ----------------------------- parameters -------------------------------------

_BN_SCALE = 1.0 / float(jnp.sqrt(1.0 + 1e-5))  # eval-mode BN fold (gamma=1, var=1)


def _pad_cout(w, shift, to):
    cout = w.shape[1]
    cp = _round_up(cout, to)
    if cp != cout:
        w = jnp.pad(w, ((0, 0), (0, cp - cout)))
        shift = jnp.pad(shift, ((0, 0), (0, cp - cout)))
    return w, shift


def _conv_bn_params(key, cin, cout, k, stride=1, pad=None, crelu=False):
    if pad is None:
        pad = k // 2
    K = k * k * cin
    w = jax.random.normal(key, (K, cout), jnp.float32) * 0.01 * _BN_SCALE  # BN scale folded in
    shift = jnp.zeros((1, cout), jnp.float32)
    w, shift = _pad_cout(w, shift, 64 if crelu else 128)
    return dict(w=w.astype(jnp.bfloat16), shift=shift, cout=cout,
                kh=k, kw=k, stride=stride, pad=pad)


def _fused_head_params(key, cin, n_anchor, num_classes, k=3):
    # loc (n_anchor*4) and conf (n_anchor*num_classes) heads fused along Cout.
    c_loc, c_conf = n_anchor * 4, n_anchor * num_classes
    K = k * k * cin
    kl, kc = jax.random.split(key)
    std = (2.0 / (K + 1)) ** 0.5  # xavier-ish init (heads have bias in the reference)
    wl = jax.random.normal(kl, (K, c_loc), jnp.float32) * std
    wc = jax.random.normal(kc, (K, c_conf), jnp.float32) * std
    w = jnp.concatenate([wl, wc], axis=1)
    shift = jnp.full((1, c_loc + c_conf), 0.02, jnp.float32)  # bias filled with 0.02
    w, shift = _pad_cout(w, shift, 128)
    return dict(w=w.astype(jnp.bfloat16), shift=shift, c_loc=c_loc, c_conf=c_conf)


def _inception_params(key, cin=128):
    ks = jax.random.split(key, 7)
    # The three 1x1 convs that read the same input x are fused along Cout:
    # branch1x1 (32) + branch3x3_reduce (24) + branch3x3_reduce_2 (24) = 80 -> pad 128.
    def w1(k, cout):
        return jax.random.normal(k, (cin, cout), jnp.float32) * 0.01 * _BN_SCALE
    w_f = jnp.concatenate([w1(ks[0], 32), w1(ks[2], 24), w1(ks[4], 24)], axis=1)
    shift_f = jnp.zeros((1, 80), jnp.float32)
    w_f, shift_f = _pad_cout(w_f, shift_f, 128)
    return dict(
        fused1x1=dict(w=w_f.astype(jnp.bfloat16), shift=shift_f),
        branch1x1_2=_conv_bn_params(ks[1], cin, 32, 1),
        branch3x3=_conv_bn_params(ks[3], 24, 32, 3),
        branch3x3_2=_conv_bn_params(ks[5], 24, 32, 3),
        branch3x3_3=_conv_bn_params(ks[6], 32, 32, 3),
    )


def init_faceboxes_params(key, num_classes=2):
    ks = jax.random.split(key, 12)
    fe = dict(
        conv1=_conv_bn_params(ks[0], 3, 24, 7, stride=4, pad=3, crelu=True),   # CReLU -> 48 ch
        conv2=_conv_bn_params(ks[1], 48, 64, 5, stride=2, pad=2, crelu=True),  # CReLU -> 128 ch
        inc1=_inception_params(ks[2]),
        inc2=_inception_params(ks[3]),
        inc3=_inception_params(ks[4]),
        conv3_1=_conv_bn_params(ks[5], 128, 128, 1),
        conv3_2=_conv_bn_params(ks[6], 128, 256, 3, stride=2),
        conv4_1=_conv_bn_params(ks[7], 256, 128, 1),
        conv4_2=_conv_bn_params(ks[8], 128, 256, 3, stride=2),
    )
    anchors = [21, 1, 1]
    filters = [128, 256, 256]
    head = [_fused_head_params(ks[9 + i], filters[i], anchors[i], num_classes)
            for i in range(3)]
    return dict(fe=fe, head=head)


# ------------------------------- forward --------------------------------------

def _inception(x, P):
    # TODO(synk): the reduce->3x3(->3x3) branch chains still run as separate
    # pallas_calls; a single VMEM-resident fused kernel would cut launches further.
    N, H, W, C = x.shape
    fused = _pallas_conv_mm(x.reshape(N * H * W, C),
                            P["fused1x1"]["w"], P["fused1x1"]["shift"], "relu")
    b1 = fused[:, 0:32].reshape(N, H, W, 32)          # branch1x1
    r3 = fused[:, 32:56].reshape(N, H, W, 24)         # branch3x3_reduce
    r4 = fused[:, 56:80].reshape(N, H, W, 24)         # branch3x3_reduce_2
    pool = _avg_pool_3x3_s1_p1(x)
    b2 = conv_layer(pool, P["branch1x1_2"], "relu")
    b3 = conv_layer(r3, P["branch3x3"], "relu")
    b4 = conv_layer(r4, P["branch3x3_2"], "relu")
    b4 = conv_layer(b4, P["branch3x3_3"], "relu")
    return jnp.concatenate([b1, b2, b3, b4], axis=-1)  # 128 channels


def _feature_extractor(x, P):
    x = conv_layer(x, P["conv1"], "crelu")
    x = _max_pool_3x3_s2_p1(x)
    x = conv_layer(x, P["conv2"], "crelu")
    x = _max_pool_3x3_s2_p1(x)
    x = _inception(x, P["inc1"])
    x = _inception(x, P["inc2"])
    scale1 = _inception(x, P["inc3"])
    x = conv_layer(scale1, P["conv3_1"], "relu")
    scale2 = conv_layer(x, P["conv3_2"], "relu")
    x = conv_layer(scale2, P["conv4_1"], "relu")
    scale3 = conv_layer(x, P["conv4_2"], "relu")
    return scale1, scale2, scale3


def faceboxes_forward(x_nchw, params, num_classes=2):
    x = jnp.transpose(x_nchw, (0, 2, 3, 1))  # NCHW -> NHWC
    feats = _feature_extractor(x, params["fe"])
    locs, confs = [], []
    for f, hp in zip(feats, params["head"]):
        patches, (N, Ho, Wo) = _im2col(f, 3, 3, 1, 1)
        y = _pallas_conv_mm(patches, hp["w"], hp["shift"], "none")  # fused loc+conf
        c_loc, c_conf = hp["c_loc"], hp["c_conf"]
        # NHWC row order == PyTorch permute(0,2,3,1).view(N,-1)
        locs.append(y[:, :c_loc].reshape(N, -1))
        confs.append(y[:, c_loc:c_loc + c_conf].reshape(N, -1))
    N = x.shape[0]
    loc = jnp.concatenate(locs, axis=1).reshape(N, -1, 4)
    conf = jnp.concatenate(confs, axis=1).reshape(N, -1, num_classes)
    conf = jax.nn.softmax(conf, axis=-1)  # eval branch of the reference module
    return loc, conf


if __name__ == "__main__":
    key = jax.random.PRNGKey(0)
    pkey, xkey = jax.random.split(key)
    num_classes = 2
    params = init_faceboxes_params(pkey, num_classes=num_classes)
    # Input is NCHW like the PyTorch module; 128x128 is the smallest size that
    # keeps all three detection scales non-degenerate (total stride 32/64/128).
    x = jax.random.normal(xkey, (2, 3, 128, 128), jnp.float32)

    # params are closed over (static conv hyper-params stay Python ints).
    fwd = jax.jit(lambda inp: faceboxes_forward(inp, params, num_classes=num_classes))
    loc, conf = fwd(x)
    jax.block_until_ready((loc, conf))

    assert loc.shape == (2, 341, 4), loc.shape    # 21*4*4 + 1*2*2 + 1*1*1 = 341 anchors
    assert conf.shape == (2, 341, 2), conf.shape
    assert bool(jnp.allclose(conf.sum(-1), 1.0, atol=1e-5))
    print("KERNEL_OK")
</pallas_src>

<mosaic_0001>
module attributes {stable_mosaic.version = 11 : i64} {
  func.func @_conv_kernel_crelu(%arg0: i32, %arg1: memref<1024x147xbf16, #tpu.memory_space<vmem>>, %arg2: memref<147x64xbf16, #tpu.memory_space<vmem>>, %arg3: memref<1x64xf32, #tpu.memory_space<vmem>>, %arg4: memref<1024x128xf32, #tpu.memory_space<vmem>>) attributes {dimension_semantics = [#tpu.dimension_semantics<parallel>], iteration_bounds = array<i64: 2>, scalar_prefetch = 0 : i64, scratch_operands = 0 : i64, tpu.core_type = #tpu.core_type<tc>, window_params = [{transform_indices = @transform_0, window_bounds = array<i64: 1024, 147>}, {pipeline_mode = #tpu.pipeline_mode<synchronous>, transform_indices = @transform_1, window_bounds = array<i64: 147, 64>}, {pipeline_mode = #tpu.pipeline_mode<synchronous>, transform_indices = @transform_2, window_bounds = array<i64: 1, 64>}, {transform_indices = @transform_3, window_bounds = array<i64: 1024, 128>}]} {
    %c0 = arith.constant 0 : index
    %c0_0 = arith.constant 0 : index
    %0 = vector.load %arg1[%c0, %c0_0] : memref<1024x147xbf16, #tpu.memory_space<vmem>>, vector<1024x147xbf16>
    %c0_1 = arith.constant 0 : index
    %c0_2 = arith.constant 0 : index
    %1 = vector.load %arg2[%c0_1, %c0_2] : memref<147x64xbf16, #tpu.memory_space<vmem>>, vector<147x64xbf16>
    %cst = arith.constant dense<0.000000e+00> : vector<1024x64xf32>
    %2 = tpu.matmul %0, %1, %cst {dimension_numbers = #tpu.dot_dimension_numbers<[1], [0], [0], [1], [0, 0, 1, 1], [], []>} : vector<1024x147xbf16>, vector<147x64xbf16>, vector<1024x64xf32> -> vector<1024x64xf32>
    %c0_3 = arith.constant 0 : index
    %c0_4 = arith.constant 0 : index
    %3 = vector.load %arg3[%c0_3, %c0_4] : memref<1x64xf32, #tpu.memory_space<vmem>>, vector<1x64xf32>
    %4 = vector.broadcast %3 : vector<1x64xf32> to vector<1024x64xf32>
    %5 = arith.addf %2, %4 : vector<1024x64xf32>
    %cst_5 = arith.constant 0.000000e+00 : f32
    %6 = vector.broadcast %cst_5 : f32 to vector<1024x64xf32>
    %7 = arith.maximumf %5, %6 : vector<1024x64xf32>
    %cst_6 = arith.constant 0.000000e+00 : f32
    %8 = vector.broadcast %cst_6 : f32 to vector<1024x64xf32>
    %9 = arith.subf %8, %5 : vector<1024x64xf32>
    %cst_7 = arith.constant 0.000000e+00 : f32
    %10 = vector.broadcast %cst_7 : f32 to vector<1024x64xf32>
    %11 = arith.maximumf %9, %10 : vector<1024x64xf32>
    %12 = tpu.concatenate %7, %11 in 1 : vector<1024x64xf32>, vector<1024x64xf32> -> vector<1024x128xf32>
    %c0_8 = arith.constant 0 : index
    %c0_9 = arith.constant 0 : index
    %13 = vector.load %arg4[%c0_8, %c0_9] : memref<1024x128xf32, #tpu.memory_space<vmem>>, vector<1024x128xf32>
    tpu.vector_store %arg4[%c0_8, %c0_9], %12 {strides = array<i32>} : memref<1024x128xf32, #tpu.memory_space<vmem>>, vector<1024x128xf32>,
    return
  }
  func.func @transform_0(%arg0: i32) -> (i32, i32) {
    %c0_i32 = arith.constant 0 : i32
    %c0_i32_0 = arith.constant 0 : i32
    return %arg0, %c0_i32 : i32, i32
  }
  func.func @transform_1(%arg0: i32) -> (i32, i32) {
    %c0_i32 = arith.constant 0 : i32
    %c0_i32_0 = arith.constant 0 : i32
    %c0_i32_1 = arith.constant 0 : i32
    return %c0_i32, %c0_i32_0 : i32, i32
  }
  func.func @transform_2(%arg0: i32) -> (i32, i32) {
    %c0_i32 = arith.constant 0 : i32
    %c0_i32_0 = arith.constant 0 : i32
    %c0_i32_1 = arith.constant 0 : i32
    return %c0_i32, %c0_i32_0 : i32, i32
  }
  func.func @transform_3(%arg0: i32) -> (i32, i32) {
    %c0_i32 = arith.constant 0 : i32
    %c0_i32_0 = arith.constant 0 : i32
    return %arg0, %c0_i32 : i32, i32
  }
}

module attributes {stable_mosaic.version = 11 : i64} {
  func.func @_conv_kernel_crelu(%arg0: i32, %arg1: memref<128x1200xbf16, #tpu.memory_space<vmem>>, %arg2: memref<1200x64xbf16, #tpu.memory_space<vmem>>, %arg3: memref<1x64xf32, #tpu.memory_space<vmem>>, %arg4: memref<128x128xf32, #tpu.memory_space<vmem>>) attributes {dimension_semantics = [#tpu.dimension_semantics<parallel>], iteration_bounds = array<i64: 1>, scalar_prefetch = 0 : i64, scratch_operands = 0 : i64, tpu.core_type = #tpu.core_type<tc>, window_params = [{transform_indices = @transform_0, window_bounds = array<i64: 128, 1200>}, {pipeline_mode = #tpu.pipeline_mode<synchronous>, transform_indices = @transform_1, window_bounds = array<i64: 1200, 64>}, {pipeline_mode = #tpu.pipeline_mode<synchronous>, transform_indices = @transform_2, window_bounds = array<i64: 1, 64>}, {transform_indices = @transform_3, window_bounds = array<i64: 128, 128>}]} {
    %c0 = arith.constant 0 : index
    %c0_0 = arith.constant 0 : index
    %0 = vector.load %arg1[%c0, %c0_0] : memref<128x1200xbf16, #tpu.memory_space<vmem>>, vector<128x1200xbf16>
    %c0_1 = arith.constant 0 : index
    %c0_2 = arith.constant 0 : index
    %1 = vector.load %arg2[%c0_1, %c0_2] : memref<1200x64xbf16, #tpu.memory_space<vmem>>, vector<1200x64xbf16>
    %cst = arith.constant dense<0.000000e+00> : vector<128x64xf32>
    %2 = tpu.matmul %0, %1, %cst {dimension_numbers = #tpu.dot_dimension_numbers<[1], [0], [0], [1], [0, 0, 1, 1], [], []>} : vector<128x1200xbf16>, vector<1200x64xbf16>, vector<128x64xf32> -> vector<128x64xf32>
    %c0_3 = arith.constant 0 : index
    %c0_4 = arith.constant 0 : index
    %3 = vector.load %arg3[%c0_3, %c0_4] : memref<1x64xf32, #tpu.memory_space<vmem>>, vector<1x64xf32>
    %4 = vector.broadcast %3 : vector<1x64xf32> to vector<128x64xf32>
    %5 = arith.addf %2, %4 : vector<128x64xf32>
    %cst_5 = arith.constant 0.000000e+00 : f32
    %6 = vector.broadcast %cst_5 : f32 to vector<128x64xf32>
    %7 = arith.maximumf %5, %6 : vector<128x64xf32>
    %cst_6 = arith.constant 0.000000e+00 : f32
    %8 = vector.broadcast %cst_6 : f32 to vector<128x64xf32>
    %9 = arith.subf %8, %5 : vector<128x64xf32>
    %cst_7 = arith.constant 0.000000e+00 : f32
    %10 = vector.broadcast %cst_7 : f32 to vector<128x64xf32>
    %11 = arith.maximumf %9, %10 : vector<128x64xf32>
    %12 = tpu.concatenate %7, %11 in 1 : vector<128x64xf32>, vector<128x64xf32> -> vector<128x128xf32>
    %c0_8 = arith.constant 0 : index
    %c0_9 = arith.constant 0 : index
    %13 = vector.load %arg4[%c0_8, %c0_9] : memref<128x128xf32, #tpu.memory_space<vmem>>, vector<128x128xf32>
    tpu.vector_store %arg4[%c0_8, %c0_9], %12 {strides = array<i32>} : memref<128x128xf32, #tpu.memory_space<vmem>>, vector<128x128xf32>,
    return
  }
  func.func @transform_0(%arg0: i32) -> (i32, i32) {
    %c0_i32 = arith.constant 0 : i32
    %c0_i32_0 = arith.constant 0 : i32
    return %arg0, %c0_i32 : i32, i32
  }
  func.func @transform_1(%arg0: i32) -> (i32, i32) {
    %c0_i32 = arith.constant 0 : i32
    %c0_i32_0 = arith.constant 0 : i32
    %c0_i32_1 = arith.constant 0 : i32
    return %c0_i32, %c0_i32_0 : i32, i32
  }
  func.func @transform_2(%arg0: i32) -> (i32, i32) {
    %c0_i32 = arith.constant 0 : i32
    %c0_i32_0 = arith.constant 0 : i32
    %c0_i32_1 = arith.constant 0 : i32
    return %c0_i32, %c0_i32_0 : i32, i32
  }
  func.func @transform_3(%arg0: i32) -> (i32, i32) {
    %c0_i32 = arith.constant 0 : i32
    %c0_i32_0 = arith.constant 0 : i32
    return %arg0, %c0_i32 : i32, i32
  }
}

module attributes {stable_mosaic.version = 11 : i64} {
  func.func @_conv_kernel(%arg0: i32, %arg1: memref<32x128xbf16, #tpu.memory_space<vmem>>, %arg2: memref<128x128xbf16, #tpu.memory_space<vmem>>, %arg3: memref<1x128xf32, #tpu.memory_space<vmem>>, %arg4: memref<32x128xf32, #tpu.memory_space<vmem>>) attributes {dimension_semantics = [#tpu.dimension_semantics<parallel>], iteration_bounds = array<i64: 1>, scalar_prefetch = 0 : i64, scratch_operands = 0 : i64, tpu.core_type = #tpu.core_type<tc>, window_params = [{transform_indices = @transform_0, window_bounds = array<i64: 32, 128>}, {pipeline_mode = #tpu.pipeline_mode<synchronous>, transform_indices = @transform_1, window_bounds = array<i64: 128, 128>}, {pipeline_mode = #tpu.pipeline_mode<synchronous>, transform_indices = @transform_2, window_bounds = array<i64: 1, 128>}, {transform_indices = @transform_3, window_bounds = array<i64: 32, 128>}]} {
    %c0 = arith.constant 0 : index
    %c0_0 = arith.constant 0 : index
    %0 = vector.load %arg1[%c0, %c0_0] : memref<32x128xbf16, #tpu.memory_space<vmem>>, vector<32x128xbf16>
    %c0_1 = arith.constant 0 : index
    %c0_2 = arith.constant 0 : index
    %1 = vector.load %arg2[%c0_1, %c0_2] : memref<128x128xbf16, #tpu.memory_space<vmem>>, vector<128x128xbf16>
    %cst = arith.constant dense<0.000000e+00> : vector<32x128xf32>
    %2 = tpu.matmul %0, %1, %cst {dimension_numbers = #tpu.dot_dimension_numbers<[1], [0], [0], [1], [0, 0, 1, 1], [], []>} : vector<32x128xbf16>, vector<128x128xbf16>, vector<32x128xf32> -> vector<32x128xf32>
    %c0_3 = arith.constant 0 : index
    %c0_4 = arith.constant 0 : index
    %3 = vector.load %arg3[%c0_3, %c0_4] : memref<1x128xf32, #tpu.memory_space<vmem>>, vector<1x128xf32>
    %4 = vector.broadcast %3 : vector<1x128xf32> to vector<32x128xf32>
    %5 = arith.addf %2, %4 : vector<32x128xf32>
    %cst_5 = arith.constant 0.000000e+00 : f32
    %6 = vector.broadcast %cst_5 : f32 to vector<32x128xf32>
    %7 = arith.maximumf %5, %6 : vector<32x128xf32>
    %c0_6 = arith.constant 0 : index
    %c0_7 = arith.constant 0 : index
    %8 = vector.load %arg4[%c0_6, %c0_7] : memref<32x128xf32, #tpu.memory_space<vmem>>, vector<32x128xf32>
    tpu.vector_store %arg4[%c0_6, %c0_7], %7 {strides = array<i32>} : memref<32x128xf32, #tpu.memory_space<vmem>>, vector<32x128xf32>,
    return
  }
  func.func @transform_0(%arg0: i32) -> (i32, i32) {
    %c0_i32 = arith.constant 0 : i32
    %c0_i32_0 = arith.constant 0 : i32
    return %arg0, %c0_i32 : i32, i32
  }
  func.func @transform_1(%arg0: i32) -> (i32, i32) {
    %c0_i32 = arith.constant 0 : i32
    %c0_i32_0 = arith.constant 0 : i32
    %c0_i32_1 = arith.constant 0 : i32
    return %c0_i32, %c0_i32_0 : i32, i32
  }
  func.func @transform_2(%arg0: i32) -> (i32, i32) {
    %c0_i32 = arith.constant 0 : i32
    %c0_i32_0 = arith.constant 0 : i32
    %c0_i32_1 = arith.constant 0 : i32
    return %c0_i32, %c0_i32_0 : i32, i32
  }
  func.func @transform_3(%arg0: i32) -> (i32, i32) {
    %c0_i32 = arith.constant 0 : i32
    %c0_i32_0 = arith.constant 0 : i32
    return %arg0, %c0_i32 : i32, i32
  }
}

module attributes {stable_mosaic.version = 11 : i64} {
  func.func @_conv_kernel(%arg0: i32, %arg1: memref<32x216xbf16, #tpu.memory_space<vmem>>, %arg2: memref<216x128xbf16, #tpu.memory_space<vmem>>, %arg3: memref<1x128xf32, #tpu.memory_space<vmem>>, %arg4: memref<32x128xf32, #tpu.memory_space<vmem>>) attributes {dimension_semantics = [#tpu.dimension_semantics<parallel>], iteration_bounds = array<i64: 1>, scalar_prefetch = 0 : i64, scratch_operands = 0 : i64, tpu.core_type = #tpu.core_type<tc>, window_params = [{transform_indices = @transform_0, window_bounds = array<i64: 32, 216>}, {pipeline_mode = #tpu.pipeline_mode<synchronous>, transform_indices = @transform_1, window_bounds = array<i64: 216, 128>}, {pipeline_mode = #tpu.pipeline_mode<synchronous>, transform_indices = @transform_2, window_bounds = array<i64: 1, 128>}, {transform_indices = @transform_3, window_bounds = array<i64: 32, 128>}]} {
    %c0 = arith.constant 0 : index
    %c0_0 = arith.constant 0 : index
    %0 = vector.load %arg1[%c0, %c0_0] : memref<32x216xbf16, #tpu.memory_space<vmem>>, vector<32x216xbf16>
    %c0_1 = arith.constant 0 : index
    %c0_2 = arith.constant 0 : index
    %1 = vector.load %arg2[%c0_1, %c0_2] : memref<216x128xbf16, #tpu.memory_space<vmem>>, vector<216x128xbf16>
    %cst = arith.constant dense<0.000000e+00> : vector<32x128xf32>
    %2 = tpu.matmul %0, %1, %cst {dimension_numbers = #tpu.dot_dimension_numbers<[1], [0], [0], [1], [0, 0, 1, 1], [], []>} : vector<32x216xbf16>, vector<216x128xbf16>, vector<32x128xf32> -> vector<32x128xf32>
    %c0_3 = arith.constant 0 : index
    %c0_4 = arith.constant 0 : index
    %3 = vector.load %arg3[%c0_3, %c0_4] : memref<1x128xf32, #tpu.memory_space<vmem>>, vector<1x128xf32>
    %4 = vector.broadcast %3 : vector<1x128xf32> to vector<32x128xf32>
    %5 = arith.addf %2, %4 : vector<32x128xf32>
    %cst_5 = arith.constant 0.000000e+00 : f32
    %6 = vector.broadcast %cst_5 : f32 to vector<32x128xf32>
    %7 = arith.maximumf %5, %6 : vector<32x128xf32>
    %c0_6 = arith.constant 0 : index
    %c0_7 = arith.constant 0 : index
    %8 = vector.load %arg4[%c0_6, %c0_7] : memref<32x128xf32, #tpu.memory_space<vmem>>, vector<32x128xf32>
    tpu.vector_store %arg4[%c0_6, %c0_7], %7 {strides = array<i32>} : memref<32x128xf32, #tpu.memory_space<vmem>>, vector<32x128xf32>,
    return
  }
  func.func @transform_0(%arg0: i32) -> (i32, i32) {
    %c0_i32 = arith.constant 0 : i32
    %c0_i32_0 = arith.constant 0 : i32
    return %arg0, %c0_i32 : i32, i32
  }
  func.func @transform_1(%arg0: i32) -> (i32, i32) {
    %c0_i32 = arith.constant 0 : i32
    %c0_i32_0 = arith.constant 0 : i32
    %c0_i32_1 = arith.constant 0 : i32
    return %c0_i32, %c0_i32_0 : i32, i32
  }
  func.func @transform_2(%arg0: i32) -> (i32, i32) {
    %c0_i32 = arith.constant 0 : i32
    %c0_i32_0 = arith.constant 0 : i32
    %c0_i32_1 = arith.constant 0 : i32
    return %c0_i32, %c0_i32_0 : i32, i32
  }
  func.func @transform_3(%arg0: i32) -> (i32, i32) {
    %c0_i32 = arith.constant 0 : i32
    %c0_i32_0 = arith.constant 0 : i32
    return %arg0, %c0_i32 : i32, i32
  }
}

module attributes {stable_mosaic.version = 11 : i64} {
  func.func @_conv_kernel(%arg0: i32, %arg1: memref<32x288xbf16, #tpu.memory_space<vmem>>, %arg2: memref<288x128xbf16, #tpu.memory_space<vmem>>, %arg3: memref<1x128xf32, #tpu.memory_space<vmem>>, %arg4: memref<32x128xf32, #tpu.memory_space<vmem>>) attributes {dimension_semantics = [#tpu.dimension_semantics<parallel>], iteration_bounds = array<i64: 1>, scalar_prefetch = 0 : i64, scratch_operands = 0 : i64, tpu.core_type = #tpu.core_type<tc>, window_params = [{transform_indices = @transform_0, window_bounds = array<i64: 32, 288>}, {pipeline_mode = #tpu.pipeline_mode<synchronous>, transform_indices = @transform_1, window_bounds = array<i64: 288, 128>}, {pipeline_mode = #tpu.pipeline_mode<synchronous>, transform_indices = @transform_2, window_bounds = array<i64: 1, 128>}, {transform_indices = @transform_3, window_bounds = array<i64: 32, 128>}]} {
    %c0 = arith.constant 0 : index
    %c0_0 = arith.constant 0 : index
    %0 = vector.load %arg1[%c0, %c0_0] : memref<32x288xbf16, #tpu.memory_space<vmem>>, vector<32x288xbf16>
    %c0_1 = arith.constant 0 : index
    %c0_2 = arith.constant 0 : index
    %1 = vector.load %arg2[%c0_1, %c0_2] : memref<288x128xbf16, #tpu.memory_space<vmem>>, vector<288x128xbf16>
    %cst = arith.constant dense<0.000000e+00> : vector<32x128xf32>
    %2 = tpu.matmul %0, %1, %cst {dimension_numbers = #tpu.dot_dimension_numbers<[1], [0], [0], [1], [0, 0, 1, 1], [], []>} : vector<32x288xbf16>, vector<288x128xbf16>, vector<32x128xf32> -> vector<32x128xf32>
    %c0_3 = arith.constant 0 : index
    %c0_4 = arith.constant 0 : index
    %3 = vector.load %arg3[%c0_3, %c0_4] : memref<1x128xf32, #tpu.memory_space<vmem>>, vector<1x128xf32>
    %4 = vector.broadcast %3 : vector<1x128xf32> to vector<32x128xf32>
    %5 = arith.addf %2, %4 : vector<32x128xf32>
    %cst_5 = arith.constant 0.000000e+00 : f32
    %6 = vector.broadcast %cst_5 : f32 to vector<32x128xf32>
    %7 = arith.maximumf %5, %6 : vector<32x128xf32>
    %c0_6 = arith.constant 0 : index
    %c0_7 = arith.constant 0 : index
    %8 = vector.load %arg4[%c0_6, %c0_7] : memref<32x128xf32, #tpu.memory_space<vmem>>, vector<32x128xf32>
    tpu.vector_store %arg4[%c0_6, %c0_7], %7 {strides = array<i32>} : memref<32x128xf32, #tpu.memory_space<vmem>>, vector<32x128xf32>,
    return
  }
  func.func @transform_0(%arg0: i32) -> (i32, i32) {
    %c0_i32 = arith.constant 0 : i32
    %c0_i32_0 = arith.constant 0 : i32
    return %arg0, %c0_i32 : i32, i32
  }
  func.func @transform_1(%arg0: i32) -> (i32, i32) {
    %c0_i32 = arith.constant 0 : i32
    %c0_i32_0 = arith.constant 0 : i32
    %c0_i32_1 = arith.constant 0 : i32
    return %c0_i32, %c0_i32_0 : i32, i32
  }
  func.func @transform_2(%arg0: i32) -> (i32, i32) {
    %c0_i32 = arith.constant 0 : i32
    %c0_i32_0 = arith.constant 0 : i32
    %c0_i32_1 = arith.constant 0 : i32
    return %c0_i32, %c0_i32_0 : i32, i32
  }
  func.func @transform_3(%arg0: i32) -> (i32, i32) {
    %c0_i32 = arith.constant 0 : i32
    %c0_i32_0 = arith.constant 0 : i32
    return %arg0, %c0_i32 : i32, i32
  }
}

module attributes {stable_mosaic.version = 11 : i64} {
  func.func @_conv_kernel(%arg0: i32, %arg1: memref<8x1152xbf16, #tpu.memory_space<vmem>>, %arg2: memref<1152x256xbf16, #tpu.memory_space<vmem>>, %arg3: memref<1x256xf32, #tpu.memory_space<vmem>>, %arg4: memref<8x256xf32, #tpu.memory_space<vmem>>) attributes {dimension_semantics = [#tpu.dimension_semantics<parallel>], iteration_bounds = array<i64: 1>, scalar_prefetch = 0 : i64, scratch_operands = 0 : i64, tpu.core_type = #tpu.core_type<tc>, window_params = [{transform_indices = @transform_0, window_bounds = array<i64: 8, 1152>}, {pipeline_mode = #tpu.pipeline_mode<synchronous>, transform_indices = @transform_1, window_bounds = array<i64: 1152, 256>}, {pipeline_mode = #tpu.pipeline_mode<synchronous>, transform_indices = @transform_2, window_bounds = array<i64: 1, 256>}, {transform_indices = @transform_3, window_bounds = array<i64: 8, 256>}]} {
    %c0 = arith.constant 0 : index
    %c0_0 = arith.constant 0 : index
    %0 = vector.load %arg1[%c0, %c0_0] : memref<8x1152xbf16, #tpu.memory_space<vmem>>, vector<8x1152xbf16>
    %c0_1 = arith.constant 0 : index
    %c0_2 = arith.constant 0 : index
    %1 = vector.load %arg2[%c0_1, %c0_2] : memref<1152x256xbf16, #tpu.memory_space<vmem>>, vector<1152x256xbf16>
    %cst = arith.constant dense<0.000000e+00> : vector<8x256xf32>
    %2 = tpu.matmul %0, %1, %cst {dimension_numbers = #tpu.dot_dimension_numbers<[1], [0], [0], [1], [0, 0, 1, 1], [], []>} : vector<8x1152xbf16>, vector<1152x256xbf16>, vector<8x256xf32> -> vector<8x256xf32>
    %c0_3 = arith.constant 0 : index
    %c0_4 = arith.constant 0 : index
    %3 = vector.load %arg3[%c0_3, %c0_4] : memref<1x256xf32, #tpu.memory_space<vmem>>, vector<1x256xf32>
    %4 = vector.broadcast %3 : vector<1x256xf32> to vector<8x256xf32>
    %5 = arith.addf %2, %4 : vector<8x256xf32>
    %cst_5 = arith.constant 0.000000e+00 : f32
    %6 = vector.broadcast %cst_5 : f32 to vector<8x256xf32>
    %7 = arith.maximumf %5, %6 : vector<8x256xf32>
    %c0_6 = arith.constant 0 : index
    %c0_7 = arith.constant 0 : index
    %8 = vector.load %arg4[%c0_6, %c0_7] : memref<8x256xf32, #tpu.memory_space<vmem>>, vector<8x256xf32>
    tpu.vector_store %arg4[%c0_6, %c0_7], %7 {strides = array<i32>} : memref<8x256xf32, #tpu.memory_space<vmem>>, vector<8x256xf32>,
    return
  }
  func.func @transform_0(%arg0: i32) -> (i32, i32) {
    %c0_i32 = arith.constant 0 : i32
    %c0_i32_0 = arith.constant 0 : i32
    return %arg0, %c0_i32 : i32, i32
  }
  func.func @transform_1(%arg0: i32) -> (i32, i32) {
    %c0_i32 = arith.constant 0 : i32
    %c0_i32_0 = arith.constant 0 : i32
    %c0_i32_1 = arith.constant 0 : i32
    return %c0_i32, %c0_i32_0 : i32, i32
  }
  func.func @transform_2(%arg0: i32) -> (i32, i32) {
    %c0_i32 = arith.constant 0 : i32
    %c0_i32_0 = arith.constant 0 : i32
    %c0_i32_1 = arith.constant 0 : i32
    return %c0_i32, %c0_i32_0 : i32, i32
  }
  func.func @transform_3(%arg0: i32) -> (i32, i32) {
    %c0_i32 = arith.constant 0 : i32
    %c0_i32_0 = arith.constant 0 : i32
    return %arg0, %c0_i32 : i32, i32
  }
}

module attributes {stable_mosaic.version = 11 : i64} {
  func.func @_conv_kernel(%arg0: i32, %arg1: memref<8x256xbf16, #tpu.memory_space<vmem>>, %arg2: memref<256x128xbf16, #tpu.memory_space<vmem>>, %arg3: memref<1x128xf32, #tpu.memory_space<vmem>>, %arg4: memref<8x128xf32, #tpu.memory_space<vmem>>) attributes {dimension_semantics = [#tpu.dimension_semantics<parallel>], iteration_bounds = array<i64: 1>, scalar_prefetch = 0 : i64, scratch_operands = 0 : i64, tpu.core_type = #tpu.core_type<tc>, window_params = [{transform_indices = @transform_0, window_bounds = array<i64: 8, 256>}, {pipeline_mode = #tpu.pipeline_mode<synchronous>, transform_indices = @transform_1, window_bounds = array<i64: 256, 128>}, {pipeline_mode = #tpu.pipeline_mode<synchronous>, transform_indices = @transform_2, window_bounds = array<i64: 1, 128>}, {transform_indices = @transform_3, window_bounds = array<i64: 8, 128>}]} {
    %c0 = arith.constant 0 : index
    %c0_0 = arith.constant 0 : index
    %0 = vector.load %arg1[%c0, %c0_0] : memref<8x256xbf16, #tpu.memory_space<vmem>>, vector<8x256xbf16>
    %c0_1 = arith.constant 0 : index
    %c0_2 = arith.constant 0 : index
    %1 = vector.load %arg2[%c0_1, %c0_2] : memref<256x128xbf16, #tpu.memory_space<vmem>>, vector<256x128xbf16>
    %cst = arith.constant dense<0.000000e+00> : vector<8x128xf32>
    %2 = tpu.matmul %0, %1, %cst {dimension_numbers = #tpu.dot_dimension_numbers<[1], [0], [0], [1], [0, 0, 1, 1], [], []>} : vector<8x256xbf16>, vector<256x128xbf16>, vector<8x128xf32> -> vector<8x128xf32>
    %c0_3 = arith.constant 0 : index
    %c0_4 = arith.constant 0 : index
    %3 = vector.load %arg3[%c0_3, %c0_4] : memref<1x128xf32, #tpu.memory_space<vmem>>, vector<1x128xf32>
    %4 = vector.broadcast %3 : vector<1x128xf32> to vector<8x128xf32>
    %5 = arith.addf %2, %4 : vector<8x128xf32>
    %cst_5 = arith.constant 0.000000e+00 : f32
    %6 = vector.broadcast %cst_5 : f32 to vector<8x128xf32>
    %7 = arith.maximumf %5, %6 : vector<8x128xf32>
    %c0_6 = arith.constant 0 : index
    %c0_7 = arith.constant 0 : index
    %8 = vector.load %arg4[%c0_6, %c0_7] : memref<8x128xf32, #tpu.memory_space<vmem>>, vector<8x128xf32>
    tpu.vector_store %arg4[%c0_6, %c0_7], %7 {strides = array<i32>} : memref<8x128xf32, #tpu.memory_space<vmem>>, vector<8x128xf32>,
    return
  }
  func.func @transform_0(%arg0: i32) -> (i32, i32) {
    %c0_i32 = arith.constant 0 : i32
    %c0_i32_0 = arith.constant 0 : i32
    return %arg0, %c0_i32 : i32, i32
  }
  func.func @transform_1(%arg0: i32) -> (i32, i32) {
    %c0_i32 = arith.constant 0 : i32
    %c0_i32_0 = arith.constant 0 : i32
    %c0_i32_1 = arith.constant 0 : i32
    return %c0_i32, %c0_i32_0 : i32, i32
  }
  func.func @transform_2(%arg0: i32) -> (i32, i32) {
    %c0_i32 = arith.constant 0 : i32
    %c0_i32_0 = arith.constant 0 : i32
    %c0_i32_1 = arith.constant 0 : i32
    return %c0_i32, %c0_i32_0 : i32, i32
  }
  func.func @transform_3(%arg0: i32) -> (i32, i32) {
    %c0_i32 = arith.constant 0 : i32
    %c0_i32_0 = arith.constant 0 : i32
    return %arg0, %c0_i32 : i32, i32
  }
}

module attributes {stable_mosaic.version = 11 : i64} {
  func.func @_conv_kernel(%arg0: i32, %arg1: memref<2x1152xbf16, #tpu.memory_space<vmem>>, %arg2: memref<1152x256xbf16, #tpu.memory_space<vmem>>, %arg3: memref<1x256xf32, #tpu.memory_space<vmem>>, %arg4: memref<2x256xf32, #tpu.memory_space<vmem>>) attributes {dimension_semantics = [#tpu.dimension_semantics<parallel>], iteration_bounds = array<i64: 1>, scalar_prefetch = 0 : i64, scratch_operands = 0 : i64, tpu.core_type = #tpu.core_type<tc>, window_params = [{transform_indices = @transform_0, window_bounds = array<i64: 2, 1152>}, {pipeline_mode = #tpu.pipeline_mode<synchronous>, transform_indices = @transform_1, window_bounds = array<i64: 1152, 256>}, {pipeline_mode = #tpu.pipeline_mode<synchronous>, transform_indices = @transform_2, window_bounds = array<i64: 1, 256>}, {transform_indices = @transform_3, window_bounds = array<i64: 2, 256>}]} {
    %c0 = arith.constant 0 : index
    %c0_0 = arith.constant 0 : index
    %0 = vector.load %arg1[%c0, %c0_0] : memref<2x1152xbf16, #tpu.memory_space<vmem>>, vector<2x1152xbf16>
    %c0_1 = arith.constant 0 : index
    %c0_2 = arith.constant 0 : index
    %1 = vector.load %arg2[%c0_1, %c0_2] : memref<1152x256xbf16, #tpu.memory_space<vmem>>, vector<1152x256xbf16>
    %cst = arith.constant dense<0.000000e+00> : vector<2x256xf32>
    %2 = tpu.matmul %0, %1, %cst {dimension_numbers = #tpu.dot_dimension_numbers<[1], [0], [0], [1], [0, 0, 1, 1], [], []>} : vector<2x1152xbf16>, vector<1152x256xbf16>, vector<2x256xf32> -> vector<2x256xf32>
    %c0_3 = arith.constant 0 : index
    %c0_4 = arith.constant 0 : index
    %3 = vector.load %arg3[%c0_3, %c0_4] : memref<1x256xf32, #tpu.memory_space<vmem>>, vector<1x256xf32>
    %4 = vector.broadcast %3 : vector<1x256xf32> to vector<2x256xf32>
    %5 = arith.addf %2, %4 : vector<2x256xf32>
    %cst_5 = arith.constant 0.000000e+00 : f32
    %6 = vector.broadcast %cst_5 : f32 to vector<2x256xf32>
    %7 = arith.maximumf %5, %6 : vector<2x256xf32>
    %c0_6 = arith.constant 0 : index
    %c0_7 = arith.constant 0 : index
    %8 = vector.load %arg4[%c0_6, %c0_7] : memref<2x256xf32, #tpu.memory_space<vmem>>, vector<2x256xf32>
    tpu.vector_store %arg4[%c0_6, %c0_7], %7 {strides = array<i32>} : memref<2x256xf32, #tpu.memory_space<vmem>>, vector<2x256xf32>,
    return
  }
  func.func @transform_0(%arg0: i32) -> (i32, i32) {
    %c0_i32 = arith.constant 0 : i32
    %c0_i32_0 = arith.constant 0 : i32
    return %arg0, %c0_i32 : i32, i32
  }
  func.func @transform_1(%arg0: i32) -> (i32, i32) {
    %c0_i32 = arith.constant 0 : i32
    %c0_i32_0 = arith.constant 0 : i32
    %c0_i32_1 = arith.constant 0 : i32
    return %c0_i32, %c0_i32_0 : i32, i32
  }
  func.func @transform_2(%arg0: i32) -> (i32, i32) {
    %c0_i32 = arith.constant 0 : i32
    %c0_i32_0 = arith.constant 0 : i32
    %c0_i32_1 = arith.constant 0 : i32
    return %c0_i32, %c0_i32_0 : i32, i32
  }
  func.func @transform_3(%arg0: i32) -> (i32, i32) {
    %c0_i32 = arith.constant 0 : i32
    %c0_i32_0 = arith.constant 0 : i32
    return %arg0, %c0_i32 : i32, i32
  }
}

module attributes {stable_mosaic.version = 11 : i64} {
  func.func @_conv_kernel(%arg0: i32, %arg1: memref<2x2304xbf16, #tpu.memory_space<vmem>>, %arg2: memref<2304x128xbf16, #tpu.memory_space<vmem>>, %arg3: memref<1x128xf32, #tpu.memory_space<vmem>>, %arg4: memref<2x128xf32, #tpu.memory_space<vmem>>) attributes {dimension_semantics = [#tpu.dimension_semantics<parallel>], iteration_bounds = array<i64: 1>, scalar_prefetch = 0 : i64, scratch_operands = 0 : i64, tpu.core_type = #tpu.core_type<tc>, window_params = [{transform_indices = @transform_0, window_bounds = array<i64: 2, 2304>}, {pipeline_mode = #tpu.pipeline_mode<synchronous>, transform_indices = @transform_1, window_bounds = array<i64: 2304, 128>}, {pipeline_mode = #tpu.pipeline_mode<synchronous>, transform_indices = @transform_2, window_bounds = array<i64: 1, 128>}, {transform_indices = @transform_3, window_bounds = array<i64: 2, 128>}]} {
    %c0 = arith.constant 0 : index
    %c0_0 = arith.constant 0 : index
    %0 = vector.load %arg1[%c0, %c0_0] : memref<2x2304xbf16, #tpu.memory_space<vmem>>, vector<2x2304xbf16>
    %c0_1 = arith.constant 0 : index
    %c0_2 = arith.constant 0 : index
    %1 = vector.load %arg2[%c0_1, %c0_2] : memref<2304x128xbf16, #tpu.memory_space<vmem>>, vector<2304x128xbf16>
    %cst = arith.constant dense<0.000000e+00> : vector<2x128xf32>
    %2 = tpu.matmul %0, %1, %cst {dimension_numbers = #tpu.dot_dimension_numbers<[1], [0], [0], [1], [0, 0, 1, 1], [], []>} : vector<2x2304xbf16>, vector<2304x128xbf16>, vector<2x128xf32> -> vector<2x128xf32>
    %c0_3 = arith.constant 0 : index
    %c0_4 = arith.constant 0 : index
    %3 = vector.load %arg3[%c0_3, %c0_4] : memref<1x128xf32, #tpu.memory_space<vmem>>, vector<1x128xf32>
    %4 = vector.broadcast %3 : vector<1x128xf32> to vector<2x128xf32>
    %5 = arith.addf %2, %4 : vector<2x128xf32>
    %c0_5 = arith.constant 0 : index
    %c0_6 = arith.constant 0 : index
    %6 = vector.load %arg4[%c0_5, %c0_6] : memref<2x128xf32, #tpu.memory_space<vmem>>, vector<2x128xf32>
    tpu.vector_store %arg4[%c0_5, %c0_6], %5 {strides = array<i32>} : memref<2x128xf32, #tpu.memory_space<vmem>>, vector<2x128xf32>,
    return
  }
  func.func @transform_0(%arg0: i32) -> (i32, i32) {
    %c0_i32 = arith.constant 0 : i32
    %c0_i32_0 = arith.constant 0 : i32
    return %arg0, %c0_i32 : i32, i32
  }
  func.func @transform_1(%arg0: i32) -> (i32, i32) {
    %c0_i32 = arith.constant 0 : i32
    %c0_i32_0 = arith.constant 0 : i32
    %c0_i32_1 = arith.constant 0 : i32
    return %c0_i32, %c0_i32_0 : i32, i32
  }
  func.func @transform_2(%arg0: i32) -> (i32, i32) {
    %c0_i32 = arith.constant 0 : i32
    %c0_i32_0 = arith.constant 0 : i32
    %c0_i32_1 = arith.constant 0 : i32
    return %c0_i32, %c0_i32_0 : i32, i32
  }
  func.func @transform_3(%arg0: i32) -> (i32, i32) {
    %c0_i32 = arith.constant 0 : i32
    %c0_i32_0 = arith.constant 0 : i32
    return %arg0, %c0_i32 : i32, i32
  }
}

module attributes {stable_mosaic.version = 11 : i64} {
  func.func @_conv_kernel(%arg0: i32, %arg1: memref<8x2304xbf16, #tpu.memory_space<vmem>>, %arg2: memref<2304x128xbf16, #tpu.memory_space<vmem>>, %arg3: memref<1x128xf32, #tpu.memory_space<vmem>>, %arg4: memref<8x128xf32, #tpu.memory_space<vmem>>) attributes {dimension_semantics = [#tpu.dimension_semantics<parallel>], iteration_bounds = array<i64: 1>, scalar_prefetch = 0 : i64, scratch_operands = 0 : i64, tpu.core_type = #tpu.core_type<tc>, window_params = [{transform_indices = @transform_0, window_bounds = array<i64: 8, 2304>}, {pipeline_mode = #tpu.pipeline_mode<synchronous>, transform_indices = @transform_1, window_bounds = array<i64: 2304, 128>}, {pipeline_mode = #tpu.pipeline_mode<synchronous>, transform_indices = @transform_2, window_bounds = array<i64: 1, 128>}, {transform_indices = @transform_3, window_bounds = array<i64: 8, 128>}]} {
    %c0 = arith.constant 0 : index
    %c0_0 = arith.constant 0 : index
    %0 = vector.load %arg1[%c0, %c0_0] : memref<8x2304xbf16, #tpu.memory_space<vmem>>, vector<8x2304xbf16>
    %c0_1 = arith.constant 0 : index
    %c0_2 = arith.constant 0 : index
    %1 = vector.load %arg2[%c0_1, %c0_2] : memref<2304x128xbf16, #tpu.memory_space<vmem>>, vector<2304x128xbf16>
    %cst = arith.constant dense<0.000000e+00> : vector<8x128xf32>
    %2 = tpu.matmul %0, %1, %cst {dimension_numbers = #tpu.dot_dimension_numbers<[1], [0], [0], [1], [0, 0, 1, 1], [], []>} : vector<8x2304xbf16>, vector<2304x128xbf16>, vector<8x128xf32> -> vector<8x128xf32>
    %c0_3 = arith.constant 0 : index
    %c0_4 = arith.constant 0 : index
    %3 = vector.load %arg3[%c0_3, %c0_4] : memref<1x128xf32, #tpu.memory_space<vmem>>, vector<1x128xf32>
    %4 = vector.broadcast %3 : vector<1x128xf32> to vector<8x128xf32>
    %5 = arith.addf %2, %4 : vector<8x128xf32>
    %c0_5 = arith.constant 0 : index
    %c0_6 = arith.constant 0 : index
    %6 = vector.load %arg4[%c0_5, %c0_6] : memref<8x128xf32, #tpu.memory_space<vmem>>, vector<8x128xf32>
    tpu.vector_store %arg4[%c0_5, %c0_6], %5 {strides = array<i32>} : memref<8x128xf32, #tpu.memory_space<vmem>>, vector<8x128xf32>,
    return
  }
  func.func @transform_0(%arg0: i32) -> (i32, i32) {
    %c0_i32 = arith.constant 0 : i32
    %c0_i32_0 = arith.constant 0 : i32
    return %arg0, %c0_i32 : i32, i32
  }
  func.func @transform_1(%arg0: i32) -> (i32, i32) {
    %c0_i32 = arith.constant 0 : i32
    %c0_i32_0 = arith.constant 0 : i32
    %c0_i32_1 = arith.constant 0 : i32
    return %c0_i32, %c0_i32_0 : i32, i32
  }
  func.func @transform_2(%arg0: i32) -> (i32, i32) {
    %c0_i32 = arith.constant 0 : i32
    %c0_i32_0 = arith.constant 0 : i32
    %c0_i32_1 = arith.constant 0 : i32
    return %c0_i32, %c0_i32_0 : i32, i32
  }
  func.func @transform_3(%arg0: i32) -> (i32, i32) {
    %c0_i32 = arith.constant 0 : i32
    %c0_i32_0 = arith.constant 0 : i32
    return %arg0, %c0_i32 : i32, i32
  }
}

module attributes {stable_mosaic.version = 11 : i64} {
  func.func @_conv_kernel(%arg0: i32, %arg1: memref<32x1152xbf16, #tpu.memory_space<vmem>>, %arg2: memref<1152x128xbf16, #tpu.memory_space<vmem>>, %arg3: memref<1x128xf32, #tpu.memory_space<vmem>>, %arg4: memref<32x128xf32, #tpu.memory_space<vmem>>) attributes {dimension_semantics = [#tpu.dimension_semantics<parallel>], iteration_bounds = array<i64: 1>, scalar_prefetch = 0 : i64, scratch_operands = 0 : i64, tpu.core_type = #tpu.core_type<tc>, window_params = [{transform_indices = @transform_0, window_bounds = array<i64: 32, 1152>}, {pipeline_mode = #tpu.pipeline_mode<synchronous>, transform_indices = @transform_1, window_bounds = array<i64: 1152, 128>}, {pipeline_mode = #tpu.pipeline_mode<synchronous>, transform_indices = @transform_2, window_bounds = array<i64: 1, 128>}, {transform_indices = @transform_3, window_bounds = array<i64: 32, 128>}]} {
    %c0 = arith.constant 0 : index
    %c0_0 = arith.constant 0 : index
    %0 = vector.load %arg1[%c0, %c0_0] : memref<32x1152xbf16, #tpu.memory_space<vmem>>, vector<32x1152xbf16>
    %c0_1 = arith.constant 0 : index
    %c0_2 = arith.constant 0 : index
    %1 = vector.load %arg2[%c0_1, %c0_2] : memref<1152x128xbf16, #tpu.memory_space<vmem>>, vector<1152x128xbf16>
    %cst = arith.constant dense<0.000000e+00> : vector<32x128xf32>
    %2 = tpu.matmul %0, %1, %cst {dimension_numbers = #tpu.dot_dimension_numbers<[1], [0], [0], [1], [0, 0, 1, 1], [], []>} : vector<32x1152xbf16>, vector<1152x128xbf16>, vector<32x128xf32> -> vector<32x128xf32>
    %c0_3 = arith.constant 0 : index
    %c0_4 = arith.constant 0 : index
    %3 = vector.load %arg3[%c0_3, %c0_4] : memref<1x128xf32, #tpu.memory_space<vmem>>, vector<1x128xf32>
    %4 = vector.broadcast %3 : vector<1x128xf32> to vector<32x128xf32>
    %5 = arith.addf %2, %4 : vector<32x128xf32>
    %c0_5 = arith.constant 0 : index
    %c0_6 = arith.constant 0 : index
    %6 = vector.load %arg4[%c0_5, %c0_6] : memref<32x128xf32, #tpu.memory_space<vmem>>, vector<32x128xf32>
    tpu.vector_store %arg4[%c0_5, %c0_6], %5 {strides = array<i32>} : memref<32x128xf32, #tpu.memory_space<vmem>>, vector<32x128xf32>,
    return
  }
  func.func @transform_0(%arg0: i32) -> (i32, i32) {
    %c0_i32 = arith.constant 0 : i32
    %c0_i32_0 = arith.constant 0 : i32
    return %arg0, %c0_i32 : i32, i32
  }
  func.func @transform_1(%arg0: i32) -> (i32, i32) {
    %c0_i32 = arith.constant 0 : i32
    %c0_i32_0 = arith.constant 0 : i32
    %c0_i32_1 = arith.constant 0 : i32
    return %c0_i32, %c0_i32_0 : i32, i32
  }
  func.func @transform_2(%arg0: i32) -> (i32, i32) {
    %c0_i32 = arith.constant 0 : i32
    %c0_i32_0 = arith.constant 0 : i32
    %c0_i32_1 = arith.constant 0 : i32
    return %c0_i32, %c0_i32_0 : i32, i32
  }
  func.func @transform_3(%arg0: i32) -> (i32, i32) {
    %c0_i32 = arith.constant 0 : i32
    %c0_i32_0 = arith.constant 0 : i32
    return %arg0, %c0_i32 : i32, i32
  }
}

</mosaic_0001>

<bundles_post_ra>
// kernel: _lambda_.24
= control target key start
LH: loop header
LB: loop body
LE: loop exit
PB: predicated region body
PF: predicated region fallthrough
CT: control target
= control target key end

     0   :  { %s3845_s12 = smov 0   ;;  %s5597_s0 = inlined_call_operand.vmem [shape: bf16[2048,147], index: 0, kind: input, shape index: {}]   ;;  %s5598_s1 = inlined_call_operand.vmem [shape: bf16[147,64], index: 1, kind: input, shape index: {}]   ;;  %s5599_s2 = inlined_call_operand.vmem [shape: f32[1,64], index: 2, kind: input, shape index: {}]   ;;  %s5600_s3 = inlined_call_operand.vmem [shape: f32[2048,128], index: 3, kind: output, shape index: {}]  }
   0x1 LB: > { %s3029_s13 = sadd.s32 4294967295, %s3821_s12   ;;  %p3033_p0 = scmp.ge.s32.totalorder %s3821_s12, 1  ;;  %s3821_s12 = sphi %s3845_s12, %s13_s12  }
   0x2   : > { %p139_p1 = scmp.lt.s32.totalorder %s3821_s12, 3 }
   0x4   : > { %p140_p2 = pnand %p3033_p0, %p139_p1 }
   0x5   : > { %s3034_s18 = sshll.u32 (!%p140_p2), %s3029_s13, 7  ;;  %s3824_s15 = smov (!%p140_p2), 64  }
   0x6   : > { %143 = sbr.rel (%p140_p2) target bundleno = 806 (0x326), region = 32  ;;  %p165_p3 = scmp.lt.s32.totalorder (!%p140_p2), %s3034_s18, 255 }
   0xb   : > { %v3789_v0 = vld [vmem:[%s5598_s1 + $0x38] sm:$0xff]  ;;  %v324_v1 = vld [vmem:[%s5598_s1 + $0x48] sm:$0x3]  ;;  %vm1155_vm0 = vcmask 1040384   ;;  %vm1156_vm1 = vcmask 1041408   ;;  %v3788_v3 = vld [vmem:[%s5598_s1 + $0x30] sm:$0xff] }
   0xc   : > { %v942_v2 = vunpack.c.l.b16 %v324_v1  ;;  %1162 = vmatpush.bf16.msra.mxu0 %v3789_v0  ;;  %3791 = vmatpush.bf16.msra.mxu2 %v3789_v0  ;;  %v3823_v4 = vmov 65535   ;;  %s5602_s18 = smov (!%p165_p3, %s3034_s18), 255  ;;  %v3787_v9 = vld [vmem:[%s5598_s1 + $0x28] sm:$0xff]  ;;  %v3790_v10 = vld [vmem:[%s5598_s1 + $0x40] sm:$0xff]  ;;  %vm962_vm2 = vcmask 154624   ;;  %v3785_v18 = vld [vmem:[%s5598_s1 + $0x18] sm:$0xff] }
   0xd   : > { %v1157_v5 = vsel %vm1155_vm0, 4294967295, %v3823_v4  ;;  %s3653_s23 = sshll.u32 %s5602_s18, 3  ;;  %v3786_v14 = vld [vmem:[%s5598_s1 + $0x20] sm:$0xff]  ;;  %v3784_v19 = vld [vmem:[%s5598_s1 + $0x10] sm:$0xff]  ;;  %v3783_v20 = vld [vmem:[%s5598_s1 + $0x8] sm:$0xff]  ;;  %vm2716_vm3 = vcmask 523264  }
   0xe   : > { %v952_v6 = vpack.c.b16 %v942_v2, %v942_v2  ;;  %v1158_v7 = vsel %vm1156_vm1, %v1157_v5, 0  ;;  %s3876_s28 = scalar_lea.vmem %s5597_s0, %s3653_s23  ;;  %v3782_v23 = vld [vmem:[%s5598_s1] sm:$0xff]  ;;  %s4295_s19 = scalar_lea.vmem %s5600_s3, %s3653_s23 }
   0xf   : > { %v3654_v11 = vld [vmem:[%s3876_s28 + $0x4] sm:$0xf]  ;;  %v3043_v12 = vld [vmem:[%s3876_s28 + $0x8] sm:$0xf0]  ;;  %v3720_v15 = vld [vmem:[%s3876_s28 + $0x214] sm:$0xf] }
  0x10   : > { %v1160_v8 = vand.u32 %v1158_v7, %v952_v6  ;;  %1163 = vmatpush.bf16.msra.mxu0 %v3788_v3  ;;  %3792 = vmatpush.bf16.msra.mxu2 %v3788_v3  ;;  %v3046_v13 = vor.u32 %v3654_v11, %v3043_v12  ;;  %v3307_v16 = vld [vmem:[%s3876_s28 + $0x218] sm:$0xf0]  ;;  %v3656_v21 = vld [vmem:[%s3876_s28 + $0x14] sm:$0xf]  ;;  %v3041_v25 = vld [vmem:[%s3876_s28] sm:$0xf] }
  0x11   : > { %v3310_v17 = vor.u32 %v3720_v15, %v3307_v16  ;;  %v3051_v22 = vld [vmem:[%s3876_s28 + $0x18] sm:$0xf0]  ;;  %v3655_v26 = vld [vmem:[%s3876_s28 + $0x4] sm:$0xf0]  ;;  %v3297_v27 = vld [vmem:[%s3876_s28 + $0x200] sm:$0xf] }
  0x12   : > { %1497 = vmatpush.bf16.msra.mxu1 %v1160_v8  ;;  %3799 = vmatpush.bf16.msra.mxu3 %v1160_v8  ;;  %v3054_v24 = vor.u32 %v3656_v21, %v3051_v22  ;;  %v3719_v28 = vld [vmem:[%s3876_s28 + $0x204] sm:$0xf0]  ;;  %v3722_v29 = vld [vmem:[%s3876_s28 + $0x224] sm:$0xf]  ;;  %v3315_v30 = vld [vmem:[%s3876_s28 + $0x228] sm:$0xf0]  ;;  %v3042_v32 = vor.u32 %v3655_v26, %v3041_v25 }
  0x13   : > { %v3318_v31 = vor.u32 %v3722_v29, %v3315_v30  ;;  %v3298_v33 = vor.u32 %v3719_v28, %v3297_v27  ;;  %v3658_v34 = vld [vmem:[%s3876_s28 + $0x24] sm:$0xf]  ;;  %v3059_v35 = vld [vmem:[%s3876_s28 + $0x28] sm:$0xf0]  ;;  %v3049_v37 = vld [vmem:[%s3876_s28 + $0x10] sm:$0xf] }
  0x14   : > { %1164 = vmatpush.bf16.msra.mxu0 %v3787_v9  ;;  %3793 = vmatpush.bf16.msra.mxu2 %v3787_v9  ;;  %v3062_v36 = vor.u32 %v3658_v34, %v3059_v35  ;;  %v3657_v38 = vld [vmem:[%s3876_s28 + $0x14] sm:$0xf0]  ;;  %v3305_v39 = vld [vmem:[%s3876_s28 + $0x210] sm:$0xf]  ;;  %v3724_v41 = vld [vmem:[%s3876_s28 + $0x234] sm:$0xf] }
  0x15   : > { %v3721_v40 = vld [vmem:[%s3876_s28 + $0x214] sm:$0xf0]  ;;  %v3323_v42 = vld [vmem:[%s3876_s28 + $0x238] sm:$0xf0]  ;;  %v3050_v44 = vor.u32 %v3657_v38, %v3049_v37  ;;  %v3660_v46 = vld [vmem:[%s3876_s28 + $0x34] sm:$0xf] }
  0x16   : > { %1498 = vmatpush.bf16.msra.mxu1 %v3790_v10  ;;  %3800 = vmatpush.bf16.msra.mxu3 %v3790_v10  ;;  %v3326_v43 = vor.u32 %v3724_v41, %v3323_v42  ;;  %v3306_v45 = vor.u32 %v3721_v40, %v3305_v39  ;;  %v3067_v47 = vld [vmem:[%s3876_s28 + $0x38] sm:$0xf0]  ;;  %v3057_v49 = vld [vmem:[%s3876_s28 + $0x20] sm:$0xf]  ;;  %v3659_v50 = vld [vmem:[%s3876_s28 + $0x24] sm:$0xf0] }
  0x17   : > { %v3070_v48 = vor.u32 %v3660_v46, %v3067_v47  ;;  %v3313_v51 = vld [vmem:[%s3876_s28 + $0x220] sm:$0xf]  ;;  %v3723_v52 = vld [vmem:[%s3876_s28 + $0x224] sm:$0xf0]  ;;  %v3726_v53 = vld [vmem:[%s3876_s28 + $0x244] sm:$0xf]  ;;  %v3058_v56 = vor.u32 %v3659_v50, %v3057_v49 }
  0x18   : > { %1165 = vmatpush.bf16.msra.mxu0 %v3786_v14  ;;  %3794 = vmatpush.bf16.msra.mxu2 %v3786_v14  ;;  %v3331_v54 = vld [vmem:[%s3876_s28 + $0x248] sm:$0xf0]  ;;  %v3314_v57 = vor.u32 %v3723_v52, %v3313_v51  ;;  %v3662_v58 = vld [vmem:[%s3876_s28 + $0x44] sm:$0xf]  ;;  %v3065_v61 = vld [vmem:[%s3876_s28 + $0x30] sm:$0xf] }
  0x19   : > { %3587 = vmatmul.msk.bf16.vlgmr.msra.gmra.mxu1 %vm962_vm2, %v3046_v13  ;;  %3620 = vmatmul.msk.bf16.vlgmr.msra.gmra.mxu3 %vm962_vm2, %v3310_v17  ;;  %v3334_v55 = vor.u32 %v3726_v53, %v3331_v54  ;;  %v3075_v59 = vld [vmem:[%s3876_s28 + $0x48] sm:$0xf0]  ;;  %v3661_v62 = vld [vmem:[%s3876_s28 + $0x34] sm:$0xf0]  ;;  %v3321_v63 = vld [vmem:[%s3876_s28 + $0x230] sm:$0xf] }
  0x1a   : > { %v3078_v60 = vor.u32 %v3662_v58, %v3075_v59  ;;  %v3725_v0 = vld [vmem:[%s3876_s28 + $0x234] sm:$0xf0]  ;;  %v3728_v1 = vld [vmem:[%s3876_s28 + $0x254] sm:$0xf]  ;;  %v3339_v2 = vld [vmem:[%s3876_s28 + $0x258] sm:$0xf0]  ;;  %v3066_v4 = vor.u32 %v3661_v62, %v3065_v61 }
  0x1b   : > { %v3342_v3 = vor.u32 %v3728_v1, %v3339_v2  ;;  %v3322_v5 = vor.u32 %v3725_v0, %v3321_v63  ;;  %v3664_v6 = vld [vmem:[%s3876_s28 + $0x54] sm:$0xf]  ;;  %v3083_v7 = vld [vmem:[%s3876_s28 + $0x58] sm:$0xf0]  ;;  %v3073_v9 = vld [vmem:[%s3876_s28 + $0x40] sm:$0xf] }
  0x1c   : > { %1166 = vmatpush.bf16.msra.mxu0 %v3785_v18  ;;  %3795 = vmatpush.bf16.msra.mxu2 %v3785_v18  ;;  %v3086_v8 = vor.u32 %v3664_v6, %v3083_v7  ;;  %v3663_v10 = vld [vmem:[%s3876_s28 + $0x44] sm:$0xf0]  ;;  %v3329_v11 = vld [vmem:[%s3876_s28 + $0x240] sm:$0xf]  ;;  %v3730_v13 = vld [vmem:[%s3876_s28 + $0x264] sm:$0xf] }
  0x1d   : > { %v3727_v12 = vld [vmem:[%s3876_s28 + $0x244] sm:$0xf0]  ;;  %v3347_v14 = vld [vmem:[%s3876_s28 + $0x268] sm:$0xf0]  ;;  %v3074_v16 = vor.u32 %v3663_v10, %v3073_v9  ;;  %v3666_v18 = vld [vmem:[%s3876_s28 + $0x64] sm:$0xf] }
  0x1e   : > { %v3350_v15 = vor.u32 %v3730_v13, %v3347_v14  ;;  %v3330_v17 = vor.u32 %v3727_v12, %v3329_v11  ;;  %v3081_v21 = vld [vmem:[%s3876_s28 + $0x50] sm:$0xf]  ;;  %v3665_v22 = vld [vmem:[%s3876_s28 + $0x54] sm:$0xf0]  ;;  %v3732_v25 = vld [vmem:[%s3876_s28 + $0x274] sm:$0xf] }
  0x1f   : > { %v3355_v26 = vld [vmem:[%s3876_s28 + $0x278] sm:$0xf0]  ;;  %v3082_v27 = vor.u32 %v3665_v22, %v3081_v21  ;;  %v3668_v30 = vld [vmem:[%s3876_s28 + $0x74] sm:$0xf]  ;;  %v3667_v34 = vld [vmem:[%s3876_s28 + $0x64] sm:$0xf0] }
  0x20   : > { %1167 = vmatpush.bf16.msra.mxu0 %v3784_v19  ;;  %3796 = vmatpush.bf16.msra.mxu2 %v3784_v19  ;;  %v3091_v19 = vld [vmem:[%s3876_s28 + $0x68] sm:$0xf0]  ;;  %v3358_v28 = vor.u32 %v3732_v25, %v3355_v26  ;;  %v3345_v35 = vld [vmem:[%s3876_s28 + $0x260] sm:$0xf]  ;;  %v3734_v37 = vld [vmem:[%s3876_s28 + $0x284] sm:$0xf] }
  0x21   : > { %v3363_v38 = vld [vmem:[%s3876_s28 + $0x288] sm:$0xf0]  ;;  %v3670_v42 = vld [vmem:[%s3876_s28 + $0x84] sm:$0xf]  ;;  %v3669_v46 = vld [vmem:[%s3876_s28 + $0x74] sm:$0xf0] }
  0x22   : > { %v3366_v40 = vor.u32 %v3734_v37, %v3363_v38  ;;  %v3353_v47 = vld [vmem:[%s3876_s28 + $0x270] sm:$0xf]  ;;  %v3733_v49 = vld [vmem:[%s3876_s28 + $0x274] sm:$0xf0]  ;;  %v3736_v50 = vld [vmem:[%s3876_s28 + $0x294] sm:$0xf] }
  0x23   : > { %v3371_v51 = vld [vmem:[%s3876_s28 + $0x298] sm:$0xf0]  ;;  %v3354_v54 = vor.u32 %v3733_v49, %v3353_v47  ;;  %v3986_v59 = vld [vmem:[%s5599_s2] ss:$0 sm:$0xff]  ;;  %v3671_v62 = vld [vmem:[%s3876_s28 + $0x84] sm:$0xf0] }
  0x24   : > { %1168 = vmatpush.bf16.msra.mxu0 %v3783_v20  ;;  %3797 = vmatpush.bf16.msra.mxu2 %v3783_v20  ;;  %v3094_v20 = vor.u32 %v3666_v18, %v3091_v19  ;;  %v3374_v52 = vor.u32 %v3736_v50, %v3371_v51  ;;  %v3115_v58 = vld [vmem:[%s3876_s28 + $0x98] sm:$0xf0]  ;;  %v3105_v61 = vld [vmem:[%s3876_s28 + $0x80] sm:$0xf]  ;;  %v3735_v2 = vld [vmem:[%s3876_s28 + $0x284] sm:$0xf0] }
  0x25   : > { %v3361_v63 = vld [vmem:[%s3876_s28 + $0x280] sm:$0xf]  ;;  %v3106_v6 = vor.u32 %v3671_v62, %v3105_v61  ;;  %v3674_v18 = vld [vmem:[%s3876_s28 + $0xa4] sm:$0xf]  ;;  %v3123_v19 = vld [vmem:[%s3876_s28 + $0xa8] sm:$0xf0] }
  0x26   : > { %v3113_v21 = vld [vmem:[%s3876_s28 + $0x90] sm:$0xf]  ;;  %v3126_v22 = vor.u32 %v3674_v18, %v3123_v19  ;;  %v3737_v25 = vld [vmem:[%s3876_s28 + $0x294] sm:$0xf0]  ;;  %v3676_v47 = vld [vmem:[%s3876_s28 + $0xb4] sm:$0xf] }
  0x27   : > { %v3121_v51 = vld [vmem:[%s3876_s28 + $0xa0] sm:$0xf]  ;;  %v3742_v62 = vld [vmem:[%s3876_s28 + $0x2c4] sm:$0xf] }
  0x28   : > { %1169 = vmatpush.bf16.msra.mxu0 %v3782_v23  ;;  %3798 = vmatpush.bf16.msra.mxu2 %v3782_v23  ;;  %v3337_v23 = vld [vmem:[%s3876_s28 + $0x250] sm:$0xf] }
  0x29   : > { %3588 = vmatmul.msk.bf16.gmra.mxu1 %vm962_vm2, %v3054_v24  ;;  %3621 = vmatmul.msk.bf16.gmra.mxu3 %vm962_vm2, %v3318_v31  ;;  %v3729_v24 = vld [vmem:[%s3876_s28 + $0x254] sm:$0xf0]  ;;  %v3099_v31 = vld [vmem:[%s3876_s28 + $0x78] sm:$0xf0] }
  0x2a   : > { %v3338_v29 = vor.u32 %v3729_v24, %v3337_v23  ;;  %v3673_v23 = vld [vmem:[%s3876_s28 + $0x94] sm:$0xf0]  ;;  %v3369_v24 = vld [vmem:[%s3876_s28 + $0x290] sm:$0xf] }
  0x2b   : > { %1170 = vmatmul.bf16.vlgmr.msra.gmra.mxu0 %v3042_v32  ;;  %1330 = vmatmul.bf16.vlgmr.msra.gmra.mxu2 %v3298_v33  ;;  %v3102_v32 = vor.u32 %v3668_v30, %v3099_v31  ;;  %v3089_v33 = vld [vmem:[%s3876_s28 + $0x60] sm:$0xf]  ;;  %v3387_v30 = vld [vmem:[%s3876_s28 + $0x2b8] sm:$0xf0] }
  0x2c   : > { %v3090_v39 = vor.u32 %v3667_v34, %v3089_v33  ;;  %v3114_v34 = vor.u32 %v3673_v23, %v3113_v21  ;;  %v3678_v23 = vld [vmem:[%s3876_s28 + $0xc4] sm:$0xf] }
  0x39   : > { %3589 = vmatmul.msk.bf16.gmra.mxu1 %vm962_vm2, %v3062_v36  ;;  %3622 = vmatmul.msk.bf16.gmra.mxu3 %vm962_vm2, %v3326_v43  ;;  %v3731_v36 = vld [vmem:[%s3876_s28 + $0x264] sm:$0xf0]  ;;  %v3107_v43 = vld [vmem:[%s3876_s28 + $0x88] sm:$0xf0] }
  0x3a   : > { %v3346_v41 = vor.u32 %v3731_v36, %v3345_v35  ;;  %v3370_v36 = vor.u32 %v3737_v25, %v3369_v24  ;;  %v3139_v24 = vld [vmem:[%s3876_s28 + $0xc8] sm:$0xf0] }
  0x3b   : > { %1175 = vmatmul.bf16.gmra.mxu0 %v3050_v44  ;;  %1335 = vmatmul.bf16.gmra.mxu2 %v3306_v45  ;;  %v3110_v44 = vor.u32 %v3670_v42, %v3107_v43  ;;  %v3097_v45 = vld [vmem:[%s3876_s28 + $0x70] sm:$0xf] }
  0x3c   : > { %v3098_v53 = vor.u32 %v3669_v46, %v3097_v45 }
  0x49   : > { %3590 = vmatmul.msk.bf16.gmra.mxu1 %vm962_vm2, %v3070_v48  ;;  %3623 = vmatmul.msk.bf16.gmra.mxu3 %vm962_vm2, %v3334_v55 }
  0x4b   : > { %1180 = vmatmul.bf16.gmra.mxu0 %v3058_v56  ;;  %1340 = vmatmul.bf16.gmra.mxu2 %v3314_v57  ;;  %v3672_v57 = vld [vmem:[%s3876_s28 + $0x94] sm:$0xf] }
  0x59   : > { %3591 = vmatmul.msk.bf16.gmra.mxu1 %vm962_vm2, %v3078_v60  ;;  %3624 = vmatmul.msk.bf16.gmra.mxu3 %vm962_vm2, %v3342_v3  ;;  %v3118_v60 = vor.u32 %v3672_v57, %v3115_v58  ;;  %v3738_v3 = vld [vmem:[%s3876_s28 + $0x2a4] sm:$0xf]  ;;  %v3739_v57 = vld [vmem:[%s3876_s28 + $0x2a4] sm:$0xf0] }
  0x5b   : > { %1185 = vmatmul.bf16.gmra.mxu0 %v3066_v4  ;;  %1345 = vmatmul.bf16.gmra.mxu2 %v3322_v5  ;;  %v3379_v4 = vld [vmem:[%s3876_s28 + $0x2a8] sm:$0xf0] }
  0x5c   : > { %v3382_v5 = vor.u32 %v3738_v3, %v3379_v4 }
  0x69   : > { %3592 = vmatmul.msk.bf16.gmra.mxu1 %vm962_vm2, %v3086_v8  ;;  %3625 = vmatmul.msk.bf16.gmra.mxu3 %vm962_vm2, %v3350_v15  ;;  %v3362_v8 = vor.u32 %v3735_v2, %v3361_v63  ;;  %v3395_v63 = vld [vmem:[%s3876_s28 + $0x2c8] sm:$0xf0] }
  0x6b   : > { %1190 = vmatmul.bf16.gmra.mxu0 %v3074_v16  ;;  %1350 = vmatmul.bf16.gmra.mxu2 %v3330_v17 }
  0x79   : > { %3593 = vmatmul.msk.bf16.gmra.mxu1 %vm962_vm2, %v3094_v20  ;;  %3626 = vmatmul.msk.bf16.gmra.mxu3 %vm962_vm2, %v3358_v28 }
  0x7b   : > { %1195 = vmatmul.bf16.gmra.mxu0 %v3082_v27  ;;  %1355 = vmatmul.bf16.gmra.mxu2 %v3338_v29  ;;  %v3740_v29 = vld [vmem:[%s3876_s28 + $0x2b4] sm:$0xf] }
  0x7c   : > { %v3390_v31 = vor.u32 %v3740_v29, %v3387_v30  ;;  %v3129_v30 = vld [vmem:[%s3876_s28 + $0xb0] sm:$0xf] }
  0x89   : > { %3594 = vmatmul.msk.bf16.gmra.mxu1 %vm962_vm2, %v3102_v32  ;;  %3627 = vmatmul.msk.bf16.gmra.mxu3 %vm962_vm2, %v3366_v40 }
  0x8b   : > { %1200 = vmatmul.bf16.gmra.mxu0 %v3090_v39  ;;  %1360 = vmatmul.bf16.gmra.mxu2 %v3346_v41 }
  0x96   : > { %v1500_v48 = vpop.f32.mrf.mxu1 }
  0x99   : > { %3595 = vmatmul.msk.bf16.gmra.mxu1 %vm962_vm2, %v3110_v44  ;;  %3628 = vmatmul.msk.bf16.gmra.mxu3 %vm962_vm2, %v3374_v52  ;;  %v3675_v52 = vld [vmem:[%s3876_s28 + $0xa4] sm:$0xf0] }
  0x9a   : > { %v3122_v4 = vor.u32 %v3675_v52, %v3121_v51 }
  0x9b   : > { %1205 = vmatmul.bf16.gmra.mxu0 %v3098_v53  ;;  %1365 = vmatmul.bf16.gmra.mxu2 %v3354_v54 }
  0x9c   : > { %v3979_v55 = vpop.f32.mrf.mxu3 }
  0x9e   : > { %v1502_v56 = vpop.f32.mrf.mxu1 }
  0xa4   : > { %v3991_v0 = vpop.f32.mrf.mxu3 }
  0xa6   : > { %v1505_v1 = vpop.f32.mrf.mxu1 }
  0xa8   : > { %v1171_v7 = vpop.f32.mrf.mxu0 }
  0xa9   : > { %3596 = vmatmul.msk.bf16.gmra.mxu1 %vm962_vm2, %v3118_v60  ;;  %v1172_v9 = vadd.f32 %v3986_v59, %v1171_v7  ;;  %3629 = vmatmul.msk.bf16.gmra.mxu3 %vm962_vm2, %v3382_v5 }
  0xab   : > { %v3999_v10 = vadd.f32 %v1500_v48, %v1172_v9  ;;  %1210 = vmatmul.bf16.gmra.mxu0 %v3106_v6  ;;  %1370 = vmatmul.bf16.gmra.mxu2 %v3362_v8  ;;  %v3131_v48 = vld [vmem:[%s3876_s28 + $0xb8] sm:$0xf0] }
  0xac   : > { %v4001_v11 = vpop.f32.mrf.mxu3  ;;  %v3134_v53 = vor.u32 %v3676_v47, %v3131_v48 }
  0xad   : > { %v1948_v13 = vsub.f32 0.0, %v3999_v10 }
  0xae   : > { %v1507_v12 = vpop.f32.mrf.mxu1  ;;  %v4004_v14 = vpop.f32.mrf.mxu2 }
  0xaf   : > { %v2076_v15 = vmax.f32 %v1948_v13, 0.0 }
  0xb0   : > { %v1173_v16 = vpop.f32.mrf.mxu0 }
  0xb1   : > { %v1174_v17 = vadd.f32 %v3986_v59, %v1173_v16  ;;  %2332 = vrot.lane.b32.xlu0 %v2076_v15, %s3824_s15 }
  0xb3   : > { %v4010_v20 = vadd.f32 %v1502_v56, %v1174_v17  ;;  %v3377_v56 = vld [vmem:[%s3876_s28 + $0x2a0] sm:$0xf] }
  0xb4   : > { %v4016_v26 = vpop.f32.mrf.mxu3  ;;  %v3378_v7 = vor.u32 %v3739_v57, %v3377_v56 }
  0xb5   : > { %v1949_v28 = vsub.f32 0.0, %v4010_v20 }
  0xb6   : > { %v1510_v27 = vpop.f32.mrf.mxu1  ;;  %v4021_v32 = vpop.f32.mrf.mxu2 }
  0xb7   : > { %v2077_v33 = vmax.f32 %v1949_v28, 0.0  ;;  %v3142_v28 = vor.u32 %v3678_v23, %v3139_v24 }
  0xb8   : > { %v1176_v35 = vpop.f32.mrf.mxu0 }
  0xb9   : > { %3597 = vmatmul.msk.bf16.gmra.mxu1 %vm962_vm2, %v3126_v22  ;;  %v1177_v37 = vadd.f32 %v3986_v59, %v1176_v35  ;;  %2334 = vrot.lane.b32.xlu0 %v2077_v33, %s3824_s15  ;;  %v3385_v35 = vld [vmem:[%s3876_s28 + $0x2b0] sm:$0xf] }
  0xba   : > { %3630 = vmatmul.msk.bf16.gmra.mxu3 %vm962_vm2, %v3390_v31  ;;  %v3677_v31 = vld [vmem:[%s3876_s28 + $0xb4] sm:$0xf0] }
  0xbb   : > { %v4027_v38 = vadd.f32 %v1505_v1, %v1177_v37  ;;  %1215 = vmatmul.bf16.gmra.mxu0 %v3114_v34  ;;  %1375 = vmatmul.bf16.gmra.mxu2 %v3370_v36  ;;  %v3741_v36 = vld [vmem:[%s3876_s28 + $0x2b4] sm:$0xf0] }
  0xbc   : > { %v4029_v39 = vpop.f32.mrf.mxu3  ;;  %v3386_v48 = vor.u32 %v3741_v36, %v3385_v35 }
  0xbd   : > { %v1950_v41 = vsub.f32 0.0, %v4027_v38 }
  0xbe   : > { %v4031_v40 = vpop.f32.mrf.mxu1  ;;  %v1336_v42 = vpop.f32.mrf.mxu2 }
  0xbf   : > { %v2078_v43 = vmax.f32 %v1950_v41, 0.0  ;;  %v1337_v44 = vadd.f32 %v3986_v59, %v1336_v42  ;;  %v3744_v41 = vld [vmem:[%s3876_s28 + $0x2d4] sm:$0xf]  ;;  %v3403_v42 = vld [vmem:[%s3876_s28 + $0x2d8] sm:$0xf0] }
  0xc0   : > { %v1178_v45 = vpop.f32.mrf.mxu0 }
  0xc1   : > { %v1179_v46 = vadd.f32 %v3986_v59, %v1178_v45  ;;  %2336 = vrot.lane.b32.xlu1 %v2078_v43, %s3824_s15  ;;  %v4040_v49 = vadd.f32 %v3979_v55, %v1337_v44  ;;  %v3398_v55 = vor.u32 %v3742_v62, %v3395_v63  ;;  %v3130_v44 = vor.u32 %v3677_v31, %v3129_v30 }
  0xc2   : > { %v3406_v45 = vor.u32 %v3744_v41, %v3403_v42 }
  0xc3   : > { %v4042_v50 = vadd.f32 %v1507_v12, %v1179_v46  ;;  %v2014_v54 = vsub.f32 0.0, %v4040_v49 }
  0xc4   : > { %v4049_v58 = vpop.f32.mrf.mxu3 }
  0xc5   : > { %v1951_v61 = vsub.f32 0.0, %v4042_v50  ;;  %v2142_v1 = vmax.f32 %v2014_v54, 0.0 }
  0xc6   : > { %v4051_v60 = vpop.f32.mrf.mxu1  ;;  %v1338_v2 = vpop.f32.mrf.mxu2 }
  0xc7   : > { %v2079_v3 = vmax.f32 %v1951_v61, 0.0  ;;  %v1339_v5 = vadd.f32 %v3986_v59, %v1338_v2  ;;  %2464 = vrot.lane.b32.xlu0 %v2142_v1, %s3824_s15  ;;  %v3147_v2 = vld [vmem:[%s3876_s28 + $0xd8] sm:$0xf0] }
  0xc8   : > { %v1181_v6 = vpop.f32.mrf.mxu0 }
  0xc9   : > { %3598 = vmatmul.msk.bf16.gmra.mxu1 %vm962_vm2, %v3134_v53  ;;  %v1182_v8 = vadd.f32 %v3986_v59, %v1181_v6  ;;  %2338 = vrot.lane.b32.xlu1 %v2079_v3, %s3824_s15  ;;  %v4063_v9 = vadd.f32 %v3991_v0, %v1339_v5 }
  0xca   : > { %3631 = vmatmul.msk.bf16.gmra.mxu3 %vm962_vm2, %v3398_v55  ;;  %v3680_v55 = vld [vmem:[%s3876_s28 + $0xd4] sm:$0xf] }
  0xcb   : > { %v4065_v12 = vadd.f32 %v1510_v27, %v1182_v8  ;;  %1220 = vmatmul.bf16.gmra.mxu0 %v3122_v4  ;;  %1380 = vmatmul.bf16.gmra.mxu2 %v3378_v7  ;;  %v2015_v13 = vsub.f32 0.0, %v4063_v9  ;;  %v3150_v5 = vor.u32 %v3680_v55, %v3147_v2  ;;  %v3137_v7 = vld [vmem:[%s3876_s28 + $0xc0] sm:$0xf]  ;;  %v3679_v8 = vld [vmem:[%s3876_s28 + $0xc4] sm:$0xf0] }
  0xcc   : > { %v4068_v15 = vpop.f32.mrf.mxu3  ;;  %v3401_v2 = vld [vmem:[%s3876_s28 + $0x2d0] sm:$0xf] }
  0xcd   : > { %v1952_v17 = vsub.f32 0.0, %v4065_v12  ;;  %v2143_v0 = vmax.f32 %v2015_v13, 0.0 }
  0xce   : > { %v4070_v16 = vpop.f32.mrf.mxu1  ;;  %v1341_v18 = vpop.f32.mrf.mxu2 }
  0xcf   : > { %v2080_v19 = vmax.f32 %v1952_v17, 0.0  ;;  %v1342_v21 = vadd.f32 %v3986_v59, %v1341_v18  ;;  %v3393_v18 = vld [vmem:[%s3876_s28 + $0x2c0] sm:$0xf] }
  0xd0   : > { %v1183_v22 = vpop.f32.mrf.mxu0 }
  0xd1   : > { %2340 = vrot.lane.b32.xlu2 %v2080_v19, %s3824_s15  ;;  %2466 = vrot.lane.b32.xlu1 %v2143_v0, %s3824_s15  ;;  %v4079_v25 = vadd.f32 %v4001_v11, %v1342_v21  ;;  %v1184_v27 = vadd.f32 %v3986_v59, %v1183_v22  ;;  %v3743_v19 = vld [vmem:[%s3876_s28 + $0x2c4] sm:$0xf0]  ;;  %v3746_v21 = vld [vmem:[%s3876_s28 + $0x2e4] sm:$0xf] }
  0xd2   : > { %v3411_v22 = vld [vmem:[%s3876_s28 + $0x2e8] sm:$0xf0]  ;;  %v3394_v31 = vor.u32 %v3743_v19, %v3393_v18 }
  0xd3   : > { %v2016_v29 = vsub.f32 0.0, %v4079_v25  ;;  %v4094_v43 = vadd.f32 %v4031_v40, %v1184_v27  ;;  %v3138_v27 = vor.u32 %v3679_v8, %v3137_v7 }
  0xd4   : > { %v4085_v33 = vpop.f32.mrf.mxu3 }
  0xd5   : > { %v2144_v37 = vmax.f32 %v2016_v29, 0.0  ;;  %v1953_v52 = vsub.f32 0.0, %v4094_v43 }
  0xd6   : > { %v4087_v34 = vpop.f32.mrf.mxu1  ;;  %v1343_v11 = vpop.f32.mrf.mxu2 }
  0xd7   : > { %v1344_v46 = vadd.f32 %v3986_v59, %v1343_v11  ;;  %v2081_v62 = vmax.f32 %v1953_v52, 0.0 }
  0xd8   : > { %v1186_v47 = vpop.f32.mrf.mxu0 }
  0xd9   : > { %3599 = vmatmul.msk.bf16.gmra.mxu1 %vm962_vm2, %v3142_v28  ;;  %2468 = vrot.lane.b32.xlu2 %v2144_v37, %s3824_s15  ;;  %v4101_v51 = vadd.f32 %v4016_v26, %v1344_v46  ;;  %v1187_v40 = vadd.f32 %v3986_v59, %v1186_v47  ;;  %v3414_v28 = vor.u32 %v3746_v21, %v3411_v22 }
  0xda   : > { %3632 = vmatmul.msk.bf16.gmra.mxu3 %vm962_vm2, %v3406_v45 }
  0xdb   : > { %1225 = vmatmul.bf16.gmra.mxu0 %v3130_v44  ;;  %1385 = vmatmul.bf16.gmra.mxu2 %v3386_v48  ;;  %v2017_v53 = vsub.f32 0.0, %v4101_v51  ;;  %v4111_v26 = vadd.f32 %v4051_v60, %v1187_v40  ;;  %v3682_v48 = vld [vmem:[%s3876_s28 + $0xe4] sm:$0xf]  ;;  %v3155_v40 = vld [vmem:[%s3876_s28 + $0xe8] sm:$0xf0] }
  0xdc   : > { %v4106_v54 = vpop.f32.mrf.mxu3 }
  0xdd   : > { %v2145_v57 = vmax.f32 %v2017_v53, 0.0  ;;  %v1954_v4 = vsub.f32 0.0, %v4111_v26 }
  0xde   : > { %v4108_v56 = vpop.f32.mrf.mxu1  ;;  %v1346_v61 = vpop.f32.mrf.mxu2 }
  0xdf   : > { %v1347_v63 = vadd.f32 %v3986_v59, %v1346_v61  ;;  %2470 = vrot.lane.b32.xlu0 %v2145_v57, %s3824_s15  ;;  %v2082_v24 = vmax.f32 %v1954_v4, 0.0  ;;  %v3158_v57 = vor.u32 %v3682_v48, %v3155_v40  ;;  %v3153_v40 = vld [vmem:[%s3876_s28 + $0xe0] sm:$0xf] }
  0xe0   : > { %v1188_v1 = vpop.f32.mrf.mxu0 }
  0xe1   : > { %2342 = vrot.lane.b32.xlu2 %v2081_v62, %s3824_s15  ;;  %v4119_v3 = vadd.f32 %v4029_v39, %v1347_v63  ;;  %v1189_v60 = vadd.f32 %v3986_v59, %v1188_v1  ;;  %v3145_v62 = vld [vmem:[%s3876_s28 + $0xd0] sm:$0xf]  ;;  %v3681_v63 = vld [vmem:[%s3876_s28 + $0xd4] sm:$0xf0] }
  0xe2   : > { %v3146_v18 = vor.u32 %v3681_v63, %v3145_v62  ;;  %v3747_v62 = vld [vmem:[%s3876_s28 + $0x2e4] sm:$0xf0] }
  0xe3   : > { %v2018_v6 = vsub.f32 0.0, %v4119_v3  ;;  %v4133_v0 = vadd.f32 %v4070_v16, %v1189_v60  ;;  %v3745_v60 = vld [vmem:[%s3876_s28 + $0x2d4] sm:$0xf0] }
  0xe4   : > { %v4126_v13 = vpop.f32.mrf.mxu3  ;;  %v3402_v22 = vor.u32 %v3745_v60, %v3401_v2  ;;  %v3750_v2 = vld [vmem:[%s3876_s28 + $0x304] sm:$0xf]  ;;  %v3427_v60 = vld [vmem:[%s3876_s28 + $0x308] sm:$0xf0] }
  0xe5   : > { %v2146_v39 = vmax.f32 %v2018_v6, 0.0  ;;  %v1955_v36 = vsub.f32 0.0, %v4133_v0  ;;  %v3748_v6 = vld [vmem:[%s3876_s28 + $0x2f4] sm:$0xf] }
  0xe6   : > { %v4128_v17 = vpop.f32.mrf.mxu1  ;;  %v1348_v23 = vpop.f32.mrf.mxu2 }
  0xe7   : > { %v1349_v29 = vadd.f32 %v3986_v59, %v1348_v23  ;;  %2472 = vrot.lane.b32.xlu1 %v2146_v39, %s3824_s15  ;;  %2344 = vrot.lane.b32.xlu0 %v2082_v24, %s3824_s15  ;;  %v2083_v44 = vmax.f32 %v1955_v36, 0.0 }
  0xe8   : > { %v1191_v30 = vpop.f32.mrf.mxu0 }
  0xe9   : > { %3600 = vmatmul.msk.bf16.gmra.mxu1 %vm962_vm2, %v3150_v5  ;;  %v4143_v16 = vadd.f32 %v4049_v58, %v1349_v29  ;;  %v1192_v35 = vadd.f32 %v3986_v59, %v1191_v30 }
  0xea   : > { %3633 = vmatmul.msk.bf16.gmra.mxu3 %vm962_vm2, %v3414_v28 }
  0xeb   : > { %1230 = vmatmul.bf16.gmra.mxu0 %v3138_v27  ;;  %1390 = vmatmul.bf16.gmra.mxu2 %v3394_v31  ;;  %v2019_v37 = vsub.f32 0.0, %v4143_v16  ;;  %v4153_v11 = vadd.f32 %v4087_v34, %v1192_v35 }
  0xec   : > { %v4148_v41 = vpop.f32.mrf.mxu3 }
  0xed   : > { %v2147_v58 = vmax.f32 %v2019_v37, 0.0  ;;  %v1956_v52 = vsub.f32 0.0, %v4153_v11 }
  0xee   : > { %v4150_v42 = vpop.f32.mrf.mxu1  ;;  %v1351_v45 = vpop.f32.mrf.mxu2 }
  0xef   : > { %v1352_v46 = vadd.f32 %v3986_v59, %v1351_v45  ;;  %2474 = vrot.lane.b32.xlu2 %v2147_v58, %s3824_s15  ;;  %2346 = vrot.lane.b32.xlu1 %v2083_v44, %s3824_s15  ;;  %v2084_v4 = vmax.f32 %v1956_v52, 0.0  ;;  %v3684_v58 = vld [vmem:[%s3876_s28 + $0xf4] sm:$0xf]  ;;  %v3163_v44 = vld [vmem:[%s3876_s28 + $0xf8] sm:$0xf0] }
  0xf0   : > { %v1193_v47 = vpop.f32.mrf.mxu0  ;;  %v3683_v52 = vld [vmem:[%s3876_s28 + $0xe4] sm:$0xf0] }
  0xf1   : > { %v4161_v34 = vadd.f32 %v4068_v15, %v1352_v46  ;;  %v1194_v53 = vadd.f32 %v3986_v59, %v1193_v47  ;;  %v3419_v15 = vld [vmem:[%s3876_s28 + $0x2f8] sm:$0xf0]  ;;  %v3166_v47 = vor.u32 %v3684_v58, %v3163_v44  ;;  %v3171_v58 = vld [vmem:[%s3876_s28 + $0x108] sm:$0xf0] }
  0xf2   : > { %v3422_v19 = vor.u32 %v3748_v6, %v3419_v15  ;;  %v3154_v6 = vor.u32 %v3683_v52, %v3153_v40  ;;  %v3430_v15 = vor.u32 %v3750_v2, %v3427_v60  ;;  %v3685_v40 = vld [vmem:[%s3876_s28 + $0xf4] sm:$0xf0]  ;;  %v3752_v60 = vld [vmem:[%s3876_s28 + $0x314] sm:$0xf] }
  0xf3   : > { %v2020_v61 = vsub.f32 0.0, %v4161_v34  ;;  %v4177_v7 = vadd.f32 %v4108_v56, %v1194_v53 }
  0xf4   : > { %v4168_v1 = vpop.f32.mrf.mxu3 }
  0xf5   : > { %v2148_v5 = vmax.f32 %v2020_v61, 0.0  ;;  %v1957_v24 = vsub.f32 0.0, %v4177_v7  ;;  %v3409_v61 = vld [vmem:[%s3876_s28 + $0x2e0] sm:$0xf] }
  0xf6   : > { %v4170_v55 = vpop.f32.mrf.mxu1  ;;  %v1353_v8 = vpop.f32.mrf.mxu2 }
  0xf7   : > { %v1354_v39 = vadd.f32 %v3986_v59, %v1353_v8  ;;  %2348 = vrot.lane.b32.xlu2 %v2084_v4, %s3824_s15  ;;  %2476 = vrot.lane.b32.xlu0 %v2148_v5, %s3824_s15  ;;  %v2085_v35 = vmax.f32 %v1957_v24, 0.0 }
  0xf8   : > { %v1196_v21 = vpop.f32.mrf.mxu0 }
  0xf9   : > { %3601 = vmatmul.msk.bf16.gmra.mxu1 %vm962_vm2, %v3158_v57  ;;  %v4185_v23 = vadd.f32 %v4085_v33, %v1354_v39  ;;  %v1197_v56 = vadd.f32 %v3986_v59, %v1196_v21 }
  0xfa   : > { %3634 = vmatmul.msk.bf16.gmra.mxu3 %vm962_vm2, %v3422_v19  ;;  %v3410_v19 = vor.u32 %v3747_v62, %v3409_v61  ;;  %v3417_v62 = vld [vmem:[%s3876_s28 + $0x2f0] sm:$0xf] }
  0xfb   : > { %1235 = vmatmul.bf16.gmra.mxu0 %v3146_v18  ;;  %1395 = vmatmul.bf16.gmra.mxu2 %v3402_v22  ;;  %v2021_v27 = vsub.f32 0.0, %v4185_v23  ;;  %v4195_v33 = vadd.f32 %v4128_v17, %v1197_v56 }
  0xfc   : > { %v4190_v28 = vpop.f32.mrf.mxu3 }
  0xfd   : > { %v2149_v30 = vmax.f32 %v2021_v27, 0.0  ;;  %v1958_v46 = vsub.f32 0.0, %v4195_v33 }
  0xfe   : > { %v4192_v29 = vpop.f32.mrf.mxu1  ;;  %v1356_v31 = vpop.f32.mrf.mxu2 }
  0xff   : > { %v1357_v36 = vadd.f32 %v3986_v59, %v1356_v31  ;;  %2478 = vrot.lane.b32.xlu1 %v2149_v30, %s3824_s15  ;;  %2350 = vrot.lane.b32.xlu0 %v2085_v35, %s3824_s15  ;;  %v2086_v5 = vmax.f32 %v1958_v46, 0.0 }
 0x100   : > { %v1198_v37 = vpop.f32.mrf.mxu0 }
 0x101   : > { %v4203_v45 = vadd.f32 %v4106_v54, %v1357_v36  ;;  %v1199_v17 = vadd.f32 %v3986_v59, %v1198_v37  ;;  %v3686_v37 = vld [vmem:[%s3876_s28 + $0x104] sm:$0xf] }
 0x102   : > { %v3174_v46 = vor.u32 %v3686_v37, %v3171_v58 }
 0x103   : > { %v2022_v48 = vsub.f32 0.0, %v4203_v45  ;;  %v4217_v63 = vadd.f32 %v4150_v42, %v1199_v17 }
 0x104   : > { %v4210_v53 = vpop.f32.mrf.mxu3 }
 0x105   : > { %v2150_v54 = vmax.f32 %v2022_v48, 0.0  ;;  %v1959_v39 = vsub.f32 0.0, %v4217_v63  ;;  %v3161_v48 = vld [vmem:[%s3876_s28 + $0xf0] sm:$0xf] }
 0x106   : > { %v4212_v57 = vpop.f32.mrf.mxu1  ;;  %v1358_v4 = vpop.f32.mrf.mxu2 }
 0x107   : > { %v1359_v8 = vadd.f32 %v3986_v59, %v1358_v4  ;;  %2480 = vrot.lane.b32.xlu2 %v2150_v54, %s3824_s15  ;;  %2352 = vrot.lane.b32.xlu1 %v2086_v5, %s3824_s15  ;;  %v2087_v27 = vmax.f32 %v1959_v39, 0.0  ;;  %v3749_v54 = vld [vmem:[%s3876_s28 + $0x2f4] sm:$0xf0]  ;;  %v3435_v4 = vld [vmem:[%s3876_s28 + $0x318] sm:$0xf0] }
 0x108   : > { %v1201_v18 = vpop.f32.mrf.mxu0  ;;  %v3418_v39 = vor.u32 %v3749_v54, %v3417_v62 }
 0x109   : > { %3602 = vmatmul.msk.bf16.gmra.mxu1 %vm962_vm2, %v3166_v47  ;;  %v4227_v42 = vadd.f32 %v4126_v13, %v1359_v8  ;;  %v1202_v21 = vadd.f32 %v3986_v59, %v1201_v18  ;;  %v3438_v8 = vor.u32 %v3752_v60, %v3435_v4  ;;  %v3687_v60 = vld [vmem:[%s3876_s28 + $0x104] sm:$0xf0] }
 0x10a   : > { %3635 = vmatmul.msk.bf16.gmra.mxu3 %vm962_vm2, %v3430_v15  ;;  %v3162_v15 = vor.u32 %v3685_v40, %v3161_v48 }
 0x10b   : > { %1240 = vmatmul.bf16.gmra.mxu0 %v3154_v6  ;;  %1400 = vmatmul.bf16.gmra.mxu2 %v3410_v19  ;;  %v2023_v22 = vsub.f32 0.0, %v4227_v42  ;;  %v4237_v13 = vadd.f32 %v4170_v55, %v1202_v21 }
 0x10c   : > { %v4232_v56 = vpop.f32.mrf.mxu3 }
 0x10d   : > { %v2151_v30 = vmax.f32 %v2023_v22, 0.0  ;;  %v1960_v17 = vsub.f32 0.0, %v4237_v13 }
 0x10e   : > { %v4234_v24 = vpop.f32.mrf.mxu1  ;;  %v1361_v31 = vpop.f32.mrf.mxu2 }
 0x10f   : > { %v1362_v35 = vadd.f32 %v3986_v59, %v1361_v31  ;;  %2354 = vrot.lane.b32.xlu2 %v2087_v27, %s3824_s15  ;;  %2482 = vrot.lane.b32.xlu0 %v2151_v30, %s3824_s15  ;;  %v2088_v6 = vmax.f32 %v1960_v17, 0.0  ;;  %v3688_v17 = vld [vmem:[%s3876_s28 + $0x114] sm:$0xf] }
 0x110   : > { %v1203_v36 = vpop.f32.mrf.mxu0 }
 0x111   : > { %v4245_v44 = vadd.f32 %v4148_v41, %v1362_v35  ;;  %v1204_v55 = vadd.f32 %v3986_v59, %v1203_v36 }
 0x113   : > { %v2024_v47 = vsub.f32 0.0, %v4245_v44  ;;  %v4259_v2 = vadd.f32 %v4192_v29, %v1204_v55 }
 0x114   : > { %v4252_v52 = vpop.f32.mrf.mxu3 }
 0x115   : > { %v2152_v41 = vmax.f32 %v2024_v47, 0.0  ;;  %v1961_v22 = vsub.f32 0.0, %v4259_v2 }
 0x116   : > { %v4254_v61 = vpop.f32.mrf.mxu1  ;;  %v1363_v5 = vpop.f32.mrf.mxu2 }
 0x117   : > { %v1364_v18 = vadd.f32 %v3986_v59, %v1363_v5  ;;  %2484 = vrot.lane.b32.xlu1 %v2152_v41, %s3824_s15  ;;  %2356 = vrot.lane.b32.xlu0 %v2088_v6, %s3824_s15  ;;  %v2089_v36 = vmax.f32 %v1961_v22, 0.0  ;;  %v3169_v41 = vld [vmem:[%s3876_s28 + $0x100] sm:$0xf] }
 0x118   : > { %v1206_v19 = vpop.f32.mrf.mxu0  ;;  %v3425_v6 = vld [vmem:[%s3876_s28 + $0x300] sm:$0xf] }
 0x119   : > { %3603 = vmatmul.msk.bf16.gmra.mxu1 %vm962_vm2, %v3174_v46  ;;  %v4269_v29 = vadd.f32 %v4168_v1, %v1364_v18  ;;  %v1207_v21 = vadd.f32 %v3986_v59, %v1206_v19  ;;  %v3179_v46 = vld [vmem:[%s3876_s28 + $0x118] sm:$0xf0]  ;;  %v3754_v19 = vld [vmem:[%s3876_s28 + $0x324] sm:$0xf] }
 0x11a   : > { %3636 = vmatmul.msk.bf16.gmra.mxu3 %vm962_vm2, %v3438_v8 }
 0x11b   : > { %1245 = vmatmul.bf16.gmra.mxu0 %v3162_v15  ;;  %1405 = vmatmul.bf16.gmra.mxu2 %v3418_v39  ;;  %v2025_v27 = vsub.f32 0.0, %v4269_v29  ;;  %v4279_v35 = vadd.f32 %v4212_v57, %v1207_v21  ;;  %v1820_v57 = vmax.f32 %v3999_v10, 0.0  ;;  %v3182_v10 = vor.u32 %v3688_v17, %v3179_v46  ;;  %v3751_v15 = vld [vmem:[%s3876_s28 + $0x304] sm:$0xf0]  ;;  %v3443_v39 = vld [vmem:[%s3876_s28 + $0x328] sm:$0xf0] }
 0x11c   : > { %v4274_v30 = vpop.f32.mrf.mxu3 }
 0x11d   : > { %v2153_v1 = vmax.f32 %v2025_v27, 0.0  ;;  %v1962_v48 = vsub.f32 0.0, %v4279_v35  ;;  %v3170_v27 = vor.u32 %v3687_v60, %v3169_v41 }
 0x11e   : > { %v4276_v31 = vpop.f32.mrf.mxu1  ;;  %v1366_v37 = vpop.f32.mrf.mxu2 }
 0x11f   : > { %v1367_v58 = vadd.f32 %v3986_v59, %v1366_v37  ;;  %2486 = vrot.lane.b32.xlu2 %v2153_v1, %s3824_s15  ;;  %2358 = vrot.lane.b32.xlu1 %v2089_v36, %s3824_s15  ;;  %v2090_v8 = vmax.f32 %v1962_v48, 0.0  ;;  %v3446_v1 = vor.u32 %v3754_v19, %v3443_v39  ;;  %v1822_v19 = vmax.f32 %v4027_v38, 0.0 }
 0x120   : > { %v1208_v55 = vpop.f32.mrf.mxu0 }
 0x121   : > { %v4288_v47 = vadd.f32 %v4190_v28, %v1367_v58  ;;  %v1209_v40 = vadd.f32 %v3986_v59, %v1208_v55  ;;  %v3426_v58 = vor.u32 %v3751_v15, %v3425_v6  ;;  %v1824_v55 = vmax.f32 %v4065_v12, 0.0 }
 0x123   : > { %v2333_v62 = vpop.permute.xlu0 %2332  ;;  %v2026_v28 = vsub.f32 0.0, %v4288_v47  ;;  %v4313_v21 = vadd.f32 %v4234_v24, %v1209_v40  ;;  %v1821_v24 = vmax.f32 %v4010_v20, 0.0 }
 0x124   : > { %v2717_v54 = vsel %vm2716_vm3, %v1820_v57, %v2333_v62  ;;  %v4303_v4 = vpop.f32.mrf.mxu3 }
 0x125   : > { %2845 = vst [vmem:[%s4295_s19] sm:$0xff] %v2717_v54  ;;  %v2154_v18 = vmax.f32 %v2026_v28, 0.0  ;;  %v1963_v40 = vsub.f32 0.0, %v4313_v21 }
 0x126   : > { %v4306_v5 = vpop.f32.mrf.mxu1  ;;  %v1368_v22 = vpop.f32.mrf.mxu2 }
 0x127   : > { %v1369_v36 = vadd.f32 %v3986_v59, %v1368_v22  ;;  %2360 = vrot.lane.b32.xlu2 %v2090_v8, %s3824_s15  ;;  %2488 = vrot.lane.b32.xlu0 %v2154_v18, %s3824_s15  ;;  %v2091_v60 = vmax.f32 %v1963_v40, 0.0  ;;  %v3690_v8 = vld [vmem:[%s3876_s28 + $0x124] sm:$0xf]  ;;  %v3187_v18 = vld [vmem:[%s3876_s28 + $0x128] sm:$0xf0] }
 0x128   : > { %v1211_v37 = vpop.f32.mrf.mxu0 }
 0x129   : > { %3604 = vmatmul.msk.bf16.gmra.mxu1 %vm962_vm2, %v3182_v10  ;;  %v4323_v17 = vadd.f32 %v4210_v53, %v1369_v36  ;;  %v1212_v46 = vadd.f32 %v3986_v59, %v1211_v37 }
 0x12a   : > { %3637 = vmatmul.msk.bf16.gmra.mxu3 %vm962_vm2, %v3446_v1 }
 0x12b   : > { %1250 = vmatmul.bf16.gmra.mxu0 %v3170_v27  ;;  %v2341_v57 = vpop.permute.xlu2 %2340  ;;  %v2335_v48 = vpop.permute.xlu0 %2334  ;;  %1410 = vmatmul.bf16.gmra.mxu2 %v3426_v58  ;;  %v2027_v20 = vsub.f32 0.0, %v4323_v17  ;;  %v4337_v28 = vadd.f32 %v4254_v61, %v1212_v46  ;;  %v1888_v61 = vmax.f32 %v4079_v25, 0.0  ;;  %v3190_v58 = vor.u32 %v3690_v8, %v3187_v18 }
 0x12c   : > { %v2721_v62 = vsel %vm2716_vm3, %v1824_v55, %v2341_v57  ;;  %v2718_v54 = vsel %vm2716_vm3, %v1821_v24, %v2335_v48  ;;  %v4330_v12 = vpop.f32.mrf.mxu3  ;;  %v3177_v24 = vld [vmem:[%s3876_s28 + $0x110] sm:$0xf]  ;;  %v3689_v55 = vld [vmem:[%s3876_s28 + $0x114] sm:$0xf0] }
 0x12d   : > { %2849 = vst [vmem:[%s4295_s19 + $0x20] sm:$0xff] %v2721_v62  ;;  %v2155_v10 = vmax.f32 %v2027_v20, 0.0  ;;  %v1964_v36 = vsub.f32 0.0, %v4337_v28  ;;  %v3433_v57 = vld [vmem:[%s3876_s28 + $0x310] sm:$0xf] }
 0x12e   : > { %v4333_v53 = vpop.f32.mrf.mxu1  ;;  %2846 = vst [vmem:[%s4295_s19 + $0x8] sm:$0xff] %v2718_v54  ;;  %v1371_v41 = vpop.f32.mrf.mxu2  ;;  %v3753_v48 = vld [vmem:[%s3876_s28 + $0x314] sm:$0xf0]  ;;  %v3756_v54 = vld [vmem:[%s3876_s28 + $0x334] sm:$0xf] }
 0x12f   : > { %v1372_v6 = vadd.f32 %v3986_v59, %v1371_v41  ;;  %2490 = vrot.lane.b32.xlu1 %v2155_v10, %s3824_s15  ;;  %2362 = vrot.lane.b32.xlu0 %v2091_v60, %s3824_s15  ;;  %v3451_v20 = vld [vmem:[%s3876_s28 + $0x338] sm:$0xf0]  ;;  %v2092_v41 = vmax.f32 %v1964_v36, 0.0  ;;  %v3178_v60 = vor.u32 %v3689_v55, %v3177_v24  ;;  %v3434_v18 = vor.u32 %v3753_v48, %v3433_v57 }
 0x130   : > { %v1213_v15 = vpop.f32.mrf.mxu0 }
 0x131   : > { %v4347_v39 = vadd.f32 %v4232_v56, %v1372_v6  ;;  %v1214_v22 = vadd.f32 %v3986_v59, %v1213_v15  ;;  %v3454_v6 = vor.u32 %v3756_v54, %v3451_v20  ;;  %v3692_v20 = vld [vmem:[%s3876_s28 + $0x134] sm:$0xf] }
 0x133   : > { %v2469_v27 = vpop.permute.xlu2 %2468  ;;  %v2337_v1 = vpop.permute.xlu1 %2336  ;;  %v2028_v25 = vsub.f32 0.0, %v4347_v39  ;;  %v4364_v40 = vadd.f32 %v4276_v31, %v1214_v22  ;;  %v1886_v31 = vmax.f32 %v4040_v49, 0.0 }
 0x134   : > { %v2785_v37 = vsel %vm2716_vm3, %v1888_v61, %v2469_v27  ;;  %v2719_v38 = vsel %vm2716_vm3, %v1822_v19, %v2337_v1  ;;  %v4356_v56 = vpop.f32.mrf.mxu3  ;;  %v1823_v19 = vmax.f32 %v4042_v50, 0.0  ;;  %v1825_v61 = vmax.f32 %v4094_v43, 0.0 }
 0x135   : > { %2913 = vst [vmem:[%s4295_s19 + $0x220] sm:$0xff] %v2785_v37  ;;  %v2156_v62 = vmax.f32 %v2028_v25, 0.0  ;;  %v1965_v1 = vsub.f32 0.0, %v4364_v40 }
 0x136   : > { %v4359_v46 = vpop.f32.mrf.mxu1  ;;  %2847 = vst [vmem:[%s4295_s19 + $0x10] sm:$0xff] %v2719_v38  ;;  %v1373_v10 = vpop.f32.mrf.mxu2 }
 0x137   : > { %v1374_v15 = vadd.f32 %v3986_v59, %v1373_v10  ;;  %2492 = vrot.lane.b32.xlu2 %v2156_v62, %s3824_s15  ;;  %2364 = vrot.lane.b32.xlu1 %v2092_v41, %s3824_s15  ;;  %v2093_v24 = vmax.f32 %v1965_v1, 0.0  ;;  %v3195_v10 = vld [vmem:[%s3876_s28 + $0x138] sm:$0xf0]  ;;  %v1887_v41 = vmax.f32 %v4063_v9, 0.0  ;;  %v3755_v1 = vld [vmem:[%s3876_s28 + $0x324] sm:$0xf0] }
 0x138   : > { %v1216_v8 = vpop.f32.mrf.mxu0 }
 0x139   : > { %3605 = vmatmul.msk.bf16.gmra.mxu1 %vm962_vm2, %v3190_v58  ;;  %v4378_v22 = vadd.f32 %v4252_v52, %v1374_v15  ;;  %v2465_v27 = vpop.permute.xlu0 %2464  ;;  %v1217_v36 = vadd.f32 %v3986_v59, %v1216_v8 }
 0x13a   : > { %3638 = vmatmul.msk.bf16.gmra.mxu3 %vm962_vm2, %v3454_v6  ;;  %v2783_v49 = vsel %vm2716_vm3, %v1886_v31, %v2465_v27 }
 0x13b   : > { %1255 = vmatmul.bf16.gmra.mxu0 %v3178_v60  ;;  %v2343_v37 = vpop.permute.xlu2 %2342  ;;  %v2339_v38 = vpop.permute.xlu1 %2338  ;;  %2911 = vst [vmem:[%s4295_s19 + $0x210] sm:$0xff] %v2783_v49  ;;  %1415 = vmatmul.bf16.gmra.mxu2 %v3434_v18  ;;  %v2029_v52 = vsub.f32 0.0, %v4378_v22  ;;  %v4394_v57 = vadd.f32 %v4306_v5, %v1217_v36  ;;  %v3198_v18 = vor.u32 %v3692_v20, %v3195_v10 }
 0x13c   : > { %v2722_v50 = vsel %vm2716_vm3, %v1825_v61, %v2343_v37  ;;  %v2720_v43 = vsel %vm2716_vm3, %v1823_v19, %v2339_v38  ;;  %v3185_v19 = vld [vmem:[%s3876_s28 + $0x120] sm:$0xf]  ;;  %v3691_v61 = vld [vmem:[%s3876_s28 + $0x124] sm:$0xf0]  ;;  %v3758_v37 = vld [vmem:[%s3876_s28 + $0x344] sm:$0xf] }
 0x13d   : > { %v4387_v58 = vpop.f32.mrf.mxu3  ;;  %2850 = vst [vmem:[%s4295_s19 + $0x28] sm:$0xff] %v2722_v50  ;;  %v2157_v55 = vmax.f32 %v2029_v52, 0.0  ;;  %v1966_v15 = vsub.f32 0.0, %v4394_v57  ;;  %v3459_v38 = vld [vmem:[%s3876_s28 + $0x348] sm:$0xf0]  ;;  %v3186_v52 = vor.u32 %v3691_v61, %v3185_v19 }
 0x13e   : > { %v4390_v25 = vpop.f32.mrf.mxu1  ;;  %2848 = vst [vmem:[%s4295_s19 + $0x18] sm:$0xff] %v2720_v43  ;;  %v1376_v48 = vpop.f32.mrf.mxu2 }
 0x13f   : > { %v1377_v62 = vadd.f32 %v3986_v59, %v1376_v48  ;;  %2366 = vrot.lane.b32.xlu2 %v2093_v24, %s3824_s15  ;;  %2494 = vrot.lane.b32.xlu0 %v2157_v55, %s3824_s15  ;;  %v2094_v43 = vmax.f32 %v1966_v15, 0.0  ;;  %v3462_v24 = vor.u32 %v3758_v37, %v3459_v38 }
 0x140   : > { %v1218_v54 = vpop.f32.mrf.mxu0 }
 0x141   : > { %v4403_v5 = vadd.f32 %v4274_v30, %v1377_v62  ;;  %v1219_v60 = vadd.f32 %v3986_v59, %v1218_v54  ;;  %v3441_v30 = vld [vmem:[%s3876_s28 + $0x320] sm:$0xf]  ;;  %v1891_v54 = vmax.f32 %v4143_v16, 0.0 }
 0x142   : > { %v3442_v62 = vor.u32 %v3755_v1, %v3441_v30  ;;  %v1889_v30 = vmax.f32 %v4101_v51, 0.0  ;;  %v1828_v1 = vmax.f32 %v4153_v11, 0.0 }
 0x143   : > { %v2467_v6 = vpop.permute.xlu1 %2466  ;;  %v2030_v31 = vsub.f32 0.0, %v4403_v5  ;;  %v4419_v36 = vadd.f32 %v4333_v53, %v1219_v60 }
 0x144   : > { %v2784_v8 = vsel %vm2716_vm3, %v1887_v41, %v2467_v6 }
 0x145   : > { %v4411_v27 = vpop.f32.mrf.mxu3  ;;  %2912 = vst [vmem:[%s4295_s19 + $0x218] sm:$0xff] %v2784_v8  ;;  %v2158_v49 = vmax.f32 %v2030_v31, 0.0  ;;  %v1967_v41 = vsub.f32 0.0, %v4419_v36 }
 0x146   : > { %v4414_v9 = vpop.f32.mrf.mxu1  ;;  %v1378_v50 = vpop.f32.mrf.mxu2 }
 0x147   : > { %v1379_v55 = vadd.f32 %v3986_v59, %v1378_v50  ;;  %2496 = vrot.lane.b32.xlu1 %v2158_v49, %s3824_s15  ;;  %2368 = vrot.lane.b32.xlu0 %v2094_v43, %s3824_s15  ;;  %v3203_v49 = vld [vmem:[%s3876_s28 + $0x148] sm:$0xf0] }
 0x148   : > { %v1221_v48 = vpop.f32.mrf.mxu0 }
 0x149   : > { %3606 = vmatmul.msk.bf16.gmra.mxu1 %vm962_vm2, %v3198_v18  ;;  %v4430_v53 = vadd.f32 %v4303_v4, %v1379_v55  ;;  %v1222_v20 = vadd.f32 %v3986_v59, %v1221_v48  ;;  %v2475_v10 = vpop.permute.xlu2 %2474  ;;  %v2095_v18 = vmax.f32 %v1967_v41, 0.0  ;;  %v3193_v48 = vld [vmem:[%s3876_s28 + $0x130] sm:$0xf] }
 0x14a   : > { %3639 = vmatmul.msk.bf16.gmra.mxu3 %vm962_vm2, %v3462_v24  ;;  %v2788_v60 = vsel %vm2716_vm3, %v1891_v54, %v2475_v10  ;;  %v3757_v10 = vld [vmem:[%s3876_s28 + $0x334] sm:$0xf0] }
 0x14b   : > { %1260 = vmatmul.bf16.gmra.mxu0 %v3186_v52  ;;  %2916 = vst [vmem:[%s4295_s19 + $0x238] sm:$0xff] %v2788_v60  ;;  %1420 = vmatmul.bf16.gmra.mxu2 %v3442_v62  ;;  %v2031_v16 = vsub.f32 0.0, %v4430_v53  ;;  %v4442_v4 = vadd.f32 %v4359_v46, %v1222_v20  ;;  %v3694_v46 = vld [vmem:[%s3876_s28 + $0x144] sm:$0xf]  ;;  %v3449_v20 = vld [vmem:[%s3876_s28 + $0x330] sm:$0xf] }
 0x14c   : > { %v3206_v24 = vor.u32 %v3694_v46, %v3203_v49  ;;  %v3760_v60 = vld [vmem:[%s3876_s28 + $0x354] sm:$0xf]  ;;  %v3450_v46 = vor.u32 %v3757_v10, %v3449_v20  ;;  %v1826_v49 = vmax.f32 %v4111_v26, 0.0 }
 0x14d   : > { %v4437_v6 = vpop.f32.mrf.mxu3  ;;  %v2159_v8 = vmax.f32 %v2031_v16, 0.0  ;;  %v1968_v43 = vsub.f32 0.0, %v4442_v4  ;;  %v3467_v16 = vld [vmem:[%s3876_s28 + $0x358] sm:$0xf0] }
 0x14e   : > { %v4439_v15 = vpop.f32.mrf.mxu1  ;;  %v1381_v31 = vpop.f32.mrf.mxu2 }
 0x14f   : > { %v1382_v19 = vadd.f32 %v3986_v59, %v1381_v31  ;;  %2498 = vrot.lane.b32.xlu2 %v2159_v8, %s3824_s15  ;;  %2370 = vrot.lane.b32.xlu1 %v2095_v18, %s3824_s15  ;;  %v2096_v41 = vmax.f32 %v1968_v43, 0.0 }
 0x150   : > { %v1223_v61 = vpop.f32.mrf.mxu0 }
 0x151   : > { %v4452_v37 = vadd.f32 %v4330_v12, %v1382_v19  ;;  %v2349_v38 = vpop.permute.xlu2 %2348  ;;  %v2471_v50 = vpop.permute.xlu0 %2470  ;;  %v1224_v52 = vadd.f32 %v3986_v59, %v1223_v61  ;;  %v3693_v12 = vld [vmem:[%s3876_s28 + $0x134] sm:$0xf0]  ;;  %v3470_v19 = vor.u32 %v3760_v60, %v3467_v16  ;;  %v4477_v61 = vld [vmem:[%s5599_s2] ss:$0 sm:$0xff]  ;;  %v1894_v60 = vmax.f32 %v4203_v45, 0.0 }
 0x152   : > { %v2725_v51 = vsel %vm2716_vm3, %v1828_v1, %v2349_v38  ;;  %v2786_v11 = vsel %vm2716_vm3, %v1889_v30, %v2471_v50  ;;  %v3194_v31 = vor.u32 %v3693_v12, %v3193_v48  ;;  %v3696_v16 = vld [vmem:[%s3876_s28 + $0x154] sm:$0xf] }
 0x153   : > { %2853 = vst [vmem:[%s4295_s19 + $0x40] sm:$0xff] %v2725_v51  ;;  %v2032_v55 = vsub.f32 0.0, %v4452_v37  ;;  %v4472_v8 = vadd.f32 %v4390_v25, %v1224_v52  ;;  %v1890_v25 = vmax.f32 %v4119_v3, 0.0 }
 0x154   : > { %2914 = vst [vmem:[%s4295_s19 + $0x228] sm:$0xff] %v2786_v11 }
 0x155   : > { %v4462_v62 = vpop.f32.mrf.mxu3  ;;  %v2160_v59 = vmax.f32 %v2032_v55, 0.0  ;;  %v1969_v11 = vsub.f32 0.0, %v4472_v8 }
 0x156   : > { %v4465_v54 = vpop.f32.mrf.mxu1  ;;  %v1383_v18 = vpop.f32.mrf.mxu2 }
 0x157   : > { %v1384_v30 = vadd.f32 %v4477_v61, %v1383_v18  ;;  %2372 = vrot.lane.b32.xlu2 %v2096_v41, %s3824_s15  ;;  %2500 = vrot.lane.b32.xlu0 %v2160_v59, %s3824_s15  ;;  %v2097_v20 = vmax.f32 %v1969_v11, 0.0  ;;  %v1827_v59 = vmax.f32 %v4133_v0, 0.0 }
 0x158   : > { %v1226_v1 = vpop.f32.mrf.mxu0 }
 0x159   : > { %3607 = vmatmul.msk.bf16.gmra.mxu1 %vm962_vm2, %v3206_v24  ;;  %v4487_v38 = vadd.f32 %v4356_v56, %v1384_v30  ;;  %v2473_v50 = vpop.permute.xlu1 %2472  ;;  %v1227_v43 = vadd.f32 %v4477_v61, %v1226_v1  ;;  %v2345_v51 = vpop.permute.xlu0 %2344 }
 0x15a   : > { %3640 = vmatmul.msk.bf16.gmra.mxu3 %vm962_vm2, %v3470_v19  ;;  %v2787_v52 = vsel %vm2716_vm3, %v1890_v25, %v2473_v50  ;;  %v2723_v3 = vsel %vm2716_vm3, %v1826_v49, %v2345_v51  ;;  %v3201_v49 = vld [vmem:[%s3876_s28 + $0x140] sm:$0xf]  ;;  %v3759_v51 = vld [vmem:[%s3876_s28 + $0x344] sm:$0xf0] }
 0x15b   : > { %1265 = vmatmul.bf16.gmra.mxu0 %v3194_v31  ;;  %2915 = vst [vmem:[%s4295_s19 + $0x230] sm:$0xff] %v2787_v52  ;;  %1425 = vmatmul.bf16.gmra.mxu2 %v3450_v46  ;;  %v2033_v26 = vsub.f32 0.0, %v4487_v38  ;;  %v4501_v48 = vadd.f32 %v4414_v9, %v1227_v43  ;;  %v3211_v9 = vld [vmem:[%s3876_s28 + $0x158] sm:$0xf0]  ;;  %v3457_v52 = vld [vmem:[%s3876_s28 + $0x340] sm:$0xf] }
 0x15c   : > { %2851 = vst [vmem:[%s4295_s19 + $0x30] sm:$0xff] %v2723_v3  ;;  %v3214_v46 = vor.u32 %v3696_v16, %v3211_v9  ;;  %v3458_v16 = vor.u32 %v3759_v51, %v3457_v52  ;;  %v1831_v9 = vmax.f32 %v4217_v63, 0.0 }
 0x15d   : > { %v4495_v24 = vpop.f32.mrf.mxu3  ;;  %v2161_v55 = vmax.f32 %v2033_v26, 0.0  ;;  %v1970_v1 = vsub.f32 0.0, %v4501_v48  ;;  %v3762_v26 = vld [vmem:[%s3876_s28 + $0x364] sm:$0xf] }
 0x15e   : > { %v4498_v56 = vpop.f32.mrf.mxu1  ;;  %v1386_v12 = vpop.f32.mrf.mxu2 }
 0x15f   : > { %v1387_v10 = vadd.f32 %v4477_v61, %v1386_v12  ;;  %2502 = vrot.lane.b32.xlu1 %v2161_v55, %s3824_s15  ;;  %2374 = vrot.lane.b32.xlu0 %v2097_v20, %s3824_s15  ;;  %v3475_v55 = vld [vmem:[%s3876_s28 + $0x368] sm:$0xf0]  ;;  %v2098_v20 = vmax.f32 %v1970_v1, 0.0 }
 0x160   : > { %v1228_v41 = vpop.f32.mrf.mxu0 }
 0x161   : > { %v4511_v18 = vadd.f32 %v4387_v58, %v1387_v10  ;;  %v1229_v31 = vadd.f32 %v4477_v61, %v1228_v41  ;;  %v2481_v19 = vpop.permute.xlu2 %2480  ;;  %v2347_v30 = vpop.permute.xlu1 %2346  ;;  %v3695_v58 = vld [vmem:[%s3876_s28 + $0x144] sm:$0xf0]  ;;  %v3478_v41 = vor.u32 %v3762_v26, %v3475_v55  ;;  %v1893_v26 = vmax.f32 %v4185_v23, 0.0  ;;  %v3698_v55 = vld [vmem:[%s3876_s28 + $0x164] sm:$0xf] }
 0x162   : > { %v2791_v0 = vsel %vm2716_vm3, %v1894_v60, %v2481_v19  ;;  %v2724_v45 = vsel %vm2716_vm3, %v1827_v59, %v2347_v30  ;;  %v3202_v10 = vor.u32 %v3695_v58, %v3201_v49 }
 0x163   : > { %2919 = vst [vmem:[%s4295_s19 + $0x250] sm:$0xff] %v2791_v0  ;;  %v2034_v25 = vsub.f32 0.0, %v4511_v18  ;;  %v4529_v11 = vadd.f32 %v4439_v15, %v1229_v31  ;;  %v1892_v15 = vmax.f32 %v4161_v34, 0.0 }
 0x164   : > { %2852 = vst [vmem:[%s4295_s19 + $0x38] sm:$0xff] %v2724_v45 }
 0x165   : > { %v4521_v50 = vpop.f32.mrf.mxu3  ;;  %v2162_v3 = vmax.f32 %v2034_v25, 0.0  ;;  %v1971_v30 = vsub.f32 0.0, %v4529_v11 }
 0x166   : > { %v4524_v43 = vpop.f32.mrf.mxu1  ;;  %v1388_v12 = vpop.f32.mrf.mxu2 }
 0x167   : > { %v1389_v59 = vadd.f32 %v4477_v61, %v1388_v12  ;;  %2504 = vrot.lane.b32.xlu2 %v2162_v3, %s3824_s15  ;;  %2376 = vrot.lane.b32.xlu1 %v2098_v20, %s3824_s15  ;;  %v2099_v25 = vmax.f32 %v1971_v30, 0.0  ;;  %v3219_v12 = vld [vmem:[%s3876_s28 + $0x168] sm:$0xf0]  ;;  %v1829_v20 = vmax.f32 %v4177_v7, 0.0 }
 0x168   : > { %v1231_v60 = vpop.f32.mrf.mxu0 }
 0x169   : > { %3608 = vmatmul.msk.bf16.gmra.mxu1 %vm962_vm2, %v3214_v46  ;;  %v4541_v31 = vadd.f32 %v4411_v27, %v1389_v59  ;;  %v2355_v19 = vpop.permute.xlu2 %2354  ;;  %v1232_v0 = vadd.f32 %v4477_v61, %v1231_v60  ;;  %v2477_v1 = vpop.permute.xlu0 %2476 }
 0x16a   : > { %3641 = vmatmul.msk.bf16.gmra.mxu3 %vm962_vm2, %v3478_v41  ;;  %v2728_v45 = vsel %vm2716_vm3, %v1831_v9, %v2355_v19  ;;  %v2789_v63 = vsel %vm2716_vm3, %v1892_v15, %v2477_v1  ;;  %v3222_v9 = vor.u32 %v3698_v55, %v3219_v12  ;;  %v3209_v15 = vld [vmem:[%s3876_s28 + $0x150] sm:$0xf] }
 0x16b   : > { %1270 = vmatmul.bf16.gmra.mxu0 %v3202_v10  ;;  %2856 = vst [vmem:[%s4295_s19 + $0x58] sm:$0xff] %v2728_v45  ;;  %1430 = vmatmul.bf16.gmra.mxu2 %v3458_v16  ;;  %v2035_v34 = vsub.f32 0.0, %v4541_v31  ;;  %v4555_v58 = vadd.f32 %v4465_v54, %v1232_v0  ;;  %v3465_v0 = vld [vmem:[%s3876_s28 + $0x350] sm:$0xf]  ;;  %v3761_v45 = vld [vmem:[%s3876_s28 + $0x354] sm:$0xf0] }
 0x16c   : > { %2917 = vst [vmem:[%s4295_s19 + $0x240] sm:$0xff] %v2789_v63  ;;  %v3466_v12 = vor.u32 %v3761_v45, %v3465_v0 }
 0x16d   : > { %v4549_v46 = vpop.f32.mrf.mxu3  ;;  %v2163_v49 = vmax.f32 %v2035_v34, 0.0  ;;  %v1972_v23 = vsub.f32 0.0, %v4555_v58  ;;  %v3764_v34 = vld [vmem:[%s3876_s28 + $0x374] sm:$0xf] }
 0x16e   : > { %v4552_v27 = vpop.f32.mrf.mxu1  ;;  %v1391_v52 = vpop.f32.mrf.mxu2 }
 0x16f   : > { %v1392_v51 = vadd.f32 %v4477_v61, %v1391_v52  ;;  %2378 = vrot.lane.b32.xlu2 %v2099_v25, %s3824_s15  ;;  %2506 = vrot.lane.b32.xlu0 %v2163_v49, %s3824_s15  ;;  %v3483_v25 = vld [vmem:[%s3876_s28 + $0x378] sm:$0xf0]  ;;  %v2100_v52 = vmax.f32 %v1972_v23, 0.0 }
 0x170   : > { %v1233_v3 = vpop.f32.mrf.mxu0 }
 0x171   : > { %v4565_v54 = vadd.f32 %v4437_v6, %v1392_v51  ;;  %v1234_v10 = vadd.f32 %v4477_v61, %v1233_v3  ;;  %v2479_v41 = vpop.permute.xlu1 %2478  ;;  %v2351_v60 = vpop.permute.xlu0 %2350  ;;  %v3697_v6 = vld [vmem:[%s3876_s28 + $0x154] sm:$0xf0]  ;;  %v3486_v3 = vor.u32 %v3764_v34, %v3483_v25  ;;  %v1895_v34 = vmax.f32 %v4227_v42, 0.0 }
 0x172   : > { %v2790_v59 = vsel %vm2716_vm3, %v1893_v26, %v2479_v41  ;;  %v2726_v16 = vsel %vm2716_vm3, %v1829_v20, %v2351_v60  ;;  %v3210_v51 = vor.u32 %v3697_v6, %v3209_v15  ;;  %v1897_v20 = vmax.f32 %v4269_v29, 0.0 }
 0x173   : > { %2918 = vst [vmem:[%s4295_s19 + $0x248] sm:$0xff] %v2790_v59  ;;  %v2036_v7 = vsub.f32 0.0, %v4565_v54  ;;  %v4583_v1 = vadd.f32 %v4498_v56, %v1234_v10  ;;  %v1830_v56 = vmax.f32 %v4195_v33, 0.0  ;;  %v1834_v25 = vmax.f32 %v4279_v35, 0.0 }
 0x174   : > { %2854 = vst [vmem:[%s4295_s19 + $0x48] sm:$0xff] %v2726_v16 }
 0x175   : > { %v4575_v19 = vpop.f32.mrf.mxu3  ;;  %v2164_v63 = vmax.f32 %v2036_v7, 0.0  ;;  %v1973_v60 = vsub.f32 0.0, %v4583_v1 }
 0x176   : > { %v4578_v30 = vpop.f32.mrf.mxu1  ;;  %v1393_v49 = vpop.f32.mrf.mxu2 }
 0x177   : > { %v1394_v26 = vadd.f32 %v4477_v61, %v1393_v49  ;;  %2508 = vrot.lane.b32.xlu1 %v2164_v63, %s3824_s15  ;;  %2380 = vrot.lane.b32.xlu0 %v2100_v52, %s3824_s15  ;;  %v2101_v6 = vmax.f32 %v1973_v60, 0.0  ;;  %v3227_v49 = vld [vmem:[%s3876_s28 + $0x178] sm:$0xf0]  ;;  %v3473_v60 = vld [vmem:[%s3876_s28 + $0x360] sm:$0xf] }
 0x178   : > { %v1236_v55 = vpop.f32.mrf.mxu0 }
 0x179   : > { %3609 = vmatmul.msk.bf16.gmra.mxu1 %vm962_vm2, %v3222_v9  ;;  %v4595_v10 = vadd.f32 %v4462_v62, %v1394_v26  ;;  %v1237_v41 = vadd.f32 %v4477_v61, %v1236_v55  ;;  %v2487_v59 = vpop.permute.xlu2 %2486  ;;  %v2353_v16 = vpop.permute.xlu1 %2352 }
 0x17a   : > { %3642 = vmatmul.msk.bf16.gmra.mxu3 %vm962_vm2, %v3486_v3  ;;  %v2794_v23 = vsel %vm2716_vm3, %v1897_v20, %v2487_v59  ;;  %v2727_v29 = vsel %vm2716_vm3, %v1830_v56, %v2353_v16  ;;  %v3217_v56 = vld [vmem:[%s3876_s28 + $0x160] sm:$0xf] }
 0x17b   : > { %1275 = vmatmul.bf16.gmra.mxu0 %v3210_v51  ;;  %2922 = vst [vmem:[%s4295_s19 + $0x268] sm:$0xff] %v2794_v23  ;;  %1435 = vmatmul.bf16.gmra.mxu2 %v3466_v12  ;;  %v2037_v33 = vsub.f32 0.0, %v4595_v10  ;;  %v4609_v7 = vadd.f32 %v4524_v43, %v1237_v41  ;;  %v3700_v43 = vld [vmem:[%s3876_s28 + $0x174] sm:$0xf]  ;;  %v3763_v23 = vld [vmem:[%s3876_s28 + $0x364] sm:$0xf0] }
 0x17c   : > { %2855 = vst [vmem:[%s4295_s19 + $0x50] sm:$0xff] %v2727_v29  ;;  %v3230_v12 = vor.u32 %v3700_v43, %v3227_v49  ;;  %v3474_v43 = vor.u32 %v3763_v23, %v3473_v60  ;;  %v1896_v49 = vmax.f32 %v4245_v44, 0.0 }
 0x17d   : > { %v4603_v9 = vpop.f32.mrf.mxu3  ;;  %v2165_v15 = vmax.f32 %v2037_v33, 0.0  ;;  %v1974_v26 = vsub.f32 0.0, %v4609_v7  ;;  %v3766_v33 = vld [vmem:[%s3876_s28 + $0x384] sm:$0xf] }
 0x17e   : > { %v4606_v62 = vpop.f32.mrf.mxu1  ;;  %v1396_v0 = vpop.f32.mrf.mxu2 }
 0x17f   : > { %v1397_v45 = vadd.f32 %v4477_v61, %v1396_v0  ;;  %2510 = vrot.lane.b32.xlu2 %v2165_v15, %s3824_s15  ;;  %2382 = vrot.lane.b32.xlu1 %v2101_v6, %s3824_s15  ;;  %v2102_v16 = vmax.f32 %v1974_v26, 0.0  ;;  %v3491_v15 = vld [vmem:[%s3876_s28 + $0x388] sm:$0xf0] }
 0x180   : > { %v1238_v63 = vpop.f32.mrf.mxu0 }
 0x181   : > { %v4619_v52 = vadd.f32 %v4495_v24, %v1397_v45  ;;  %v2361_v51 = vpop.permute.xlu2 %2360  ;;  %v2483_v3 = vpop.permute.xlu0 %2482  ;;  %v1239_v55 = vadd.f32 %v4477_v61, %v1238_v63  ;;  %v3699_v24 = vld [vmem:[%s3876_s28 + $0x164] sm:$0xf0]  ;;  %v3494_v63 = vor.u32 %v3766_v33, %v3491_v15  ;;  %v1900_v33 = vmax.f32 %v4347_v39, 0.0  ;;  %v3702_v15 = vld [vmem:[%s3876_s28 + $0x184] sm:$0xf] }
 0x182   : > { %v2731_v42 = vsel %vm2716_vm3, %v1834_v25, %v2361_v51  ;;  %v2792_v35 = vsel %vm2716_vm3, %v1895_v34, %v2483_v3  ;;  %v3218_v45 = vor.u32 %v3699_v24, %v3217_v56 }
 0x183   : > { %2859 = vst [vmem:[%s4295_s19 + $0x70] sm:$0xff] %v2731_v42  ;;  %v2038_v20 = vsub.f32 0.0, %v4619_v52  ;;  %v4639_v6 = vadd.f32 %v4552_v27, %v1239_v55  ;;  %v1832_v27 = vmax.f32 %v4237_v13, 0.0 }
 0x184   : > { %2920 = vst [vmem:[%s4295_s19 + $0x258] sm:$0xff] %v2792_v35 }
 0x185   : > { %v4629_v41 = vpop.f32.mrf.mxu3  ;;  %v2166_v29 = vmax.f32 %v2038_v20, 0.0  ;;  %v1975_v35 = vsub.f32 0.0, %v4639_v6 }
 0x186   : > { %v4632_v59 = vpop.f32.mrf.mxu1  ;;  %v1398_v0 = vpop.f32.mrf.mxu2 }
 0x187   : > { %v1399_v34 = vadd.f32 %v4477_v61, %v1398_v0  ;;  %2384 = vrot.lane.b32.xlu2 %v2102_v16, %s3824_s15  ;;  %2512 = vrot.lane.b32.xlu0 %v2166_v29, %s3824_s15  ;;  %v2103_v60 = vmax.f32 %v1975_v35, 0.0  ;;  %v1833_v29 = vmax.f32 %v4259_v2, 0.0 }
 0x188   : > { %v1241_v25 = vpop.f32.mrf.mxu0 }
 0x189   : > { %3610 = vmatmul.msk.bf16.gmra.mxu1 %vm962_vm2, %v3230_v12  ;;  %v4649_v51 = vadd.f32 %v4521_v50, %v1399_v34  ;;  %v2485_v3 = vpop.permute.xlu1 %2484  ;;  %v1242_v26 = vadd.f32 %v4477_v61, %v1241_v25  ;;  %v2357_v42 = vpop.permute.xlu0 %2356 }
 0x18a   : > { %3643 = vmatmul.msk.bf16.gmra.mxu3 %vm962_vm2, %v3494_v63  ;;  %v2793_v55 = vsel %vm2716_vm3, %v1896_v49, %v2485_v3  ;;  %v2729_v44 = vsel %vm2716_vm3, %v1832_v27, %v2357_v42  ;;  %v3225_v27 = vld [vmem:[%s3876_s28 + $0x170] sm:$0xf]  ;;  %v3765_v42 = vld [vmem:[%s3876_s28 + $0x374] sm:$0xf0] }
 0x18b   : > { %1280 = vmatmul.bf16.gmra.mxu0 %v3218_v45  ;;  %2921 = vst [vmem:[%s4295_s19 + $0x260] sm:$0xff] %v2793_v55  ;;  %1440 = vmatmul.bf16.gmra.mxu2 %v3474_v43  ;;  %v2039_v13 = vsub.f32 0.0, %v4649_v51  ;;  %v4663_v56 = vadd.f32 %v4578_v30, %v1242_v26  ;;  %v3235_v30 = vld [vmem:[%s3876_s28 + $0x188] sm:$0xf0]  ;;  %v3481_v55 = vld [vmem:[%s3876_s28 + $0x370] sm:$0xf] }
 0x18c   : > { %2857 = vst [vmem:[%s4295_s19 + $0x60] sm:$0xff] %v2729_v44  ;;  %v3238_v43 = vor.u32 %v3702_v15, %v3235_v30  ;;  %v3482_v15 = vor.u32 %v3765_v42, %v3481_v55  ;;  %v1837_v30 = vmax.f32 %v4364_v40, 0.0 }
 0x18d   : > { %v4657_v12 = vpop.f32.mrf.mxu3  ;;  %v2167_v20 = vmax.f32 %v2039_v13, 0.0  ;;  %v1976_v25 = vsub.f32 0.0, %v4663_v56  ;;  %v3768_v13 = vld [vmem:[%s3876_s28 + $0x394] sm:$0xf] }
 0x18e   : > { %v4660_v50 = vpop.f32.mrf.mxu1  ;;  %v1401_v24 = vpop.f32.mrf.mxu2 }
 0x18f   : > { %v1402_v23 = vadd.f32 %v4477_v61, %v1401_v24  ;;  %2514 = vrot.lane.b32.xlu1 %v2167_v20, %s3824_s15  ;;  %2386 = vrot.lane.b32.xlu0 %v2103_v60, %s3824_s15  ;;  %v3499_v20 = vld [vmem:[%s3876_s28 + $0x398] sm:$0xf0]  ;;  %v2104_v60 = vmax.f32 %v1976_v25, 0.0 }
 0x190   : > { %v1243_v16 = vpop.f32.mrf.mxu0 }
 0x191   : > { %v4673_v0 = vadd.f32 %v4549_v46, %v1402_v23  ;;  %v1244_v45 = vadd.f32 %v4477_v61, %v1243_v16  ;;  %v2493_v63 = vpop.permute.xlu2 %2492  ;;  %v2359_v34 = vpop.permute.xlu1 %2358  ;;  %v3701_v46 = vld [vmem:[%s3876_s28 + $0x174] sm:$0xf0]  ;;  %v3502_v16 = vor.u32 %v3768_v13, %v3499_v20  ;;  %v1899_v13 = vmax.f32 %v4323_v17, 0.0  ;;  %v3704_v20 = vld [vmem:[%s3876_s28 + $0x194] sm:$0xf] }
 0x192   : > { %v2797_v2 = vsel %vm2716_vm3, %v1900_v33, %v2493_v63  ;;  %v2730_v39 = vsel %vm2716_vm3, %v1833_v29, %v2359_v34  ;;  %v3226_v23 = vor.u32 %v3701_v46, %v3225_v27 }
 0x193   : > { %2925 = vst [vmem:[%s4295_s19 + $0x280] sm:$0xff] %v2797_v2  ;;  %v2040_v49 = vsub.f32 0.0, %v4673_v0  ;;  %v4691_v35 = vadd.f32 %v4606_v62, %v1244_v45  ;;  %v1898_v62 = vmax.f32 %v4288_v47, 0.0 }
 0x194   : > { %2858 = vst [vmem:[%s4295_s19 + $0x68] sm:$0xff] %v2730_v39 }
 0x195   : > { %v4683_v3 = vpop.f32.mrf.mxu3  ;;  %v2168_v44 = vmax.f32 %v2040_v49, 0.0  ;;  %v1977_v34 = vsub.f32 0.0, %v4691_v35 }
 0x196   : > { %v4686_v26 = vpop.f32.mrf.mxu1  ;;  %v1403_v24 = vpop.f32.mrf.mxu2 }
 0x197   : > { %v1404_v29 = vadd.f32 %v4477_v61, %v1403_v24  ;;  %2516 = vrot.lane.b32.xlu2 %v2168_v44, %s3824_s15  ;;  %2388 = vrot.lane.b32.xlu1 %v2104_v60, %s3824_s15  ;;  %v2105_v49 = vmax.f32 %v1977_v34, 0.0  ;;  %v3243_v24 = vld [vmem:[%s3876_s28 + $0x198] sm:$0xf0]  ;;  %v1835_v60 = vmax.f32 %v4313_v21, 0.0 }
 0x198   : > { %v1246_v33 = vpop.f32.mrf.mxu0 }
 0x199   : > { %3611 = vmatmul.msk.bf16.gmra.mxu1 %vm962_vm2, %v3238_v43  ;;  %v4703_v45 = vadd.f32 %v4575_v19, %v1404_v29  ;;  %v2367_v63 = vpop.permute.xlu2 %2366  ;;  %v1247_v2 = vadd.f32 %v4477_v61, %v1246_v33  ;;  %v2489_v25 = vpop.permute.xlu0 %2488 }
 0x19a   : > { %3644 = vmatmul.msk.bf16.gmra.mxu3 %vm962_vm2, %v3502_v16  ;;  %v2734_v39 = vsel %vm2716_vm3, %v1837_v30, %v2367_v63  ;;  %v2795_v40 = vsel %vm2716_vm3, %v1898_v62, %v2489_v25  ;;  %v3246_v30 = vor.u32 %v3704_v20, %v3243_v24  ;;  %v3233_v62 = vld [vmem:[%s3876_s28 + $0x180] sm:$0xf] }
 0x19b   : > { %1285 = vmatmul.bf16.gmra.mxu0 %v3226_v23  ;;  %2862 = vst [vmem:[%s4295_s19 + $0x88] sm:$0xff] %v2734_v39  ;;  %1445 = vmatmul.bf16.gmra.mxu2 %v3482_v15  ;;  %v2041_v47 = vsub.f32 0.0, %v4703_v45  ;;  %v4717_v46 = vadd.f32 %v4632_v59, %v1247_v2  ;;  %v3489_v2 = vld [vmem:[%s3876_s28 + $0x380] sm:$0xf]  ;;  %v3767_v39 = vld [vmem:[%s3876_s28 + $0x384] sm:$0xf0] }
 0x19c   : > { %2923 = vst [vmem:[%s4295_s19 + $0x270] sm:$0xff] %v2795_v40  ;;  %v3490_v24 = vor.u32 %v3767_v39, %v3489_v2 }
 0x19d   : > { %v4711_v43 = vpop.f32.mrf.mxu3  ;;  %v2169_v27 = vmax.f32 %v2041_v47, 0.0  ;;  %v1978_v17 = vsub.f32 0.0, %v4717_v46  ;;  %v3770_v47 = vld [vmem:[%s3876_s28 + $0x3a4] sm:$0xf] }
 0x19e   : > { %v4714_v19 = vpop.f32.mrf.mxu1  ;;  %v1406_v55 = vpop.f32.mrf.mxu2 }
 0x19f   : > { %v1407_v42 = vadd.f32 %v4477_v61, %v1406_v55  ;;  %2390 = vrot.lane.b32.xlu2 %v2105_v49, %s3824_s15  ;;  %2518 = vrot.lane.b32.xlu0 %v2169_v27, %s3824_s15  ;;  %v3507_v49 = vld [vmem:[%s3876_s28 + $0x3a8] sm:$0xf0]  ;;  %v2106_v55 = vmax.f32 %v1978_v17, 0.0 }
 0x1a0   : > { %v1248_v44 = vpop.f32.mrf.mxu0 }
 0x1a1   : > { %v4727_v59 = vadd.f32 %v4603_v9, %v1407_v42  ;;  %v1249_v23 = vadd.f32 %v4477_v61, %v1248_v44  ;;  %v2491_v16 = vpop.permute.xlu1 %2490  ;;  %v2363_v33 = vpop.permute.xlu0 %2362  ;;  %v3703_v9 = vld [vmem:[%s3876_s28 + $0x184] sm:$0xf0]  ;;  %v3510_v44 = vor.u32 %v3770_v47, %v3507_v49  ;;  %v1901_v47 = vmax.f32 %v4378_v22, 0.0 }
 0x1a2   : > { %v2796_v29 = vsel %vm2716_vm3, %v1899_v13, %v2491_v16  ;;  %v2732_v15 = vsel %vm2716_vm3, %v1835_v60, %v2363_v33  ;;  %v3234_v42 = vor.u32 %v3703_v9, %v3233_v62  ;;  %v1903_v60 = vmax.f32 %v4430_v53, 0.0 }
 0x1a3   : > { %2924 = vst [vmem:[%s4295_s19 + $0x278] sm:$0xff] %v2796_v29  ;;  %v2042_v21 = vsub.f32 0.0, %v4727_v59  ;;  %v4745_v25 = vadd.f32 %v4660_v50, %v1249_v23  ;;  %v1836_v50 = vmax.f32 %v4337_v28, 0.0  ;;  %v1840_v49 = vmax.f32 %v4442_v4, 0.0 }
 0x1a4   : > { %2860 = vst [vmem:[%s4295_s19 + $0x78] sm:$0xff] %v2732_v15 }
 0x1a5   : > { %v4737_v63 = vpop.f32.mrf.mxu3  ;;  %v2170_v40 = vmax.f32 %v2042_v21, 0.0  ;;  %v1979_v33 = vsub.f32 0.0, %v4745_v25 }
 0x1a6   : > { %v4740_v34 = vpop.f32.mrf.mxu1  ;;  %v1408_v27 = vpop.f32.mrf.mxu2 }
 0x1a7   : > { %v1409_v13 = vadd.f32 %v4477_v61, %v1408_v27  ;;  %2520 = vrot.lane.b32.xlu1 %v2170_v40, %s3824_s15  ;;  %2392 = vrot.lane.b32.xlu0 %v2106_v55, %s3824_s15  ;;  %v2107_v9 = vmax.f32 %v1979_v33, 0.0  ;;  %v3251_v27 = vld [vmem:[%s3876_s28 + $0x1a8] sm:$0xf0]  ;;  %v3497_v33 = vld [vmem:[%s3876_s28 + $0x390] sm:$0xf] }
 0x1a8   : > { %v1251_v20 = vpop.f32.mrf.mxu0 }
 0x1a9   : > { %3612 = vmatmul.msk.bf16.gmra.mxu1 %vm962_vm2, %v3246_v30  ;;  %v4757_v23 = vadd.f32 %v4629_v41, %v1409_v13  ;;  %v1252_v16 = vadd.f32 %v4477_v61, %v1251_v20  ;;  %v2499_v29 = vpop.permute.xlu2 %2498  ;;  %v2365_v15 = vpop.permute.xlu1 %2364 }
 0x1aa   : > { %3645 = vmatmul.msk.bf16.gmra.mxu3 %vm962_vm2, %v3510_v44  ;;  %v2800_v17 = vsel %vm2716_vm3, %v1903_v60, %v2499_v29  ;;  %v2733_v53 = vsel %vm2716_vm3, %v1836_v50, %v2365_v15  ;;  %v3241_v50 = vld [vmem:[%s3876_s28 + $0x190] sm:$0xf] }
 0x1ab   : > { %1290 = vmatmul.bf16.gmra.mxu0 %v3234_v42  ;;  %2928 = vst [vmem:[%s4295_s19 + $0x298] sm:$0xff] %v2800_v17  ;;  %1450 = vmatmul.bf16.gmra.mxu2 %v3490_v24  ;;  %v2043_v28 = vsub.f32 0.0, %v4757_v23  ;;  %v4771_v21 = vadd.f32 %v4686_v26, %v1252_v16  ;;  %v3706_v26 = vld [vmem:[%s3876_s28 + $0x1a4] sm:$0xf]  ;;  %v3769_v17 = vld [vmem:[%s3876_s28 + $0x394] sm:$0xf0] }
 0x1ac   : > { %2861 = vst [vmem:[%s4295_s19 + $0x80] sm:$0xff] %v2733_v53  ;;  %v3254_v24 = vor.u32 %v3706_v26, %v3251_v27  ;;  %v3498_v26 = vor.u32 %v3769_v17, %v3497_v33  ;;  %v1902_v27 = vmax.f32 %v4403_v5, 0.0 }
 0x1ad   : > { %v4765_v30 = vpop.f32.mrf.mxu3  ;;  %v2171_v62 = vmax.f32 %v2043_v28, 0.0  ;;  %v1980_v13 = vsub.f32 0.0, %v4771_v21  ;;  %v3772_v28 = vld [vmem:[%s3876_s28 + $0x3b4] sm:$0xf] }
 0x1ae   : > { %v4768_v41 = vpop.f32.mrf.mxu1  ;;  %v1411_v2 = vpop.f32.mrf.mxu2 }
 0x1af   : > { %v1412_v39 = vadd.f32 %v4477_v61, %v1411_v2  ;;  %2522 = vrot.lane.b32.xlu2 %v2171_v62, %s3824_s15  ;;  %2394 = vrot.lane.b32.xlu1 %v2107_v9, %s3824_s15  ;;  %v2108_v15 = vmax.f32 %v1980_v13, 0.0  ;;  %v3515_v62 = vld [vmem:[%s3876_s28 + $0x3b8] sm:$0xf0] }
 0x1b0   : > { %v1253_v40 = vpop.f32.mrf.mxu0 }
 0x1b1   : > { %v4781_v55 = vadd.f32 %v4657_v12, %v1412_v39  ;;  %v2373_v42 = vpop.permute.xlu2 %2372  ;;  %v2495_v44 = vpop.permute.xlu0 %2494  ;;  %v1254_v20 = vadd.f32 %v4477_v61, %v1253_v40  ;;  %v3705_v12 = vld [vmem:[%s3876_s28 + $0x194] sm:$0xf0]  ;;  %v3518_v40 = vor.u32 %v3772_v28, %v3515_v62  ;;  %v1906_v28 = vmax.f32 %v4511_v18, 0.0  ;;  %v3708_v62 = vld [vmem:[%s3876_s28 + $0x1b4] sm:$0xf] }
 0x1b2   : > { %v2737_v22 = vsel %vm2716_vm3, %v1840_v49, %v2373_v42  ;;  %v2798_v4 = vsel %vm2716_vm3, %v1901_v47, %v2495_v44  ;;  %v3242_v39 = vor.u32 %v3705_v12, %v3241_v50 }
 0x1b3   : > { %2865 = vst [vmem:[%s4295_s19 + $0xa0] sm:$0xff] %v2737_v22  ;;  %v2044_v60 = vsub.f32 0.0, %v4781_v55  ;;  %v4801_v9 = vadd.f32 %v4714_v19, %v1254_v20  ;;  %v1838_v19 = vmax.f32 %v4394_v57, 0.0 }
 0x1b4   : > { %2926 = vst [vmem:[%s4295_s19 + $0x288] sm:$0xff] %v2798_v4 }
 0x1b5   : > { %v4791_v16 = vpop.f32.mrf.mxu3  ;;  %v2172_v53 = vmax.f32 %v2044_v60, 0.0  ;;  %v1981_v4 = vsub.f32 0.0, %v4801_v9 }
 0x1b6   : > { %v4794_v29 = vpop.f32.mrf.mxu1  ;;  %v1413_v2 = vpop.f32.mrf.mxu2 }
 0x1b7   : > { %v1414_v47 = vadd.f32 %v4477_v61, %v1413_v2  ;;  %2396 = vrot.lane.b32.xlu2 %v2108_v15, %s3824_s15  ;;  %2524 = vrot.lane.b32.xlu0 %v2172_v53, %s3824_s15  ;;  %v2109_v33 = vmax.f32 %v1981_v4, 0.0  ;;  %v1839_v53 = vmax.f32 %v4419_v36, 0.0 }
 0x1b8   : > { %v1256_v49 = vpop.f32.mrf.mxu0 }
 0x1b9   : > { %3613 = vmatmul.msk.bf16.gmra.mxu1 %vm962_vm2, %v3254_v24  ;;  %v4811_v42 = vadd.f32 %v4683_v3, %v1414_v47  ;;  %v2497_v44 = vpop.permute.xlu1 %2496  ;;  %v1257_v13 = vadd.f32 %v4477_v61, %v1256_v49  ;;  %v2369_v22 = vpop.permute.xlu0 %2368 }
 0x1ba   : > { %3646 = vmatmul.msk.bf16.gmra.mxu3 %vm962_vm2, %v3518_v40  ;;  %v2799_v20 = vsel %vm2716_vm3, %v1902_v27, %v2497_v44  ;;  %v2735_v5 = vsel %vm2716_vm3, %v1838_v19, %v2369_v22  ;;  %v3249_v19 = vld [vmem:[%s3876_s28 + $0x1a0] sm:$0xf]  ;;  %v3771_v22 = vld [vmem:[%s3876_s28 + $0x3a4] sm:$0xf0] }
 0x1bb   : > { %1295 = vmatmul.bf16.gmra.mxu0 %v3242_v39  ;;  %2927 = vst [vmem:[%s4295_s19 + $0x290] sm:$0xff] %v2799_v20  ;;  %1455 = vmatmul.bf16.gmra.mxu2 %v3498_v26  ;;  %v2045_v57 = vsub.f32 0.0, %v4811_v42  ;;  %v4825_v50 = vadd.f32 %v4740_v34, %v1257_v13  ;;  %v3259_v34 = vld [vmem:[%s3876_s28 + $0x1b8] sm:$0xf0]  ;;  %v3505_v20 = vld [vmem:[%s3876_s28 + $0x3a0] sm:$0xf] }
 0x1bc   : > { %2863 = vst [vmem:[%s4295_s19 + $0x90] sm:$0xff] %v2735_v5  ;;  %v3262_v26 = vor.u32 %v3708_v62, %v3259_v34  ;;  %v3506_v62 = vor.u32 %v3771_v22, %v3505_v20  ;;  %v1843_v34 = vmax.f32 %v4529_v11, 0.0 }
 0x1bd   : > { %v4819_v24 = vpop.f32.mrf.mxu3  ;;  %v2173_v60 = vmax.f32 %v2045_v57, 0.0  ;;  %v1982_v49 = vsub.f32 0.0, %v4825_v50  ;;  %v3774_v57 = vld [vmem:[%s3876_s28 + $0x3c4] sm:$0xf] }
 0x1be   : > { %v4822_v3 = vpop.f32.mrf.mxu1  ;;  %v1416_v12 = vpop.f32.mrf.mxu2 }
 0x1bf   : > { %v1417_v17 = vadd.f32 %v4477_v61, %v1416_v12  ;;  %2526 = vrot.lane.b32.xlu1 %v2173_v60, %s3824_s15  ;;  %2398 = vrot.lane.b32.xlu0 %v2109_v33, %s3824_s15  ;;  %v3523_v60 = vld [vmem:[%s3876_s28 + $0x3c8] sm:$0xf0]  ;;  %v2110_v33 = vmax.f32 %v1982_v49, 0.0 }
 0x1c0   : > { %v1258_v15 = vpop.f32.mrf.mxu0 }
 0x1c1   : > { %v4835_v2 = vadd.f32 %v4711_v43, %v1417_v17  ;;  %v1259_v39 = vadd.f32 %v4477_v61, %v1258_v15  ;;  %v2505_v40 = vpop.permute.xlu2 %2504  ;;  %v2371_v47 = vpop.permute.xlu1 %2370  ;;  %v3707_v43 = vld [vmem:[%s3876_s28 + $0x1a4] sm:$0xf0]  ;;  %v3526_v15 = vor.u32 %v3774_v57, %v3523_v60  ;;  %v1905_v57 = vmax.f32 %v4487_v38, 0.0  ;;  %v3710_v60 = vld [vmem:[%s3876_s28 + $0x1c4] sm:$0xf] }
 0x1c2   : > { %v2803_v36 = vsel %vm2716_vm3, %v1906_v28, %v2505_v40  ;;  %v2736_v18 = vsel %vm2716_vm3, %v1839_v53, %v2371_v47  ;;  %v3250_v17 = vor.u32 %v3707_v43, %v3249_v19 }
 0x1c3   : > { %2931 = vst [vmem:[%s4295_s19 + $0x2b0] sm:$0xff] %v2803_v36  ;;  %v2046_v27 = vsub.f32 0.0, %v4835_v2  ;;  %v4853_v4 = vadd.f32 %v4768_v41, %v1259_v39  ;;  %v1904_v41 = vmax.f32 %v4452_v37, 0.0 }
 0x1c4   : > { %2864 = vst [vmem:[%s4295_s19 + $0x98] sm:$0xff] %v2736_v18 }
 0x1c5   : > { %v4845_v44 = vpop.f32.mrf.mxu3  ;;  %v2174_v5 = vmax.f32 %v2046_v27, 0.0  ;;  %v1983_v47 = vsub.f32 0.0, %v4853_v4 }
 0x1c6   : > { %v4848_v13 = vpop.f32.mrf.mxu1  ;;  %v1418_v12 = vpop.f32.mrf.mxu2 }
 0x1c7   : > { %v1419_v53 = vadd.f32 %v4477_v61, %v1418_v12  ;;  %2528 = vrot.lane.b32.xlu2 %v2174_v5, %s3824_s15  ;;  %2400 = vrot.lane.b32.xlu1 %v2110_v33, %s3824_s15  ;;  %v2111_v27 = vmax.f32 %v1983_v47, 0.0  ;;  %v3267_v12 = vld [vmem:[%s3876_s28 + $0x1c8] sm:$0xf0]  ;;  %v1841_v33 = vmax.f32 %v4472_v8, 0.0 }
 0x1c8   : > { %v1261_v28 = vpop.f32.mrf.mxu0 }
 0x1c9   : > { %3614 = vmatmul.msk.bf16.gmra.mxu1 %vm962_vm2, %v3262_v26  ;;  %v4865_v39 = vadd.f32 %v4737_v63, %v1419_v53  ;;  %v2379_v40 = vpop.permute.xlu2 %2378  ;;  %v1262_v36 = vadd.f32 %v4477_v61, %v1261_v28  ;;  %v2501_v49 = vpop.permute.xlu0 %2500 }
 0x1ca   : > { %3647 = vmatmul.msk.bf16.gmra.mxu3 %vm962_vm2, %v3526_v15  ;;  %v2740_v18 = vsel %vm2716_vm3, %v1843_v34, %v2379_v40  ;;  %v2801_v11 = vsel %vm2716_vm3, %v1904_v41, %v2501_v49  ;;  %v3270_v34 = vor.u32 %v3710_v60, %v3267_v12  ;;  %v3257_v41 = vld [vmem:[%s3876_s28 + $0x1b0] sm:$0xf] }
 0x1cb   : > { %1300 = vmatmul.bf16.gmra.mxu0 %v3250_v17  ;;  %2868 = vst [vmem:[%s4295_s19 + $0xb8] sm:$0xff] %v2740_v18  ;;  %1460 = vmatmul.bf16.gmra.mxu2 %v3506_v62  ;;  %v2047_v37 = vsub.f32 0.0, %v4865_v39  ;;  %v4879_v43 = vadd.f32 %v4794_v29, %v1262_v36  ;;  %v3513_v36 = vld [vmem:[%s3876_s28 + $0x3b0] sm:$0xf]  ;;  %v3773_v18 = vld [vmem:[%s3876_s28 + $0x3b4] sm:$0xf0] }
 0x1cc   : > { %2929 = vst [vmem:[%s4295_s19 + $0x2a0] sm:$0xff] %v2801_v11  ;;  %v3514_v12 = vor.u32 %v3773_v18, %v3513_v36 }
 0x1cd   : > { %v4873_v26 = vpop.f32.mrf.mxu3  ;;  %v2175_v19 = vmax.f32 %v2047_v37, 0.0  ;;  %v1984_v38 = vsub.f32 0.0, %v4879_v43  ;;  %v3776_v37 = vld [vmem:[%s3876_s28 + $0x3d4] sm:$0xf] }
 0x1ce   : > { %v4876_v63 = vpop.f32.mrf.mxu1  ;;  %v1421_v20 = vpop.f32.mrf.mxu2 }
 0x1cf   : > { %v1422_v22 = vadd.f32 %v4477_v61, %v1421_v20  ;;  %2402 = vrot.lane.b32.xlu2 %v2111_v27, %s3824_s15  ;;  %2530 = vrot.lane.b32.xlu0 %v2175_v19, %s3824_s15  ;;  %v3531_v27 = vld [vmem:[%s3876_s28 + $0x3d8] sm:$0xf0]  ;;  %v2112_v20 = vmax.f32 %v1984_v38, 0.0 }
 0x1d0   : > { %v1263_v5 = vpop.f32.mrf.mxu0 }
 0x1d1   : > { %v4889_v29 = vadd.f32 %v4765_v30, %v1422_v22  ;;  %v1264_v17 = vadd.f32 %v4477_v61, %v1263_v5  ;;  %v2503_v15 = vpop.permute.xlu1 %2502  ;;  %v2375_v28 = vpop.permute.xlu0 %2374  ;;  %v3709_v30 = vld [vmem:[%s3876_s28 + $0x1b4] sm:$0xf0]  ;;  %v3534_v5 = vor.u32 %v3776_v37, %v3531_v27  ;;  %v1907_v37 = vmax.f32 %v4541_v31, 0.0 }
 0x1d2   : > { %v2802_v53 = vsel %vm2716_vm3, %v1905_v57, %v2503_v15  ;;  %v2738_v62 = vsel %vm2716_vm3, %v1841_v33, %v2375_v28  ;;  %v3258_v22 = vor.u32 %v3709_v30, %v3257_v41  ;;  %v1909_v33 = vmax.f32 %v4595_v10, 0.0 }
 0x1d3   : > { %2930 = vst [vmem:[%s4295_s19 + $0x2a8] sm:$0xff] %v2802_v53  ;;  %v2048_v8 = vsub.f32 0.0, %v4889_v29  ;;  %v4907_v49 = vadd.f32 %v4822_v3, %v1264_v17  ;;  %v1842_v3 = vmax.f32 %v4501_v48, 0.0  ;;  %v1846_v27 = vmax.f32 %v4609_v7, 0.0 }
 0x1d4   : > { %2866 = vst [vmem:[%s4295_s19 + $0xa8] sm:$0xff] %v2738_v62 }
 0x1d5   : > { %v4899_v40 = vpop.f32.mrf.mxu3  ;;  %v2176_v11 = vmax.f32 %v2048_v8, 0.0  ;;  %v1985_v28 = vsub.f32 0.0, %v4907_v49 }
 0x1d6   : > { %v4902_v47 = vpop.f32.mrf.mxu1  ;;  %v1423_v19 = vpop.f32.mrf.mxu2 }
 0x1d7   : > { %v1424_v57 = vadd.f32 %v4477_v61, %v1423_v19  ;;  %2532 = vrot.lane.b32.xlu1 %v2176_v11, %s3824_s15  ;;  %2404 = vrot.lane.b32.xlu0 %v2112_v20, %s3824_s15  ;;  %v2113_v30 = vmax.f32 %v1985_v28, 0.0  ;;  %v3712_v19 = vld [vmem:[%s3876_s28 + $0x1d4] sm:$0xf]  ;;  %v3521_v28 = vld [vmem:[%s3876_s28 + $0x3c0] sm:$0xf] }
 0x1d8   : > { %v1266_v60 = vpop.f32.mrf.mxu0 }
 0x1d9   : > { %3615 = vmatmul.msk.bf16.gmra.mxu1 %vm962_vm2, %v3270_v34  ;;  %v4919_v17 = vadd.f32 %v4791_v16, %v1424_v57  ;;  %v1267_v15 = vadd.f32 %v4477_v61, %v1266_v60  ;;  %v2511_v53 = vpop.permute.xlu2 %2510  ;;  %v2377_v62 = vpop.permute.xlu1 %2376  ;;  %v4949_v57 = vld [vmem:[%s5599_s2] ss:$0 sm:$0xff] }
 0x1da   : > { %3648 = vmatmul.msk.bf16.gmra.mxu3 %vm962_vm2, %v3534_v5  ;;  %v2806_v38 = vsel %vm2716_vm3, %v1909_v33, %v2511_v53  ;;  %v2739_v10 = vsel %vm2716_vm3, %v1842_v3, %v2377_v62  ;;  %v3265_v33 = vld [vmem:[%s3876_s28 + $0x1c0] sm:$0xf]  ;;  %v3711_v3 = vld [vmem:[%s3876_s28 + $0x1c4] sm:$0xf0] }
 0x1db   : > { %1305 = vmatmul.bf16.gmra.mxu0 %v3258_v22  ;;  %2934 = vst [vmem:[%s4295_s19 + $0x2c8] sm:$0xff] %v2806_v38  ;;  %1465 = vmatmul.bf16.gmra.mxu2 %v3514_v12  ;;  %v2049_v48 = vsub.f32 0.0, %v4919_v17  ;;  %v4933_v8 = vadd.f32 %v4848_v13, %v1267_v15  ;;  %v3275_v13 = vld [vmem:[%s3876_s28 + $0x1d8] sm:$0xf0]  ;;  %v3775_v38 = vld [vmem:[%s3876_s28 + $0x3c4] sm:$0xf0] }
 0x1dc   : > { %2867 = vst [vmem:[%s4295_s19 + $0xb0] sm:$0xff] %v2739_v10  ;;  %v3278_v60 = vor.u32 %v3712_v19, %v3275_v13  ;;  %v3522_v19 = vor.u32 %v3775_v38, %v3521_v28  ;;  %v1908_v13 = vmax.f32 %v4565_v54, 0.0 }
 0x1dd   : > { %v4927_v34 = vpop.f32.mrf.mxu3  ;;  %v2177_v41 = vmax.f32 %v2049_v48, 0.0  ;;  %v1986_v5 = vsub.f32 0.0, %v4933_v8  ;;  %v3778_v48 = vld [vmem:[%s3876_s28 + $0x3e4] sm:$0xf] }
 0x1de   : > { %v4930_v16 = vpop.f32.mrf.mxu1  ;;  %v1426_v36 = vpop.f32.mrf.mxu2 }
 0x1df   : > { %v1427_v18 = vadd.f32 %v4477_v61, %v1426_v36  ;;  %2534 = vrot.lane.b32.xlu2 %v2177_v41, %s3824_s15  ;;  %2406 = vrot.lane.b32.xlu1 %v2113_v30, %s3824_s15  ;;  %v2114_v62 = vmax.f32 %v1986_v5, 0.0  ;;  %v3539_v41 = vld [vmem:[%s3876_s28 + $0x3e8] sm:$0xf0] }
 0x1e0   : > { %v1268_v11 = vpop.f32.mrf.mxu0 }
 0x1e1   : > { %v4943_v20 = vadd.f32 %v4819_v24, %v1427_v18  ;;  %v2385_v61 = vpop.permute.xlu2 %2384  ;;  %v2507_v22 = vpop.permute.xlu0 %2506  ;;  %v1269_v31 = vadd.f32 %v4949_v57, %v1268_v11  ;;  %v3266_v18 = vor.u32 %v3711_v3, %v3265_v33  ;;  %v3542_v11 = vor.u32 %v3778_v48, %v3539_v41  ;;  %v3714_v41 = vld [vmem:[%s3876_s28 + $0x1e4] sm:$0xf] }
 0x1e2   : > { %v2743_v7 = vsel %vm2716_vm3, %v1846_v27, %v2385_v61  ;;  %v2804_v24 = vsel %vm2716_vm3, %v1907_v37, %v2507_v22  ;;  %v1912_v48 = vmax.f32 %v4673_v0, 0.0 }
 0x1e3   : > { %2871 = vst [vmem:[%s4295_s19 + $0xd0] sm:$0xff] %v2743_v7  ;;  %v2050_v12 = vsub.f32 0.0, %v4943_v20  ;;  %v4968_v30 = vadd.f32 %v4876_v63, %v1269_v31  ;;  %v1844_v63 = vmax.f32 %v4555_v58, 0.0 }
 0x1e4   : > { %2932 = vst [vmem:[%s4295_s19 + $0x2b8] sm:$0xff] %v2804_v24 }
 0x1e5   : > { %v4958_v15 = vpop.f32.mrf.mxu3  ;;  %v2178_v10 = vmax.f32 %v2050_v12, 0.0  ;;  %v1987_v24 = vsub.f32 0.0, %v4968_v30 }
 0x1e6   : > { %v4961_v53 = vpop.f32.mrf.mxu1  ;;  %v1428_v36 = vpop.f32.mrf.mxu2 }
 0x1e7   : > { %v1429_v37 = vadd.f32 %v4949_v57, %v1428_v36  ;;  %2408 = vrot.lane.b32.xlu2 %v2114_v62, %s3824_s15  ;;  %2536 = vrot.lane.b32.xlu0 %v2178_v10, %s3824_s15  ;;  %v2115_v28 = vmax.f32 %v1987_v24, 0.0  ;;  %v1845_v10 = vmax.f32 %v4583_v1, 0.0 }
 0x1e8   : > { %v1271_v27 = vpop.f32.mrf.mxu0 }
 0x1e9   : > { %3616 = vmatmul.msk.bf16.gmra.mxu1 %vm962_vm2, %v3278_v60  ;;  %v4978_v61 = vadd.f32 %v4845_v44, %v1429_v37  ;;  %v2509_v22 = vpop.permute.xlu1 %2508  ;;  %v1272_v5 = vadd.f32 %v4949_v57, %v1271_v27  ;;  %v2381_v7 = vpop.permute.xlu0 %2380 }
 0x1ea   : > { %3649 = vmatmul.msk.bf16.gmra.mxu3 %vm962_vm2, %v3542_v11  ;;  %v2805_v31 = vsel %vm2716_vm3, %v1908_v13, %v2509_v22  ;;  %v2741_v54 = vsel %vm2716_vm3, %v1844_v63, %v2381_v7  ;;  %v3273_v63 = vld [vmem:[%s3876_s28 + $0x1d0] sm:$0xf]  ;;  %v3713_v22 = vld [vmem:[%s3876_s28 + $0x1d4] sm:$0xf0] }
 0x1eb   : > { %1310 = vmatmul.bf16.gmra.mxu0 %v3266_v18  ;;  %2933 = vst [vmem:[%s4295_s19 + $0x2c0] sm:$0xff] %v2805_v31  ;;  %1470 = vmatmul.bf16.gmra.mxu2 %v3522_v19  ;;  %v2051_v58 = vsub.f32 0.0, %v4978_v61  ;;  %v4992_v33 = vadd.f32 %v4902_v47, %v1272_v5  ;;  %v3283_v47 = vld [vmem:[%s3876_s28 + $0x1e8] sm:$0xf0]  ;;  %v3529_v5 = vld [vmem:[%s3876_s28 + $0x3d0] sm:$0xf] }
 0x1ec   : > { %2869 = vst [vmem:[%s4295_s19 + $0xc0] sm:$0xff] %v2741_v54  ;;  %v3286_v19 = vor.u32 %v3714_v41, %v3283_v47  ;;  %v3777_v31 = vld [vmem:[%s3876_s28 + $0x3d4] sm:$0xf0]  ;;  %v1910_v47 = vmax.f32 %v4619_v52, 0.0 }
 0x1ed   : > { %v4986_v60 = vpop.f32.mrf.mxu3  ;;  %v2179_v12 = vmax.f32 %v2051_v58, 0.0  ;;  %v1988_v27 = vsub.f32 0.0, %v4992_v33  ;;  %v3780_v58 = vld [vmem:[%s3876_s28 + $0x3f4] sm:$0xf]  ;;  %v3530_v41 = vor.u32 %v3777_v31, %v3529_v5 }
 0x1ee   : > { %v4989_v44 = vpop.f32.mrf.mxu1  ;;  %v1431_v3 = vpop.f32.mrf.mxu2 }
 0x1ef   : > { %v1432_v38 = vadd.f32 %v4949_v57, %v1431_v3  ;;  %2538 = vrot.lane.b32.xlu1 %v2179_v12, %s3824_s15  ;;  %2410 = vrot.lane.b32.xlu0 %v2115_v28, %s3824_s15  ;;  %v3547_v12 = vld [vmem:[%s3876_s28 + $0x3f8] sm:$0xf0]  ;;  %v2116_v28 = vmax.f32 %v1988_v27, 0.0 }
 0x1f0   : > { %v1273_v62 = vpop.f32.mrf.mxu0 }
 0x1f1   : > { %v5002_v36 = vadd.f32 %v4873_v26, %v1432_v38  ;;  %v1274_v18 = vadd.f32 %v4949_v57, %v1273_v62  ;;  %v2517_v11 = vpop.permute.xlu2 %2516  ;;  %v2383_v37 = vpop.permute.xlu1 %2382  ;;  %v3274_v38 = vor.u32 %v3713_v22, %v3273_v63  ;;  %v3550_v62 = vor.u32 %v3780_v58, %v3547_v12  ;;  %v3716_v12 = vld [vmem:[%s3876_s28 + $0x1f4] sm:$0xf] }
 0x1f2   : > { %v2809_v1 = vsel %vm2716_vm3, %v1912_v48, %v2517_v11  ;;  %v2742_v0 = vsel %vm2716_vm3, %v1845_v10, %v2383_v37  ;;  %v1911_v58 = vmax.f32 %v4649_v51, 0.0 }
 0x1f3   : > { %2937 = vst [vmem:[%s4295_s19 + $0x2e0] sm:$0xff] %v2809_v1  ;;  %v2052_v13 = vsub.f32 0.0, %v5002_v36  ;;  %v5020_v24 = vadd.f32 %v4930_v16, %v1274_v18  ;;  %v1849_v16 = vmax.f32 %v4691_v35, 0.0 }
 0x1f4   : > { %2870 = vst [vmem:[%s4295_s19 + $0xc8] sm:$0xff] %v2742_v0 }
 0x1f5   : > { %v5017_v7 = vpop.f32.mrf.mxu3  ;;  %v2180_v54 = vmax.f32 %v2052_v13, 0.0  ;;  %v1989_v37 = vsub.f32 0.0, %v5020_v24 }
 0x1f6   : > { %v5013_v26 = vpop.f32.mrf.mxu1  ;;  %v1433_v3 = vpop.f32.mrf.mxu2 }
 0x1f7   : > { %v1434_v10 = vadd.f32 %v4949_v57, %v1433_v3  ;;  %2540 = vrot.lane.b32.xlu2 %v2180_v54, %s3824_s15  ;;  %2412 = vrot.lane.b32.xlu1 %v2116_v28, %s3824_s15  ;;  %v3291_v3 = vld [vmem:[%s3876_s28 + $0x1f8] sm:$0xf0] }
 0x1f8   : > { %v1276_v48 = vpop.f32.mrf.mxu0 }
 0x1f9   : > { %3617 = vmatmul.msk.bf16.gmra.mxu1 %vm962_vm2, %v3286_v19  ;;  %v5032_v18 = vadd.f32 %v4899_v40, %v1434_v10  ;;  %v2391_v11 = vpop.permute.xlu2 %2390  ;;  %v1277_v1 = vadd.f32 %v4949_v57, %v1276_v48  ;;  %v2513_v27 = vpop.permute.xlu0 %2512  ;;  %v2117_v19 = vmax.f32 %v1989_v37, 0.0 }
 0x1fa   : > { %3650 = vmatmul.msk.bf16.gmra.mxu3 %vm962_vm2, %v3550_v62  ;;  %v2746_v0 = vsel %vm2716_vm3, %v1849_v16, %v2391_v11  ;;  %v2807_v35 = vsel %vm2716_vm3, %v1910_v47, %v2513_v27  ;;  %v3294_v16 = vor.u32 %v3716_v12, %v3291_v3  ;;  %v3281_v11 = vld [vmem:[%s3876_s28 + $0x1e0] sm:$0xf] }
 0x1fb   : > { %1315 = vmatmul.bf16.gmra.mxu0 %v3274_v38  ;;  %2874 = vst [vmem:[%s4295_s19 + $0xe8] sm:$0xff] %v2746_v0  ;;  %1475 = vmatmul.bf16.gmra.mxu2 %v3530_v41  ;;  %v2053_v52 = vsub.f32 0.0, %v5032_v18  ;;  %v5044_v63 = vadd.f32 %v4961_v53, %v1277_v1  ;;  %v1847_v53 = vmax.f32 %v4639_v6, 0.0  ;;  %v3715_v6 = vld [vmem:[%s3876_s28 + $0x1e4] sm:$0xf0] }
 0x1fc   : > { %2935 = vst [vmem:[%s4295_s19 + $0x2d0] sm:$0xff] %v2807_v35  ;;  %v3779_v1 = vld [vmem:[%s3876_s28 + $0x3e4] sm:$0xf0] }
 0x1fd   : > { %v2181_v13 = vmax.f32 %v2053_v52, 0.0  ;;  %v5046_v5 = vpop.f32.mrf.mxu3  ;;  %v1990_v41 = vsub.f32 0.0, %v5044_v63 }
 0x1fe   : > { %v5041_v40 = vpop.f32.mrf.mxu1  ;;  %v1436_v22 = vpop.f32.mrf.mxu2 }
 0x1ff   : > { %v1437_v31 = vadd.f32 %v4949_v57, %v1436_v22  ;;  %2414 = vrot.lane.b32.xlu2 %v2117_v19, %s3824_s15  ;;  %2542 = vrot.lane.b32.xlu0 %v2181_v13, %s3824_s15  ;;  %v2118_v52 = vmax.f32 %v1990_v41, 0.0  ;;  %v3282_v19 = vor.u32 %v3715_v6, %v3281_v11  ;;  %v1913_v6 = vmax.f32 %v4703_v45, 0.0 }
 0x200   : > { %v1278_v54 = vpop.f32.mrf.mxu0 }
 0x201   : > { %v5056_v28 = vadd.f32 %v4927_v34, %v1437_v31  ;;  %v1279_v38 = vadd.f32 %v4949_v57, %v1278_v54  ;;  %v2515_v62 = vpop.permute.xlu1 %2514  ;;  %v2387_v48 = vpop.permute.xlu0 %2386  ;;  %v3537_v34 = vld [vmem:[%s3876_s28 + $0x3e0] sm:$0xf]  ;;  %v1915_v54 = vmax.f32 %v4757_v23, 0.0 }
 0x202   : > { %v2808_v10 = vsel %vm2716_vm3, %v1911_v58, %v2515_v62  ;;  %v2744_v51 = vsel %vm2716_vm3, %v1847_v53, %v2387_v48  ;;  %v3538_v31 = vor.u32 %v3779_v1, %v3537_v34  ;;  %v1848_v58 = vmax.f32 %v4663_v56, 0.0  ;;  %v3299_v1 = vld [vmem:[%s3876_s28 + $0x208] sm:$0xf0] }
 0x203   : > { %2936 = vst [vmem:[%s4295_s19 + $0x2d8] sm:$0xff] %v2808_v10  ;;  %v2054_v47 = vsub.f32 0.0, %v5056_v28  ;;  %v5072_v0 = vadd.f32 %v4989_v44, %v1279_v38  ;;  %v1852_v34 = vmax.f32 %v4771_v21, 0.0 }
 0x204   : > { %2872 = vst [vmem:[%s4295_s19 + $0xd8] sm:$0xff] %v2744_v51 }
 0x205   : > { %v2182_v27 = vmax.f32 %v2054_v47, 0.0  ;;  %v5079_v44 = vpop.f32.mrf.mxu3  ;;  %v1991_v38 = vsub.f32 0.0, %v5072_v0 }
 0x206   : > { %v5067_v37 = vpop.f32.mrf.mxu1  ;;  %v1438_v35 = vpop.f32.mrf.mxu2 }
 0x207   : > { %v1439_v13 = vadd.f32 %v4949_v57, %v1438_v35  ;;  %2544 = vrot.lane.b32.xlu1 %v2182_v27, %s3824_s15  ;;  %2416 = vrot.lane.b32.xlu0 %v2118_v52, %s3824_s15  ;;  %v2119_v51 = vmax.f32 %v1991_v38, 0.0  ;;  %v3781_v38 = vld [vmem:[%s3876_s28 + $0x3f4] sm:$0xf0] }
 0x208   : > { %v1281_v22 = vpop.f32.mrf.mxu0 }
 0x209   : > { %3618 = vmatmul.msk.bf16.gmra.mxu1 %vm962_vm2, %v3294_v16  ;;  %v5083_v12 = vadd.f32 %v4958_v15, %v1439_v13  ;;  %v1282_v3 = vadd.f32 %v4949_v57, %v1281_v22  ;;  %v2523_v53 = vpop.permute.xlu2 %2522  ;;  %v2389_v10 = vpop.permute.xlu1 %2388 }
 0x20a   : > { %v2812_v62 = vsel %vm2716_vm3, %v1915_v54, %v2523_v53  ;;  %v2745_v23 = vsel %vm2716_vm3, %v1848_v58, %v2389_v10  ;;  %v3289_v58 = vld [vmem:[%s3876_s28 + $0x1f0] sm:$0xf] }
 0x20b   : > { %1320 = vmatmul.bf16.gmra.mxu0 %v3282_v19  ;;  %2940 = vst [vmem:[%s4295_s19 + $0x2f8] sm:$0xff] %v2812_v62  ;;  %1480 = vmatmul.bf16.gmra.mxu2 %v3538_v31  ;;  %v2055_v56 = vsub.f32 0.0, %v5083_v12  ;;  %v5095_v48 = vadd.f32 %v5013_v26, %v1282_v3  ;;  %v3718_v26 = vld [vmem:[%s3876_s28 + $0x204] sm:$0xf]  ;;  %v3545_v53 = vld [vmem:[%s3876_s28 + $0x3f0] sm:$0xf] }
 0x20c   : > { %2873 = vst [vmem:[%s4295_s19 + $0xe0] sm:$0xff] %v2745_v23  ;;  %v3302_v21 = vor.u32 %v3718_v26, %v3299_v1 }
 0x20d   : > { %v2183_v41 = vmax.f32 %v2055_v56, 0.0  ;;  %v1992_v19 = vsub.f32 0.0, %v5095_v48  ;;  %v5111_v31 = vpop.f32.mrf.mxu3 }
 0x20e   : > { %v5092_v15 = vpop.f32.mrf.mxu1  ;;  %v1441_v16 = vpop.f32.mrf.mxu2 }
 0x20f   : > { %v1442_v47 = vadd.f32 %v4949_v57, %v1441_v16  ;;  %2546 = vrot.lane.b32.xlu2 %v2183_v41, %s3824_s15  ;;  %2418 = vrot.lane.b32.xlu1 %v2119_v51, %s3824_s15  ;;  %v2120_v62 = vmax.f32 %v1992_v19, 0.0 }
 0x210   : > { %v1283_v11 = vpop.f32.mrf.mxu0 }
 0x211   : > { %v5105_v27 = vadd.f32 %v4986_v60, %v1442_v47  ;;  %v2397_v35 = vpop.permute.xlu2 %2396  ;;  %v2519_v52 = vpop.permute.xlu0 %2518  ;;  %v1284_v13 = vadd.f32 %v4949_v57, %v1283_v11  ;;  %v3717_v60 = vld [vmem:[%s3876_s28 + $0x1f4] sm:$0xf0]  ;;  %v3546_v47 = vor.u32 %v3781_v38, %v3545_v53  ;;  %v1914_v11 = vmax.f32 %v4727_v59, 0.0 }
 0x212   : > { %v2749_v22 = vsel %vm2716_vm3, %v1852_v34, %v2397_v35  ;;  %v2810_v45 = vsel %vm2716_vm3, %v1913_v6, %v2519_v52  ;;  %v3290_v41 = vor.u32 %v3717_v60, %v3289_v58  ;;  %v1850_v6 = vmax.f32 %v4717_v46, 0.0 }
 0x213   : > { %2877 = vst [vmem:[%s4295_s19 + $0x100] sm:$0xff] %v2749_v22  ;;  %v2056_v54 = vsub.f32 0.0, %v5105_v27  ;;  %v5123_v23 = vadd.f32 %v5041_v40, %v1284_v13  ;;  %v1851_v60 = vmax.f32 %v4745_v25, 0.0  ;;  %v1918_v53 = vmax.f32 %v4835_v2, 0.0 }
 0x214   : > { %2938 = vst [vmem:[%s4295_s19 + $0x2e8] sm:$0xff] %v2810_v45 }
 0x215   : > { %v2184_v10 = vmax.f32 %v2056_v54, 0.0  ;;  %v1993_v52 = vsub.f32 0.0, %v5123_v23 }
 0x216   : > { %v5118_v3 = vpop.f32.mrf.mxu1  ;;  %v1443_v56 = vpop.f32.mrf.mxu2 }
 0x217   : > { %v1444_v51 = vadd.f32 %v4949_v57, %v1443_v56  ;;  %2420 = vrot.lane.b32.xlu2 %v2120_v62, %s3824_s15  ;;  %2548 = vrot.lane.b32.xlu0 %v2184_v10, %s3824_s15 }
 0x218   : > { %v1286_v16 = vpop.f32.mrf.mxu0 }
 0x219   : > { %3619 = vmatmul.msk.bf16.gmra.mxu1 %vm962_vm2, %v3302_v21  ;;  %v5132_v40 = vadd.f32 %v5017_v7, %v1444_v51  ;;  %v1287_v34 = vadd.f32 %v4949_v57, %v1286_v16  ;;  %v2521_v26 = vpop.permute.xlu1 %2520  ;;  %v2393_v35 = vpop.permute.xlu0 %2392  ;;  %v2121_v21 = vmax.f32 %v1993_v52, 0.0 }
 0x21a   : > { %v2811_v1 = vsel %vm2716_vm3, %v1914_v11, %v2521_v26  ;;  %v2747_v19 = vsel %vm2716_vm3, %v1850_v6, %v2393_v35  ;;  %v5143_v7 = vpop.f32.mrf.mxu3  ;;  %v1916_v35 = vmax.f32 %v4781_v55, 0.0 }
 0x21b   : > { %1325 = vmatmul.bf16.gmra.mxu0 %v3290_v41  ;;  %2939 = vst [vmem:[%s4295_s19 + $0x2f0] sm:$0xff] %v2811_v1  ;;  %1485 = vmatmul.bf16.gmra.mxu2 %v3546_v47  ;;  %v2057_v59 = vsub.f32 0.0, %v5132_v40  ;;  %v5146_v13 = vadd.f32 %v5067_v37, %v1287_v34  ;;  %v1855_v1 = vmax.f32 %v4853_v4, 0.0 }
 0x21c   : > { %2875 = vst [vmem:[%s4295_s19 + $0xf0] sm:$0xff] %v2747_v19 }
 0x21d   : > { %v2185_v22 = vmax.f32 %v2057_v59, 0.0  ;;  %v1994_v56 = vsub.f32 0.0, %v5146_v13 }
 0x21e   : > { %v5141_v46 = vpop.f32.mrf.mxu1  ;;  %v1446_v45 = vpop.f32.mrf.mxu2 }
 0x21f   : > { %v1447_v54 = vadd.f32 %v4949_v57, %v1446_v45  ;;  %2550 = vrot.lane.b32.xlu1 %v2185_v22, %s3824_s15  ;;  %2422 = vrot.lane.b32.xlu0 %v2121_v21, %s3824_s15  ;;  %v2122_v47 = vmax.f32 %v1994_v56, 0.0  ;;  %v1853_v56 = vmax.f32 %v4801_v9, 0.0 }
 0x220   : > { %v1288_v58 = vpop.f32.mrf.mxu0 }
 0x221   : > { %v5154_v38 = vadd.f32 %v5046_v5, %v1447_v54  ;;  %v1289_v37 = vadd.f32 %v4949_v57, %v1288_v58  ;;  %v2529_v62 = vpop.permute.xlu2 %2528  ;;  %v2395_v10 = vpop.permute.xlu1 %2394 }
 0x222   : > { %v2815_v41 = vsel %vm2716_vm3, %v1918_v53, %v2529_v62  ;;  %v2748_v51 = vsel %vm2716_vm3, %v1851_v60, %v2395_v10  ;;  %v5168_v6 = vpop.f32.mrf.mxu3  ;;  %v1917_v62 = vmax.f32 %v4811_v42, 0.0 }
 0x223   : > { %2943 = vst [vmem:[%s4295_s19 + $0x310] sm:$0xff] %v2815_v41  ;;  %v2058_v25 = vsub.f32 0.0, %v5154_v38  ;;  %v5166_v16 = vadd.f32 %v5092_v15, %v1289_v37 }
 0x224   : > { %2876 = vst [vmem:[%s4295_s19 + $0xf8] sm:$0xff] %v2748_v51 }
 0x225   : > { %v2186_v5 = vmax.f32 %v2058_v25, 0.0  ;;  %v1995_v59 = vsub.f32 0.0, %v5166_v16 }
 0x226   : > { %v5163_v2 = vpop.f32.mrf.mxu1  ;;  %v1448_v11 = vpop.f32.mrf.mxu2 }
 0x227   : > { %v1449_v34 = vadd.f32 %v4949_v57, %v1448_v11  ;;  %2552 = vrot.lane.b32.xlu2 %v2186_v5, %s3824_s15  ;;  %2424 = vrot.lane.b32.xlu1 %v2122_v47, %s3824_s15 }
 0x228   : > { %v1291_v26 = vpop.f32.mrf.mxu0 }
 0x229   : > { %v5176_v15 = vadd.f32 %v5079_v44, %v1449_v34  ;;  %v1292_v52 = vadd.f32 %v4949_v57, %v1291_v26  ;;  %v2403_v19 = vpop.permute.xlu2 %2402  ;;  %v2525_v45 = vpop.permute.xlu0 %2524  ;;  %v2123_v44 = vmax.f32 %v1995_v59, 0.0  ;;  %v1854_v59 = vmax.f32 %v4825_v50, 0.0 }
 0x22a   : > { %v2752_v22 = vsel %vm2716_vm3, %v1855_v1, %v2403_v19  ;;  %v2813_v21 = vsel %vm2716_vm3, %v1916_v35, %v2525_v45  ;;  %v5194_v10 = vpop.f32.mrf.mxu3  ;;  %v1921_v19 = vmax.f32 %v4919_v17, 0.0 }
 0x22b   : > { %2880 = vst [vmem:[%s4295_s19 + $0x118] sm:$0xff] %v2752_v22  ;;  %v2059_v54 = vsub.f32 0.0, %v5176_v15  ;;  %v5188_v55 = vadd.f32 %v5118_v3, %v1292_v52 }
 0x22c   : > { %2941 = vst [vmem:[%s4295_s19 + $0x300] sm:$0xff] %v2813_v21 }
 0x22d   : > { %v2187_v58 = vmax.f32 %v2059_v54, 0.0  ;;  %v1996_v25 = vsub.f32 0.0, %v5188_v55 }
 0x22e   : > { %v5185_v4 = vpop.f32.mrf.mxu1  ;;  %v1451_v60 = vpop.f32.mrf.mxu2 }
 0x22f   : > { %v1452_v53 = vadd.f32 %v4949_v57, %v1451_v60  ;;  %2426 = vrot.lane.b32.xlu2 %v2123_v44, %s3824_s15  ;;  %2554 = vrot.lane.b32.xlu0 %v2187_v58, %s3824_s15  ;;  %v2124_v26 = vmax.f32 %v1996_v25, 0.0  ;;  %v1858_v25 = vmax.f32 %v4933_v8, 0.0 }
 0x230   : > { %v1293_v37 = vpop.f32.mrf.mxu0 }
 0x231   : > { %v5198_v3 = vadd.f32 %v5111_v31, %v1452_v53  ;;  %v1294_v41 = vadd.f32 %v4949_v57, %v1293_v37  ;;  %v2527_v51 = vpop.permute.xlu1 %2526  ;;  %v2399_v47 = vpop.permute.xlu0 %2398 }
 0x232   : > { %v2814_v5 = vsel %vm2716_vm3, %v1917_v62, %v2527_v51  ;;  %v2750_v11 = vsel %vm2716_vm3, %v1853_v56, %v2399_v47  ;;  %v1790_v58 = vpop.f32.mrf.mxu3  ;;  %v1919_v51 = vmax.f32 %v4865_v39, 0.0 }
 0x233   : > { %2942 = vst [vmem:[%s4295_s19 + $0x308] sm:$0xff] %v2814_v5  ;;  %v2060_v42 = vsub.f32 0.0, %v5198_v3  ;;  %v5210_v9 = vadd.f32 %v5141_v46, %v1294_v41 }
 0x234   : > { %2878 = vst [vmem:[%s4295_s19 + $0x108] sm:$0xff] %v2750_v11 }
 0x235   : > { %v2188_v31 = vmax.f32 %v2060_v42, 0.0  ;;  %v1997_v21 = vsub.f32 0.0, %v5210_v9 }
 0x236   : > { %v5207_v34 = vpop.f32.mrf.mxu1  ;;  %v1453_v1 = vpop.f32.mrf.mxu2 }
 0x237   : > { %v1454_v35 = vadd.f32 %v4949_v57, %v1453_v1  ;;  %2556 = vrot.lane.b32.xlu1 %v2188_v31, %s3824_s15  ;;  %2428 = vrot.lane.b32.xlu0 %v2124_v26, %s3824_s15  ;;  %v2125_v37 = vmax.f32 %v1997_v21, 0.0  ;;  %v1856_v21 = vmax.f32 %v4879_v43, 0.0 }
 0x238   : > { %v1296_v52 = vpop.f32.mrf.mxu0 }
 0x239   : > { %v5218_v22 = vadd.f32 %v5143_v7, %v1454_v35  ;;  %v1297_v46 = vadd.f32 %v4949_v57, %v1296_v52  ;;  %v2535_v45 = vpop.permute.xlu2 %2534  ;;  %v2401_v44 = vpop.permute.xlu1 %2400 }
 0x23a   : > { %v2818_v54 = vsel %vm2716_vm3, %v1921_v19, %v2535_v45  ;;  %v2751_v60 = vsel %vm2716_vm3, %v1854_v59, %v2401_v44  ;;  %v1792_v8 = vpop.f32.mrf.mxu3  ;;  %v1920_v45 = vmax.f32 %v4889_v29, 0.0 }
 0x23b   : > { %2946 = vst [vmem:[%s4295_s19 + $0x328] sm:$0xff] %v2818_v54  ;;  %v2061_v53 = vsub.f32 0.0, %v5218_v22  ;;  %v5230_v50 = vadd.f32 %v5163_v2, %v1297_v46 }
 0x23c   : > { %2879 = vst [vmem:[%s4295_s19 + $0x110] sm:$0xff] %v2751_v60 }
 0x23d   : > { %v2189_v7 = vmax.f32 %v2061_v53, 0.0  ;;  %v1998_v42 = vsub.f32 0.0, %v5230_v50 }
 0x23e   : > { %v5227_v17 = vpop.f32.mrf.mxu1  ;;  %v1456_v62 = vpop.f32.mrf.mxu2 }
 0x23f   : > { %v1457_v56 = vadd.f32 %v4949_v57, %v1456_v62  ;;  %2558 = vrot.lane.b32.xlu2 %v2189_v7, %s3824_s15  ;;  %2430 = vrot.lane.b32.xlu1 %v2125_v37, %s3824_s15  ;;  %v2126_v35 = vmax.f32 %v1998_v42, 0.0 }
 0x240   : > { %v1298_v41 = vpop.f32.mrf.mxu0 }
 0x241   : > { %v5238_v5 = vadd.f32 %v5168_v6, %v1457_v56  ;;  %v1299_v2 = vadd.f32 %v4949_v57, %v1298_v41  ;;  %v2409_v47 = vpop.permute.xlu2 %2408  ;;  %v2531_v11 = vpop.permute.xlu0 %2530 }
 0x242   : > { %v2755_v31 = vsel %vm2716_vm3, %v1858_v25, %v2409_v47  ;;  %v2816_v26 = vsel %vm2716_vm3, %v1919_v51, %v2531_v11  ;;  %v1795_v51 = vpop.f32.mrf.mxu3  ;;  %v1857_v47 = vmax.f32 %v4907_v49, 0.0  ;;  %v1924_v11 = vmax.f32 %v5002_v36, 0.0 }
 0x243   : > { %2883 = vst [vmem:[%s4295_s19 + $0x130] sm:$0xff] %v2755_v31  ;;  %v2062_v1 = vsub.f32 0.0, %v5238_v5  ;;  %v5250_v6 = vadd.f32 %v5185_v4, %v1299_v2 }
 0x244   : > { %2944 = vst [vmem:[%s4295_s19 + $0x318] sm:$0xff] %v2816_v26 }
 0x245   : > { %v2190_v52 = vmax.f32 %v2062_v1, 0.0  ;;  %v1999_v60 = vsub.f32 0.0, %v5250_v6 }
 0x246   : > { %v5247_v39 = vpop.f32.mrf.mxu1  ;;  %v1458_v19 = vpop.f32.mrf.mxu2 }
 0x247   : > { %v1459_v59 = vadd.f32 %v4949_v57, %v1458_v19  ;;  %2432 = vrot.lane.b32.xlu2 %v2126_v35, %s3824_s15  ;;  %2560 = vrot.lane.b32.xlu0 %v2190_v52, %s3824_s15  ;;  %v2127_v56 = vmax.f32 %v1999_v60, 0.0  ;;  %v1922_v60 = vmax.f32 %v4943_v20, 0.0 }
 0x248   : > { %v1301_v46 = vpop.f32.mrf.mxu0 }
 0x249   : > { %v5258_v54 = vadd.f32 %v5194_v10, %v1459_v59  ;;  %v1302_v4 = vadd.f32 %v4949_v57, %v1301_v46  ;;  %v2533_v44 = vpop.permute.xlu1 %2532  ;;  %v2405_v7 = vpop.permute.xlu0 %2404 }
 0x24a   : > { %v2817_v53 = vsel %vm2716_vm3, %v1920_v45, %v2533_v44  ;;  %v2753_v37 = vsel %vm2716_vm3, %v1856_v21, %v2405_v7  ;;  %v1797_v44 = vpop.f32.mrf.mxu3 }
 0x24b   : > { %2945 = vst [vmem:[%s4295_s19 + $0x320] sm:$0xff] %v2817_v53  ;;  %v2063_v62 = vsub.f32 0.0, %v5258_v54  ;;  %v5270_v43 = vadd.f32 %v5207_v34, %v1302_v4  ;;  %v1861_v4 = vmax.f32 %v5020_v24, 0.0 }
 0x24c   : > { %2881 = vst [vmem:[%s4295_s19 + $0x120] sm:$0xff] %v2753_v37 }
 0x24d   : > { %v2191_v10 = vmax.f32 %v2063_v62, 0.0  ;;  %v2000_v1 = vsub.f32 0.0, %v5270_v43 }
 0x24e   : > { %v5267_v29 = vpop.f32.mrf.mxu1  ;;  %v1461_v41 = vpop.f32.mrf.mxu2 }
 0x24f   : > { %v1462_v25 = vadd.f32 %v4949_v57, %v1461_v41  ;;  %2562 = vrot.lane.b32.xlu1 %v2191_v10, %s3824_s15  ;;  %2434 = vrot.lane.b32.xlu0 %v2127_v56, %s3824_s15 }
 0x250   : > { %v1303_v2 = vpop.f32.mrf.mxu0 }
 0x251   : > { %v5277_v42 = vadd.f32 %v1790_v58, %v1462_v25  ;;  %v1304_v34 = vadd.f32 %v4949_v57, %v1303_v2  ;;  %v2541_v31 = vpop.permute.xlu2 %2540  ;;  %v2407_v26 = vpop.permute.xlu1 %2406  ;;  %v2128_v58 = vmax.f32 %v2000_v1, 0.0 }
 0x252   : > { %v2821_v35 = vsel %vm2716_vm3, %v1924_v11, %v2541_v31  ;;  %v2754_v52 = vsel %vm2716_vm3, %v1857_v47, %v2407_v26  ;;  %v1859_v31 = vmax.f32 %v4968_v30, 0.0 }
 0x253   : > { %2949 = vst [vmem:[%s4295_s19 + $0x340] sm:$0xff] %v2821_v35  ;;  %v2064_v19 = vsub.f32 0.0, %v5277_v42  ;;  %v5289_v49 = vadd.f32 %v5227_v17, %v1304_v34  ;;  %v1923_v34 = vmax.f32 %v4978_v61, 0.0 }
 0x254   : > { %2882 = vst [vmem:[%s4295_s19 + $0x128] sm:$0xff] %v2754_v52 }
 0x255   : > { %v2192_v36 = vmax.f32 %v2064_v19, 0.0  ;;  %v2001_v37 = vsub.f32 0.0, %v5289_v49 }
 0x256   : > { %v5286_v59 = vpop.f32.mrf.mxu1  ;;  %v1463_v46 = vpop.f32.mrf.mxu2 }
 0x257   : > { %v1464_v45 = vadd.f32 %v4949_v57, %v1463_v46  ;;  %2564 = vrot.lane.b32.xlu2 %v2192_v36, %s3824_s15  ;;  %2436 = vrot.lane.b32.xlu1 %v2128_v58, %s3824_s15  ;;  %v1800_v36 = vpop.f32.mrf.mxu3 }
 0x258   : > { %v1306_v21 = vpop.f32.mrf.mxu0 }
 0x259   : > { %v5296_v53 = vadd.f32 %v1792_v8, %v1464_v45  ;;  %v1307_v17 = vadd.f32 %v4949_v57, %v1306_v21  ;;  %v2415_v7 = vpop.permute.xlu2 %2414  ;;  %v2537_v10 = vpop.permute.xlu0 %2536  ;;  %v2129_v8 = vmax.f32 %v2001_v37, 0.0 }
 0x25a   : > { %v2758_v62 = vsel %vm2716_vm3, %v1861_v4, %v2415_v7  ;;  %v2819_v56 = vsel %vm2716_vm3, %v1922_v60, %v2537_v10  ;;  %v1860_v7 = vmax.f32 %v4992_v33, 0.0 }
 0x25b   : > { %2886 = vst [vmem:[%s4295_s19 + $0x148] sm:$0xff] %v2758_v62  ;;  %v2065_v41 = vsub.f32 0.0, %v5296_v53  ;;  %v5308_v20 = vadd.f32 %v5247_v39, %v1307_v17  ;;  %v1927_v17 = vmax.f32 %v5083_v12, 0.0 }
 0x25c   : > { %2947 = vst [vmem:[%s4295_s19 + $0x330] sm:$0xff] %v2819_v56 }
 0x25d   : > { %v2193_v25 = vmax.f32 %v2065_v41, 0.0  ;;  %v2002_v35 = vsub.f32 0.0, %v5308_v20 }
 0x25e   : > { %v5305_v24 = vpop.f32.mrf.mxu1  ;;  %v1466_v2 = vpop.f32.mrf.mxu2 }
 0x25f   : > { %v1467_v47 = vadd.f32 %v4949_v57, %v1466_v2  ;;  %2438 = vrot.lane.b32.xlu2 %v2129_v8, %s3824_s15  ;;  %2566 = vrot.lane.b32.xlu0 %v2193_v25, %s3824_s15  ;;  %v2130_v45 = vmax.f32 %v2002_v35, 0.0  ;;  %v1802_v12 = vpop.f32.mrf.mxu3 }
 0x260   : > { %v1308_v11 = vpop.f32.mrf.mxu0 }
 0x261   : > { %v5315_v26 = vadd.f32 %v1795_v51, %v1467_v47  ;;  %v1309_v39 = vadd.f32 %v4949_v57, %v1308_v11  ;;  %v2539_v1 = vpop.permute.xlu1 %2538  ;;  %v2411_v19 = vpop.permute.xlu0 %2410 }
 0x262   : > { %v2820_v52 = vsel %vm2716_vm3, %v1923_v34, %v2539_v1  ;;  %v2756_v58 = vsel %vm2716_vm3, %v1859_v31, %v2411_v19  ;;  %v1864_v1 = vmax.f32 %v5095_v48, 0.0 }
 0x263   : > { %2948 = vst [vmem:[%s4295_s19 + $0x338] sm:$0xff] %v2820_v52  ;;  %v2066_v46 = vsub.f32 0.0, %v5315_v26  ;;  %v5327_v30 = vadd.f32 %v5267_v29, %v1309_v39  ;;  %v1925_v39 = vmax.f32 %v5032_v18, 0.0 }
 0x264   : > { %2884 = vst [vmem:[%s4295_s19 + $0x138] sm:$0xff] %v2756_v58 }
 0x265   : > { %v2194_v51 = vmax.f32 %v2066_v46, 0.0  ;;  %v2003_v10 = vsub.f32 0.0, %v5327_v30 }
 0x266   : > { %v5324_v61 = vpop.f32.mrf.mxu1  ;;  %v1468_v21 = vpop.f32.mrf.mxu2 }
 0x267   : > { %v1469_v4 = vadd.f32 %v4949_v57, %v1468_v21  ;;  %2568 = vrot.lane.b32.xlu1 %v2194_v51, %s3824_s15  ;;  %2440 = vrot.lane.b32.xlu0 %v2130_v45, %s3824_s15  ;;  %v2131_v47 = vmax.f32 %v2003_v10, 0.0 }
 0x268   : > { %v1311_v60 = vpop.f32.mrf.mxu0 }
 0x269   : > { %v5334_v37 = vadd.f32 %v1797_v44, %v1469_v4  ;;  %v1312_v29 = vadd.f32 %v4949_v57, %v1311_v60  ;;  %v2547_v62 = vpop.permute.xlu2 %2546  ;;  %v2413_v41 = vpop.permute.xlu1 %2412 }
 0x26a   : > { %v2824_v56 = vsel %vm2716_vm3, %v1927_v17, %v2547_v62  ;;  %v2757_v8 = vsel %vm2716_vm3, %v1860_v7, %v2413_v41  ;;  %v1805_v60 = vpop.f32.mrf.mxu3  ;;  %v1862_v62 = vmax.f32 %v5044_v63, 0.0 }
 0x26b   : > { %2952 = vst [vmem:[%s4295_s19 + $0x358] sm:$0xff] %v2824_v56  ;;  %v2067_v25 = vsub.f32 0.0, %v5334_v37  ;;  %v5346_v33 = vadd.f32 %v5286_v59, %v1312_v29  ;;  %v1926_v29 = vmax.f32 %v5056_v28, 0.0 }
 0x26c   : > { %2885 = vst [vmem:[%s4295_s19 + $0x140] sm:$0xff] %v2757_v8 }
 0x26d   : > { %v2195_v44 = vmax.f32 %v2067_v25, 0.0  ;;  %v2004_v58 = vsub.f32 0.0, %v5346_v33 }
 0x26e   : > { %v5343_v2 = vpop.f32.mrf.mxu1  ;;  %v1471_v11 = vpop.f32.mrf.mxu2 }
 0x26f   : > { %v1472_v34 = vadd.f32 %v4949_v57, %v1471_v11  ;;  %2570 = vrot.lane.b32.xlu2 %v2195_v44, %s3824_s15  ;;  %2442 = vrot.lane.b32.xlu1 %v2131_v47, %s3824_s15  ;;  %v2132_v48 = vmax.f32 %v2004_v58, 0.0 }
 0x270   : > { %v1313_v31 = vpop.f32.mrf.mxu0 }
 0x271   : > { %v5353_v35 = vadd.f32 %v1800_v36, %v1472_v34  ;;  %v1314_v59 = vadd.f32 %v4949_v57, %v1313_v31  ;;  %v2421_v52 = vpop.permute.xlu2 %2420  ;;  %v2543_v19 = vpop.permute.xlu0 %2542 }
 0x272   : > { %v2761_v46 = vsel %vm2716_vm3, %v1864_v1, %v2421_v52  ;;  %v2822_v51 = vsel %vm2716_vm3, %v1925_v39, %v2543_v19  ;;  %v1863_v1 = vmax.f32 %v5072_v0, 0.0  ;;  %v1807_v52 = vpop.f32.mrf.mxu3 }
 0x273   : > { %2889 = vst [vmem:[%s4295_s19 + $0x160] sm:$0xff] %v2761_v46  ;;  %v2068_v45 = vsub.f32 0.0, %v5353_v35  ;;  %v5365_v18 = vadd.f32 %v5305_v24, %v1314_v59  ;;  %v1930_v59 = vmax.f32 %v5154_v38, 0.0 }
 0x274   : > { %2950 = vst [vmem:[%s4295_s19 + $0x348] sm:$0xff] %v2822_v51 }
 0x275   : > { %v2196_v36 = vmax.f32 %v2068_v45, 0.0  ;;  %v2005_v41 = vsub.f32 0.0, %v5365_v18 }
 0x276   : > { %v5362_v21 = vpop.f32.mrf.mxu1  ;;  %v1473_v4 = vpop.f32.mrf.mxu2 }
 0x277   : > { %v1474_v17 = vadd.f32 %v4949_v57, %v1473_v4  ;;  %2444 = vrot.lane.b32.xlu2 %v2132_v48, %s3824_s15  ;;  %2572 = vrot.lane.b32.xlu0 %v2196_v36, %s3824_s15 }
 0x278   : > { %v1316_v7 = vpop.f32.mrf.mxu0 }
 0x279   : > { %v5372_v10 = vadd.f32 %v1802_v12, %v1474_v17  ;;  %v1317_v24 = vadd.f32 %v4949_v57, %v1316_v7  ;;  %v2545_v56 = vpop.permute.xlu1 %2544  ;;  %v2417_v25 = vpop.permute.xlu0 %2416  ;;  %v2133_v12 = vmax.f32 %v2005_v41, 0.0 }
 0x27a   : > { %v2823_v8 = vsel %vm2716_vm3, %v1926_v29, %v2545_v56  ;;  %v2759_v44 = vsel %vm2716_vm3, %v1862_v62, %v2417_v25  ;;  %v1867_v62 = vmax.f32 %v5166_v16, 0.0 }
 0x27b   : > { %2951 = vst [vmem:[%s4295_s19 + $0x350] sm:$0xff] %v2823_v8  ;;  %v2069_v47 = vsub.f32 0.0, %v5372_v10  ;;  %v5384_v63 = vadd.f32 %v5324_v61, %v1317_v24  ;;  %v1928_v24 = vmax.f32 %v5105_v27, 0.0 }
 0x27c   : > { %2887 = vst [vmem:[%s4295_s19 + $0x150] sm:$0xff] %v2759_v44 }
 0x27d   : > { %v2197_v28 = vmax.f32 %v2069_v47, 0.0  ;;  %v2006_v51 = vsub.f32 0.0, %v5384_v63  ;;  %v1810_v47 = vpop.f32.mrf.mxu3 }
 0x27e   : > { %v5381_v11 = vpop.f32.mrf.mxu1  ;;  %v1476_v34 = vpop.f32.mrf.mxu2 }
 0x27f   : > { %v1477_v31 = vadd.f32 %v4949_v57, %v1476_v34  ;;  %2574 = vrot.lane.b32.xlu1 %v2197_v28, %s3824_s15  ;;  %2446 = vrot.lane.b32.xlu0 %v2133_v12, %s3824_s15 }
 0x280   : > { %v1318_v39 = vpop.f32.mrf.mxu0 }
 0x281   : > { %v5391_v19 = vadd.f32 %v1805_v60, %v1477_v31  ;;  %v1319_v61 = vadd.f32 %v4949_v57, %v1318_v39  ;;  %v2553_v58 = vpop.permute.xlu2 %2552  ;;  %v2419_v46 = vpop.permute.xlu1 %2418  ;;  %v2134_v60 = vmax.f32 %v2006_v51, 0.0  ;;  %v5425_v39 = vld [vmem:[%s5599_s2] ss:$0 sm:$0xff] }
 0x282   : > { %v2827_v45 = vsel %vm2716_vm3, %v1930_v59, %v2553_v58  ;;  %v2760_v48 = vsel %vm2716_vm3, %v1863_v1, %v2419_v46 }
 0x283   : > { %2955 = vst [vmem:[%s4295_s19 + $0x370] sm:$0xff] %v2827_v45  ;;  %v2070_v36 = vsub.f32 0.0, %v5391_v19  ;;  %v5401_v38 = vadd.f32 %v5343_v2, %v1319_v61 }
 0x284   : > { %2888 = vst [vmem:[%s4295_s19 + $0x158] sm:$0xff] %v2760_v48 }
 0x285   : > { %v2198_v4 = vmax.f32 %v2070_v36, 0.0  ;;  %v2007_v8 = vsub.f32 0.0, %v5401_v38 }
 0x286   : > { %v1655_v0 = vpop.f32.mrf.mxu1  ;;  %v1478_v17 = vpop.f32.mrf.mxu2 }
 0x287   : > { %v1479_v7 = vadd.f32 %v4949_v57, %v1478_v17  ;;  %2576 = vrot.lane.b32.xlu2 %v2198_v4, %s3824_s15  ;;  %2448 = vrot.lane.b32.xlu1 %v2134_v60, %s3824_s15  ;;  %v2135_v34 = vmax.f32 %v2007_v8, 0.0  ;;  %v1812_v60 = vpop.f32.mrf.mxu3 }
 0x288   : > { %v1321_v29 = vpop.f32.mrf.mxu0 }
 0x289   : > { %v5408_v56 = vadd.f32 %v1807_v52, %v1479_v7  ;;  %v1322_v2 = vadd.f32 %v4949_v57, %v1321_v29  ;;  %v2427_v41 = vpop.permute.xlu2 %2426  ;;  %v2549_v44 = vpop.permute.xlu0 %2548  ;;  %v1865_v52 = vmax.f32 %v5123_v23, 0.0 }
 0x28a   : > { %v2764_v25 = vsel %vm2716_vm3, %v1867_v62, %v2427_v41  ;;  %v2825_v28 = vsel %vm2716_vm3, %v1928_v24, %v2549_v44  ;;  %v1866_v24 = vmax.f32 %v5146_v13, 0.0  ;;  %v1334_v13 = vadd.f32 %v5425_v39, %v4021_v32 }
 0x28b   : > { %2892 = vst [vmem:[%s4295_s19 + $0x178] sm:$0xff] %v2764_v25  ;;  %v2071_v12 = vsub.f32 0.0, %v5408_v56  ;;  %v5420_v27 = vadd.f32 %v5362_v21, %v1322_v2  ;;  %v1929_v21 = vmax.f32 %v5132_v40, 0.0  ;;  %v1933_v2 = vmax.f32 %v5218_v22, 0.0 }
 0x28c   : > { %2953 = vst [vmem:[%s4295_s19 + $0x360] sm:$0xff] %v2825_v28  ;;  %v1931_v32 = vmax.f32 %v5176_v15, 0.0 }
 0x28d   : > { %v2199_v57 = vmax.f32 %v2071_v12, 0.0  ;;  %v2008_v51 = vsub.f32 0.0, %v5420_v27  ;;  %v1332_v12 = vadd.f32 %v5425_v39, %v4004_v14 }
 0x28e   : > { %v5417_v16 = vpop.f32.mrf.mxu1  ;;  %v1481_v31 = vpop.f32.mrf.mxu2 }
 0x28f   : > { %v1482_v1 = vadd.f32 %v5425_v39, %v1481_v31  ;;  %2450 = vrot.lane.b32.xlu2 %v2135_v34, %s3824_s15  ;;  %2578 = vrot.lane.b32.xlu0 %v2199_v57, %s3824_s15  ;;  %v2136_v7 = vmax.f32 %v2008_v51, 0.0 }
 0x290   : > { %v1323_v59 = vpop.f32.mrf.mxu0 }
 0x291   : > { %v5432_v61 = vadd.f32 %v1810_v47, %v1482_v1  ;;  %v1324_v58 = vadd.f32 %v5425_v39, %v1323_v59  ;;  %v2551_v46 = vpop.permute.xlu1 %2550  ;;  %v2423_v48 = vpop.permute.xlu0 %2422 }
 0x292   : > { %v2826_v45 = vsel %vm2716_vm3, %v1929_v21, %v2551_v46  ;;  %v2762_v36 = vsel %vm2716_vm3, %v1865_v52, %v2423_v48  ;;  %v1815_v1 = vpop.f32.mrf.mxu3  ;;  %v1870_v52 = vmax.f32 %v5230_v50, 0.0 }
 0x293   : > { %2954 = vst [vmem:[%s4295_s19 + $0x368] sm:$0xff] %v2826_v45  ;;  %v2072_v4 = vsub.f32 0.0, %v5432_v61  ;;  %v5442_v23 = vadd.f32 %v5381_v11, %v1324_v58 }
 0x294   : > { %2890 = vst [vmem:[%s4295_s19 + $0x168] sm:$0xff] %v2762_v36 }
 0x295   : > { %v2200_v17 = vmax.f32 %v2072_v4, 0.0  ;;  %v2009_v11 = vsub.f32 0.0, %v5442_v23 }
 0x296   : > { %v1660_v40 = vpop.f32.mrf.mxu1  ;;  %v1483_v29 = vpop.f32.mrf.mxu2 }
 0x297   : > { %2580 = vrot.lane.b32.xlu1 %v2200_v17, %s3824_s15  ;;  %2452 = vrot.lane.b32.xlu0 %v2136_v7, %s3824_s15  ;;  %v5461_v57 = vadd.f32 %v1660_v40, %v1332_v12  ;;  %v1484_v51 = vadd.f32 %v5425_v39, %v1483_v29 }
 0x298   : > { %v1326_v62 = vpop.f32.mrf.mxu0 }
 0x299   : > { %v1327_v41 = vadd.f32 %v5425_v39, %v1326_v62  ;;  %v2559_v8 = vpop.permute.xlu2 %2558  ;;  %v2425_v25 = vpop.permute.xlu1 %2424  ;;  %v2012_v46 = vsub.f32 0.0, %v5461_v57  ;;  %v5482_v62 = vadd.f32 %v1812_v60, %v1484_v51 }
 0x29a   : > { %v2830_v47 = vsel %vm2716_vm3, %v1933_v2, %v2559_v8  ;;  %v2763_v28 = vsel %vm2716_vm3, %v1866_v24, %v2425_v25  ;;  %v1868_v8 = vmax.f32 %v5188_v55, 0.0  ;;  %v1932_v25 = vmax.f32 %v5198_v3, 0.0 }
 0x29b   : > { %v5450_v44 = vadd.f32 %v1655_v0, %v1327_v41  ;;  %2958 = vst [vmem:[%s4295_s19 + $0x388] sm:$0xff] %v2830_v47  ;;  %v2137_v0 = vmax.f32 %v2009_v11, 0.0  ;;  %v2140_v7 = vmax.f32 %v2012_v46, 0.0  ;;  %v1817_v11 = vpop.f32.mrf.mxu3 }
 0x29c   : > { %2891 = vst [vmem:[%s4295_s19 + $0x170] sm:$0xff] %v2763_v28 }
 0x29d   : > { %v2010_v34 = vsub.f32 0.0, %v5450_v44 }
 0x29e   : > { %v1662_v22 = vpop.f32.mrf.mxu1  ;;  %v1486_v59 = vpop.f32.mrf.mxu2 }
 0x29f   : > { %v5463_v31 = vadd.f32 %v1662_v22, %v1334_v13  ;;  %v2138_v21 = vmax.f32 %v2010_v34, 0.0  ;;  %2454 = vrot.lane.b32.xlu1 %v2137_v0, %s3824_s15  ;;  %v1487_v4 = vadd.f32 %v5425_v39, %v1486_v59  ;;  %v2073_v13 = vsub.f32 0.0, %v5482_v62 }
 0x2a0   : > { %v1328_v14 = vpop.f32.mrf.mxu0  ;;  %v1936_v59 = vmax.f32 %v5277_v42, 0.0 }
 0x2a1   : > { %v1329_v58 = vadd.f32 %v5425_v39, %v1328_v14  ;;  %2456 = vrot.lane.b32.xlu2 %v2138_v21, %s3824_s15  ;;  %v2013_v45 = vsub.f32 0.0, %v5463_v31  ;;  %v2433_v48 = vpop.permute.xlu2 %2432  ;;  %v2555_v36 = vpop.permute.xlu0 %2554  ;;  %v5484_v24 = vadd.f32 %v1815_v1, %v1487_v4  ;;  %v2201_v34 = vmax.f32 %v2073_v13, 0.0 }
 0x2a2   : > { %v2767_v15 = vsel %vm2716_vm3, %v1870_v52, %v2433_v48  ;;  %v2828_v50 = vsel %vm2716_vm3, %v1931_v32, %v2555_v36  ;;  %v1869_v1 = vmax.f32 %v5210_v9, 0.0  ;;  %v1934_v9 = vmax.f32 %v5238_v5, 0.0 }
 0x2a3   : > { %v5475_v40 = vadd.f32 %v5417_v16, %v1329_v58  ;;  %2895 = vst [vmem:[%s4295_s19 + $0x190] sm:$0xff] %v2767_v15  ;;  %v2141_v29 = vmax.f32 %v2013_v45, 0.0  ;;  %v2074_v22 = vsub.f32 0.0, %v5484_v24  ;;  %v1873_v58 = vmax.f32 %v5289_v49, 0.0 }
 0x2a4   : > { %2956 = vst [vmem:[%s4295_s19 + $0x378] sm:$0xff] %v2828_v50  ;;  %v1871_v48 = vmax.f32 %v5250_v6, 0.0  ;;  %v1935_v36 = vmax.f32 %v5258_v54, 0.0  ;;  %v1872_v50 = vmax.f32 %v5270_v43, 0.0 }
 0x2a5   : > { %v2011_v17 = vsub.f32 0.0, %v5475_v40  ;;  %v2202_v0 = vmax.f32 %v2074_v22, 0.0 }
 0x2a6   : > { %v1488_v2 = vpop.f32.mrf.mxu2 }
 0x2a7   : > { %v2139_v41 = vmax.f32 %v2011_v17, 0.0  ;;  %v1489_v16 = vadd.f32 %v5425_v39, %v1488_v2  ;;  %2460 = vrot.lane.b32.xlu1 %v2140_v7, %s3824_s15  ;;  %v1939_v17 = vmax.f32 %v5334_v37, 0.0  ;;  %v1937_v2 = vmax.f32 %v5296_v53, 0.0 }
 0x2a9   : > { %2462 = vrot.lane.b32.xlu2 %v2141_v29, %s3824_s15  ;;  %2458 = vrot.lane.b32.xlu0 %v2139_v41, %s3824_s15  ;;  %v5492_v60 = vadd.f32 %v1817_v11, %v1489_v16  ;;  %v2557_v47 = vpop.permute.xlu1 %2556  ;;  %v2429_v28 = vpop.permute.xlu0 %2428  ;;  %v1876_v41 = vmax.f32 %v5346_v33, 0.0  ;;  %v1938_v11 = vmax.f32 %v5315_v26, 0.0 }
 0x2aa   : > { %v2829_v12 = vsel %vm2716_vm3, %v1932_v25, %v2557_v47  ;;  %v2765_v39 = vsel %vm2716_vm3, %v1868_v8, %v2429_v28  ;;  %v1874_v25 = vmax.f32 %v5308_v20, 0.0 }
 0x2ab   : > { %2957 = vst [vmem:[%s4295_s19 + $0x380] sm:$0xff] %v2829_v12  ;;  %v2075_v55 = vsub.f32 0.0, %v5492_v60  ;;  %v1875_v12 = vmax.f32 %v5327_v30, 0.0 }
 0x2ac   : > { %2893 = vst [vmem:[%s4295_s19 + $0x180] sm:$0xff] %v2765_v39  ;;  %v1942_v39 = vmax.f32 %v5391_v19, 0.0 }
 0x2ad   : > { %v2203_v3 = vmax.f32 %v2075_v55, 0.0  ;;  %v1940_v55 = vmax.f32 %v5353_v35, 0.0 }
 0x2af   : > { %2586 = vrot.lane.b32.xlu1 %v2203_v3, %s3824_s15  ;;  %v1879_v3 = vmax.f32 %v5401_v38, 0.0 }
 0x2b1   : > { %2582 = vrot.lane.b32.xlu2 %v2201_v34, %s3824_s15  ;;  %2584 = vrot.lane.b32.xlu0 %v2202_v0, %s3824_s15  ;;  %v2565_v21 = vpop.permute.xlu2 %2564  ;;  %v2431_v14 = vpop.permute.xlu1 %2430 }
 0x2b2   : > { %v2833_v32 = vsel %vm2716_vm3, %v1936_v59, %v2565_v21  ;;  %v2766_v52 = vsel %vm2716_vm3, %v1869_v1, %v2431_v14  ;;  %v1877_v1 = vmax.f32 %v5365_v18, 0.0  ;;  %v1941_v59 = vmax.f32 %v5372_v10, 0.0 }
 0x2b3   : > { %2961 = vst [vmem:[%s4295_s19 + $0x3a0] sm:$0xff] %v2833_v32  ;;  %v1878_v32 = vmax.f32 %v5384_v63, 0.0 }
 0x2b4   : > { %2894 = vst [vmem:[%s4295_s19 + $0x188] sm:$0xff] %v2766_v52  ;;  %v1882_v52 = vmax.f32 %v5450_v44, 0.0 }
 0x2b9   : > { %v2439_v42 = vpop.permute.xlu2 %2438  ;;  %v2561_v46 = vpop.permute.xlu0 %2560 }
 0x2ba   : > { %v2770_v51 = vsel %vm2716_vm3, %v1873_v58, %v2439_v42  ;;  %v2831_v45 = vsel %vm2716_vm3, %v1934_v9, %v2561_v46  ;;  %v1943_v42 = vmax.f32 %v5408_v56, 0.0  ;;  %v1885_v46 = vmax.f32 %v5463_v31, 0.0 }
 0x2bb   : > { %2898 = vst [vmem:[%s4295_s19 + $0x1a8] sm:$0xff] %v2770_v51  ;;  %v1945_v56 = vmax.f32 %v5482_v62, 0.0  ;;  %v1884_v62 = vmax.f32 %v5461_v57, 0.0 }
 0x2bc   : > { %2959 = vst [vmem:[%s4295_s19 + $0x390] sm:$0xff] %v2831_v45 }
 0x2c1   : > { %v2563_v4 = vpop.permute.xlu1 %2562  ;;  %v2435_v15 = vpop.permute.xlu0 %2434 }
 0x2c2   : > { %v2832_v5 = vsel %vm2716_vm3, %v1935_v36, %v2563_v4  ;;  %v2768_v49 = vsel %vm2716_vm3, %v1871_v48, %v2435_v15  ;;  %v1880_v48 = vmax.f32 %v5420_v27, 0.0  ;;  %v1944_v36 = vmax.f32 %v5432_v61, 0.0 }
 0x2c3   : > { %2960 = vst [vmem:[%s4295_s19 + $0x398] sm:$0xff] %v2832_v5  ;;  %v1881_v27 = vmax.f32 %v5442_v23, 0.0  ;;  %v1947_v23 = vmax.f32 %v5492_v60, 0.0 }
 0x2c4   : > { %2896 = vst [vmem:[%s4295_s19 + $0x198] sm:$0xff] %v2768_v49 }
 0x2c9   : > { %v2571_v7 = vpop.permute.xlu2 %2570  ;;  %v2437_v29 = vpop.permute.xlu1 %2436 }
 0x2ca   : > { %v2836_v6 = vsel %vm2716_vm3, %v1939_v17, %v2571_v7  ;;  %v2769_v54 = vsel %vm2716_vm3, %v1872_v50, %v2437_v29  ;;  %v1883_v7 = vmax.f32 %v5475_v40, 0.0 }
 0x2cb   : > { %2964 = vst [vmem:[%s4295_s19 + $0x3b8] sm:$0xff] %v2836_v6 }
 0x2cc   : > { %2897 = vst [vmem:[%s4295_s19 + $0x1a0] sm:$0xff] %v2769_v54 }
 0x2d1   : > { %v2445_v16 = vpop.permute.xlu2 %2444  ;;  %v2567_v8 = vpop.permute.xlu0 %2566 }
 0x2d2   : > { %v2773_v43 = vsel %vm2716_vm3, %v1876_v41, %v2445_v16  ;;  %v2834_v37 = vsel %vm2716_vm3, %v1937_v2, %v2567_v8  ;;  %v1946_v41 = vmax.f32 %v5484_v24, 0.0 }
 0x2d3   : > { %2901 = vst [vmem:[%s4295_s19 + $0x1c0] sm:$0xff] %v2773_v43 }
 0x2d4   : > { %2962 = vst [vmem:[%s4295_s19 + $0x3a8] sm:$0xff] %v2834_v37 }
 0x2d9   : > { %v2569_v47 = vpop.permute.xlu1 %2568  ;;  %v2441_v28 = vpop.permute.xlu0 %2440 }
 0x2da   : > { %v2835_v53 = vsel %vm2716_vm3, %v1938_v11, %v2569_v47  ;;  %v2771_v33 = vsel %vm2716_vm3, %v1874_v25, %v2441_v28 }
 0x2db   : > { %2963 = vst [vmem:[%s4295_s19 + $0x3b0] sm:$0xff] %v2835_v53 }
 0x2dc   : > { %2899 = vst [vmem:[%s4295_s19 + $0x1b0] sm:$0xff] %v2771_v33 }
 0x2e1   : > { %v2577_v13 = vpop.permute.xlu2 %2576  ;;  %v2443_v22 = vpop.permute.xlu1 %2442 }
 0x2e2   : > { %v2839_v20 = vsel %vm2716_vm3, %v1942_v39, %v2577_v13  ;;  %v2772_v26 = vsel %vm2716_vm3, %v1875_v12, %v2443_v22 }
 0x2e3   : > { %2967 = vst [vmem:[%s4295_s19 + $0x3d0] sm:$0xff] %v2839_v20 }
 0x2e4   : > { %2900 = vst [vmem:[%s4295_s19 + $0x1b8] sm:$0xff] %v2772_v26 }
 0x2e9   : > { %v2451_v34 = vpop.permute.xlu2 %2450  ;;  %v2573_v0 = vpop.permute.xlu0 %2572 }
 0x2ea   : > { %v2776_v30 = vsel %vm2716_vm3, %v1879_v3, %v2451_v34  ;;  %v2837_v19 = vsel %vm2716_vm3, %v1940_v55, %v2573_v0 }
 0x2eb   : > { %2904 = vst [vmem:[%s4295_s19 + $0x1d8] sm:$0xff] %v2776_v30 }
 0x2ec   : > { %2965 = vst [vmem:[%s4295_s19 + $0x3c0] sm:$0xff] %v2837_v19 }
 0x2f1   : > { %v2575_v21 = vpop.permute.xlu1 %2574  ;;  %v2447_v14 = vpop.permute.xlu0 %2446 }
 0x2f2   : > { %v2838_v35 = vsel %vm2716_vm3, %v1941_v59, %v2575_v21  ;;  %v2774_v38 = vsel %vm2716_vm3, %v1877_v1, %v2447_v14 }
 0x2f3   : > { %2966 = vst [vmem:[%s4295_s19 + $0x3c8] sm:$0xff] %v2838_v35 }
 0x2f4   : > { %2902 = vst [vmem:[%s4295_s19 + $0x1c8] sm:$0xff] %v2774_v38 }
 0x2f9   : > { %v2449_v9 = vpop.permute.xlu1 %2448 }
 0x2fa   : > { %v2775_v58 = vsel %vm2716_vm3, %v1878_v32, %v2449_v9 }
 0x2fb   : > { %v2457_v18 = vpop.permute.xlu2 %2456  ;;  %2903 = vst [vmem:[%s4295_s19 + $0x1d0] sm:$0xff] %v2775_v58 }
 0x2fc   : > { %v2779_v10 = vsel %vm2716_vm3, %v1882_v52, %v2457_v18 }
 0x2fd   : > { %2907 = vst [vmem:[%s4295_s19 + $0x1f0] sm:$0xff] %v2779_v10 }
 0x301   : > { %v2579_v51 = vpop.permute.xlu0 %2578 }
 0x302   : > { %v2840_v45 = vsel %vm2716_vm3, %v1943_v42, %v2579_v51 }
 0x303   : > { %v2463_v63 = vpop.permute.xlu2 %2462  ;;  %2968 = vst [vmem:[%s4295_s19 + $0x3d8] sm:$0xff] %v2840_v45 }
 0x304   : > { %v2782_v44 = vsel %vm2716_vm3, %v1885_v46, %v2463_v63 }
 0x305   : > { %2910 = vst [vmem:[%s4295_s19 + $0x208] sm:$0xff] %v2782_v44 }
 0x309   : > { %v2581_v4 = vpop.permute.xlu1 %2580  ;;  %v2453_v15 = vpop.permute.xlu0 %2452 }
 0x30a   : > { %v2841_v31 = vsel %vm2716_vm3, %v1944_v36, %v2581_v4  ;;  %v2777_v5 = vsel %vm2716_vm3, %v1880_v48, %v2453_v15 }
 0x30b   : > { %v2583_v49 = vpop.permute.xlu2 %2582  ;;  %2969 = vst [vmem:[%s4295_s19 + $0x3e0] sm:$0xff] %v2841_v31 }
 0x30c   : > { %v2842_v50 = vsel %vm2716_vm3, %v1945_v56, %v2583_v49  ;;  %2905 = vst [vmem:[%s4295_s19 + $0x1e0] sm:$0xff] %v2777_v5 }
 0x30d   : > { %2970 = vst [vmem:[%s4295_s19 + $0x3e8] sm:$0xff] %v2842_v50 }
 0x311   : > { %v2455_v17 = vpop.permute.xlu1 %2454 }
 0x312   : > { %v2778_v61 = vsel %vm2716_vm3, %v1881_v27, %v2455_v17 }
 0x313   : > { %2906 = vst [vmem:[%s4295_s19 + $0x1e8] sm:$0xff] %v2778_v61 }
 0x319   : > { %v2461_v29 = vpop.permute.xlu1 %2460 }
 0x31a   : > { %v2781_v6 = vsel %vm2716_vm3, %v1884_v62, %v2461_v29 }
 0x31b   : > { %v2459_v54 = vpop.permute.xlu0 %2458  ;;  %2909 = vst [vmem:[%s4295_s19 + $0x200] sm:$0xff] %v2781_v6 }
 0x31c   : > { %v2780_v2 = vsel %vm2716_vm3, %v1883_v7, %v2459_v54 }
 0x31d   : > { %2908 = vst [vmem:[%s4295_s19 + $0x1f8] sm:$0xff] %v2780_v2 }
 0x321   : > { %v2587_v16 = vpop.permute.xlu1 %2586 }
 0x322   : > { %v2844_v8 = vsel %vm2716_vm3, %v1947_v23, %v2587_v16 }
 0x323   : > { %v2585_v43 = vpop.permute.xlu0 %2584  ;;  %2972 = vst [vmem:[%s4295_s19 + $0x3f8] sm:$0xff] %v2844_v8 }
 0x324   : > { %v2843_v57 = vsel %vm2716_vm3, %v1946_v41, %v2585_v43 }
 0x325   : > { %2971 = vst [vmem:[%s4295_s19 + $0x3f0] sm:$0xff] %v2843_v57 }
 0x326 PF: > { %s13_s12 = sadd.s32 1, %s3821_s12  }
 0x327   : > { %p10_p4 = scmp.ge.s32.totalorder %s13_s12, 4  }
 0x329   :  { %12 = sbr.rel (!%p10_p4) target bundleno = 1 (0x1), region = 62 }

// kernel: _lambda_.25
= control target key start
LH: loop header
LB: loop body
LE: loop exit
PB: predicated region body
PF: predicated region fallthrough
CT: control target
= control target key end

     0   :  { %vm1091_vm0 = vcmask 392192   ;;  %vm1718_vm1 = vcmask 523264   ;;  %s3551_s1 = inlined_call_operand.vmem [shape: bf16[1200,64], index: 1, kind: input, shape index: {}]   ;;  %s3552_s2 = inlined_call_operand.vmem [shape: f32[1,64], index: 2, kind: input, shape index: {}]   ;;  %s3553_s0 = inlined_call_operand.vmem [shape: bf16[128,1200], index: 0, kind: input, shape index: {}]   ;;  %s3554_s3 = inlined_call_operand.vmem [shape: f32[128,128], index: 3, kind: output, shape index: {}]  }
   0x1   :  { %v2470_v0 = vld [vmem:[%s3551_s1 + $0x38] sm:$0xff]  ;;  %v2469_v2 = vld [vmem:[%s3551_s1 + $0x30] sm:$0xff]  ;;  %v2468_v4 = vld [vmem:[%s3551_s1 + $0x28] sm:$0xff] }
   0x2   :  { %v2478_v1 = vld [vmem:[%s3551_s1 + $0x78] sm:$0xff]  ;;  %2538 = vmatpush.bf16.msra.mxu2 %v2470_v0  ;;  %v2477_v3 = vld [vmem:[%s3551_s1 + $0x70] sm:$0xff]  ;;  %1116 = vmatpush.bf16.msra.mxu0 %v2470_v0  ;;  %v2476_v5 = vld [vmem:[%s3551_s1 + $0x68] sm:$0xff] }
   0x3   :  { %2546 = vmatpush.bf16.msra.mxu3 %v2478_v1  ;;  %1165 = vmatpush.bf16.msra.mxu1 %v2478_v1  ;;  %v2467_v6 = vld [vmem:[%s3551_s1 + $0x20] sm:$0xff]  ;;  %v2466_v8 = vld [vmem:[%s3551_s1 + $0x18] sm:$0xff]  ;;  %v2465_v10 = vld [vmem:[%s3551_s1 + $0x10] sm:$0xff] }
   0x4   :  { %v2475_v7 = vld [vmem:[%s3551_s1 + $0x60] sm:$0xff]  ;;  %v2474_v9 = vld [vmem:[%s3551_s1 + $0x58] sm:$0xff]  ;;  %v2473_v11 = vld [vmem:[%s3551_s1 + $0x50] sm:$0xff] }
   0x5   :  { %v2464_v12 = vld [vmem:[%s3551_s1 + $0x8] sm:$0xff]  ;;  %v2463_v14 = vld [vmem:[%s3551_s1] sm:$0xff]  ;;  %v2486_v20 = vld [vmem:[%s3551_s1 + $0xb8] sm:$0xff] }
   0x6   :  { %2539 = vmatpush.bf16.msra.mxu2 %v2469_v2  ;;  %1117 = vmatpush.bf16.msra.mxu0 %v2469_v2  ;;  %v2472_v13 = vld [vmem:[%s3551_s1 + $0x48] sm:$0xff]  ;;  %v2471_v15 = vld [vmem:[%s3551_s1 + $0x40] sm:$0xff]  ;;  %v2494_v23 = vld [vmem:[%s3551_s1 + $0xf8] sm:$0xff] }
   0x7   :  { %2547 = vmatpush.bf16.msra.mxu3 %v2477_v3  ;;  %1166 = vmatpush.bf16.msra.mxu1 %v2477_v3  ;;  %v1917_v16 = vld [vmem:[%s3553_s0 + $0x140] sm:$0xf]  ;;  %v2428_v17 = vld [vmem:[%s3553_s0 + $0x164] sm:$0xf0]  ;;  %v2423_v18 = vld [vmem:[%s3553_s0 + $0x144] sm:$0xf] }
   0x8   :  { %v1919_v19 = vld [vmem:[%s3553_s0 + $0x168] sm:$0xf0]  ;;  %v1757_v21 = vld [vmem:[%s3553_s0] sm:$0xf]  ;;  %v2388_v22 = vld [vmem:[%s3553_s0 + $0x24] sm:$0xf0]  ;;  %v1918_v26 = vor.u32 %v2428_v17, %v1917_v16 }
   0x9   :  { %v2383_v24 = vld [vmem:[%s3553_s0 + $0x4] sm:$0xf]  ;;  %v1759_v25 = vld [vmem:[%s3553_s0 + $0x28] sm:$0xf0]  ;;  %v1922_v27 = vor.u32 %v2423_v18, %v1919_v19  ;;  %v1758_v28 = vor.u32 %v2388_v22, %v1757_v21  ;;  %v2510_v29 = vld [vmem:[%s3551_s1 + $0x178] sm:$0xff] }
   0xa   :  { %2540 = vmatpush.bf16.msra.mxu2 %v2468_v4  ;;  %1118 = vmatpush.bf16.msra.mxu0 %v2468_v4  ;;  %v1762_v30 = vor.u32 %v2383_v24, %v1759_v25  ;;  %v2485_v31 = vld [vmem:[%s3551_s1 + $0xb0] sm:$0xff]  ;;  %v2502_v33 = vld [vmem:[%s3551_s1 + $0x138] sm:$0xff]  ;;  %v2484_v35 = vld [vmem:[%s3551_s1 + $0xa8] sm:$0xff] }
   0xb   :  { %2548 = vmatpush.bf16.msra.mxu3 %v2476_v5  ;;  %1167 = vmatpush.bf16.msra.mxu1 %v2476_v5  ;;  %v2493_v32 = vld [vmem:[%s3551_s1 + $0xf0] sm:$0xff]  ;;  %v2492_v36 = vld [vmem:[%s3551_s1 + $0xe8] sm:$0xff]  ;;  %v2483_v39 = vld [vmem:[%s3551_s1 + $0xa0] sm:$0xff] }
   0xc   :  { %v2509_v34 = vld [vmem:[%s3551_s1 + $0x170] sm:$0xff]  ;;  %v2508_v38 = vld [vmem:[%s3551_s1 + $0x168] sm:$0xff]  ;;  %v2491_v40 = vld [vmem:[%s3551_s1 + $0xe0] sm:$0xff] }
   0xd   :  { %v2501_v37 = vld [vmem:[%s3551_s1 + $0x130] sm:$0xff]  ;;  %v2500_v41 = vld [vmem:[%s3551_s1 + $0x128] sm:$0xff]  ;;  %v2438_v43 = vld [vmem:[%s3553_s0 + $0x1b4] sm:$0xf0] }
   0xe   :  { %2541 = vmatpush.bf16.msra.mxu2 %v2467_v6  ;;  %1119 = vmatpush.bf16.msra.mxu0 %v2467_v6  ;;  %v1957_v42 = vld [vmem:[%s3553_s0 + $0x190] sm:$0xf]  ;;  %v2433_v44 = vld [vmem:[%s3553_s0 + $0x194] sm:$0xf]  ;;  %v1959_v45 = vld [vmem:[%s3553_s0 + $0x1b8] sm:$0xf0] }
   0xf   :  { %2549 = vmatpush.bf16.msra.mxu3 %v2475_v7  ;;  %1168 = vmatpush.bf16.msra.mxu1 %v2475_v7  ;;  %v1797_v46 = vld [vmem:[%s3553_s0 + $0x50] sm:$0xf]  ;;  %v2507_v47 = vld [vmem:[%s3551_s1 + $0x160] sm:$0xff]  ;;  %v2398_v48 = vld [vmem:[%s3553_s0 + $0x74] sm:$0xf0]  ;;  %v1958_v54 = vor.u32 %v2438_v43, %v1957_v42  ;;  %v1962_v55 = vor.u32 %v2433_v44, %v1959_v45 }
  0x10   :  { %v2393_v49 = vld [vmem:[%s3553_s0 + $0x54] sm:$0xf]  ;;  %v2482_v50 = vld [vmem:[%s3551_s1 + $0x98] sm:$0xff]  ;;  %v2499_v53 = vld [vmem:[%s3551_s1 + $0x120] sm:$0xff]  ;;  %v1798_v56 = vor.u32 %v2398_v48, %v1797_v46 }
  0x11   :  { %v1799_v51 = vld [vmem:[%s3553_s0 + $0x78] sm:$0xf0]  ;;  %v2481_v59 = vld [vmem:[%s3551_s1 + $0x90] sm:$0xff]  ;;  %v2480_v62 = vld [vmem:[%s3551_s1 + $0x88] sm:$0xff] }
  0x12   :  { %2542 = vmatpush.bf16.msra.mxu2 %v2466_v8  ;;  %1120 = vmatpush.bf16.msra.mxu0 %v2466_v8  ;;  %v2490_v52 = vld [vmem:[%s3551_s1 + $0xd8] sm:$0xff]  ;;  %v1802_v58 = vor.u32 %v2393_v49, %v1799_v51  ;;  %v2489_v60 = vld [vmem:[%s3551_s1 + $0xd0] sm:$0xff]  ;;  %v2488_v0 = vld [vmem:[%s3551_s1 + $0xc8] sm:$0xff] }
  0x13   :  { %2550 = vmatpush.bf16.msra.mxu3 %v2474_v9  ;;  %1169 = vmatpush.bf16.msra.mxu1 %v2474_v9  ;;  %v2506_v57 = vld [vmem:[%s3551_s1 + $0x158] sm:$0xff]  ;;  %v2505_v63 = vld [vmem:[%s3551_s1 + $0x150] sm:$0xff]  ;;  %v2504_v2 = vld [vmem:[%s3551_s1 + $0x148] sm:$0xff] }
  0x14   :  { %v2498_v61 = vld [vmem:[%s3551_s1 + $0x118] sm:$0xff]  ;;  %v2497_v1 = vld [vmem:[%s3551_s1 + $0x110] sm:$0xff]  ;;  %v2479_v3 = vld [vmem:[%s3551_s1 + $0x80] sm:$0xff] }
  0x15   :  { %v2487_v4 = vld [vmem:[%s3551_s1 + $0xc0] sm:$0xff]  ;;  %v2496_v5 = vld [vmem:[%s3551_s1 + $0x108] sm:$0xff]  ;;  %v2526_v21 = vld [vmem:[%s3551_s1 + $0x1f8] sm:$0xff] }
  0x16   :  { %2543 = vmatpush.bf16.msra.mxu2 %v2465_v10  ;;  %1121 = vmatpush.bf16.msra.mxu0 %v2465_v10  ;;  %v1997_v6 = vld [vmem:[%s3553_s0 + $0x1e0] sm:$0xf]  ;;  %v2448_v7 = vld [vmem:[%s3553_s0 + $0x204] sm:$0xf0]  ;;  %v2443_v8 = vld [vmem:[%s3553_s0 + $0x1e4] sm:$0xf] }
  0x17   :  { %2551 = vmatpush.bf16.msra.mxu3 %v2473_v11  ;;  %1170 = vmatpush.bf16.msra.mxu1 %v2473_v11  ;;  %v1999_v9 = vld [vmem:[%s3553_s0 + $0x208] sm:$0xf0]  ;;  %v1837_v10 = vld [vmem:[%s3553_s0 + $0xa0] sm:$0xf]  ;;  %v2408_v11 = vld [vmem:[%s3553_s0 + $0xc4] sm:$0xf0] }
  0x18   :  { %v2002_v16 = vor.u32 %v2443_v8, %v1999_v9  ;;  %v1838_v17 = vor.u32 %v2408_v11, %v1837_v10  ;;  %v2503_v19 = vld [vmem:[%s3551_s1 + $0x140] sm:$0xff]  ;;  %v2534_v22 = vld [vmem:[%s3551_s1 + $0x238] sm:$0xff]  ;;  %v2037_v24 = vld [vmem:[%s3553_s0 + $0x230] sm:$0xf] }
  0x19   :  { %v2458_v25 = vld [vmem:[%s3553_s0 + $0x254] sm:$0xf0]  ;;  %v1767_v42 = vld [vmem:[%s3553_s0 + $0x30] sm:$0xf0]  ;;  %v1773_v43 = vld [vmem:[%s3553_s0 + $0x10] sm:$0xf] }
  0x1a   :  { %2544 = vmatpush.bf16.msra.mxu2 %v2464_v12  ;;  %1122 = vmatpush.bf16.msra.mxu0 %v2464_v12  ;;  %v2403_v12 = vld [vmem:[%s3553_s0 + $0xa4] sm:$0xf]  ;;  %v2390_v44 = vld [vmem:[%s3553_s0 + $0x34] sm:$0xf0]  ;;  %v2385_v45 = vld [vmem:[%s3553_s0 + $0x14] sm:$0xf] }
  0x1b   :  { %2552 = vmatpush.bf16.msra.mxu3 %v2472_v13  ;;  %1171 = vmatpush.bf16.msra.mxu1 %v2472_v13  ;;  %v1839_v13 = vld [vmem:[%s3553_s0 + $0xc8] sm:$0xf0]  ;;  %v1775_v46 = vld [vmem:[%s3553_s0 + $0x38] sm:$0xf0]  ;;  %v1774_v49 = vor.u32 %v2390_v44, %v1773_v43  ;;  %v1847_v9 = vld [vmem:[%s3553_s0 + $0xd0] sm:$0xf0] }
  0x1c   :  { %v1842_v18 = vor.u32 %v2403_v12, %v1839_v13  ;;  %v2516_v51 = vld [vmem:[%s3551_s1 + $0x1a8] sm:$0xff]  ;;  %v1853_v10 = vld [vmem:[%s3553_s0 + $0xb0] sm:$0xf]  ;;  %v2410_v11 = vld [vmem:[%s3553_s0 + $0xd4] sm:$0xf0] }
  0x1d   :  { %v2404_v8 = vld [vmem:[%s3553_s0 + $0xac] sm:$0xf]  ;;  %v2405_v12 = vld [vmem:[%s3553_s0 + $0xb4] sm:$0xf]  ;;  %v1855_v13 = vld [vmem:[%s3553_s0 + $0xd8] sm:$0xf0] }
  0x1e   :  { %2545 = vmatpush.bf16.msra.mxu2 %v2463_v14  ;;  %1123 = vmatpush.bf16.msra.mxu0 %v2463_v14  ;;  %v2495_v14 = vld [vmem:[%s3551_s1 + $0x100] sm:$0xff]  ;;  %v1935_v43 = vld [vmem:[%s3553_s0 + $0x178] sm:$0xf0] }
  0x1f   :  { %2553 = vmatpush.bf16.msra.mxu3 %v2471_v15  ;;  %1172 = vmatpush.bf16.msra.mxu1 %v2471_v15  ;;  %v1998_v15 = vor.u32 %v2448_v7, %v1997_v6  ;;  %v1845_v6 = vld [vmem:[%s3553_s0 + $0xa8] sm:$0xf]  ;;  %v2409_v7 = vld [vmem:[%s3553_s0 + $0xcc] sm:$0xf0] }
  0x21   :  { %1144 = vmatmul.bf16.vlgmr.msra.gmra.mxu2 %v1918_v26  ;;  %1124 = vmatmul.bf16.vlgmr.msra.gmra.mxu0 %v1758_v28  ;;  %v2453_v26 = vld [vmem:[%s3553_s0 + $0x234] sm:$0xf]  ;;  %v1877_v28 = vld [vmem:[%s3553_s0 + $0xf0] sm:$0xf] }
  0x22   :  { %1214 = vmatpush.bf16.msrb.mxu2 %v2486_v20  ;;  %1193 = vmatmul.bf16.vlgmr.msra.gmra.mxu3 %v1922_v27  ;;  %v2518_v20 = vld [vmem:[%s3551_s1 + $0x1b8] sm:$0xff] }
  0x23   :  { %1263 = vmatpush.bf16.msrb.mxu3 %v2494_v23  ;;  %1361 = vmatpush.bf16.msrb.mxu1 %v2510_v29  ;;  %v2537_v23 = vld [vmem:[%s3551_s1 + $0x250] sm:$0xff]  ;;  %v2039_v27 = vld [vmem:[%s3553_s0 + $0x258] sm:$0xf0]  ;;  %v2418_v29 = vld [vmem:[%s3553_s0 + $0x114] sm:$0xf0] }
  0x24   :  { %1173 = vmatmul.bf16.vlgmr.msra.gmra.mxu1 %v1762_v30  ;;  %1312 = vmatpush.bf16.msrb.mxu0 %v2502_v33  ;;  %v2413_v30 = vld [vmem:[%s3553_s0 + $0xf4] sm:$0xf]  ;;  %v2042_v33 = vor.u32 %v2453_v26, %v2039_v27  ;;  %v2420_v26 = vld [vmem:[%s3553_s0 + $0x124] sm:$0xf0]  ;;  %v2415_v27 = vld [vmem:[%s3553_s0 + $0x104] sm:$0xf] }
  0x26   :  { %1215 = vmatpush.bf16.msrb.mxu2 %v2485_v31  ;;  %v1879_v31 = vld [vmem:[%s3553_s0 + $0x118] sm:$0xf0] }
  0x27   :  { %1264 = vmatpush.bf16.msrb.mxu3 %v2493_v32  ;;  %1362 = vmatpush.bf16.msrb.mxu1 %v2509_v34  ;;  %v2038_v32 = vor.u32 %v2458_v25, %v2037_v24  ;;  %v1878_v34 = vor.u32 %v2418_v29, %v1877_v28  ;;  %v2530_v24 = vld [vmem:[%s3551_s1 + $0x218] sm:$0xff]  ;;  %v1893_v25 = vld [vmem:[%s3553_s0 + $0x100] sm:$0xf]  ;;  %v1895_v28 = vld [vmem:[%s3553_s0 + $0x128] sm:$0xf0] }
  0x28   :  { %1313 = vmatpush.bf16.msrb.mxu0 %v2501_v37  ;;  %v2525_v37 = vld [vmem:[%s3551_s1 + $0x1f0] sm:$0xff] }
  0x2a   :  { %1216 = vmatpush.bf16.msrb.mxu2 %v2484_v35  ;;  %v1882_v35 = vor.u32 %v2413_v30, %v1879_v31  ;;  %v1894_v31 = vor.u32 %v2420_v26, %v1893_v25 }
  0x2b   :  { %1265 = vmatpush.bf16.msrb.mxu3 %v2492_v36  ;;  %1363 = vmatpush.bf16.msrb.mxu1 %v2508_v38  ;;  %v2517_v36 = vld [vmem:[%s3551_s1 + $0x1b0] sm:$0xff] }
  0x2c   :  { %1314 = vmatpush.bf16.msrb.mxu0 %v2500_v41  ;;  %v2533_v38 = vld [vmem:[%s3551_s1 + $0x230] sm:$0xff]  ;;  %v2384_v41 = vld [vmem:[%s3553_s0 + $0xc] sm:$0xf] }
  0x2d   :  { %v1770_v48 = vor.u32 %v2384_v41, %v1767_v42  ;;  %v2430_v41 = vld [vmem:[%s3553_s0 + $0x174] sm:$0xf0]  ;;  %v2425_v42 = vld [vmem:[%s3553_s0 + $0x154] sm:$0xf] }
  0x2e   :  { %1217 = vmatpush.bf16.msrb.mxu2 %v2483_v39  ;;  %v1765_v39 = vld [vmem:[%s3553_s0 + $0x8] sm:$0xf] }
  0x2f   :  { %1266 = vmatpush.bf16.msrb.mxu3 %v2491_v40  ;;  %1364 = vmatpush.bf16.msrb.mxu1 %v2507_v47  ;;  %v2389_v40 = vld [vmem:[%s3553_s0 + $0x2c] sm:$0xf0] }
  0x30   :  { %1315 = vmatpush.bf16.msrb.mxu0 %v2499_v53  ;;  %v1766_v47 = vor.u32 %v2389_v40, %v1765_v39  ;;  %v2532_v53 = vld [vmem:[%s3551_s1 + $0x228] sm:$0xff]  ;;  %v2529_v39 = vld [vmem:[%s3551_s1 + $0x210] sm:$0xff] }
  0x31   :  { %1149 = vmatmul.bf16.gmra.mxu2 %v1958_v54  ;;  %1129 = vmatmul.bf16.gmra.mxu0 %v1798_v56  ;;  %v1805_v54 = vld [vmem:[%s3553_s0 + $0x58] sm:$0xf]  ;;  %v2394_v56 = vld [vmem:[%s3553_s0 + $0x5c] sm:$0xf]  ;;  %v1933_v40 = vld [vmem:[%s3553_s0 + $0x150] sm:$0xf] }
  0x32   :  { %1218 = vmatpush.bf16.msrb.mxu2 %v2482_v50  ;;  %1198 = vmatmul.bf16.gmra.mxu3 %v1962_v55  ;;  %v1778_v50 = vor.u32 %v2385_v45, %v1775_v46  ;;  %v2399_v55 = vld [vmem:[%s3553_s0 + $0x7c] sm:$0xf0] }
  0x33   :  { %1267 = vmatpush.bf16.msrb.mxu3 %v2490_v52  ;;  %1365 = vmatpush.bf16.msrb.mxu1 %v2506_v57  ;;  %v2524_v52 = vld [vmem:[%s3551_s1 + $0x1e8] sm:$0xff]  ;;  %v1807_v57 = vld [vmem:[%s3553_s0 + $0x80] sm:$0xf0]  ;;  %v3000_v46 = vld [vmem:[%s3552_s2] ss:$0 sm:$0xff] }
  0x34   :  { %1178 = vmatmul.bf16.gmra.mxu1 %v1802_v58  ;;  %1316 = vmatpush.bf16.msrb.mxu0 %v2498_v61  ;;  %v1813_v58 = vld [vmem:[%s3553_s0 + $0x60] sm:$0xf]  ;;  %v1815_v61 = vld [vmem:[%s3553_s0 + $0x88] sm:$0xf0] }
  0x36   :  { %1219 = vmatpush.bf16.msrb.mxu2 %v2481_v59  ;;  %v2400_v59 = vld [vmem:[%s3553_s0 + $0x84] sm:$0xf0] }
  0x37   :  { %1268 = vmatpush.bf16.msrb.mxu3 %v2489_v60  ;;  %1366 = vmatpush.bf16.msrb.mxu1 %v2505_v63  ;;  %v2395_v60 = vld [vmem:[%s3553_s0 + $0x64] sm:$0xf]  ;;  %v1810_v63 = vor.u32 %v2394_v56, %v1807_v57 }
  0x38   :  { %1317 = vmatpush.bf16.msrb.mxu0 %v2497_v1  ;;  %v1818_v1 = vor.u32 %v2395_v60, %v1815_v61 }
  0x3a   :  { %1220 = vmatpush.bf16.msrb.mxu2 %v2480_v62  ;;  %v1806_v62 = vor.u32 %v2399_v55, %v1805_v54  ;;  %v2520_v54 = vld [vmem:[%s3551_s1 + $0x1c8] sm:$0xff]  ;;  %v2535_v55 = vld [vmem:[%s3551_s1 + $0x240] sm:$0xff] }
  0x3b   :  { %1269 = vmatpush.bf16.msrb.mxu3 %v2488_v0  ;;  %1367 = vmatpush.bf16.msrb.mxu1 %v2504_v2  ;;  %v1814_v0 = vor.u32 %v2400_v59, %v1813_v58  ;;  %v2515_v2 = vld [vmem:[%s3551_s1 + $0x1a0] sm:$0xff] }
  0x3c   :  { %1318 = vmatpush.bf16.msrb.mxu0 %v2496_v5  ;;  %v2531_v5 = vld [vmem:[%s3551_s1 + $0x220] sm:$0xff] }
  0x3e   :  { %1221 = vmatpush.bf16.msrb.mxu2 %v2479_v3  ;;  %v2523_v3 = vld [vmem:[%s3551_s1 + $0x1e0] sm:$0xff] }
  0x3f   :  { %1270 = vmatpush.bf16.msrb.mxu3 %v2487_v4  ;;  %1368 = vmatpush.bf16.msrb.mxu1 %v2503_v19  ;;  %v2536_v4 = vld [vmem:[%s3551_s1 + $0x248] sm:$0xff]  ;;  %v2522_v19 = vld [vmem:[%s3551_s1 + $0x1d8] sm:$0xff] }
  0x40   :  { %1319 = vmatpush.bf16.msrb.mxu0 %v2495_v14  ;;  %v1846_v14 = vor.u32 %v2409_v7, %v1845_v6  ;;  %v2440_v6 = vld [vmem:[%s3553_s0 + $0x1c4] sm:$0xf0] }
  0x41   :  { %1154 = vmatmul.bf16.gmra.mxu2 %v1998_v15  ;;  %1134 = vmatmul.bf16.gmra.mxu0 %v1838_v17  ;;  %v1850_v15 = vor.u32 %v2404_v8, %v1847_v9  ;;  %v1858_v17 = vor.u32 %v2405_v12, %v1855_v13  ;;  %v2435_v9 = vld [vmem:[%s3553_s0 + $0x1a4] sm:$0xf] }
  0x42   :  { %1203 = vmatmul.bf16.gmra.mxu3 %v2002_v16  ;;  %1410 = vmatpush.bf16.msra.mxu2 %v2518_v20  ;;  %v1854_v16 = vor.u32 %v2410_v11, %v1853_v10  ;;  %v1885_v20 = vld [vmem:[%s3553_s0 + $0xf8] sm:$0xf]  ;;  %v1975_v10 = vld [vmem:[%s3553_s0 + $0x1c8] sm:$0xf0] }
  0x43   :  { %1459 = vmatpush.bf16.msra.mxu3 %v2526_v21  ;;  %1562 = vmatpush.bf16.msra.mxu1 %v2537_v23  ;;  %v2419_v21 = vld [vmem:[%s3553_s0 + $0x11c] sm:$0xf0]  ;;  %v1887_v23 = vld [vmem:[%s3553_s0 + $0x120] sm:$0xf0] }
  0x44   :  { %1183 = vmatmul.bf16.gmra.mxu1 %v1842_v18  ;;  %1508 = vmatpush.bf16.msra.mxu0 %v2534_v22  ;;  %v2514_v18 = vld [vmem:[%s3551_s1 + $0x198] sm:$0xff]  ;;  %v1886_v29 = vor.u32 %v2419_v21, %v1885_v20  ;;  %v2511_v20 = vld [vmem:[%s3551_s1 + $0x180] sm:$0xff] }
  0x45   :  { %v2414_v22 = vld [vmem:[%s3553_s0 + $0xfc] sm:$0xf] }
  0x46   :  { %1411 = vmatpush.bf16.msra.mxu2 %v2517_v36  ;;  %v1890_v30 = vor.u32 %v2414_v22, %v1887_v23  ;;  %v2429_v36 = vld [vmem:[%s3553_s0 + $0x16c] sm:$0xf0]  ;;  %v2519_v22 = vld [vmem:[%s3551_s1 + $0x1c0] sm:$0xff] }
  0x47   :  { %1460 = vmatpush.bf16.msra.mxu3 %v2525_v37  ;;  %1563 = vmatpush.bf16.msra.mxu1 %v2536_v4  ;;  %v2424_v37 = vld [vmem:[%s3553_s0 + $0x14c] sm:$0xf] }
  0x48   :  { %1509 = vmatpush.bf16.msra.mxu0 %v2533_v38  ;;  %v1927_v38 = vld [vmem:[%s3553_s0 + $0x170] sm:$0xf0]  ;;  %v2528_v4 = vld [vmem:[%s3551_s1 + $0x208] sm:$0xff] }
  0x49   :  { %v1930_v45 = vor.u32 %v2424_v37, %v1927_v38  ;;  %v2450_v37 = vld [vmem:[%s3553_s0 + $0x214] sm:$0xf0] }
  0x4a   :  { %1412 = vmatpush.bf16.msra.mxu2 %v2516_v51 }
  0x4b   :  { %1461 = vmatpush.bf16.msra.mxu3 %v2524_v52  ;;  %v2512_v52 = vld [vmem:[%s3551_s1 + $0x188] sm:$0xff]  ;;  %1564 = vmatpush.bf16.msra.mxu1 %v2535_v55 }
  0x4c   :  { %1510 = vmatpush.bf16.msra.mxu0 %v2532_v53 }
  0x4e   :  { %1413 = vmatpush.bf16.msra.mxu2 %v2515_v2  ;;  %v2434_v2 = vld [vmem:[%s3553_s0 + $0x19c] sm:$0xf] }
  0x4f   :  { %1462 = vmatpush.bf16.msra.mxu3 %v2523_v3  ;;  %v1967_v3 = vld [vmem:[%s3553_s0 + $0x1c0] sm:$0xf0] }
  0x50   :  { %1511 = vmatpush.bf16.msra.mxu0 %v2531_v5  ;;  %v1973_v5 = vld [vmem:[%s3553_s0 + $0x1a0] sm:$0xf]  ;;  %v1970_v13 = vor.u32 %v2434_v2, %v1967_v3  ;;  %v2454_v2 = vld [vmem:[%s3553_s0 + $0x23c] sm:$0xf]  ;;  %v2047_v3 = vld [vmem:[%s3553_s0 + $0x260] sm:$0xf0] }
  0x51   :  { %1159 = vmatmul.bf16.gmra.mxu2 %v2038_v32  ;;  %1139 = vmatmul.bf16.gmra.mxu0 %v1878_v34  ;;  %v1898_v32 = vor.u32 %v2415_v27, %v1895_v28  ;;  %v2521_v34 = vld [vmem:[%s3551_s1 + $0x1d0] sm:$0xff] }
  0x52   :  { %1208 = vmatmul.bf16.gmra.mxu3 %v2042_v33  ;;  %1414 = vmatpush.bf16.msra.mxu2 %v2514_v18  ;;  %v2513_v33 = vld [vmem:[%s3551_s1 + $0x190] sm:$0xff] }
  0x53   :  { %1463 = vmatpush.bf16.msra.mxu3 %v2522_v19 }
  0x54   :  { %1188 = vmatmul.bf16.gmra.mxu1 %v1882_v35  ;;  %1512 = vmatpush.bf16.msra.mxu0 %v2530_v24  ;;  %v1925_v35 = vld [vmem:[%s3553_s0 + $0x148] sm:$0xf] }
  0x55   :  { %v1926_v44 = vor.u32 %v2429_v36, %v1925_v35  ;;  %v2527_v35 = vld [vmem:[%s3551_s1 + $0x200] sm:$0xff]  ;;  %v2013_v36 = vld [vmem:[%s3553_s0 + $0x1f0] sm:$0xf] }
  0x56   :  { %1415 = vmatpush.bf16.msra.mxu2 %v2513_v33  ;;  %v2444_v33 = vld [vmem:[%s3553_s0 + $0x1ec] sm:$0xf] }
  0x57   :  { %1464 = vmatpush.bf16.msra.mxu3 %v2521_v34  ;;  %v2007_v34 = vld [vmem:[%s3553_s0 + $0x210] sm:$0xf0] }
  0x58   :  { %1513 = vmatpush.bf16.msra.mxu0 %v2529_v39 }
  0x5a   :  { %1416 = vmatpush.bf16.msra.mxu2 %v2512_v52 }
  0x5b   :  { %1465 = vmatpush.bf16.msra.mxu3 %v2520_v54 }
  0x5c   :  { %1514 = vmatpush.bf16.msra.mxu0 %v2528_v4  ;;  %v2053_v4 = vld [vmem:[%s3553_s0 + $0x240] sm:$0xf] }
  0x5e   :  { %1417 = vmatpush.bf16.msra.mxu2 %v2511_v20 }
  0x5f   :  { %1466 = vmatpush.bf16.msra.mxu3 %v2519_v22 }
  0x60   :  { %1515 = vmatpush.bf16.msra.mxu0 %v2527_v35  ;;  %v1783_v35 = vld [vmem:[%s3553_s0 + $0x40] sm:$0xf0] }
  0x61   :  { %1222 = vmatmul.bf16.vlgmr.msrb.gmra.mxu2 %v1766_v47  ;;  %1320 = vmatmul.bf16.vlgmr.msrb.gmra.mxu0 %v1774_v49  ;;  %v1934_v47 = vor.u32 %v2430_v41, %v1933_v40  ;;  %v1938_v49 = vor.u32 %v2425_v42, %v1935_v43  ;;  %v2445_v40 = vld [vmem:[%s3553_s0 + $0x1f4] sm:$0xf]  ;;  %v2015_v41 = vld [vmem:[%s3553_s0 + $0x218] sm:$0xf0] }
  0x62   :  { %1271 = vmatmul.bf16.vlgmr.msrb.gmra.mxu3 %v1770_v48 }
  0x64   :  { %1369 = vmatmul.bf16.vlgmr.msrb.gmra.mxu1 %v1778_v50 }
  0x71   :  { %1227 = vmatmul.bf16.gmra.mxu2 %v1806_v62  ;;  %1325 = vmatmul.bf16.gmra.mxu0 %v1814_v0  ;;  %v2439_v0 = vld [vmem:[%s3553_s0 + $0x1bc] sm:$0xf0] }
  0x72   :  { %1276 = vmatmul.bf16.gmra.mxu3 %v1810_v63  ;;  %v1965_v63 = vld [vmem:[%s3553_s0 + $0x198] sm:$0xf] }
  0x73   :  { %v1966_v12 = vor.u32 %v2439_v0, %v1965_v63  ;;  %v2459_v0 = vld [vmem:[%s3553_s0 + $0x25c] sm:$0xf0] }
  0x74   :  { %1374 = vmatmul.bf16.gmra.mxu1 %v1818_v1 }
  0x81   :  { %1232 = vmatmul.bf16.gmra.mxu2 %v1846_v14  ;;  %1330 = vmatmul.bf16.gmra.mxu0 %v1854_v16  ;;  %v1974_v14 = vor.u32 %v2440_v6, %v1973_v5  ;;  %v2460_v5 = vld [vmem:[%s3553_s0 + $0x264] sm:$0xf0] }
  0x82   :  { %1281 = vmatmul.bf16.gmra.mxu3 %v1850_v15 }
  0x84   :  { %1379 = vmatmul.bf16.gmra.mxu1 %v1858_v17  ;;  %v1978_v17 = vor.u32 %v2435_v9, %v1975_v10  ;;  %v2055_v9 = vld [vmem:[%s3553_s0 + $0x268] sm:$0xf0] }
  0x91   :  { %1237 = vmatmul.bf16.gmra.mxu2 %v1886_v29  ;;  %1335 = vmatmul.bf16.gmra.mxu0 %v1894_v31  ;;  %v2449_v31 = vld [vmem:[%s3553_s0 + $0x20c] sm:$0xf0] }
  0x92   :  { %1286 = vmatmul.bf16.gmra.mxu3 %v1890_v30  ;;  %v2005_v30 = vld [vmem:[%s3553_s0 + $0x1e8] sm:$0xf] }
  0x93   :  { %v2006_v43 = vor.u32 %v2449_v31, %v2005_v30  ;;  %v1781_v30 = vld [vmem:[%s3553_s0 + $0x18] sm:$0xf] }
  0x94   :  { %1384 = vmatmul.bf16.gmra.mxu1 %v1898_v32 }
  0x9e   :  { %v1125_v48 = vpop.f32.mrf.mxu0 }
  0x9f   :  { %v1126_v50 = vadd.f32 %v3000_v46, %v1125_v48 }
  0xa1   :  { %v1174_v51 = vpop.f32.mrf.mxu1  ;;  %1242 = vmatmul.bf16.gmra.mxu2 %v1926_v44  ;;  %1340 = vmatmul.bf16.gmra.mxu0 %v1934_v47  ;;  %v2010_v44 = vor.u32 %v2444_v33, %v2007_v34  ;;  %v2391_v33 = vld [vmem:[%s3553_s0 + $0x3c] sm:$0xf0]  ;;  %v2386_v34 = vld [vmem:[%s3553_s0 + $0x1c] sm:$0xf] }
  0xa2   :  { %1291 = vmatmul.bf16.gmra.mxu3 %v1930_v45  ;;  %v3006_v53 = vadd.f32 %v1174_v51, %v1126_v50  ;;  %v2014_v45 = vor.u32 %v2450_v37, %v2013_v36  ;;  %v1789_v36 = vld [vmem:[%s3553_s0 + $0x20] sm:$0xf]  ;;  %v2392_v37 = vld [vmem:[%s3553_s0 + $0x44] sm:$0xf0] }
  0xa4   :  { %1389 = vmatmul.bf16.gmra.mxu1 %v1938_v49  ;;  %v1145_v56 = vpop.f32.mrf.mxu2  ;;  %v2018_v49 = vor.u32 %v2445_v40, %v2015_v41  ;;  %v2387_v40 = vld [vmem:[%s3553_s0 + $0x24] sm:$0xf]  ;;  %v1791_v41 = vld [vmem:[%s3553_s0 + $0x48] sm:$0xf0] }
  0xa5   :  { %v1194_v57 = vpop.f32.mrf.mxu3  ;;  %v1146_v58 = vadd.f32 %v3000_v46, %v1145_v56 }
  0xa6   :  { %v1127_v60 = vpop.f32.mrf.mxu0 }
  0xa7   :  { %v3015_v59 = vadd.f32 %v1194_v57, %v1146_v58  ;;  %v1128_v61 = vadd.f32 %v3000_v46, %v1127_v60 }
  0xa9   :  { %v1176_v62 = vpop.f32.mrf.mxu1 }
  0xaa   :  { %v3024_v1 = vadd.f32 %v1176_v62, %v1128_v61  ;;  %v2045_v62 = vld [vmem:[%s3553_s0 + $0x238] sm:$0xf] }
  0xac   :  { %v1147_v7 = vpop.f32.mrf.mxu2 }
  0xad   :  { %v1196_v8 = vpop.f32.mrf.mxu3  ;;  %v1148_v11 = vadd.f32 %v3000_v46, %v1147_v7 }
  0xae   :  { %v1130_v16 = vpop.f32.mrf.mxu0 }
  0xaf   :  { %v3048_v15 = vadd.f32 %v1196_v8, %v1148_v11  ;;  %v1131_v18 = vadd.f32 %v3000_v46, %v1130_v16  ;;  %v2455_v8 = vld [vmem:[%s3553_s0 + $0x244] sm:$0xf]  ;;  %v2046_v11 = vor.u32 %v2459_v0, %v2045_v62  ;;  %v1821_v62 = vld [vmem:[%s3553_s0 + $0x68] sm:$0xf]  ;;  %v2401_v0 = vld [vmem:[%s3553_s0 + $0x8c] sm:$0xf0] }
  0xb1   :  { %v1179_v19 = vpop.f32.mrf.mxu1  ;;  %1247 = vmatmul.bf16.gmra.mxu2 %v1966_v12  ;;  %1345 = vmatmul.bf16.gmra.mxu0 %v1974_v14  ;;  %v2050_v12 = vor.u32 %v2454_v2, %v2047_v3  ;;  %v2396_v2 = vld [vmem:[%s3553_s0 + $0x6c] sm:$0xf]  ;;  %v1829_v3 = vld [vmem:[%s3553_s0 + $0x70] sm:$0xf] }
  0xb2   :  { %1296 = vmatmul.bf16.gmra.mxu3 %v1970_v13  ;;  %v3054_v21 = vadd.f32 %v1179_v19, %v1131_v18  ;;  %v2054_v13 = vor.u32 %v2460_v5, %v2053_v4  ;;  %v2402_v4 = vld [vmem:[%s3553_s0 + $0x94] sm:$0xf0] }
  0xb4   :  { %1394 = vmatmul.bf16.gmra.mxu1 %v1978_v17  ;;  %v1150_v23 = vpop.f32.mrf.mxu2  ;;  %v2058_v17 = vor.u32 %v2455_v8, %v2055_v9  ;;  %v2397_v8 = vld [vmem:[%s3553_s0 + $0x74] sm:$0xf]  ;;  %v1831_v9 = vld [vmem:[%s3553_s0 + $0x98] sm:$0xf0] }
  0xb5   :  { %v1199_v24 = vpop.f32.mrf.mxu3  ;;  %v1151_v25 = vadd.f32 %v3000_v46, %v1150_v23 }
  0xb6   :  { %v1132_v27 = vpop.f32.mrf.mxu0 }
  0xb7   :  { %v3060_v26 = vadd.f32 %v1199_v24, %v1151_v25  ;;  %v1133_v28 = vadd.f32 %v3000_v46, %v1132_v27 }
  0xb9   :  { %v1181_v29 = vpop.f32.mrf.mxu1 }
  0xba   :  { %v3069_v32 = vadd.f32 %v1181_v29, %v1133_v28 }
  0xbc   :  { %v1152_v38 = vpop.f32.mrf.mxu2 }
  0xbd   :  { %v1201_v39 = vpop.f32.mrf.mxu3  ;;  %v1153_v42 = vadd.f32 %v3000_v46, %v1152_v38 }
  0xbe   :  { %v1135_v48 = vpop.f32.mrf.mxu0 }
  0xbf   :  { %v3093_v47 = vadd.f32 %v1201_v39, %v1153_v42  ;;  %v1136_v50 = vadd.f32 %v3000_v46, %v1135_v48 }
  0xc1   :  { %v1184_v51 = vpop.f32.mrf.mxu1  ;;  %1252 = vmatmul.bf16.gmra.mxu2 %v2006_v43  ;;  %1350 = vmatmul.bf16.gmra.mxu0 %v2014_v45  ;;  %v1782_v43 = vor.u32 %v2391_v33, %v1781_v30  ;;  %v1790_v45 = vor.u32 %v2392_v37, %v1789_v36  ;;  %v2406_v36 = vld [vmem:[%s3553_s0 + $0xbc] sm:$0xf]  ;;  %v1869_v37 = vld [vmem:[%s3553_s0 + $0xc0] sm:$0xf] }
  0xc2   :  { %1301 = vmatmul.bf16.gmra.mxu3 %v2010_v44  ;;  %v3096_v52 = vadd.f32 %v1184_v51, %v1136_v50  ;;  %v1786_v44 = vor.u32 %v2386_v34, %v1783_v35  ;;  %v1794_v50 = vor.u32 %v2387_v40, %v1791_v41  ;;  %v1861_v34 = vld [vmem:[%s3553_s0 + $0xb8] sm:$0xf]  ;;  %v2411_v35 = vld [vmem:[%s3553_s0 + $0xdc] sm:$0xf0] }
  0xc4   :  { %1399 = vmatmul.bf16.gmra.mxu1 %v2018_v49  ;;  %v1155_v54 = vpop.f32.mrf.mxu2 }
  0xc5   :  { %v1204_v55 = vpop.f32.mrf.mxu3  ;;  %v1156_v56 = vadd.f32 %v3000_v46, %v1155_v54 }
  0xc6   :  { %v1137_v58 = vpop.f32.mrf.mxu0 }
  0xc7   :  { %v3099_v57 = vadd.f32 %v1204_v55, %v1156_v56  ;;  %v1138_v60 = vadd.f32 %v3000_v46, %v1137_v58 }
  0xc9   :  { %v1186_v61 = vpop.f32.mrf.mxu1 }
  0xca   :  { %v3105_v63 = vadd.f32 %v1186_v61, %v1138_v60 }
  0xcc   :  { %v1157_v6 = vpop.f32.mrf.mxu2 }
  0xcd   :  { %v1206_v7 = vpop.f32.mrf.mxu3  ;;  %v1158_v10 = vadd.f32 %v3000_v46, %v1157_v6 }
  0xce   :  { %v1140_v16 = vpop.f32.mrf.mxu0 }
  0xcf   :  { %v3129_v14 = vadd.f32 %v1206_v7, %v1158_v10  ;;  %v1141_v18 = vadd.f32 %v3000_v46, %v1140_v16 }
  0xd1   :  { %v1189_v19 = vpop.f32.mrf.mxu1  ;;  %1257 = vmatmul.bf16.gmra.mxu2 %v2046_v11  ;;  %1355 = vmatmul.bf16.gmra.mxu0 %v2054_v13  ;;  %v1822_v11 = vor.u32 %v2401_v0, %v1821_v62  ;;  %v1830_v13 = vor.u32 %v2402_v4, %v1829_v3  ;;  %v1901_v3 = vld [vmem:[%s3553_s0 + $0x108] sm:$0xf]  ;;  %v2421_v4 = vld [vmem:[%s3553_s0 + $0x12c] sm:$0xf0] }
  0xd2   :  { %1306 = vmatmul.bf16.gmra.mxu3 %v2050_v12  ;;  %v3132_v20 = vadd.f32 %v1189_v19, %v1141_v18  ;;  %v1834_v18 = vor.u32 %v2397_v8, %v1831_v9  ;;  %v2422_v8 = vld [vmem:[%s3553_s0 + $0x134] sm:$0xf0] }
  0xd4   :  { %1404 = vmatmul.bf16.gmra.mxu1 %v2058_v17  ;;  %v1160_v22 = vpop.f32.mrf.mxu2 }
  0xd5   :  { %v1209_v23 = vpop.f32.mrf.mxu3  ;;  %v1161_v24 = vadd.f32 %v3000_v46, %v1160_v22 }
  0xd6   :  { %v1142_v27 = vpop.f32.mrf.mxu0 }
  0xd7   :  { %v3135_v25 = vadd.f32 %v1209_v23, %v1161_v24  ;;  %v1143_v28 = vadd.f32 %v3000_v46, %v1142_v27 }
  0xd9   :  { %v1191_v29 = vpop.f32.mrf.mxu1 }
  0xda   :  { %v3141_v31 = vadd.f32 %v1191_v29, %v1143_v28 }
  0xdc   :  { %v1162_v38 = vpop.f32.mrf.mxu2 }
  0xdd   :  { %v1211_v39 = vpop.f32.mrf.mxu3  ;;  %v1163_v42 = vadd.f32 %v3000_v46, %v1162_v38  ;;  %v2412_v38 = vld [vmem:[%s3553_s0 + $0xe4] sm:$0xf0] }
  0xde   :  { %v1321_v49 = vpop.f32.mrf.mxu0 }
  0xdf   :  { %v3165_v48 = vadd.f32 %v1211_v39, %v1163_v42  ;;  %v2407_v42 = vld [vmem:[%s3553_s0 + $0xc4] sm:$0xf] }
  0xe1   :  { %v1370_v51 = vpop.f32.mrf.mxu1  ;;  %1418 = vmatmul.bf16.vlgmr.msra.gmra.mxu2 %v1782_v43  ;;  %1516 = vmatmul.bf16.vlgmr.msra.gmra.mxu0 %v1790_v45  ;;  %v1871_v43 = vld [vmem:[%s3553_s0 + $0xe8] sm:$0xf0]  ;;  %v1862_v45 = vor.u32 %v2411_v35, %v1861_v34 }
  0xe2   :  { %1467 = vmatmul.bf16.vlgmr.msra.gmra.mxu3 %v1786_v44 }
  0xe4   :  { %2375 = vmatmul.msk.bf16.vlgmr.msra.gmra.mxu1 %vm1091_vm0, %v1794_v50  ;;  %v1223_v54 = vpop.f32.mrf.mxu2  ;;  %v1870_v50 = vor.u32 %v2412_v38, %v1869_v37  ;;  %v1941_v37 = vld [vmem:[%s3553_s0 + $0x158] sm:$0xf]  ;;  %v2431_v38 = vld [vmem:[%s3553_s0 + $0x17c] sm:$0xf0] }
  0xe5   :  { %v1272_v55 = vpop.f32.mrf.mxu3  ;;  %v1224_v56 = vadd.f32 %v1223_v54, %v3006_v53  ;;  %v1823_v53 = vld [vmem:[%s3553_s0 + $0x90] sm:$0xf0] }
  0xe6   :  { %v1323_v46 = vpop.f32.mrf.mxu0  ;;  %v1826_v12 = vor.u32 %v2396_v2, %v1823_v53 }
  0xe7   :  { %v1273_v58 = vadd.f32 %v1272_v55, %v1224_v56  ;;  %v1874_v55 = vor.u32 %v2407_v42, %v1871_v43  ;;  %v2432_v42 = vld [vmem:[%s3553_s0 + $0x184] sm:$0xf0] }
  0xe9   :  { %v1372_v60 = vpop.f32.mrf.mxu1  ;;  %v1322_v61 = vadd.f32 %v1321_v49, %v1273_v58 }
  0xeb   :  { %v3187_v5 = vadd.f32 %v1370_v51, %v1322_v61 }
  0xec   :  { %v1225_v6 = vpop.f32.mrf.mxu2 }
  0xed   :  { %v1274_v7 = vpop.f32.mrf.mxu3  ;;  %v1226_v10 = vadd.f32 %v1225_v6, %v3024_v1  ;;  %v2416_v6 = vld [vmem:[%s3553_s0 + $0x10c] sm:$0xf] }
  0xee   :  { %v1326_v17 = vpop.f32.mrf.mxu0 }
  0xef   :  { %v1275_v16 = vadd.f32 %v1274_v7, %v1226_v10  ;;  %v1909_v7 = vld [vmem:[%s3553_s0 + $0x110] sm:$0xf] }
  0xf1   :  { %v1375_v19 = vpop.f32.mrf.mxu1  ;;  %v1324_v22 = vadd.f32 %v1323_v46, %v1275_v16  ;;  %1423 = vmatmul.bf16.gmra.mxu2 %v1822_v11  ;;  %1521 = vmatmul.bf16.gmra.mxu0 %v1830_v13  ;;  %v1911_v13 = vld [vmem:[%s3553_s0 + $0x138] sm:$0xf0] }
  0xf2   :  { %1472 = vmatmul.bf16.gmra.mxu3 %v1826_v12  ;;  %v2417_v12 = vld [vmem:[%s3553_s0 + $0x114] sm:$0xf] }
  0xf3   :  { %v3197_v23 = vadd.f32 %v1372_v60, %v1324_v22 }
  0xf4   :  { %2376 = vmatmul.msk.bf16.gmra.mxu1 %vm1091_vm0, %v1834_v18  ;;  %v1228_v24 = vpop.f32.mrf.mxu2 }
  0xf5   :  { %v1277_v27 = vpop.f32.mrf.mxu3  ;;  %v1229_v28 = vadd.f32 %v1228_v24, %v3054_v21  ;;  %v1863_v21 = vld [vmem:[%s3553_s0 + $0xe0] sm:$0xf0] }
  0xf6   :  { %v1328_v29 = vpop.f32.mrf.mxu0  ;;  %v1866_v49 = vor.u32 %v2406_v36, %v1863_v21 }
  0xf7   :  { %v1278_v1 = vadd.f32 %v1277_v27, %v1229_v28  ;;  %v1914_v27 = vor.u32 %v2417_v12, %v1911_v13  ;;  %v2442_v12 = vld [vmem:[%s3553_s0 + $0x1d4] sm:$0xf0] }
  0xf9   :  { %v1377_v30 = vpop.f32.mrf.mxu1  ;;  %v1327_v33 = vadd.f32 %v1326_v17, %v1278_v1  ;;  %v1902_v17 = vor.u32 %v2421_v4, %v1901_v3 }
  0xfb   :  { %v3218_v39 = vadd.f32 %v1375_v19, %v1327_v33  ;;  %v1910_v19 = vor.u32 %v2422_v8, %v1909_v7  ;;  %v1981_v7 = vld [vmem:[%s3553_s0 + $0x1a8] sm:$0xf]  ;;  %v2441_v8 = vld [vmem:[%s3553_s0 + $0x1cc] sm:$0xf0] }
  0xfc   :  { %v1230_v40 = vpop.f32.mrf.mxu2 }
  0xfd   :  { %v1279_v41 = vpop.f32.mrf.mxu3  ;;  %v1231_v44 = vadd.f32 %v1230_v40, %v3069_v32  ;;  %v2426_v40 = vld [vmem:[%s3553_s0 + $0x15c] sm:$0xf] }
  0xfe   :  { %v1331_v54 = vpop.f32.mrf.mxu0 }
  0xff   :  { %v1280_v51 = vadd.f32 %v1279_v41, %v1231_v44  ;;  %v1949_v41 = vld [vmem:[%s3553_s0 + $0x160] sm:$0xf] }
 0x101   :  { %v1380_v56 = vpop.f32.mrf.mxu1  ;;  %v1329_v58 = vadd.f32 %v1328_v29, %v1280_v51  ;;  %1428 = vmatmul.bf16.gmra.mxu2 %v1862_v45  ;;  %1526 = vmatmul.bf16.gmra.mxu0 %v1870_v50  ;;  %v1951_v50 = vld [vmem:[%s3553_s0 + $0x188] sm:$0xf0] }
 0x102   :  { %1477 = vmatmul.bf16.gmra.mxu3 %v1866_v49  ;;  %v2427_v49 = vld [vmem:[%s3553_s0 + $0x164] sm:$0xf] }
 0x103   :  { %v3228_v46 = vadd.f32 %v1377_v30, %v1329_v58 }
 0x104   :  { %2377 = vmatmul.msk.bf16.gmra.mxu1 %vm1091_vm0, %v1874_v55  ;;  %v1233_v60 = vpop.f32.mrf.mxu2 }
 0x105   :  { %v1282_v61 = vpop.f32.mrf.mxu3  ;;  %v1234_v62 = vadd.f32 %v1233_v60, %v3096_v52  ;;  %v1903_v52 = vld [vmem:[%s3553_s0 + $0x130] sm:$0xf0] }
 0x106   :  { %v1333_v0 = vpop.f32.mrf.mxu0  ;;  %v1906_v18 = vor.u32 %v2416_v6, %v1903_v52 }
 0x107   :  { %v1283_v32 = vadd.f32 %v1282_v61, %v1234_v62  ;;  %v1954_v61 = vor.u32 %v2427_v49, %v1951_v50  ;;  %v2452_v49 = vld [vmem:[%s3553_s0 + $0x224] sm:$0xf0] }
 0x109   :  { %v1382_v2 = vpop.f32.mrf.mxu1  ;;  %v1332_v53 = vadd.f32 %v1331_v54, %v1283_v32  ;;  %v1942_v54 = vor.u32 %v2431_v38, %v1941_v37 }
 0x10b   :  { %v3249_v9 = vadd.f32 %v1380_v56, %v1332_v53  ;;  %v1950_v56 = vor.u32 %v2432_v42, %v1949_v41  ;;  %v2021_v41 = vld [vmem:[%s3553_s0 + $0x1f8] sm:$0xf]  ;;  %v2451_v42 = vld [vmem:[%s3553_s0 + $0x21c] sm:$0xf0] }
 0x10c   :  { %v1235_v10 = vpop.f32.mrf.mxu2 }
 0x10d   :  { %v1284_v11 = vpop.f32.mrf.mxu3  ;;  %v1236_v16 = vadd.f32 %v1235_v10, %v3105_v63  ;;  %v2436_v10 = vld [vmem:[%s3553_s0 + $0x1ac] sm:$0xf] }
 0x10e   :  { %v1336_v24 = vpop.f32.mrf.mxu0 }
 0x10f   :  { %v1285_v22 = vadd.f32 %v1284_v11, %v1236_v16  ;;  %v1989_v11 = vld [vmem:[%s3553_s0 + $0x1b0] sm:$0xf] }
 0x111   :  { %v1385_v28 = vpop.f32.mrf.mxu1  ;;  %v1334_v1 = vadd.f32 %v1333_v0, %v1285_v22  ;;  %1433 = vmatmul.bf16.gmra.mxu2 %v1902_v17  ;;  %1531 = vmatmul.bf16.gmra.mxu0 %v1910_v19  ;;  %v1991_v19 = vld [vmem:[%s3553_s0 + $0x1d8] sm:$0xf0] }
 0x112   :  { %1482 = vmatmul.bf16.gmra.mxu3 %v1906_v18  ;;  %v2437_v18 = vld [vmem:[%s3553_s0 + $0x1b4] sm:$0xf] }
 0x113   :  { %v3259_v29 = vadd.f32 %v1382_v2, %v1334_v1 }
 0x114   :  { %2378 = vmatmul.msk.bf16.gmra.mxu1 %vm1091_vm0, %v1914_v27  ;;  %v1238_v30 = vpop.f32.mrf.mxu2 }
 0x115   :  { %v1287_v33 = vpop.f32.mrf.mxu3  ;;  %v1239_v34 = vadd.f32 %v1238_v30, %v3132_v20  ;;  %v1943_v20 = vld [vmem:[%s3553_s0 + $0x180] sm:$0xf0] }
 0x116   :  { %v1338_v35 = vpop.f32.mrf.mxu0  ;;  %v1946_v55 = vor.u32 %v2426_v40, %v1943_v20 }
 0x117   :  { %v1288_v63 = vadd.f32 %v1287_v33, %v1239_v34  ;;  %v1994_v33 = vor.u32 %v2437_v18, %v1991_v19  ;;  %v2462_v18 = vld [vmem:[%s3553_s0 + $0x274] sm:$0xf0] }
 0x119   :  { %v1387_v36 = vpop.f32.mrf.mxu1  ;;  %v1337_v21 = vadd.f32 %v1336_v24, %v1288_v63  ;;  %v1982_v24 = vor.u32 %v2441_v8, %v1981_v7 }
 0x11b   :  { %v3280_v43 = vadd.f32 %v1385_v28, %v1337_v21  ;;  %v1990_v28 = vor.u32 %v2442_v12, %v1989_v11  ;;  %v2061_v11 = vld [vmem:[%s3553_s0 + $0x248] sm:$0xf]  ;;  %v2461_v12 = vld [vmem:[%s3553_s0 + $0x26c] sm:$0xf0] }
 0x11c   :  { %v1240_v44 = vpop.f32.mrf.mxu2 }
 0x11d   :  { %v1289_v45 = vpop.f32.mrf.mxu3  ;;  %v1241_v51 = vadd.f32 %v1240_v44, %v3141_v31  ;;  %v2446_v44 = vld [vmem:[%s3553_s0 + $0x1fc] sm:$0xf] }
 0x11e   :  { %v1341_v60 = vpop.f32.mrf.mxu0 }
 0x11f   :  { %v1290_v58 = vadd.f32 %v1289_v45, %v1241_v51  ;;  %v2029_v45 = vld [vmem:[%s3553_s0 + $0x200] sm:$0xf] }
 0x121   :  { %v1390_v62 = vpop.f32.mrf.mxu1  ;;  %v1339_v32 = vadd.f32 %v1338_v35, %v1290_v58  ;;  %1438 = vmatmul.bf16.gmra.mxu2 %v1942_v54  ;;  %1536 = vmatmul.bf16.gmra.mxu0 %v1950_v56  ;;  %v2031_v56 = vld [vmem:[%s3553_s0 + $0x228] sm:$0xf0] }
 0x122   :  { %1487 = vmatmul.bf16.gmra.mxu3 %v1946_v55  ;;  %v2447_v55 = vld [vmem:[%s3553_s0 + $0x204] sm:$0xf] }
 0x123   :  { %v3290_v0 = vadd.f32 %v1387_v36, %v1339_v32 }
 0x124   :  { %2379 = vmatmul.msk.bf16.gmra.mxu1 %vm1091_vm0, %v1954_v61  ;;  %v1243_v2 = vpop.f32.mrf.mxu2 }
 0x125   :  { %v1292_v53 = vpop.f32.mrf.mxu3  ;;  %v1244_v3 = vadd.f32 %v1243_v2, %v3015_v59  ;;  %v1983_v59 = vld [vmem:[%s3553_s0 + $0x1d0] sm:$0xf0] }
 0x126   :  { %v1343_v4 = vpop.f32.mrf.mxu0  ;;  %v1986_v27 = vor.u32 %v2436_v10, %v1983_v59 }
 0x127   :  { %v1293_v31 = vadd.f32 %v1292_v53, %v1244_v3  ;;  %v2034_v53 = vor.u32 %v2447_v55, %v2031_v56 }
 0x129   :  { %v1392_v6 = vpop.f32.mrf.mxu1  ;;  %v1342_v52 = vadd.f32 %v1341_v60, %v1293_v31  ;;  %v2022_v60 = vor.u32 %v2451_v42, %v2021_v41 }
 0x12b   :  { %v3311_v13 = vadd.f32 %v1390_v62, %v1342_v52  ;;  %v2030_v62 = vor.u32 %v2452_v49, %v2029_v45 }
 0x12c   :  { %v1245_v16 = vpop.f32.mrf.mxu2 }
 0x12d   :  { %v1294_v17 = vpop.f32.mrf.mxu3  ;;  %v1246_v22 = vadd.f32 %v1245_v16, %v3048_v15  ;;  %v2456_v16 = vld [vmem:[%s3553_s0 + $0x24c] sm:$0xf] }
 0x12e   :  { %v1346_v30 = vpop.f32.mrf.mxu0 }
 0x12f   :  { %v1295_v1 = vadd.f32 %v1294_v17, %v1246_v22  ;;  %v2069_v17 = vld [vmem:[%s3553_s0 + $0x250] sm:$0xf] }
 0x131   :  { %v1395_v34 = vpop.f32.mrf.mxu1  ;;  %v1344_v63 = vadd.f32 %v1343_v4, %v1295_v1  ;;  %1443 = vmatmul.bf16.gmra.mxu2 %v1982_v24  ;;  %1541 = vmatmul.bf16.gmra.mxu0 %v1990_v28  ;;  %v2071_v28 = vld [vmem:[%s3553_s0 + $0x278] sm:$0xf0] }
 0x132   :  { %1492 = vmatmul.bf16.gmra.mxu3 %v1986_v27  ;;  %v2457_v27 = vld [vmem:[%s3553_s0 + $0x254] sm:$0xf] }
 0x133   :  { %v3321_v35 = vadd.f32 %v1392_v6, %v1344_v63 }
 0x134   :  { %2380 = vmatmul.msk.bf16.gmra.mxu1 %vm1091_vm0, %v1994_v33  ;;  %v1248_v36 = vpop.f32.mrf.mxu2 }
 0x135   :  { %v1297_v21 = vpop.f32.mrf.mxu3  ;;  %v1249_v37 = vadd.f32 %v1248_v36, %v3060_v26  ;;  %v2023_v26 = vld [vmem:[%s3553_s0 + $0x220] sm:$0xf0] }
 0x136   :  { %v1348_v38 = vpop.f32.mrf.mxu0  ;;  %v2026_v61 = vor.u32 %v2446_v44, %v2023_v26 }
 0x137   :  { %v1298_v15 = vadd.f32 %v1297_v21, %v1249_v37  ;;  %v2074_v21 = vor.u32 %v2457_v27, %v2071_v28 }
 0x139   :  { %v1397_v40 = vpop.f32.mrf.mxu1  ;;  %v1347_v20 = vadd.f32 %v1346_v30, %v1298_v15  ;;  %v2062_v30 = vor.u32 %v2461_v12, %v2061_v11 }
 0x13b   :  { %v3342_v50 = vadd.f32 %v1395_v34, %v1347_v20  ;;  %v2070_v34 = vor.u32 %v2462_v18, %v2069_v17 }
 0x13c   :  { %v1250_v51 = vpop.f32.mrf.mxu2 }
 0x13d   :  { %v1299_v54 = vpop.f32.mrf.mxu3  ;;  %v1251_v58 = vadd.f32 %v1250_v51, %v3093_v47 }
 0x13e   :  { %v1351_v2 = vpop.f32.mrf.mxu0 }
 0x13f   :  { %v1300_v32 = vadd.f32 %v1299_v54, %v1251_v58 }
 0x141   :  { %v1400_v3 = vpop.f32.mrf.mxu1  ;;  %v1349_v31 = vadd.f32 %v1348_v38, %v1300_v32  ;;  %1448 = vmatmul.bf16.gmra.mxu2 %v2022_v60  ;;  %1546 = vmatmul.bf16.gmra.mxu0 %v2030_v62 }
 0x142   :  { %1497 = vmatmul.bf16.gmra.mxu3 %v2026_v61 }
 0x143   :  { %v3352_v4 = vadd.f32 %v1397_v40, %v1349_v31 }
 0x144   :  { %2381 = vmatmul.msk.bf16.gmra.mxu1 %vm1091_vm0, %v2034_v53  ;;  %v1253_v6 = vpop.f32.mrf.mxu2 }
 0x145   :  { %v1302_v52 = vpop.f32.mrf.mxu3  ;;  %v1254_v7 = vadd.f32 %v1253_v6, %v3099_v57  ;;  %v2063_v57 = vld [vmem:[%s3553_s0 + $0x270] sm:$0xf0]  ;;  %s2556_s0 = smov 64  }
 0x146   :  { %v1353_v8 = vpop.f32.mrf.mxu0  ;;  %v2066_v33 = vor.u32 %v2456_v16, %v2063_v57 }
 0x147   :  { %v1303_v47 = vadd.f32 %v1302_v52, %v1254_v7 }
 0x149   :  { %v1402_v10 = vpop.f32.mrf.mxu1  ;;  %v1352_v59 = vadd.f32 %v1351_v2, %v1303_v47 }
 0x14b   :  { %v3373_v19 = vadd.f32 %v1400_v3, %v1352_v59 }
 0x14c   :  { %v1255_v22 = vpop.f32.mrf.mxu2 }
 0x14d   :  { %v1304_v24 = vpop.f32.mrf.mxu3  ;;  %v1256_v1 = vadd.f32 %v1255_v22, %v3129_v14 }
 0x14e   :  { %v1356_v36 = vpop.f32.mrf.mxu0 }
 0x14f   :  { %v1305_v63 = vadd.f32 %v1304_v24, %v1256_v1 }
 0x151   :  { %v1405_v37 = vpop.f32.mrf.mxu1  ;;  %v1354_v15 = vadd.f32 %v1353_v8, %v1305_v63  ;;  %1453 = vmatmul.bf16.gmra.mxu2 %v2062_v30  ;;  %1551 = vmatmul.bf16.gmra.mxu0 %v2070_v34 }
 0x152   :  { %1502 = vmatmul.bf16.gmra.mxu3 %v2066_v33 }
 0x153   :  { %v3383_v38 = vadd.f32 %v1402_v10, %v1354_v15 }
 0x154   :  { %2382 = vmatmul.msk.bf16.gmra.mxu1 %vm1091_vm0, %v2074_v21  ;;  %v1258_v40 = vpop.f32.mrf.mxu2 }
 0x155   :  { %v1307_v20 = vpop.f32.mrf.mxu3  ;;  %v1259_v41 = vadd.f32 %v1258_v40, %v3135_v25 }
 0x156   :  { %v1358_v42 = vpop.f32.mrf.mxu0 }
 0x157   :  { %v1308_v14 = vadd.f32 %v1307_v20, %v1259_v41 }
 0x159   :  { %v1407_v44 = vpop.f32.mrf.mxu1  ;;  %v1357_v26 = vadd.f32 %v1356_v36, %v1308_v14 }
 0x15b   :  { %v3386_v45 = vadd.f32 %v1405_v37, %v1357_v26 }
 0x15c   :  { %v1260_v49 = vpop.f32.mrf.mxu2 }
 0x15d   :  { %v1309_v51 = vpop.f32.mrf.mxu3  ;;  %v1261_v54 = vadd.f32 %v1260_v49, %v3165_v48 }
 0x15e   :  { %v1517_v56 = vpop.f32.mrf.mxu0 }
 0x15f   :  { %v1310_v55 = vadd.f32 %v1309_v51, %v1261_v54 }
 0x161   :  { %v1566_v58 = vpop.f32.mrf.mxu1  ;;  %v1359_v60 = vadd.f32 %v1358_v42, %v1310_v55 }
 0x163   :  { %v3389_v61 = vadd.f32 %v1407_v44, %v1359_v60 }
 0x164   :  { %v1419_v62 = vpop.f32.mrf.mxu2 }
 0x165   :  { %v1468_v32 = vpop.f32.mrf.mxu3  ;;  %v1420_v25 = vadd.f32 %v1419_v62, %v3187_v5 }
 0x166   :  { %v1519_v53 = vpop.f32.mrf.mxu0 }
 0x167   :  { %v1469_v2 = vadd.f32 %v1468_v32, %v1420_v25 }
 0x169   :  { %v1568_v3 = vpop.f32.mrf.mxu1  ;;  %v1518_v31 = vadd.f32 %v1517_v56, %v1469_v2 }
 0x16b   :  { %v3392_v6 = vadd.f32 %v1566_v58, %v1518_v31 }
 0x16c   :  { %v1421_v52 = vpop.f32.mrf.mxu2 }
 0x16d   :  { %v1470_v7 = vpop.f32.mrf.mxu3  ;;  %v1422_v48 = vadd.f32 %v1421_v52, %v3197_v23  ;;  %v1622_v47 = vsub.f32 0.0, %v3392_v6 }
 0x16e   :  { %v1522_v10 = vpop.f32.mrf.mxu0 }
 0x16f   :  { %v1471_v8 = vadd.f32 %v1470_v7, %v1422_v48  ;;  %v1638_v59 = vmax.f32 %v1622_v47, 0.0 }
 0x171   :  { %v1571_v11 = vpop.f32.mrf.mxu1  ;;  %v1520_v12 = vadd.f32 %v1519_v53, %v1471_v8  ;;  %1670 = vrot.lane.b32.xlu0 %v1638_v59, %s2556_s0 }
 0x173   :  { %v3397_v5 = vadd.f32 %v1568_v3, %v1520_v12 }
 0x174   :  { %v1424_v16 = vpop.f32.mrf.mxu2 }
 0x175   :  { %v1473_v57 = vpop.f32.mrf.mxu3  ;;  %v1425_v17 = vadd.f32 %v1424_v16, %v3218_v39  ;;  %v1623_v18 = vsub.f32 0.0, %v3397_v5 }
 0x176   :  { %v1524_v23 = vpop.f32.mrf.mxu0 }
 0x177   :  { %v1474_v22 = vadd.f32 %v1473_v57, %v1425_v17  ;;  %v1639_v24 = vmax.f32 %v1623_v18, 0.0 }
 0x179   :  { %v1573_v27 = vpop.f32.mrf.mxu1  ;;  %v1523_v28 = vadd.f32 %v1522_v10, %v1474_v22  ;;  %1672 = vrot.lane.b32.xlu0 %v1639_v24, %s2556_s0 }
 0x17b   :  { %v3402_v1 = vadd.f32 %v1571_v11, %v1523_v28 }
 0x17c   :  { %v1426_v30 = vpop.f32.mrf.mxu2 }
 0x17d   :  { %v1475_v33 = vpop.f32.mrf.mxu3  ;;  %v1427_v34 = vadd.f32 %v1426_v30, %v3228_v46  ;;  %v1624_v63 = vsub.f32 0.0, %v3402_v1 }
 0x17e   :  { %v1527_v21 = vpop.f32.mrf.mxu0 }
 0x17f   :  { %v1476_v36 = vadd.f32 %v1475_v33, %v1427_v34  ;;  %v1640_v39 = vmax.f32 %v1624_v63, 0.0 }
 0x181   :  { %v1576_v37 = vpop.f32.mrf.mxu1  ;;  %v1525_v15 = vadd.f32 %v1524_v23, %v1476_v36  ;;  %1674 = vrot.lane.b32.xlu1 %v1640_v39, %s2556_s0 }
 0x183   :  { %v3407_v40 = vadd.f32 %v1573_v27, %v1525_v15 }
 0x184   :  { %v1429_v20 = vpop.f32.mrf.mxu2 }
 0x185   :  { %v1478_v41 = vpop.f32.mrf.mxu3  ;;  %v1430_v14 = vadd.f32 %v1429_v20, %v3249_v9  ;;  %v1625_v42 = vsub.f32 0.0, %v3407_v40 }
 0x186   :  { %v1529_v26 = vpop.f32.mrf.mxu0 }
 0x187   :  { %v1479_v44 = vadd.f32 %v1478_v41, %v1430_v14  ;;  %v1641_v46 = vmax.f32 %v1625_v42, 0.0 }
 0x189   :  { %v1578_v49 = vpop.f32.mrf.mxu1  ;;  %v1528_v51 = vadd.f32 %v1527_v21, %v1479_v44  ;;  %1676 = vrot.lane.b32.xlu1 %v1641_v46, %s2556_s0 }
 0x18b   :  { %v3412_v54 = vadd.f32 %v1576_v37, %v1528_v51 }
 0x18c   :  { %v1431_v55 = vpop.f32.mrf.mxu2 }
 0x18d   :  { %v1480_v56 = vpop.f32.mrf.mxu3  ;;  %v1432_v58 = vadd.f32 %v1431_v55, %v3259_v29  ;;  %v1626_v60 = vsub.f32 0.0, %v3412_v54 }
 0x18e   :  { %v1532_v32 = vpop.f32.mrf.mxu0 }
 0x18f   :  { %v1481_v62 = vadd.f32 %v1480_v56, %v1432_v58  ;;  %v1642_v9 = vmax.f32 %v1626_v60, 0.0 }
 0x191   :  { %v1581_v25 = vpop.f32.mrf.mxu1  ;;  %v1530_v2 = vadd.f32 %v1529_v26, %v1481_v62  ;;  %1678 = vrot.lane.b32.xlu2 %v1642_v9, %s2556_s0 }
 0x193   :  { %v3417_v53 = vadd.f32 %v1578_v49, %v1530_v2 }
 0x194   :  { %v1434_v3 = vpop.f32.mrf.mxu2 }
 0x195   :  { %v1483_v31 = vpop.f32.mrf.mxu3  ;;  %v1435_v52 = vadd.f32 %v1434_v3, %v3280_v43  ;;  %v1627_v7 = vsub.f32 0.0, %v3417_v53 }
 0x196   :  { %v1534_v47 = vpop.f32.mrf.mxu0 }
 0x197   :  { %v1484_v48 = vadd.f32 %v1483_v31, %v1435_v52  ;;  %v1643_v29 = vmax.f32 %v1627_v7, 0.0 }
 0x199   :  { %v1583_v8 = vpop.f32.mrf.mxu1  ;;  %v1533_v10 = vadd.f32 %v1532_v32, %v1484_v48  ;;  %1680 = vrot.lane.b32.xlu2 %v1643_v29, %s2556_s0 }
 0x19b   :  { %v3422_v59 = vadd.f32 %v1581_v25, %v1533_v10 }
 0x19c   :  { %v1436_v11 = vpop.f32.mrf.mxu2 }
 0x19d   :  { %v1485_v12 = vpop.f32.mrf.mxu3  ;;  %v1437_v16 = vadd.f32 %v1436_v11, %v3290_v0  ;;  %v1628_v57 = vsub.f32 0.0, %v3422_v59 }
 0x19e   :  { %v1537_v18 = vpop.f32.mrf.mxu0 }
 0x19f   :  { %v1486_v17 = vadd.f32 %v1485_v12, %v1437_v16  ;;  %v1644_v43 = vmax.f32 %v1628_v57, 0.0 }
 0x1a1   :  { %v1586_v22 = vpop.f32.mrf.mxu1  ;;  %v1535_v23 = vadd.f32 %v1534_v47, %v1486_v17  ;;  %1682 = vrot.lane.b32.xlu0 %v1644_v43, %s2556_s0 }
 0x1a3   :  { %v3427_v24 = vadd.f32 %v1583_v8, %v1535_v23 }
 0x1a4   :  { %v1439_v27 = vpop.f32.mrf.mxu2 }
 0x1a5   :  { %v1488_v28 = vpop.f32.mrf.mxu3  ;;  %v1440_v30 = vadd.f32 %v1439_v27, %v3311_v13  ;;  %v1629_v33 = vsub.f32 0.0, %v3427_v24 }
 0x1a6   :  { %v1539_v63 = vpop.f32.mrf.mxu0 }
 0x1a7   :  { %v1489_v34 = vadd.f32 %v1488_v28, %v1440_v30  ;;  %v1645_v0 = vmax.f32 %v1629_v33, 0.0 }
 0x1a9   :  { %v1588_v36 = vpop.f32.mrf.mxu1  ;;  %v1538_v21 = vadd.f32 %v1537_v18, %v1489_v34  ;;  %1684 = vrot.lane.b32.xlu1 %v1645_v0, %s2556_s0 }
 0x1ab   :  { %v3432_v39 = vadd.f32 %v1586_v22, %v1538_v21 }
 0x1ac   :  { %v1441_v37 = vpop.f32.mrf.mxu2 }
 0x1ad   :  { %v1490_v15 = vpop.f32.mrf.mxu3  ;;  %v1442_v20 = vadd.f32 %v1441_v37, %v3321_v35  ;;  %v1630_v41 = vsub.f32 0.0, %v3432_v39 }
 0x1ae   :  { %v1542_v42 = vpop.f32.mrf.mxu0 }
 0x1af   :  { %v1491_v14 = vadd.f32 %v1490_v15, %v1442_v20  ;;  %v1646_v13 = vmax.f32 %v1630_v41, 0.0 }
 0x1b1   :  { %v1591_v44 = vpop.f32.mrf.mxu1  ;;  %v1540_v26 = vadd.f32 %v1539_v63, %v1491_v14  ;;  %1686 = vrot.lane.b32.xlu2 %v1646_v13, %s2556_s0 }
 0x1b3   :  { %v3437_v46 = vadd.f32 %v1588_v36, %v1540_v26 }
 0x1b4   :  { %v1444_v49 = vpop.f32.mrf.mxu2 }
 0x1b5   :  { %v1493_v51 = vpop.f32.mrf.mxu3  ;;  %v1445_v55 = vadd.f32 %v1444_v49, %v3342_v50  ;;  %v1631_v56 = vsub.f32 0.0, %v3437_v46 }
 0x1b6   :  { %v1544_v60 = vpop.f32.mrf.mxu0 }
 0x1b7   :  { %v1494_v58 = vadd.f32 %v1493_v51, %v1445_v55  ;;  %v1647_v35 = vmax.f32 %v1631_v56, 0.0  ;;  %v1606_v56 = vmax.f32 %v3392_v6, 0.0 }
 0x1b9   :  { %v1543_v62 = vadd.f32 %v1542_v42, %v1494_v58  ;;  %1688 = vrot.lane.b32.xlu0 %v1647_v35, %s2556_s0  ;;  %v1593_v32 = vpop.f32.mrf.mxu1 }
 0x1bb   :  { %v3442_v9 = vadd.f32 %v1591_v44, %v1543_v62 }
 0x1bc   :  { %v1446_v25 = vpop.f32.mrf.mxu2 }
 0x1bd   :  { %v1495_v2 = vpop.f32.mrf.mxu3  ;;  %v1447_v3 = vadd.f32 %v1446_v25, %v3352_v4  ;;  %v1632_v31 = vsub.f32 0.0, %v3442_v9  ;;  %v1610_v25 = vmax.f32 %v3412_v54, 0.0  ;;  %v1611_v54 = vmax.f32 %v3417_v53, 0.0 }
 0x1be   :  { %v1547_v48 = vpop.f32.mrf.mxu0  ;;  %v1614_v53 = vmax.f32 %v3432_v39, 0.0 }
 0x1bf   :  { %v1496_v52 = vadd.f32 %v1495_v2, %v1447_v3  ;;  %v1648_v7 = vmax.f32 %v1632_v31, 0.0  ;;  %v1607_v2 = vmax.f32 %v3397_v5, 0.0 }
 0x1c1   :  { %v1545_v50 = vadd.f32 %v1544_v60, %v1496_v52  ;;  %1690 = vrot.lane.b32.xlu1 %v1648_v7, %s2556_s0  ;;  %v1596_v29 = vpop.f32.mrf.mxu1  ;;  %v1608_v7 = vmax.f32 %v3402_v1, 0.0 }
 0x1c3   :  { %v3447_v47 = vadd.f32 %v1593_v32, %v1545_v50 }
 0x1c4   :  { %v1449_v8 = vpop.f32.mrf.mxu2 }
 0x1c5   :  { %v1498_v10 = vpop.f32.mrf.mxu3  ;;  %v1450_v11 = vadd.f32 %v1449_v8, %v3373_v19  ;;  %v1633_v12 = vsub.f32 0.0, %v3447_v47  ;;  %v1609_v8 = vmax.f32 %v3407_v40, 0.0 }
 0x1c6   :  { %v1549_v18 = vpop.f32.mrf.mxu0 }
 0x1c7   :  { %v1499_v16 = vadd.f32 %v1498_v10, %v1450_v11  ;;  %v1649_v57 = vmax.f32 %v1633_v12, 0.0 }
 0x1c9   :  { %v1548_v4 = vadd.f32 %v1547_v48, %v1499_v16  ;;  %1692 = vrot.lane.b32.xlu2 %v1649_v57, %s2556_s0  ;;  %v1598_v28 = vpop.f32.mrf.mxu1  ;;  %v1612_v16 = vmax.f32 %v3422_v59, 0.0 }
 0x1cb   :  { %v3452_v17 = vadd.f32 %v1596_v29, %v1548_v4  ;;  %v1613_v4 = vmax.f32 %v3427_v24, 0.0 }
 0x1cc   :  { %v1451_v43 = vpop.f32.mrf.mxu2 }
 0x1cd   :  { %v1500_v22 = vpop.f32.mrf.mxu3  ;;  %v1452_v23 = vadd.f32 %v1451_v43, %v3383_v38  ;;  %v1634_v27 = vsub.f32 0.0, %v3452_v17  ;;  %v1617_v43 = vmax.f32 %v3447_v47, 0.0 }
 0x1ce   :  { %v1552_v37 = vpop.f32.mrf.mxu0 }
 0x1cf   :  { %v1501_v30 = vadd.f32 %v1500_v22, %v1452_v23  ;;  %v1650_v33 = vmax.f32 %v1634_v27, 0.0  ;;  %v1615_v23 = vmax.f32 %v3437_v46, 0.0 }
 0x1d1   :  { %v1550_v19 = vadd.f32 %v1549_v18, %v1501_v30  ;;  %1694 = vrot.lane.b32.xlu0 %v1650_v33, %s2556_s0  ;;  %v1601_v38 = vpop.f32.mrf.mxu1 }
 0x1d3   :  { %v3457_v34 = vadd.f32 %v1598_v28, %v1550_v19  ;;  %v1616_v28 = vmax.f32 %v3442_v9, 0.0 }
 0x1d4   :  { %v1454_v63 = vpop.f32.mrf.mxu2 }
 0x1d5   :  { %v1503_v0 = vpop.f32.mrf.mxu3  ;;  %v1455_v36 = vadd.f32 %v1454_v63, %v3386_v45  ;;  %v1635_v21 = vsub.f32 0.0, %v3457_v34  ;;  %v1618_v63 = vmax.f32 %v3452_v17, 0.0 }
 0x1d6   :  { %v1554_v45 = vpop.f32.mrf.mxu0 }
 0x1d7   :  { %v1504_v15 = vadd.f32 %v1503_v0, %v1455_v36  ;;  %v1651_v20 = vmax.f32 %v1635_v21, 0.0  ;;  %v1619_v36 = vmax.f32 %v3457_v34, 0.0 }
 0x1d9   :  { %v1553_v41 = vadd.f32 %v1552_v37, %v1504_v15  ;;  %1696 = vrot.lane.b32.xlu1 %v1651_v20, %s2556_s0  ;;  %v1603_v58 = vpop.f32.mrf.mxu1 }
 0x1db   :  { %v3462_v14 = vadd.f32 %v1601_v38, %v1553_v41 }
 0x1dc   :  { %v1456_v42 = vpop.f32.mrf.mxu2 }
 0x1dd   :  { %v1457_v13 = vadd.f32 %v1456_v42, %v3389_v61  ;;  %v1636_v44 = vsub.f32 0.0, %v3462_v14  ;;  %v1505_v26 = vpop.f32.mrf.mxu3  ;;  %v1620_v33 = vmax.f32 %v3462_v14, 0.0 }
 0x1df   :  { %v1506_v49 = vadd.f32 %v1505_v26, %v1457_v13  ;;  %v1652_v51 = vmax.f32 %v1636_v44, 0.0 }
 0x1e1   :  { %v1555_v55 = vadd.f32 %v1554_v45, %v1506_v49  ;;  %1698 = vrot.lane.b32.xlu2 %v1652_v51, %s2556_s0 }
 0x1e3   :  { %v3468_v60 = vadd.f32 %v1603_v58, %v1555_v55  ;;  %v1671_v35 = vpop.permute.xlu0 %1670 }
 0x1e4   :  { %v1719_v62 = vsel %vm1718_vm1, %v1606_v56, %v1671_v35 }
 0x1e5   :  { %1735 = vst [vmem:[%s3554_s3] sm:$0xff] %v1719_v62  ;;  %v1637_v61 = vsub.f32 0.0, %v3468_v60  ;;  %v1621_v15 = vmax.f32 %v3468_v60, 0.0 }
 0x1e7   :  { %v1653_v32 = vmax.f32 %v1637_v61, 0.0 }
 0x1e9   :  { %1700 = vrot.lane.b32.xlu0 %v1653_v32, %s2556_s0 }
 0x1eb   :  { %v1679_v6 = vpop.permute.xlu2 %1678  ;;  %v1673_v3 = vpop.permute.xlu0 %1672 }
 0x1ec   :  { %v1723_v31 = vsel %vm1718_vm1, %v1610_v25, %v1679_v6  ;;  %v1720_v52 = vsel %vm1718_vm1, %v1607_v2, %v1673_v3 }
 0x1ed   :  { %1739 = vst [vmem:[%s3554_s3 + $0x20] sm:$0xff] %v1723_v31 }
 0x1ee   :  { %1736 = vst [vmem:[%s3554_s3 + $0x8] sm:$0xff] %v1720_v52 }
 0x1f3   :  { %v1681_v50 = vpop.permute.xlu2 %1680  ;;  %v1675_v5 = vpop.permute.xlu1 %1674 }
 0x1f4   :  { %v1724_v48 = vsel %vm1718_vm1, %v1611_v54, %v1681_v50  ;;  %v1721_v29 = vsel %vm1718_vm1, %v1608_v7, %v1675_v5 }
 0x1f5   :  { %1740 = vst [vmem:[%s3554_s3 + $0x28] sm:$0xff] %v1724_v48 }
 0x1f6   :  { %1737 = vst [vmem:[%s3554_s3 + $0x10] sm:$0xff] %v1721_v29 }
 0x1fb   :  { %v1677_v10 = vpop.permute.xlu1 %1676 }
 0x1fc   :  { %v1722_v1 = vsel %vm1718_vm1, %v1609_v8, %v1677_v10 }
 0x1fd   :  { %1738 = vst [vmem:[%s3554_s3 + $0x18] sm:$0xff] %v1722_v1 }
 0x20b   :  { %v1687_v11 = vpop.permute.xlu2 %1686 }
 0x20c   :  { %v1727_v12 = vsel %vm1718_vm1, %v1614_v53, %v1687_v11 }
 0x20d   :  { %1743 = vst [vmem:[%s3554_s3 + $0x40] sm:$0xff] %v1727_v12 }
 0x213   :  { %v1683_v57 = vpop.permute.xlu0 %1682 }
 0x214   :  { %v1725_v40 = vsel %vm1718_vm1, %v1612_v16, %v1683_v57 }
 0x215   :  { %1741 = vst [vmem:[%s3554_s3 + $0x30] sm:$0xff] %v1725_v40 }
 0x21b   :  { %v1685_v18 = vpop.permute.xlu1 %1684 }
 0x21c   :  { %v1726_v39 = vsel %vm1718_vm1, %v1613_v4, %v1685_v18 }
 0x21d   :  { %1742 = vst [vmem:[%s3554_s3 + $0x38] sm:$0xff] %v1726_v39 }
 0x223   :  { %v1693_v22 = vpop.permute.xlu2 %1692 }
 0x224   :  { %v1730_v59 = vsel %vm1718_vm1, %v1617_v43, %v1693_v22 }
 0x225   :  { %1746 = vst [vmem:[%s3554_s3 + $0x58] sm:$0xff] %v1730_v59 }
 0x22b   :  { %v1689_v27 = vpop.permute.xlu0 %1688 }
 0x22c   :  { %v1728_v24 = vsel %vm1718_vm1, %v1615_v23, %v1689_v27 }
 0x22d   :  { %1744 = vst [vmem:[%s3554_s3 + $0x48] sm:$0xff] %v1728_v24 }
 0x233   :  { %v1691_v30 = vpop.permute.xlu1 %1690 }
 0x234   :  { %v1729_v47 = vsel %vm1718_vm1, %v1616_v28, %v1691_v30 }
 0x235   :  { %1745 = vst [vmem:[%s3554_s3 + $0x50] sm:$0xff] %v1729_v47 }
 0x23b   :  { %v1699_v19 = vpop.permute.xlu2 %1698 }
 0x23c   :  { %v1733_v46 = vsel %vm1718_vm1, %v1620_v33, %v1699_v19 }
 0x23d   :  { %1749 = vst [vmem:[%s3554_s3 + $0x70] sm:$0xff] %v1733_v46 }
 0x243   :  { %v1695_v0 = vpop.permute.xlu0 %1694 }
 0x244   :  { %v1731_v9 = vsel %vm1718_vm1, %v1618_v63, %v1695_v0 }
 0x245   :  { %1747 = vst [vmem:[%s3554_s3 + $0x60] sm:$0xff] %v1731_v9 }
 0x24b   :  { %v1697_v21 = vpop.permute.xlu1 %1696 }
 0x24c   :  { %v1732_v37 = vsel %vm1718_vm1, %v1619_v36, %v1697_v21 }
 0x24d   :  { %1748 = vst [vmem:[%s3554_s3 + $0x68] sm:$0xff] %v1732_v37 }
 0x25b   :  { %v1701_v20 = vpop.permute.xlu0 %1700 }
 0x25c   :  { %v1734_v17 = vsel %vm1718_vm1, %v1621_v15, %v1701_v20 }
 0x25d   :  { %1750 = vst [vmem:[%s3554_s3 + $0x78] sm:$0xff] %v1734_v17 }

// kernel: _lambda_.26
= control target key start
LH: loop header
LB: loop body
LE: loop exit
PB: predicated region body
PF: predicated region fallthrough
CT: control target
= control target key end

     0   :  { %s253_s1 = inlined_call_operand.vmem [shape: bf16[128,128], index: 1, kind: input, shape index: {}]   ;;  %s254_s2 = inlined_call_operand.vmem [shape: f32[1,128], index: 2, kind: input, shape index: {}]   ;;  %s255_s0 = inlined_call_operand.vmem [shape: bf16[32,128], index: 0, kind: input, shape index: {}]   ;;  %s256_s3 = inlined_call_operand.vmem [shape: f32[32,128], index: 3, kind: output, shape index: {}]  }
   0x1   :  { %v178_v0 = vld [vmem:[%s253_s1 + $0x38] sm:$0xff]  ;;  %v177_v1 = vld [vmem:[%s253_s1 + $0x30] sm:$0xff]  ;;  %v176_v2 = vld [vmem:[%s253_s1 + $0x28] sm:$0xff] }
   0x2   :  { %98 = vmatpush.bf16.msra.mxu0 %v178_v0  ;;  %179 = vmatpush.bf16.msra.mxu1 %v178_v0  ;;  %v175_v3 = vld [vmem:[%s253_s1 + $0x20] sm:$0xff]  ;;  %v174_v4 = vld [vmem:[%s253_s1 + $0x18] sm:$0xff]  ;;  %v173_v5 = vld [vmem:[%s253_s1 + $0x10] sm:$0xff] }
   0x3   :  { %v172_v6 = vld [vmem:[%s253_s1 + $0x8] sm:$0xff]  ;;  %v171_v7 = vld [vmem:[%s253_s1] sm:$0xff] }
   0x4   :  { %v169_v8 = vld [vmem:[%s255_s0] sm:$0xff]  ;;  %v170_v9 = vld [vmem:[%s255_s0 + $0x8] sm:$0xff] }
   0x5   :  { %v187_v10 = vld [vmem:[%s254_s2] ss:$0 sm:$0xff] }
   0x6   :  { %99 = vmatpush.bf16.msra.mxu0 %v177_v1  ;;  %180 = vmatpush.bf16.msra.mxu1 %v177_v1 }
   0xa   :  { %100 = vmatpush.bf16.msra.mxu0 %v176_v2  ;;  %181 = vmatpush.bf16.msra.mxu1 %v176_v2 }
   0xe   :  { %101 = vmatpush.bf16.msra.mxu0 %v175_v3  ;;  %182 = vmatpush.bf16.msra.mxu1 %v175_v3 }
  0x12   :  { %102 = vmatpush.bf16.msra.mxu0 %v174_v4  ;;  %183 = vmatpush.bf16.msra.mxu1 %v174_v4 }
  0x16   :  { %103 = vmatpush.bf16.msra.mxu0 %v173_v5  ;;  %184 = vmatpush.bf16.msra.mxu1 %v173_v5 }
  0x1a   :  { %104 = vmatpush.bf16.msra.mxu0 %v172_v6  ;;  %185 = vmatpush.bf16.msra.mxu1 %v172_v6 }
  0x1e   :  { %105 = vmatpush.bf16.msra.mxu0 %v171_v7  ;;  %186 = vmatpush.bf16.msra.mxu1 %v171_v7 }
  0x21   :  { %106 = vmatmul.bf16.vlgmr.msra.gmra.mxu0 %v169_v8  ;;  %111 = vmatmul.bf16.vlgmr.msra.gmra.mxu1 %v170_v9 }
  0x9e   :  { %v107_v11 = vpop.f32.mrf.mxu0  ;;  %v112_v12 = vpop.f32.mrf.mxu1 }
  0x9f   :  { %v108_v13 = vadd.f32 %v187_v10, %v107_v11  ;;  %v113_v14 = vadd.f32 %v187_v10, %v112_v12 }
  0xa1   :  { %v117_v15 = vmax.f32 %v108_v13, 0.0  ;;  %v119_v16 = vmax.f32 %v113_v14, 0.0 }
  0xa3   :  { %121 = vst [vmem:[%s256_s3] sm:$0xff] %v117_v15 }
  0xa4   :  { %123 = vst [vmem:[%s256_s3 + $0x10] sm:$0xff] %v119_v16 }
  0xa6   :  { %v109_v17 = vpop.f32.mrf.mxu0  ;;  %v114_v18 = vpop.f32.mrf.mxu1 }
  0xa7   :  { %v110_v19 = vadd.f32 %v187_v10, %v109_v17  ;;  %v115_v20 = vadd.f32 %v187_v10, %v114_v18 }
  0xa9   :  { %v118_v21 = vmax.f32 %v110_v19, 0.0  ;;  %v120_v22 = vmax.f32 %v115_v20, 0.0 }
  0xab   :  { %122 = vst [vmem:[%s256_s3 + $0x8] sm:$0xff] %v118_v21 }
  0xac   :  { %124 = vst [vmem:[%s256_s3 + $0x18] sm:$0xff] %v120_v22 }

// kernel: _lambda_.28
= control target key start
LH: loop header
LB: loop body
LE: loop exit
PB: predicated region body
PF: predicated region fallthrough
CT: control target
= control target key end

     0   :  { %vm156_vm0 = vcmask 1043456   ;;  %vm149_vm1 = vcmask 719872   ;;  %s413_s1 = inlined_call_operand.vmem [shape: bf16[216,128], index: 1, kind: input, shape index: {}]   ;;  %s414_s2 = inlined_call_operand.vmem [shape: f32[1,128], index: 2, kind: input, shape index: {}]   ;;  %s415_s0 = inlined_call_operand.vmem [shape: bf16[32,216], index: 0, kind: input, shape index: {}]   ;;  %s416_s3 = inlined_call_operand.vmem [shape: f32[32,128], index: 3, kind: output, shape index: {}]  }
   0x1   :  { %v291_v0 = vld [vmem:[%s413_s1 + $0x38] sm:$0xff]  ;;  %v45_v1 = vld [vmem:[%s413_s1 + $0x68] sm:$0xf]  ;;  %v290_v3 = vld [vmem:[%s413_s1 + $0x30] sm:$0xff] }
   0x2   :  { %v121_v2 = vunpack.c.l.b16 %v45_v1  ;;  %160 = vmatpush.bf16.msra.mxu0 %v291_v0  ;;  %297 = vmatpush.bf16.msra.mxu2 %v291_v0  ;;  %v296_v6 = vld [vmem:[%s413_s1 + $0x60] sm:$0xff]  ;;  %v289_v7 = vld [vmem:[%s413_s1 + $0x28] sm:$0xff]  ;;  %v295_v8 = vld [vmem:[%s413_s1 + $0x58] sm:$0xff] }
   0x3   :  { %v288_v9 = vld [vmem:[%s413_s1 + $0x20] sm:$0xff]  ;;  %v294_v10 = vld [vmem:[%s413_s1 + $0x50] sm:$0xff]  ;;  %v287_v11 = vld [vmem:[%s413_s1 + $0x18] sm:$0xff] }
   0x4   :  { %v135_v4 = vpack.c.b16 %v121_v2, %v121_v2  ;;  %v293_v12 = vld [vmem:[%s413_s1 + $0x48] sm:$0xff]  ;;  %v286_v13 = vld [vmem:[%s413_s1 + $0x10] sm:$0xff]  ;;  %v292_v14 = vld [vmem:[%s413_s1 + $0x40] sm:$0xff] }
   0x5   :  { %v285_v15 = vld [vmem:[%s413_s1 + $0x8] sm:$0xff]  ;;  %v282_v16 = vld [vmem:[%s415_s0 + $0x14] sm:$0xf]  ;;  %v222_v17 = vld [vmem:[%s415_s0 + $0x18] sm:$0xf0] }
   0x6   :  { %v158_v5 = vsel %vm156_vm0, %v135_v4, 0  ;;  %161 = vmatpush.bf16.msra.mxu0 %v290_v3  ;;  %298 = vmatpush.bf16.msra.mxu2 %v290_v3  ;;  %v280_v18 = vld [vmem:[%s415_s0 + $0x4] sm:$0xf]  ;;  %v214_v19 = vld [vmem:[%s415_s0 + $0x8] sm:$0xf0]  ;;  %v225_v20 = vor.u32 %v282_v16, %v222_v17 }
   0x7   :  { %305 = vmatpush.bf16.msra.mxu3 %v158_v5  ;;  %181 = vmatpush.bf16.msra.mxu1 %v158_v5  ;;  %v284_v21 = vld [vmem:[%s413_s1] sm:$0xff]  ;;  %v281_v23 = vld [vmem:[%s415_s0 + $0x4] sm:$0xf0]  ;;  %v217_v24 = vor.u32 %v280_v18, %v214_v19  ;;  %v220_v25 = vld [vmem:[%s415_s0 + $0x10] sm:$0xf] }
   0x8   :  { %v212_v22 = vld [vmem:[%s415_s0] sm:$0xf]  ;;  %v283_v26 = vld [vmem:[%s415_s0 + $0x14] sm:$0xf0] }
   0x9   :  { %v213_v27 = vor.u32 %v281_v23, %v212_v22  ;;  %v221_v28 = vor.u32 %v283_v26, %v220_v25  ;;  %v311_v29 = vld [vmem:[%s414_s2] ss:$0 sm:$0xff] }
   0xa   :  { %162 = vmatpush.bf16.msra.mxu0 %v289_v7  ;;  %299 = vmatpush.bf16.msra.mxu2 %v289_v7 }
   0xb   :  { %306 = vmatpush.bf16.msra.mxu3 %v296_v6  ;;  %182 = vmatpush.bf16.msra.mxu1 %v296_v6 }
   0xe   :  { %163 = vmatpush.bf16.msra.mxu0 %v288_v9  ;;  %300 = vmatpush.bf16.msra.mxu2 %v288_v9 }
   0xf   :  { %307 = vmatpush.bf16.msra.mxu3 %v295_v8  ;;  %183 = vmatpush.bf16.msra.mxu1 %v295_v8 }
  0x12   :  { %164 = vmatpush.bf16.msra.mxu0 %v287_v11  ;;  %301 = vmatpush.bf16.msra.mxu2 %v287_v11 }
  0x13   :  { %308 = vmatpush.bf16.msra.mxu3 %v294_v10  ;;  %184 = vmatpush.bf16.msra.mxu1 %v294_v10 }
  0x16   :  { %165 = vmatpush.bf16.msra.mxu0 %v286_v13  ;;  %302 = vmatpush.bf16.msra.mxu2 %v286_v13 }
  0x17   :  { %309 = vmatpush.bf16.msra.mxu3 %v293_v12  ;;  %185 = vmatpush.bf16.msra.mxu1 %v293_v12 }
  0x1a   :  { %166 = vmatpush.bf16.msra.mxu0 %v285_v15  ;;  %303 = vmatpush.bf16.msra.mxu2 %v285_v15 }
  0x1b   :  { %310 = vmatpush.bf16.msra.mxu3 %v292_v14  ;;  %186 = vmatpush.bf16.msra.mxu1 %v292_v14 }
  0x1e   :  { %279 = vmatmul.msk.bf16.vlgmr.msra.gmra.mxu3 %vm149_vm1, %v225_v20  ;;  %167 = vmatpush.bf16.msra.mxu0 %v284_v21 }
  0x1f   :  { %278 = vmatmul.msk.bf16.vlgmr.msra.gmra.mxu1 %vm149_vm1, %v217_v24  ;;  %304 = vmatpush.bf16.msra.mxu2 %v284_v21 }
  0x21   :  { %168 = vmatmul.bf16.vlgmr.msra.gmra.mxu0 %v213_v27 }
  0x22   :  { %173 = vmatmul.bf16.vlgmr.msra.gmra.mxu2 %v221_v28 }
  0x9c   :  { %v188_v31 = vpop.f32.mrf.mxu1 }
  0x9e   :  { %v169_v30 = vpop.f32.mrf.mxu0 }
  0x9f   :  { %v170_v32 = vadd.f32 %v311_v29, %v169_v30 }
  0xa1   :  { %v189_v33 = vadd.f32 %v188_v31, %v170_v32  ;;  %v193_v35 = vpop.f32.mrf.mxu3 }
  0xa3   :  { %v198_v34 = vmax.f32 %v189_v33, 0.0 }
  0xa4   :  { %v190_v41 = vpop.f32.mrf.mxu1 }
  0xa5   :  { %202 = vst [vmem:[%s416_s3] sm:$0xff] %v198_v34  ;;  %v174_v36 = vpop.f32.mrf.mxu2 }
  0xa6   :  { %v175_v37 = vadd.f32 %v311_v29, %v174_v36  ;;  %v171_v38 = vpop.f32.mrf.mxu0 }
  0xa7   :  { %v172_v39 = vadd.f32 %v311_v29, %v171_v38 }
  0xa8   :  { %v194_v40 = vadd.f32 %v193_v35, %v175_v37 }
  0xa9   :  { %v191_v42 = vadd.f32 %v190_v41, %v172_v39  ;;  %v195_v47 = vpop.f32.mrf.mxu3 }
  0xaa   :  { %v200_v43 = vmax.f32 %v194_v40, 0.0 }
  0xab   :  { %v199_v44 = vmax.f32 %v191_v42, 0.0 }
  0xac   :  { %204 = vst [vmem:[%s416_s3 + $0x10] sm:$0xff] %v200_v43 }
  0xad   :  { %203 = vst [vmem:[%s416_s3 + $0x8] sm:$0xff] %v199_v44  ;;  %v176_v45 = vpop.f32.mrf.mxu2 }
  0xae   :  { %v177_v46 = vadd.f32 %v311_v29, %v176_v45 }
  0xb0   :  { %v196_v48 = vadd.f32 %v195_v47, %v177_v46 }
  0xb2   :  { %v201_v49 = vmax.f32 %v196_v48, 0.0 }
  0xb4   :  { %205 = vst [vmem:[%s416_s3 + $0x18] sm:$0xff] %v201_v49 }

// kernel: _lambda_.30
= control target key start
LH: loop header
LB: loop body
LE: loop exit
PB: predicated region body
PF: predicated region fallthrough
CT: control target
= control target key end

     0   :  { %vm201_vm0 = vcmask 261120   ;;  %s535_s1 = inlined_call_operand.vmem [shape: bf16[288,128], index: 1, kind: input, shape index: {}]   ;;  %s536_s0 = inlined_call_operand.vmem [shape: bf16[32,288], index: 0, kind: input, shape index: {}]   ;;  %s537_s2 = inlined_call_operand.vmem [shape: f32[1,128], index: 2, kind: input, shape index: {}]   ;;  %s538_s3 = inlined_call_operand.vmem [shape: f32[32,128], index: 3, kind: output, shape index: {}]  }
   0x1   :  { %v388_v0 = vld [vmem:[%s535_s1 + $0x38] sm:$0xff]  ;;  %v387_v2 = vld [vmem:[%s535_s1 + $0x30] sm:$0xff]  ;;  %v398_v3 = vld [vmem:[%s535_s1 + $0x88] sm:$0xff] }
   0x2   :  { %v396_v1 = vld [vmem:[%s535_s1 + $0x78] sm:$0xff]  ;;  %208 = vmatpush.bf16.msra.mxu0 %v388_v0  ;;  %399 = vmatpush.bf16.msra.mxu3 %v388_v0  ;;  %v395_v4 = vld [vmem:[%s535_s1 + $0x70] sm:$0xff]  ;;  %v397_v5 = vld [vmem:[%s535_s1 + $0x80] sm:$0xff] }
   0x3   :  { %227 = vmatpush.bf16.msra.mxu1 %v396_v1  ;;  %252 = vmatpush.bf16.msra.mxu2 %v398_v3  ;;  %v287_v6 = vld [vmem:[%s536_s0 + $0x8] sm:$0xf]  ;;  %v377_v7 = vld [vmem:[%s536_s0 + $0x10] sm:$0xf0]  ;;  %v385_v11 = vld [vmem:[%s535_s1 + $0x20] sm:$0xff] }
   0x4   :  { %v386_v8 = vld [vmem:[%s535_s1 + $0x28] sm:$0xff]  ;;  %v288_v10 = vor.u32 %v377_v7, %v287_v6  ;;  %v393_v12 = vld [vmem:[%s535_s1 + $0x60] sm:$0xff]  ;;  %v384_v13 = vld [vmem:[%s535_s1 + $0x18] sm:$0xff] }
   0x5   :  { %v394_v9 = vld [vmem:[%s535_s1 + $0x68] sm:$0xff]  ;;  %v392_v14 = vld [vmem:[%s535_s1 + $0x58] sm:$0xff]  ;;  %v383_v15 = vld [vmem:[%s535_s1 + $0x10] sm:$0xff] }
   0x6   :  { %209 = vmatpush.bf16.msra.mxu0 %v387_v2  ;;  %400 = vmatpush.bf16.msra.mxu3 %v387_v2  ;;  %v391_v16 = vld [vmem:[%s535_s1 + $0x50] sm:$0xff]  ;;  %v299_v17 = vld [vmem:[%s536_s0 + $0x20] sm:$0xf]  ;;  %v380_v18 = vld [vmem:[%s536_s0 + $0x28] sm:$0xf0] }
   0x7   :  { %228 = vmatpush.bf16.msra.mxu1 %v395_v4  ;;  %253 = vmatpush.bf16.msra.mxu2 %v397_v5  ;;  %v382_v19 = vld [vmem:[%s535_s1 + $0x8] sm:$0xff]  ;;  %v300_v21 = vor.u32 %v380_v18, %v299_v17  ;;  %v381_v22 = vld [vmem:[%s535_s1] sm:$0xff]  ;;  %v291_v25 = vld [vmem:[%s536_s0 + $0x18] sm:$0xf] }
   0x8   :  { %v390_v20 = vld [vmem:[%s535_s1 + $0x48] sm:$0xff]  ;;  %v279_v23 = vld [vmem:[%s536_s0] sm:$0xf]  ;;  %v379_v26 = vld [vmem:[%s536_s0 + $0x20] sm:$0xf0] }
   0x9   :  { %v376_v24 = vld [vmem:[%s536_s0 + $0x8] sm:$0xf0]  ;;  %v389_v27 = vld [vmem:[%s535_s1 + $0x40] sm:$0xff]  ;;  %v281_v29 = vld [vmem:[%s536_s0 + $0xc] sm:$0xf0]  ;;  %v292_v31 = vor.u32 %v379_v26, %v291_v25 }
   0xa   :  { %210 = vmatpush.bf16.msra.mxu0 %v386_v8  ;;  %401 = vmatpush.bf16.msra.mxu3 %v386_v8  ;;  %v375_v28 = vld [vmem:[%s536_s0 + $0x4] sm:$0xf]  ;;  %v280_v30 = vor.u32 %v376_v24, %v279_v23  ;;  %v378_v33 = vld [vmem:[%s536_s0 + $0x1c] sm:$0xf]  ;;  %v293_v34 = vld [vmem:[%s536_s0 + $0x24] sm:$0xf0] }
   0xb   :  { %229 = vmatpush.bf16.msra.mxu1 %v394_v9  ;;  %373 = vmatmul.msk.bf16.vlgmr.msra.gmra.mxu2 %vm201_vm0, %v288_v10  ;;  %v284_v32 = vor.u32 %v375_v28, %v281_v29  ;;  %v296_v35 = vor.u32 %v378_v33, %v293_v34  ;;  %v407_v37 = vld [vmem:[%s537_s2] ss:$0 sm:$0xff] }
   0xe   :  { %211 = vmatpush.bf16.msra.mxu0 %v385_v11  ;;  %402 = vmatpush.bf16.msra.mxu3 %v385_v11 }
   0xf   :  { %230 = vmatpush.bf16.msra.mxu1 %v393_v12 }
  0x12   :  { %212 = vmatpush.bf16.msra.mxu0 %v384_v13  ;;  %403 = vmatpush.bf16.msra.mxu3 %v384_v13 }
  0x13   :  { %231 = vmatpush.bf16.msra.mxu1 %v392_v14 }
  0x16   :  { %213 = vmatpush.bf16.msra.mxu0 %v383_v15  ;;  %404 = vmatpush.bf16.msra.mxu3 %v383_v15 }
  0x17   :  { %232 = vmatpush.bf16.msra.mxu1 %v391_v16 }
  0x1a   :  { %214 = vmatpush.bf16.msra.mxu0 %v382_v19  ;;  %405 = vmatpush.bf16.msra.mxu3 %v382_v19 }
  0x1b   :  { %233 = vmatpush.bf16.msra.mxu1 %v390_v20  ;;  %374 = vmatmul.msk.bf16.gmra.mxu2 %vm201_vm0, %v300_v21 }
  0x1e   :  { %215 = vmatpush.bf16.msra.mxu0 %v381_v22  ;;  %406 = vmatpush.bf16.msra.mxu3 %v381_v22 }
  0x1f   :  { %234 = vmatpush.bf16.msra.mxu1 %v389_v27 }
  0x21   :  { %216 = vmatmul.bf16.vlgmr.msra.gmra.mxu0 %v280_v30  ;;  %221 = vmatmul.bf16.vlgmr.msra.gmra.mxu3 %v292_v31 }
  0x22   :  { %235 = vmatmul.bf16.vlgmr.msra.gmra.mxu1 %v284_v32 }
  0x32   :  { %240 = vmatmul.bf16.gmra.mxu1 %v296_v35 }
  0x8e   :  { %v255_v36 = vpop.f32.mrf.mxu2 }
  0x96   :  { %v257_v44 = vpop.f32.mrf.mxu2 }
  0x9e   :  { %v217_v38 = vpop.f32.mrf.mxu0  ;;  %v260_v53 = vpop.f32.mrf.mxu2 }
  0x9f   :  { %v218_v39 = vadd.f32 %v407_v37, %v217_v38  ;;  %v236_v40 = vpop.f32.mrf.mxu1 }
  0xa1   :  { %v237_v41 = vadd.f32 %v236_v40, %v218_v39 }
  0xa3   :  { %v256_v42 = vadd.f32 %v255_v36, %v237_v41 }
  0xa4   :  { %v222_v48 = vpop.f32.mrf.mxu3 }
  0xa5   :  { %v265_v43 = vmax.f32 %v256_v42, 0.0  ;;  %v223_v51 = vadd.f32 %v407_v37, %v222_v48 }
  0xa6   :  { %v219_v45 = vpop.f32.mrf.mxu0  ;;  %v262_v62 = vpop.f32.mrf.mxu2 }
  0xa7   :  { %269 = vst [vmem:[%s538_s3] sm:$0xff] %v265_v43  ;;  %v220_v46 = vadd.f32 %v407_v37, %v219_v45  ;;  %v238_v47 = vpop.f32.mrf.mxu1 }
  0xa9   :  { %v239_v49 = vadd.f32 %v238_v47, %v220_v46 }
  0xab   :  { %v258_v50 = vadd.f32 %v257_v44, %v239_v49 }
  0xac   :  { %v224_v57 = vpop.f32.mrf.mxu3 }
  0xad   :  { %v266_v52 = vmax.f32 %v258_v50, 0.0  ;;  %v225_v59 = vadd.f32 %v407_v37, %v224_v57 }
  0xaf   :  { %270 = vst [vmem:[%s538_s3 + $0x8] sm:$0xff] %v266_v52  ;;  %v241_v54 = vpop.f32.mrf.mxu1 }
  0xb0   :  { %v242_v55 = vadd.f32 %v241_v54, %v223_v51 }
  0xb2   :  { %v261_v56 = vadd.f32 %v260_v53, %v242_v55 }
  0xb4   :  { %v267_v58 = vmax.f32 %v261_v56, 0.0 }
  0xb6   :  { %271 = vst [vmem:[%s538_s3 + $0x10] sm:$0xff] %v267_v58 }
  0xb7   :  { %v243_v60 = vpop.f32.mrf.mxu1 }
  0xb8   :  { %v244_v61 = vadd.f32 %v243_v60, %v225_v59 }
  0xba   :  { %v263_v63 = vadd.f32 %v262_v62, %v244_v61 }
  0xbc   :  { %v268_v0 = vmax.f32 %v263_v63, 0.0 }
  0xbe   :  { %272 = vst [vmem:[%s538_s3 + $0x18] sm:$0xff] %v268_v0 }

// kernel: _lambda_.43
= control target key start
LH: loop header
LB: loop body
LE: loop exit
PB: predicated region body
PF: predicated region fallthrough
CT: control target
= control target key end

     0   :  { %s344_s1 = inlined_call_operand.vmem [shape: bf16[256,128], index: 1, kind: input, shape index: {}]   ;;  %s345_s2 = inlined_call_operand.vmem [shape: f32[1,128], index: 2, kind: input, shape index: {}]   ;;  %s346_s0 = inlined_call_operand.vmem [shape: bf16[8,256], index: 0, kind: input, shape index: {}]   ;;  %s347_s3 = inlined_call_operand.vmem [shape: f32[8,128], index: 3, kind: output, shape index: {}]  }
   0x1   :  { %v257_v0 = vld [vmem:[%s344_s1 + $0x38] sm:$0xff]  ;;  %v256_v2 = vld [vmem:[%s344_s1 + $0x30] sm:$0xff]  ;;  %v255_v4 = vld [vmem:[%s344_s1 + $0x28] sm:$0xff] }
   0x2   :  { %v265_v1 = vld [vmem:[%s344_s1 + $0x78] sm:$0xff]  ;;  %154 = vmatpush.bf16.msra.mxu0 %v257_v0  ;;  %v264_v3 = vld [vmem:[%s344_s1 + $0x70] sm:$0xff]  ;;  %v263_v5 = vld [vmem:[%s344_s1 + $0x68] sm:$0xff] }
   0x3   :  { %167 = vmatpush.bf16.msra.mxu1 %v265_v1  ;;  %v254_v6 = vld [vmem:[%s344_s1 + $0x20] sm:$0xff]  ;;  %v253_v8 = vld [vmem:[%s344_s1 + $0x18] sm:$0xff]  ;;  %v252_v10 = vld [vmem:[%s344_s1 + $0x10] sm:$0xff] }
   0x4   :  { %v262_v7 = vld [vmem:[%s344_s1 + $0x60] sm:$0xff]  ;;  %v261_v9 = vld [vmem:[%s344_s1 + $0x58] sm:$0xff]  ;;  %v260_v11 = vld [vmem:[%s344_s1 + $0x50] sm:$0xff] }
   0x5   :  { %v251_v12 = vld [vmem:[%s344_s1 + $0x8] sm:$0xff]  ;;  %v14_v14 = vld [vmem:[%s346_s0] sm:$0xff] }
   0x6   :  { %155 = vmatpush.bf16.msra.mxu0 %v256_v2  ;;  %v259_v13 = vld [vmem:[%s344_s1 + $0x48] sm:$0xff]  ;;  %v52_v15 = vunpack.c.l.b16 %v14_v14  ;;  %v53_v16 = vunpack.c.h.b16 %v14_v14  ;;  %v250_v17 = vld [vmem:[%s344_s1] sm:$0xff] }
   0x7   :  { %168 = vmatpush.bf16.msra.mxu1 %v264_v3  ;;  %v258_v18 = vld [vmem:[%s344_s1 + $0x40] sm:$0xff] }
   0x8   :  { %v54_v19 = vpack.c.b16 %v52_v15, %v52_v15  ;;  %v55_v20 = vpack.c.b16 %v53_v16, %v53_v16  ;;  %v266_v21 = vld [vmem:[%s345_s2] ss:$0 sm:$0xff] }
   0xa   :  { %156 = vmatpush.bf16.msra.mxu0 %v255_v4 }
   0xb   :  { %169 = vmatpush.bf16.msra.mxu1 %v263_v5 }
   0xe   :  { %157 = vmatpush.bf16.msra.mxu0 %v254_v6 }
   0xf   :  { %170 = vmatpush.bf16.msra.mxu1 %v262_v7 }
  0x12   :  { %158 = vmatpush.bf16.msra.mxu0 %v253_v8 }
  0x13   :  { %171 = vmatpush.bf16.msra.mxu1 %v261_v9 }
  0x16   :  { %159 = vmatpush.bf16.msra.mxu0 %v252_v10 }
  0x17   :  { %172 = vmatpush.bf16.msra.mxu1 %v260_v11 }
  0x1a   :  { %160 = vmatpush.bf16.msra.mxu0 %v251_v12 }
  0x1b   :  { %173 = vmatpush.bf16.msra.mxu1 %v259_v13 }
  0x1e   :  { %161 = vmatpush.bf16.msra.mxu0 %v250_v17 }
  0x1f   :  { %174 = vmatpush.bf16.msra.mxu1 %v258_v18 }
  0x21   :  { %162 = vmatmul.bf16.vlgmr.msra.gmra.mxu0 %v54_v19 }
  0x22   :  { %175 = vmatmul.bf16.vlgmr.msra.gmra.mxu1 %v55_v20 }
  0x9e   :  { %v163_v22 = vpop.f32.mrf.mxu0 }
  0x9f   :  { %v176_v23 = vpop.f32.mrf.mxu1  ;;  %v164_v24 = vadd.f32 %v266_v21, %v163_v22 }
  0xa1   :  { %v177_v25 = vadd.f32 %v176_v23, %v164_v24 }
  0xa3   :  { %v180_v26 = vmax.f32 %v177_v25, 0.0 }
  0xa5   :  { %181 = vst [vmem:[%s347_s3] sm:$0xff] %v180_v26 }
  0xa6   :  { %v165_v27 = vpop.f32.mrf.mxu0 }
  0xa7   :  { %v178_v28 = vpop.f32.mrf.mxu1 }

// kernel: _lambda_.42
= control target key start
LH: loop header
LB: loop body
LE: loop exit
PB: predicated region body
PF: predicated region fallthrough
CT: control target
= control target key end

     0   :  { %s2827_s1 = inlined_call_operand.vmem [shape: bf16[1152,256], index: 1, kind: input, shape index: {}]   ;;  %s2828_s0 = inlined_call_operand.vmem [shape: bf16[8,1152], index: 0, kind: input, shape index: {}]   ;;  %s2829_s2 = inlined_call_operand.vmem [shape: f32[1,256], index: 2, kind: input, shape index: {}]   ;;  %s2830_s3 = inlined_call_operand.vmem [shape: f32[8,256], index: 3, kind: output, shape index: {}]  }
   0x1   :  { %v1221_v0 = vld [vmem:[%s2827_s1 + $0x70] sm:$0xf]  ;;  %v1754_v1 = vld [vmem:[%s2827_s1 + $0x74] sm:$0xf0]  ;;  %v1213_v11 = vld [vmem:[%s2827_s1 + $0x60] sm:$0xf] }
   0x2   :  { %v1285_v2 = vld [vmem:[%s2827_s1 + $0xf0] sm:$0xf]  ;;  %v1222_v3 = vor.u32 %v1754_v1, %v1221_v0  ;;  %v1770_v4 = vld [vmem:[%s2827_s1 + $0xf4] sm:$0xf0]  ;;  %v1752_v13 = vld [vmem:[%s2827_s1 + $0x64] sm:$0xf0] }
   0x3   :  { %v1349_v5 = vld [vmem:[%s2827_s1 + $0x170] sm:$0xf]  ;;  %v1786_v6 = vld [vmem:[%s2827_s1 + $0x174] sm:$0xf0]  ;;  %v1286_v7 = vor.u32 %v1770_v4, %v1285_v2  ;;  %v1277_v14 = vld [vmem:[%s2827_s1 + $0xe0] sm:$0xf]  ;;  %v1214_v16 = vor.u32 %v1752_v13, %v1213_v11 }
   0x4   :  { %v1350_v8 = vor.u32 %v1786_v6, %v1349_v5  ;;  %v1413_v9 = vld [vmem:[%s2827_s1 + $0x1f0] sm:$0xf]  ;;  %v1802_v10 = vld [vmem:[%s2827_s1 + $0x1f4] sm:$0xf0]  ;;  %921 = vmatpush.bf16.msra.mxu0 %v1222_v3  ;;  %v1768_v15 = vld [vmem:[%s2827_s1 + $0xe4] sm:$0xf0] }
   0x5   :  { %v1414_v12 = vor.u32 %v1802_v10, %v1413_v9  ;;  %934 = vmatpush.bf16.msra.mxu1 %v1286_v7  ;;  %v1278_v17 = vor.u32 %v1768_v15, %v1277_v14  ;;  %v1341_v18 = vld [vmem:[%s2827_s1 + $0x160] sm:$0xf]  ;;  %v1784_v19 = vld [vmem:[%s2827_s1 + $0x164] sm:$0xf0]  ;;  %v1205_v23 = vld [vmem:[%s2827_s1 + $0x50] sm:$0xf] }
   0x6   :  { %947 = vmatpush.bf16.msra.mxu2 %v1350_v8  ;;  %v1405_v20 = vld [vmem:[%s2827_s1 + $0x1e0] sm:$0xf]  ;;  %v1342_v21 = vor.u32 %v1784_v19, %v1341_v18  ;;  %v1800_v22 = vld [vmem:[%s2827_s1 + $0x1e4] sm:$0xf0]  ;;  %v1750_v24 = vld [vmem:[%s2827_s1 + $0x54] sm:$0xf0] }
   0x7   :  { %960 = vmatpush.bf16.msra.mxu3 %v1414_v12  ;;  %v1406_v25 = vor.u32 %v1800_v22, %v1405_v20  ;;  %v1269_v26 = vld [vmem:[%s2827_s1 + $0xd0] sm:$0xf]  ;;  %v1766_v27 = vld [vmem:[%s2827_s1 + $0xd4] sm:$0xf0]  ;;  %v1206_v29 = vor.u32 %v1750_v24, %v1205_v23  ;;  %v1197_v35 = vld [vmem:[%s2827_s1 + $0x40] sm:$0xf] }
   0x8   :  { %v1333_v28 = vld [vmem:[%s2827_s1 + $0x150] sm:$0xf]  ;;  %922 = vmatpush.bf16.msra.mxu0 %v1214_v16  ;;  %v1782_v30 = vld [vmem:[%s2827_s1 + $0x154] sm:$0xf0]  ;;  %v1270_v33 = vor.u32 %v1766_v27, %v1269_v26  ;;  %v1748_v36 = vld [vmem:[%s2827_s1 + $0x44] sm:$0xf0] }
   0x9   :  { %v1397_v31 = vld [vmem:[%s2827_s1 + $0x1d0] sm:$0xf]  ;;  %v1798_v32 = vld [vmem:[%s2827_s1 + $0x1d4] sm:$0xf0]  ;;  %935 = vmatpush.bf16.msra.mxu1 %v1278_v17  ;;  %v1334_v34 = vor.u32 %v1782_v30, %v1333_v28  ;;  %v1261_v37 = vld [vmem:[%s2827_s1 + $0xc0] sm:$0xf]  ;;  %v1198_v44 = vor.u32 %v1748_v36, %v1197_v35 }
   0xa   :  { %948 = vmatpush.bf16.msra.mxu2 %v1342_v21  ;;  %v1398_v38 = vor.u32 %v1798_v32, %v1397_v31  ;;  %v1764_v39 = vld [vmem:[%s2827_s1 + $0xc4] sm:$0xf0]  ;;  %v1325_v40 = vld [vmem:[%s2827_s1 + $0x140] sm:$0xf]  ;;  %v1189_v47 = vld [vmem:[%s2827_s1 + $0x30] sm:$0xf] }
   0xb   :  { %961 = vmatpush.bf16.msra.mxu3 %v1406_v25  ;;  %v1780_v41 = vld [vmem:[%s2827_s1 + $0x144] sm:$0xf0]  ;;  %v1389_v42 = vld [vmem:[%s2827_s1 + $0x1c0] sm:$0xf]  ;;  %v1262_v45 = vor.u32 %v1764_v39, %v1261_v37  ;;  %v1746_v48 = vld [vmem:[%s2827_s1 + $0x34] sm:$0xf0] }
   0xc   :  { %v1796_v43 = vld [vmem:[%s2827_s1 + $0x1c4] sm:$0xf0]  ;;  %923 = vmatpush.bf16.msra.mxu0 %v1206_v29  ;;  %v1326_v46 = vor.u32 %v1780_v41, %v1325_v40  ;;  %v1253_v49 = vld [vmem:[%s2827_s1 + $0xb0] sm:$0xf]  ;;  %v1762_v51 = vld [vmem:[%s2827_s1 + $0xb4] sm:$0xf0]  ;;  %v1190_v56 = vor.u32 %v1746_v48, %v1189_v47 }
   0xd   :  { %936 = vmatpush.bf16.msra.mxu1 %v1270_v33  ;;  %v1390_v50 = vor.u32 %v1796_v43, %v1389_v42  ;;  %v1317_v52 = vld [vmem:[%s2827_s1 + $0x130] sm:$0xf]  ;;  %v1778_v53 = vld [vmem:[%s2827_s1 + $0x134] sm:$0xf0]  ;;  %v1254_v57 = vor.u32 %v1762_v51, %v1253_v49  ;;  %v1181_v59 = vld [vmem:[%s2827_s1 + $0x20] sm:$0xf] }
   0xe   :  { %949 = vmatpush.bf16.msra.mxu2 %v1334_v34  ;;  %v1381_v54 = vld [vmem:[%s2827_s1 + $0x1b0] sm:$0xf]  ;;  %v1794_v55 = vld [vmem:[%s2827_s1 + $0x1b4] sm:$0xf0]  ;;  %v1318_v58 = vor.u32 %v1778_v53, %v1317_v52  ;;  %v1744_v60 = vld [vmem:[%s2827_s1 + $0x24] sm:$0xf0] }
   0xf   :  { %962 = vmatpush.bf16.msra.mxu3 %v1398_v38  ;;  %v1245_v61 = vld [vmem:[%s2827_s1 + $0xa0] sm:$0xf]  ;;  %v1382_v62 = vor.u32 %v1794_v55, %v1381_v54  ;;  %v1760_v63 = vld [vmem:[%s2827_s1 + $0xa4] sm:$0xf0]  ;;  %v1182_v4 = vor.u32 %v1744_v60, %v1181_v59  ;;  %v1173_v7 = vld [vmem:[%s2827_s1 + $0x10] sm:$0xf] }
  0x10   :  { %924 = vmatpush.bf16.msra.mxu0 %v1198_v44  ;;  %v1309_v0 = vld [vmem:[%s2827_s1 + $0x120] sm:$0xf]  ;;  %v1776_v1 = vld [vmem:[%s2827_s1 + $0x124] sm:$0xf0]  ;;  %v1246_v5 = vor.u32 %v1760_v63, %v1245_v61  ;;  %v1742_v8 = vld [vmem:[%s2827_s1 + $0x14] sm:$0xf0] }
  0x11   :  { %937 = vmatpush.bf16.msra.mxu1 %v1262_v45  ;;  %v1373_v2 = vld [vmem:[%s2827_s1 + $0x1a0] sm:$0xf]  ;;  %v1792_v3 = vld [vmem:[%s2827_s1 + $0x1a4] sm:$0xf0]  ;;  %v1310_v6 = vor.u32 %v1776_v1, %v1309_v0  ;;  %v1237_v9 = vld [vmem:[%s2827_s1 + $0x90] sm:$0xf]  ;;  %v1174_v16 = vor.u32 %v1742_v8, %v1173_v7 }
  0x12   :  { %950 = vmatpush.bf16.msra.mxu2 %v1326_v46  ;;  %v1374_v10 = vor.u32 %v1792_v3, %v1373_v2  ;;  %v1758_v11 = vld [vmem:[%s2827_s1 + $0x94] sm:$0xf0]  ;;  %v1301_v12 = vld [vmem:[%s2827_s1 + $0x110] sm:$0xf]  ;;  %v1165_v17 = vld [vmem:[%s2827_s1] sm:$0xf] }
  0x13   :  { %963 = vmatpush.bf16.msra.mxu3 %v1390_v50  ;;  %v1774_v13 = vld [vmem:[%s2827_s1 + $0x114] sm:$0xf0]  ;;  %v1365_v14 = vld [vmem:[%s2827_s1 + $0x190] sm:$0xf]  ;;  %v1740_v18 = vld [vmem:[%s2827_s1 + $0x4] sm:$0xf0]  ;;  %v1238_v19 = vor.u32 %v1758_v11, %v1237_v9 }
  0x14   :  { %925 = vmatpush.bf16.msra.mxu0 %v1190_v56  ;;  %v1790_v15 = vld [vmem:[%s2827_s1 + $0x194] sm:$0xf0]  ;;  %v1302_v20 = vor.u32 %v1774_v13, %v1301_v12  ;;  %v1229_v21 = vld [vmem:[%s2827_s1 + $0x80] sm:$0xf]  ;;  %v1756_v22 = vld [vmem:[%s2827_s1 + $0x84] sm:$0xf0]  ;;  %v1166_v31 = vor.u32 %v1740_v18, %v1165_v17 }
  0x15   :  { %938 = vmatpush.bf16.msra.mxu1 %v1254_v57  ;;  %v1293_v23 = vld [vmem:[%s2827_s1 + $0x100] sm:$0xf]  ;;  %v1366_v24 = vor.u32 %v1790_v15, %v1365_v14  ;;  %v1772_v25 = vld [vmem:[%s2827_s1 + $0x104] sm:$0xf0]  ;;  %v1477_v26 = vld [vmem:[%s2827_s1 + $0x270] sm:$0xf]  ;;  %v1230_v35 = vor.u32 %v1756_v22, %v1229_v21 }
  0x16   :  { %951 = vmatpush.bf16.msra.mxu2 %v1318_v58  ;;  %v1818_v27 = vld [vmem:[%s2827_s1 + $0x274] sm:$0xf0]  ;;  %v1541_v28 = vld [vmem:[%s2827_s1 + $0x2f0] sm:$0xf]  ;;  %v1357_v33 = vld [vmem:[%s2827_s1 + $0x180] sm:$0xf]  ;;  %v1294_v36 = vor.u32 %v1772_v25, %v1293_v23 }
  0x17   :  { %964 = vmatpush.bf16.msra.mxu3 %v1382_v62  ;;  %v1834_v29 = vld [vmem:[%s2827_s1 + $0x2f4] sm:$0xf0]  ;;  %v1605_v30 = vld [vmem:[%s2827_s1 + $0x370] sm:$0xf]  ;;  %v1788_v34 = vld [vmem:[%s2827_s1 + $0x184] sm:$0xf0]  ;;  %v1478_v39 = vor.u32 %v1818_v27, %v1477_v26 }
  0x18   :  { %926 = vmatpush.bf16.msra.mxu0 %v1182_v4  ;;  %v1850_v32 = vld [vmem:[%s2827_s1 + $0x374] sm:$0xf0]  ;;  %v1669_v37 = vld [vmem:[%s2827_s1 + $0x3f0] sm:$0xf]  ;;  %v1542_v40 = vor.u32 %v1834_v29, %v1541_v28  ;;  %v1469_v41 = vld [vmem:[%s2827_s1 + $0x260] sm:$0xf]  ;;  %v1358_v43 = vor.u32 %v1788_v34, %v1357_v33 }
  0x19   :  { %939 = vmatpush.bf16.msra.mxu1 %v1246_v5  ;;  %v1866_v38 = vld [vmem:[%s2827_s1 + $0x3f4] sm:$0xf0]  ;;  %v1606_v42 = vor.u32 %v1850_v32, %v1605_v30  ;;  %v1816_v44 = vld [vmem:[%s2827_s1 + $0x264] sm:$0xf0]  ;;  %v1533_v45 = vld [vmem:[%s2827_s1 + $0x2e0] sm:$0xf] }
  0x1a   :  { %952 = vmatpush.bf16.msra.mxu2 %v1310_v6  ;;  %v1832_v46 = vld [vmem:[%s2827_s1 + $0x2e4] sm:$0xf0]  ;;  %v1670_v47 = vor.u32 %v1866_v38, %v1669_v37  ;;  %v1597_v48 = vld [vmem:[%s2827_s1 + $0x360] sm:$0xf]  ;;  %v1470_v52 = vor.u32 %v1816_v44, %v1469_v41  ;;  %v1461_v54 = vld [vmem:[%s2827_s1 + $0x250] sm:$0xf] }
  0x1b   :  { %965 = vmatpush.bf16.msra.mxu3 %v1374_v10  ;;  %v1848_v49 = vld [vmem:[%s2827_s1 + $0x364] sm:$0xf0]  ;;  %v1661_v50 = vld [vmem:[%s2827_s1 + $0x3e0] sm:$0xf]  ;;  %v1534_v53 = vor.u32 %v1832_v46, %v1533_v45  ;;  %v1814_v55 = vld [vmem:[%s2827_s1 + $0x254] sm:$0xf0] }
  0x1c   :  { %927 = vmatpush.bf16.msra.mxu0 %v1174_v16  ;;  %v1864_v51 = vld [vmem:[%s2827_s1 + $0x3e4] sm:$0xf0]  ;;  %v1598_v57 = vor.u32 %v1848_v49, %v1597_v48  ;;  %v1525_v58 = vld [vmem:[%s2827_s1 + $0x2d0] sm:$0xf]  ;;  %v1830_v59 = vld [vmem:[%s2827_s1 + $0x2d4] sm:$0xf0]  ;;  %v1462_v4 = vor.u32 %v1814_v55, %v1461_v54 }
  0x1d   :  { %940 = vmatpush.bf16.msra.mxu1 %v1238_v19  ;;  %v15_v56 = vld [vmem:[%s2828_s0 + $0x8] sm:$0xff]  ;;  %v14_v61 = vld [vmem:[%s2828_s0] sm:$0xff]  ;;  %v1662_v63 = vor.u32 %v1864_v51, %v1661_v50  ;;  %v1589_v0 = vld [vmem:[%s2827_s1 + $0x350] sm:$0xf]  ;;  %v1526_v9 = vor.u32 %v1830_v59, %v1525_v58 }
  0x1e   :  { %953 = vmatpush.bf16.msra.mxu2 %v1302_v20  ;;  %v176_v60 = vunpack.c.l.b16 %v15_v56  ;;  %v177_v62 = vunpack.c.h.b16 %v15_v56  ;;  %v1846_v1 = vld [vmem:[%s2827_s1 + $0x354] sm:$0xf0]  ;;  %v174_v2 = vunpack.c.l.b16 %v14_v61  ;;  %v175_v3 = vunpack.c.h.b16 %v14_v61  ;;  %v1653_v5 = vld [vmem:[%s2827_s1 + $0x3d0] sm:$0xf]  ;;  %v1453_v10 = vld [vmem:[%s2827_s1 + $0x240] sm:$0xf] }
  0x1f   :  { %966 = vmatpush.bf16.msra.mxu3 %v1366_v24  ;;  %v1862_v6 = vld [vmem:[%s2827_s1 + $0x3d4] sm:$0xf0]  ;;  %v1590_v13 = vor.u32 %v1846_v1, %v1589_v0  ;;  %v1812_v14 = vld [vmem:[%s2827_s1 + $0x244] sm:$0xf0]  ;;  %v1517_v15 = vld [vmem:[%s2827_s1 + $0x2c0] sm:$0xf] }
  0x20   :  { %928 = vmatpush.bf16.msra.mxu0 %v1166_v31  ;;  %v2173_v7 = vpack.c.b16 %v176_v60, %v176_v60  ;;  %v2175_v8 = vpack.c.b16 %v177_v62, %v177_v62  ;;  %v2180_v11 = vpack.c.b16 %v174_v2, %v174_v2  ;;  %v2182_v12 = vpack.c.b16 %v175_v3, %v175_v3  ;;  %v1828_v16 = vld [vmem:[%s2827_s1 + $0x2c4] sm:$0xf0]  ;;  %v1581_v18 = vld [vmem:[%s2827_s1 + $0x340] sm:$0xf]  ;;  %v1445_v24 = vld [vmem:[%s2827_s1 + $0x230] sm:$0xf] }
  0x21   :  { %941 = vmatpush.bf16.msra.mxu1 %v1230_v35  ;;  %v1654_v17 = vor.u32 %v1862_v6, %v1653_v5  ;;  %v1844_v19 = vld [vmem:[%s2827_s1 + $0x344] sm:$0xf0]  ;;  %v1645_v20 = vld [vmem:[%s2827_s1 + $0x3c0] sm:$0xf]  ;;  %v1454_v22 = vor.u32 %v1812_v14, %v1453_v10  ;;  %v1518_v23 = vor.u32 %v1828_v16, %v1517_v15  ;;  %v1810_v26 = vld [vmem:[%s2827_s1 + $0x234] sm:$0xf0] }
  0x22   :  { %954 = vmatpush.bf16.msra.mxu2 %v1294_v36  ;;  %v1860_v21 = vld [vmem:[%s2827_s1 + $0x3c4] sm:$0xf0]  ;;  %v1582_v25 = vor.u32 %v1844_v19, %v1581_v18  ;;  %v1509_v27 = vld [vmem:[%s2827_s1 + $0x2b0] sm:$0xf]  ;;  %v1826_v28 = vld [vmem:[%s2827_s1 + $0x2b4] sm:$0xf0]  ;;  %v1446_v34 = vor.u32 %v1810_v26, %v1445_v24 }
  0x23   :  { %967 = vmatpush.bf16.msra.mxu3 %v1358_v43  ;;  %929 = vmatmul.bf16.vlgmr.msra.gmra.mxu0 %v2180_v11  ;;  %v1646_v29 = vor.u32 %v1860_v21, %v1645_v20  ;;  %v1573_v30 = vld [vmem:[%s2827_s1 + $0x330] sm:$0xf]  ;;  %v1842_v31 = vld [vmem:[%s2827_s1 + $0x334] sm:$0xf0]  ;;  %v1510_v35 = vor.u32 %v1826_v28, %v1509_v27  ;;  %v1437_v36 = vld [vmem:[%s2827_s1 + $0x220] sm:$0xf] }
  0x24   :  { %973 = vmatpush.bf16.msrb.mxu0 %v1478_v39  ;;  %942 = vmatmul.bf16.vlgmr.msra.gmra.mxu1 %v2182_v12  ;;  %v1637_v32 = vld [vmem:[%s2827_s1 + $0x3b0] sm:$0xf]  ;;  %v1858_v33 = vld [vmem:[%s2827_s1 + $0x3b4] sm:$0xf0]  ;;  %v1574_v37 = vor.u32 %v1842_v31, %v1573_v30  ;;  %v1808_v38 = vld [vmem:[%s2827_s1 + $0x224] sm:$0xf0] }
  0x25   :  { %986 = vmatpush.bf16.msrb.mxu1 %v1542_v40  ;;  %955 = vmatmul.bf16.vlgmr.msra.gmra.mxu2 %v2173_v7  ;;  %v1501_v39 = vld [vmem:[%s2827_s1 + $0x2a0] sm:$0xf]  ;;  %v1824_v40 = vld [vmem:[%s2827_s1 + $0x2a4] sm:$0xf0]  ;;  %v1638_v41 = vor.u32 %v1858_v33, %v1637_v32  ;;  %v1438_v46 = vor.u32 %v1808_v38, %v1437_v36  ;;  %v1429_v48 = vld [vmem:[%s2827_s1 + $0x210] sm:$0xf] }
  0x26   :  { %999 = vmatpush.bf16.msrb.mxu2 %v1606_v42  ;;  %968 = vmatmul.bf16.vlgmr.msra.gmra.mxu3 %v2175_v8  ;;  %v1565_v42 = vld [vmem:[%s2827_s1 + $0x320] sm:$0xf]  ;;  %v1840_v43 = vld [vmem:[%s2827_s1 + $0x324] sm:$0xf0]  ;;  %v1806_v50 = vld [vmem:[%s2827_s1 + $0x214] sm:$0xf0] }
  0x27   :  { %1012 = vmatpush.bf16.msrb.mxu3 %v1670_v47  ;;  %v1629_v44 = vld [vmem:[%s2827_s1 + $0x3a0] sm:$0xf]  ;;  %v1856_v45 = vld [vmem:[%s2827_s1 + $0x3a4] sm:$0xf0]  ;;  %v1502_v47 = vor.u32 %v1824_v40, %v1501_v39  ;;  %v1566_v49 = vor.u32 %v1840_v43, %v1565_v42  ;;  %v1493_v51 = vld [vmem:[%s2827_s1 + $0x290] sm:$0xf]  ;;  %v1430_v60 = vor.u32 %v1806_v50, %v1429_v48 }
  0x28   :  { %974 = vmatpush.bf16.msrb.mxu0 %v1470_v52  ;;  %v1822_v52 = vld [vmem:[%s2827_s1 + $0x294] sm:$0xf0]  ;;  %v1557_v54 = vld [vmem:[%s2827_s1 + $0x310] sm:$0xf]  ;;  %v1421_v58 = vld [vmem:[%s2827_s1 + $0x200] sm:$0xf] }
  0x29   :  { %987 = vmatpush.bf16.msrb.mxu1 %v1534_v53  ;;  %v1630_v53 = vor.u32 %v1856_v45, %v1629_v44  ;;  %v1838_v55 = vld [vmem:[%s2827_s1 + $0x314] sm:$0xf0]  ;;  %v1621_v56 = vld [vmem:[%s2827_s1 + $0x390] sm:$0xf]  ;;  %v1804_v59 = vld [vmem:[%s2827_s1 + $0x204] sm:$0xf0]  ;;  %v1494_v61 = vor.u32 %v1822_v52, %v1493_v51 }
  0x2a   :  { %1000 = vmatpush.bf16.msrb.mxu2 %v1598_v57  ;;  %v1854_v57 = vld [vmem:[%s2827_s1 + $0x394] sm:$0xf0]  ;;  %v1485_v62 = vld [vmem:[%s2827_s1 + $0x280] sm:$0xf]  ;;  %v16_v0 = vld [vmem:[%s2828_s0 + $0x10] sm:$0xff]  ;;  %v1558_v1 = vor.u32 %v1838_v55, %v1557_v54 }
  0x2b   :  { %1013 = vmatpush.bf16.msrb.mxu3 %v1662_v63  ;;  %v1820_v63 = vld [vmem:[%s2827_s1 + $0x284] sm:$0xf0]  ;;  %v1549_v2 = vld [vmem:[%s2827_s1 + $0x300] sm:$0xf]  ;;  %v1622_v5 = vor.u32 %v1854_v57, %v1621_v56  ;;  %v1733_v6 = vld [vmem:[%s2827_s1 + $0x470] sm:$0xf]  ;;  %v178_v16 = vunpack.c.l.b16 %v16_v0  ;;  %v179_v26 = vunpack.c.h.b16 %v16_v0 }
  0x2c   :  { %975 = vmatpush.bf16.msrb.mxu0 %v1462_v4  ;;  %v1836_v3 = vld [vmem:[%s2827_s1 + $0x304] sm:$0xf0]  ;;  %v17_v4 = vld [vmem:[%s2828_s0 + $0x18] sm:$0xff]  ;;  %v1753_v10 = vld [vmem:[%s2827_s1 + $0x74] sm:$0xf]  ;;  %v1486_v18 = vor.u32 %v1820_v63, %v1485_v62 }
  0x2d   :  { %988 = vmatpush.bf16.msrb.mxu1 %v1526_v9  ;;  %v1882_v9 = vld [vmem:[%s2827_s1 + $0x474] sm:$0xf0]  ;;  %v1769_v14 = vld [vmem:[%s2827_s1 + $0xf4] sm:$0xf]  ;;  %v1287_v15 = vld [vmem:[%s2827_s1 + $0xf8] sm:$0xf0]  ;;  %v180_v21 = vunpack.c.l.b16 %v17_v4  ;;  %v2353_v36 = vpack.c.b16 %v178_v16, %v178_v16  ;;  %v2363_v43 = vpack.c.b16 %v179_v26, %v179_v26 }
  0x2e   :  { %1001 = vmatpush.bf16.msrb.mxu2 %v1590_v13  ;;  %v1223_v13 = vld [vmem:[%s2827_s1 + $0x78] sm:$0xf0]  ;;  %v1613_v19 = vld [vmem:[%s2827_s1 + $0x380] sm:$0xf]  ;;  %v1852_v20 = vld [vmem:[%s2827_s1 + $0x384] sm:$0xf0]  ;;  %v1290_v28 = vor.u32 %v1769_v14, %v1287_v15 }
  0x2f   :  { %1014 = vmatpush.bf16.msrb.mxu3 %v1654_v17  ;;  %v1422_v17 = vor.u32 %v1804_v59, %v1421_v58  ;;  %v1785_v24 = vld [vmem:[%s2827_s1 + $0x174] sm:$0xf]  ;;  %v1226_v27 = vor.u32 %v1753_v10, %v1223_v13  ;;  %v1880_v30 = vld [vmem:[%s2827_s1 + $0x464] sm:$0xf0]  ;;  %v1751_v31 = vld [vmem:[%s2827_s1 + $0x64] sm:$0xf]  ;;  %v1614_v32 = vor.u32 %v1852_v20, %v1613_v19  ;;  %v2355_v39 = vpack.c.b16 %v180_v21, %v180_v21 }
  0x30   :  { %976 = vmatpush.bf16.msrb.mxu0 %v1454_v22  ;;  %v1550_v22 = vor.u32 %v1836_v3, %v1549_v2  ;;  %v1215_v33 = vld [vmem:[%s2827_s1 + $0x68] sm:$0xf0]  ;;  %v1749_v48 = vld [vmem:[%s2827_s1 + $0x54] sm:$0xf]  ;;  %v1207_v50 = vld [vmem:[%s2827_s1 + $0x58] sm:$0xf0] }
  0x31   :  { %989 = vmatpush.bf16.msrb.mxu1 %v1518_v23  ;;  %v1734_v23 = vor.u32 %v1882_v9, %v1733_v6  ;;  %v1343_v42 = vld [vmem:[%s2827_s1 + $0x168] sm:$0xf0]  ;;  %v1218_v44 = vor.u32 %v1751_v31, %v1215_v33  ;;  %v1765_v51 = vld [vmem:[%s2827_s1 + $0xd4] sm:$0xf]  ;;  %v1271_v52 = vld [vmem:[%s2827_s1 + $0xd8] sm:$0xf0]  ;;  %v1210_v57 = vor.u32 %v1749_v48, %v1207_v50 }
  0x32   :  { %1002 = vmatpush.bf16.msrb.mxu2 %v1582_v25  ;;  %v1351_v25 = vld [vmem:[%s2827_s1 + $0x178] sm:$0xf0]  ;;  %v1781_v55 = vld [vmem:[%s2827_s1 + $0x154] sm:$0xf]  ;;  %v1274_v58 = vor.u32 %v1765_v51, %v1271_v52  ;;  %v1709_v59 = vld [vmem:[%s2827_s1 + $0x440] sm:$0xf] }
  0x33   :  { %1015 = vmatpush.bf16.msrb.mxu3 %v1646_v29  ;;  %v1725_v29 = vld [vmem:[%s2827_s1 + $0x460] sm:$0xf]  ;;  %v1354_v38 = vor.u32 %v1785_v24, %v1351_v25  ;;  %v1335_v56 = vld [vmem:[%s2827_s1 + $0x158] sm:$0xf0]  ;;  %v1199_v62 = vld [vmem:[%s2827_s1 + $0x48] sm:$0xf0] }
  0x34   :  { %977 = vmatpush.bf16.msrb.mxu0 %v1446_v34  ;;  %v1767_v34 = vld [vmem:[%s2827_s1 + $0xe4] sm:$0xf]  ;;  %v1726_v40 = vor.u32 %v1880_v30, %v1725_v29  ;;  %v1263_v0 = vld [vmem:[%s2827_s1 + $0xc8] sm:$0xf0]  ;;  %v1701_v9 = vld [vmem:[%s2827_s1 + $0x430] sm:$0xf] }
  0x35   :  { %990 = vmatpush.bf16.msrb.mxu1 %v1510_v35  ;;  %v1279_v35 = vld [vmem:[%s2827_s1 + $0xe8] sm:$0xf0]  ;;  %v1763_v63 = vld [vmem:[%s2827_s1 + $0xc4] sm:$0xf]  ;;  %v1874_v10 = vld [vmem:[%s2827_s1 + $0x434] sm:$0xf0] }
  0x36   :  { %1003 = vmatpush.bf16.msrb.mxu2 %v1574_v37  ;;  %v181_v37 = vunpack.c.h.b16 %v17_v4  ;;  %v1282_v45 = vor.u32 %v1767_v34, %v1279_v35  ;;  %v1779_v3 = vld [vmem:[%s2827_s1 + $0x144] sm:$0xf]  ;;  %v1327_v4 = vld [vmem:[%s2827_s1 + $0x148] sm:$0xf0]  ;;  %v1266_v6 = vor.u32 %v1763_v63, %v1263_v0  ;;  %v1745_v13 = vld [vmem:[%s2827_s1 + $0x34] sm:$0xf] }
  0x37   :  { %1016 = vmatpush.bf16.msrb.mxu3 %v1638_v41  ;;  %v1783_v41 = vld [vmem:[%s2827_s1 + $0x164] sm:$0xf]  ;;  %v1191_v14 = vld [vmem:[%s2827_s1 + $0x38] sm:$0xf0]  ;;  %v1761_v15 = vld [vmem:[%s2827_s1 + $0xb4] sm:$0xf] }
  0x38   :  { %978 = vmatpush.bf16.msrb.mxu0 %v1438_v46  ;;  %v1717_v46 = vld [vmem:[%s2827_s1 + $0x450] sm:$0xf]  ;;  %v1255_v16 = vld [vmem:[%s2827_s1 + $0xb8] sm:$0xf0]  ;;  %v1777_v19 = vld [vmem:[%s2827_s1 + $0x134] sm:$0xf]  ;;  %v1194_v21 = vor.u32 %v1745_v13, %v1191_v14 }
  0x39   :  { %991 = vmatpush.bf16.msrb.mxu1 %v1502_v47  ;;  %v1878_v47 = vld [vmem:[%s2827_s1 + $0x454] sm:$0xf0]  ;;  %v1319_v20 = vld [vmem:[%s2827_s1 + $0x138] sm:$0xf0]  ;;  %v1872_v24 = vld [vmem:[%s2827_s1 + $0x424] sm:$0xf0] }
  0x3a   :  { %1004 = vmatpush.bf16.msrb.mxu2 %v1566_v49  ;;  %v2375_v49 = vpack.c.b16 %v181_v37, %v181_v37  ;;  %v1718_v54 = vor.u32 %v1878_v47, %v1717_v46  ;;  %v1743_v25 = vld [vmem:[%s2827_s1 + $0x24] sm:$0xf]  ;;  %v1183_v26 = vld [vmem:[%s2827_s1 + $0x28] sm:$0xf0]  ;;  %v1322_v29 = vor.u32 %v1777_v19, %v1319_v20  ;;  %v1685_v35 = vld [vmem:[%s2827_s1 + $0x410] sm:$0xf] }
  0x3b   :  { %1017 = vmatpush.bf16.msrb.mxu3 %v1630_v53  ;;  %v1346_v53 = vor.u32 %v1783_v41, %v1343_v42  ;;  %v1775_v31 = vld [vmem:[%s2827_s1 + $0x124] sm:$0xf]  ;;  %v1186_v33 = vor.u32 %v1743_v25, %v1183_v26  ;;  %v1870_v37 = vld [vmem:[%s2827_s1 + $0x414] sm:$0xf0]  ;;  %v1757_v41 = vld [vmem:[%s2827_s1 + $0x94] sm:$0xf] }
  0x3c   :  { %979 = vmatpush.bf16.msrb.mxu0 %v1430_v60  ;;  %v1876_v60 = vld [vmem:[%s2827_s1 + $0x444] sm:$0xf0]  ;;  %v1239_v42 = vld [vmem:[%s2827_s1 + $0x98] sm:$0xf0]  ;;  %v1686_v46 = vor.u32 %v1870_v37, %v1685_v35  ;;  %v1677_v48 = vld [vmem:[%s2827_s1 + $0x400] sm:$0xf] }
  0x3d   :  { %992 = vmatpush.bf16.msrb.mxu1 %v1494_v61  ;;  %v1747_v61 = vld [vmem:[%s2827_s1 + $0x44] sm:$0xf]  ;;  %v1710_v2 = vor.u32 %v1876_v60, %v1709_v59  ;;  %v1303_v47 = vld [vmem:[%s2827_s1 + $0x118] sm:$0xf0]  ;;  %v18_v50 = vld [vmem:[%s2828_s0 + $0x20] sm:$0xf]  ;;  %v1242_v52 = vor.u32 %v1757_v41, %v1239_v42 }
  0x3e   :  { %1005 = vmatpush.bf16.msrb.mxu2 %v1558_v1  ;;  %v1338_v1 = vor.u32 %v1781_v55, %v1335_v56  ;;  %v1167_v55 = vld [vmem:[%s2827_s1 + $0x8] sm:$0xf0]  ;;  %v1755_v56 = vld [vmem:[%s2827_s1 + $0x84] sm:$0xf]  ;;  %v1415_v60 = vld [vmem:[%s2827_s1 + $0x1f8] sm:$0xf0]  ;;  %v182_v63 = vunpack.c.l.b16 %v18_v50 }
  0x3f   :  { %1018 = vmatpush.bf16.msrb.mxu3 %v1622_v5  ;;  %v1202_v5 = vor.u32 %v1747_v61, %v1199_v62  ;;  %v1817_v61 = vld [vmem:[%s2827_s1 + $0x274] sm:$0xf]  ;;  %v1479_v62 = vld [vmem:[%s2827_s1 + $0x278] sm:$0xf0]  ;;  %v1815_v19 = vld [vmem:[%s2827_s1 + $0x264] sm:$0xf] }
  0x40   :  { %980 = vmatpush.bf16.msrb.mxu0 %v1422_v17  ;;  %v1330_v17 = vor.u32 %v1779_v3, %v1327_v4  ;;  %v1849_v13 = vld [vmem:[%s2827_s1 + $0x374] sm:$0xf]  ;;  %v1607_v14 = vld [vmem:[%s2827_s1 + $0x378] sm:$0xf0]  ;;  %v1471_v20 = vld [vmem:[%s2827_s1 + $0x268] sm:$0xf0] }
  0x41   :  { %993 = vmatpush.bf16.msrb.mxu1 %v1486_v18  ;;  %v1702_v18 = vor.u32 %v1874_v10, %v1701_v9  ;;  %v1482_v10 = vor.u32 %v1817_v61, %v1479_v62  ;;  %v1474_v26 = vor.u32 %v1815_v19, %v1471_v20  ;;  %v1527_v35 = vld [vmem:[%s2827_s1 + $0x2d8] sm:$0xf0]  ;;  %v1845_v41 = vld [vmem:[%s2827_s1 + $0x354] sm:$0xf] }
  0x42   :  { %1006 = vmatpush.bf16.msrb.mxu2 %v1550_v22  ;;  %v1258_v22 = vor.u32 %v1761_v15, %v1255_v16  ;;  %v1799_v15 = vld [vmem:[%s2827_s1 + $0x1e4] sm:$0xf]  ;;  %v1591_v42 = vld [vmem:[%s2827_s1 + $0x358] sm:$0xf0]  ;;  %v1789_v19 = vld [vmem:[%s2827_s1 + $0x194] sm:$0xf] }
  0x43   :  { %1019 = vmatpush.bf16.msrb.mxu3 %v1614_v32  ;;  %981 = vmatmul.bf16.vlgmr.msrb.gmra.mxu0 %v2353_v36  ;;  %v1311_v32 = vld [vmem:[%s2827_s1 + $0x128] sm:$0xf0]  ;;  %v1594_v50 = vor.u32 %v1845_v41, %v1591_v42  ;;  %v1671_v41 = vld [vmem:[%s2827_s1 + $0x3f8] sm:$0xf0] }
  0x44   :  { %1025 = vmatpush.bf16.msra.mxu0 %v1734_v23  ;;  %994 = vmatmul.bf16.vlgmr.msrb.gmra.mxu1 %v2363_v43  ;;  %v1693_v23 = vld [vmem:[%s2827_s1 + $0x420] sm:$0xf] }
  0x45   :  { %1038 = vmatpush.bf16.msra.mxu1 %v1226_v27  ;;  %1007 = vmatmul.bf16.vlgmr.msrb.gmra.mxu2 %v2355_v39  ;;  %v1759_v27 = vld [vmem:[%s2827_s1 + $0xa4] sm:$0xf]  ;;  %v1694_v30 = vor.u32 %v1872_v24, %v1693_v23  ;;  %v1535_v23 = vld [vmem:[%s2827_s1 + $0x2e8] sm:$0xf0]  ;;  %v1610_v24 = vor.u32 %v1849_v13, %v1607_v14 }
  0x46   :  { %1051 = vmatpush.bf16.msra.mxu2 %v1290_v28  ;;  %1020 = vmatmul.bf16.vlgmr.msrb.gmra.mxu3 %v2375_v49  ;;  %v1247_v28 = vld [vmem:[%s2827_s1 + $0xa8] sm:$0xf0] }
  0x47   :  { %1064 = vmatpush.bf16.msra.mxu3 %v1354_v38  ;;  %v1250_v34 = vor.u32 %v1759_v27, %v1247_v28  ;;  %v1741_v38 = vld [vmem:[%s2827_s1 + $0x14] sm:$0xf]  ;;  %v1847_v27 = vld [vmem:[%s2827_s1 + $0x364] sm:$0xf]  ;;  %v1599_v28 = vld [vmem:[%s2827_s1 + $0x368] sm:$0xf0] }
  0x48   :  { %1026 = vmatpush.bf16.msra.mxu0 %v1726_v40  ;;  %v1175_v40 = vld [vmem:[%s2827_s1 + $0x18] sm:$0xf0]  ;;  %v1602_v37 = vor.u32 %v1847_v27, %v1599_v28  ;;  %v1837_v27 = vld [vmem:[%s2827_s1 + $0x314] sm:$0xf] }
  0x49   :  { %1039 = vmatpush.bf16.msra.mxu1 %v1218_v44  ;;  %v1314_v44 = vor.u32 %v1775_v31, %v1311_v32  ;;  %v1178_v51 = vor.u32 %v1741_v38, %v1175_v40  ;;  %v1399_v31 = vld [vmem:[%s2827_s1 + $0x1d8] sm:$0xf0]  ;;  %v1813_v32 = vld [vmem:[%s2827_s1 + $0x254] sm:$0xf] }
  0x4a   :  { %1052 = vmatpush.bf16.msra.mxu2 %v1282_v45  ;;  %v1773_v45 = vld [vmem:[%s2827_s1 + $0x114] sm:$0xf] }
  0x4b   :  { %1065 = vmatpush.bf16.msra.mxu3 %v1346_v53  ;;  %v1868_v53 = vld [vmem:[%s2827_s1 + $0x404] sm:$0xf0]  ;;  %v1306_v59 = vor.u32 %v1773_v45, %v1303_v47  ;;  %v1811_v45 = vld [vmem:[%s2827_s1 + $0x244] sm:$0xf] }
  0x4c   :  { %1027 = vmatpush.bf16.msra.mxu0 %v1718_v54  ;;  %v1739_v54 = vld [vmem:[%s2827_s1 + $0x4] sm:$0xf]  ;;  %v1678_v0 = vor.u32 %v1868_v53, %v1677_v48  ;;  %v1519_v48 = vld [vmem:[%s2827_s1 + $0x2c8] sm:$0xf0] }
  0x4d   :  { %1040 = vmatpush.bf16.msra.mxu1 %v1210_v57  ;;  %v1231_v57 = vld [vmem:[%s2827_s1 + $0x88] sm:$0xf0]  ;;  %v1170_v3 = vor.u32 %v1739_v54, %v1167_v55  ;;  %v1827_v47 = vld [vmem:[%s2827_s1 + $0x2c4] sm:$0xf]  ;;  %v1793_v54 = vld [vmem:[%s2827_s1 + $0x1b4] sm:$0xf] }
  0x4e   :  { %1053 = vmatpush.bf16.msra.mxu2 %v1274_v58  ;;  %v1801_v58 = vld [vmem:[%s2827_s1 + $0x1f4] sm:$0xf]  ;;  %v1234_v4 = vor.u32 %v1755_v56, %v1231_v57  ;;  %v1843_v53 = vld [vmem:[%s2827_s1 + $0x344] sm:$0xf]  ;;  %v1522_v55 = vor.u32 %v1827_v47, %v1519_v48  ;;  %v1383_v56 = vld [vmem:[%s2827_s1 + $0x1b8] sm:$0xf0] }
  0x4f   :  { %1066 = vmatpush.bf16.msra.mxu3 %v1338_v1  ;;  %v1833_v1 = vld [vmem:[%s2827_s1 + $0x2f4] sm:$0xf]  ;;  %v1418_v9 = vor.u32 %v1801_v58, %v1415_v60  ;;  %v1447_v58 = vld [vmem:[%s2827_s1 + $0x238] sm:$0xf0]  ;;  %v1386_v62 = vor.u32 %v1793_v54, %v1383_v56  ;;  %v1551_v47 = vld [vmem:[%s2827_s1 + $0x308] sm:$0xf0] }
  0x50   :  { %1028 = vmatpush.bf16.msra.mxu0 %v1710_v2  ;;  %v1543_v2 = vld [vmem:[%s2827_s1 + $0x2f8] sm:$0xf0]  ;;  %v1809_v57 = vld [vmem:[%s2827_s1 + $0x234] sm:$0xf]  ;;  %v1879_v54 = vld [vmem:[%s2827_s1 + $0x464] sm:$0xf] }
  0x51   :  { %1041 = vmatpush.bf16.msra.mxu1 %v1202_v5  ;;  %v1771_v5 = vld [vmem:[%s2827_s1 + $0x104] sm:$0xf]  ;;  %v1546_v16 = vor.u32 %v1833_v1, %v1543_v2  ;;  %v1511_v60 = vld [vmem:[%s2827_s1 + $0x2b8] sm:$0xf0] }
  0x52   :  { %1054 = vmatpush.bf16.msra.mxu2 %v1266_v6  ;;  %v1295_v6 = vld [vmem:[%s2827_s1 + $0x108] sm:$0xf0]  ;;  %v1575_v1 = vld [vmem:[%s2827_s1 + $0x338] sm:$0xf0]  ;;  %v1791_v2 = vld [vmem:[%s2827_s1 + $0x1a4] sm:$0xf] }
  0x53   :  { %1067 = vmatpush.bf16.msra.mxu3 %v1330_v17  ;;  %v2545_v17 = vpack.c.b16 %v182_v63, %v182_v63  ;;  %v1450_v63 = vor.u32 %v1809_v57, %v1447_v58  ;;  %v1861_v58 = vld [vmem:[%s2827_s1 + $0x3d4] sm:$0xf] }
  0x54   :  { %1029 = vmatpush.bf16.msra.mxu0 %v1702_v18  ;;  %v1407_v18 = vld [vmem:[%s2827_s1 + $0x1e8] sm:$0xf0] }
  0x55   :  { %1042 = vmatpush.bf16.msra.mxu1 %v1194_v21  ;;  %v1298_v21 = vor.u32 %v1771_v5, %v1295_v6  ;;  %v1410_v25 = vor.u32 %v1799_v15, %v1407_v18  ;;  %v1807_v5 = vld [vmem:[%s2827_s1 + $0x224] sm:$0xf]  ;;  %v1439_v6 = vld [vmem:[%s2827_s1 + $0x228] sm:$0xf0] }
  0x56   :  { %1055 = vmatpush.bf16.msra.mxu2 %v1258_v22  ;;  %v1831_v22 = vld [vmem:[%s2827_s1 + $0x2e4] sm:$0xf]  ;;  %v1442_v15 = vor.u32 %v1807_v5, %v1439_v6  ;;  %v1567_v18 = vld [vmem:[%s2827_s1 + $0x328] sm:$0xf0]  ;;  %v1703_v5 = vld [vmem:[%s2827_s1 + $0x438] sm:$0xf0] }
  0x57   :  { %1068 = vmatpush.bf16.msra.mxu3 %v1322_v29  ;;  %v1797_v29 = vld [vmem:[%s2827_s1 + $0x1d4] sm:$0xf] }
  0x58   :  { %1030 = vmatpush.bf16.msra.mxu0 %v1694_v30  ;;  %v1538_v30 = vor.u32 %v1831_v22, %v1535_v23  ;;  %v1402_v38 = vor.u32 %v1797_v29, %v1399_v31  ;;  %v1805_v22 = vld [vmem:[%s2827_s1 + $0x214] sm:$0xf]  ;;  %v1431_v23 = vld [vmem:[%s2827_s1 + $0x218] sm:$0xf0]  ;;  %v1787_v31 = vld [vmem:[%s2827_s1 + $0x184] sm:$0xf] }
  0x59   :  { %1043 = vmatpush.bf16.msra.mxu1 %v1186_v33  ;;  %v1463_v33 = vld [vmem:[%s2827_s1 + $0x258] sm:$0xf0]  ;;  %v1434_v29 = vor.u32 %v1805_v22, %v1431_v23 }
  0x5a   :  { %1056 = vmatpush.bf16.msra.mxu2 %v1250_v34  ;;  %v1829_v34 = vld [vmem:[%s2827_s1 + $0x2d4] sm:$0xf]  ;;  %v1466_v40 = vor.u32 %v1813_v32, %v1463_v33  ;;  %v1359_v32 = vld [vmem:[%s2827_s1 + $0x188] sm:$0xf0]  ;;  %v1687_v22 = vld [vmem:[%s2827_s1 + $0x418] sm:$0xf0] }
  0x5b   :  { %1069 = vmatpush.bf16.msra.mxu3 %v1314_v44  ;;  %v1530_v44 = vor.u32 %v1829_v34, %v1527_v35  ;;  %v1803_v34 = vld [vmem:[%s2827_s1 + $0x204] sm:$0xf]  ;;  %v1423_v35 = vld [vmem:[%s2827_s1 + $0x208] sm:$0xf0] }
  0x5c   :  { %1031 = vmatpush.bf16.msra.mxu0 %v1686_v46  ;;  %v1455_v46 = vld [vmem:[%s2827_s1 + $0x248] sm:$0xf0] }
  0x5d   :  { %1044 = vmatpush.bf16.msra.mxu1 %v1178_v51 }
  0x5e   :  { %1057 = vmatpush.bf16.msra.mxu2 %v1242_v52  ;;  %v1458_v52 = vor.u32 %v1811_v45, %v1455_v46  ;;  %v1426_v45 = vor.u32 %v1803_v34, %v1423_v35  ;;  %v1835_v46 = vld [vmem:[%s2827_s1 + $0x304] sm:$0xf] }
  0x5f   :  { %1070 = vmatpush.bf16.msra.mxu3 %v1306_v59  ;;  %v1825_v59 = vld [vmem:[%s2827_s1 + $0x2b4] sm:$0xf] }
  0x60   :  { %1032 = vmatpush.bf16.msra.mxu0 %v1678_v0  ;;  %v1841_v0 = vld [vmem:[%s2827_s1 + $0x334] sm:$0xf] }
  0x61   :  { %1045 = vmatpush.bf16.msra.mxu1 %v1170_v3  ;;  %v1514_v3 = vor.u32 %v1825_v59, %v1511_v60  ;;  %v1578_v13 = vor.u32 %v1841_v0, %v1575_v1  ;;  %v1655_v59 = vld [vmem:[%s2827_s1 + $0x3d8] sm:$0xf0]  ;;  %v1877_v60 = vld [vmem:[%s2827_s1 + $0x454] sm:$0xf]  ;;  %v1647_v0 = vld [vmem:[%s2827_s1 + $0x3c8] sm:$0xf0] }
  0x62   :  { %1058 = vmatpush.bf16.msra.mxu2 %v1234_v4  ;;  %v1375_v4 = vld [vmem:[%s2827_s1 + $0x1a8] sm:$0xf0] }
  0x63   :  { %1033 = vmatmul.bf16.vlgmr.msra.gmra.mxu0 %v2545_v17  ;;  %1071 = vmatpush.bf16.msra.mxu3 %v1298_v21  ;;  %v1378_v14 = vor.u32 %v1791_v2, %v1375_v4  ;;  %v1367_v21 = vld [vmem:[%s2827_s1 + $0x198] sm:$0xf0]  ;;  %v1857_v2 = vld [vmem:[%s2827_s1 + $0x3b4] sm:$0xf] }
  0x64   :  { %1077 = vmatpush.bf16.msrb.mxu0 %v1418_v9  ;;  %1046 = vmatmul.bf16.vlgmr.msra.gmra.mxu1 %v2180_v11  ;;  %v1391_v11 = vld [vmem:[%s2827_s1 + $0x1c8] sm:$0xf0]  ;;  %v1823_v9 = vld [vmem:[%s2827_s1 + $0x2a4] sm:$0xf]  ;;  %v1370_v28 = vor.u32 %v1789_v19, %v1367_v21  ;;  %v1873_v4 = vld [vmem:[%s2827_s1 + $0x434] sm:$0xf] }
  0x65   :  { %1090 = vmatpush.bf16.msrb.mxu1 %v1482_v10  ;;  %1059 = vmatmul.bf16.vlgmr.msra.gmra.mxu2 %v2182_v12  ;;  %v1795_v12 = vld [vmem:[%s2827_s1 + $0x1c4] sm:$0xf]  ;;  %v1503_v10 = vld [vmem:[%s2827_s1 + $0x2a8] sm:$0xf0]  ;;  %v1853_v19 = vld [vmem:[%s2827_s1 + $0x394] sm:$0xf] }
  0x66   :  { %1103 = vmatpush.bf16.msrb.mxu2 %v1546_v16  ;;  %1072 = vmatmul.bf16.vlgmr.msra.gmra.mxu3 %v2173_v7  ;;  %v1394_v51 = vor.u32 %v1795_v12, %v1391_v11  ;;  %v1583_v7 = vld [vmem:[%s2827_s1 + $0x348] sm:$0xf0]  ;;  %v1839_v16 = vld [vmem:[%s2827_s1 + $0x324] sm:$0xf]  ;;  %v1506_v20 = vor.u32 %v1823_v9, %v1503_v10  ;;  %v1881_v12 = vld [vmem:[%s2827_s1 + $0x474] sm:$0xf]  ;;  %v1362_v11 = vor.u32 %v1787_v31, %v1359_v32 }
  0x67   :  { %1116 = vmatpush.bf16.msrb.mxu3 %v1610_v24  ;;  %v1586_v61 = vor.u32 %v1843_v53, %v1583_v7  ;;  %v1821_v24 = vld [vmem:[%s2827_s1 + $0x294] sm:$0xf]  ;;  %v1663_v53 = vld [vmem:[%s2827_s1 + $0x3e8] sm:$0xf0]  ;;  %v1554_v7 = vor.u32 %v1835_v46, %v1551_v47  ;;  %v1706_v9 = vor.u32 %v1873_v4, %v1703_v5  ;;  %v1855_v10 = vld [vmem:[%s2827_s1 + $0x3a4] sm:$0xf] }
  0x68   :  { %1078 = vmatpush.bf16.msrb.mxu0 %v1410_v25  ;;  %v1495_v25 = vld [vmem:[%s2827_s1 + $0x298] sm:$0xf0]  ;;  %v1869_v21 = vld [vmem:[%s2827_s1 + $0x414] sm:$0xf] }
  0x69   :  { %1091 = vmatpush.bf16.msrb.mxu1 %v1474_v26  ;;  %v1570_v26 = vor.u32 %v1839_v16, %v1567_v18  ;;  %v1498_v33 = vor.u32 %v1821_v24, %v1495_v25  ;;  %v1690_v24 = vor.u32 %v1869_v21, %v1687_v22  ;;  %v1851_v25 = vld [vmem:[%s2827_s1 + $0x384] sm:$0xf] }
  0x6a   :  { %1104 = vmatpush.bf16.msrb.mxu2 %v1538_v30  ;;  %v1559_v30 = vld [vmem:[%s2827_s1 + $0x318] sm:$0xf0] }
  0x6b   :  { %1117 = vmatpush.bf16.msrb.mxu3 %v1602_v37  ;;  %v1819_v37 = vld [vmem:[%s2827_s1 + $0x284] sm:$0xf]  ;;  %v1562_v42 = vor.u32 %v1837_v27, %v1559_v30 }
  0x6c   :  { %1079 = vmatpush.bf16.msrb.mxu0 %v1402_v38  ;;  %v1487_v38 = vld [vmem:[%s2827_s1 + $0x288] sm:$0xf0]  ;;  %v1867_v27 = vld [vmem:[%s2827_s1 + $0x404] sm:$0xf] }
  0x6d   :  { %1092 = vmatpush.bf16.msrb.mxu1 %v1466_v40  ;;  %v1865_v40 = vld [vmem:[%s2827_s1 + $0x3f4] sm:$0xf]  ;;  %v1490_v48 = vor.u32 %v1819_v37, %v1487_v38 }
  0x6e   :  { %1105 = vmatpush.bf16.msrb.mxu2 %v1530_v44  ;;  %v1735_v44 = vld [vmem:[%s2827_s1 + $0x478] sm:$0xf0] }
  0x6f   :  { %1118 = vmatpush.bf16.msrb.mxu3 %v1594_v50  ;;  %v1674_v50 = vor.u32 %v1865_v40, %v1671_v41  ;;  %v163_v41 = vld [vmem:[%s2829_s2] sm:$0x3] }
  0x70   :  { %1080 = vmatpush.bf16.msrb.mxu0 %v1394_v51  ;;  %v1738_v51 = vor.u32 %v1881_v12, %v1735_v44 }
  0x71   :  { %1093 = vmatpush.bf16.msrb.mxu1 %v1458_v52  ;;  %v1863_v52 = vld [vmem:[%s2827_s1 + $0x3e4] sm:$0xf] }
  0x72   :  { %1106 = vmatpush.bf16.msrb.mxu2 %v1522_v55  ;;  %v1727_v55 = vld [vmem:[%s2827_s1 + $0x468] sm:$0xf0]  ;;  %v1666_v56 = vor.u32 %v1863_v52, %v1663_v53 }
  0x73   :  { %1119 = vmatpush.bf16.msrb.mxu3 %v1586_v61  ;;  %v1730_v57 = vor.u32 %v1879_v54, %v1727_v55  ;;  %v1719_v61 = vld [vmem:[%s2827_s1 + $0x458] sm:$0xf0] }
  0x74   :  { %1081 = vmatpush.bf16.msrb.mxu0 %v1386_v62  ;;  %v1658_v62 = vor.u32 %v1861_v58, %v1655_v59 }
  0x75   :  { %1094 = vmatpush.bf16.msrb.mxu1 %v1450_v63  ;;  %v1722_v63 = vor.u32 %v1877_v60, %v1719_v61 }
  0x76   :  { %1107 = vmatpush.bf16.msrb.mxu2 %v1514_v3  ;;  %v1639_v3 = vld [vmem:[%s2827_s1 + $0x3b8] sm:$0xf0] }
  0x77   :  { %1120 = vmatpush.bf16.msrb.mxu3 %v1578_v13  ;;  %v1642_v6 = vor.u32 %v1857_v2, %v1639_v3  ;;  %v1631_v13 = vld [vmem:[%s2827_s1 + $0x3a8] sm:$0xf0] }
  0x78   :  { %1082 = vmatpush.bf16.msrb.mxu0 %v1378_v14  ;;  %v1871_v14 = vld [vmem:[%s2827_s1 + $0x424] sm:$0xf]  ;;  %v1634_v16 = vor.u32 %v1855_v10, %v1631_v13 }
  0x79   :  { %1095 = vmatpush.bf16.msrb.mxu1 %v1442_v15  ;;  %v1695_v15 = vld [vmem:[%s2827_s1 + $0x428] sm:$0xf0] }
  0x7a   :  { %1108 = vmatpush.bf16.msrb.mxu2 %v1506_v20  ;;  %v1698_v18 = vor.u32 %v1871_v14, %v1695_v15  ;;  %v1623_v20 = vld [vmem:[%s2827_s1 + $0x398] sm:$0xf0] }
  0x7b   :  { %1121 = vmatpush.bf16.msrb.mxu3 %v1570_v26  ;;  %v1626_v23 = vor.u32 %v1853_v19, %v1623_v20  ;;  %v1615_v26 = vld [vmem:[%s2827_s1 + $0x388] sm:$0xf0] }
  0x7c   :  { %1083 = vmatpush.bf16.msrb.mxu0 %v1370_v28  ;;  %v1679_v28 = vld [vmem:[%s2827_s1 + $0x408] sm:$0xf0] }
  0x7d   :  { %1096 = vmatpush.bf16.msrb.mxu1 %v1434_v29  ;;  %v1618_v29 = vor.u32 %v1851_v25, %v1615_v26  ;;  %v1682_v30 = vor.u32 %v1867_v27, %v1679_v28 }
  0x7e   :  { %1109 = vmatpush.bf16.msrb.mxu2 %v1498_v33 }
  0x7f   :  { %1122 = vmatpush.bf16.msrb.mxu3 %v1562_v42  ;;  %v165_v42 = vperm.slane %v163_v41, 0 }
  0x80   :  { %1084 = vmatpush.bf16.msrb.mxu0 %v1362_v11 }
  0x81   :  { %1097 = vmatpush.bf16.msrb.mxu1 %v1426_v45 }
  0x82   :  { %1110 = vmatpush.bf16.msrb.mxu2 %v1490_v48 }
  0x83   :  { %1123 = vmatpush.bf16.msrb.mxu3 %v1554_v7  ;;  %1085 = vmatmul.bf16.vlgmr.msrb.gmra.mxu0 %v2175_v8  ;;  %v1859_v8 = vld [vmem:[%s2827_s1 + $0x3c4] sm:$0xf] }
  0x84   :  { %1129 = vmatpush.bf16.msra.mxu0 %v1674_v50  ;;  %1098 = vmatmul.bf16.vlgmr.msrb.gmra.mxu1 %v2353_v36  ;;  %v1711_v36 = vld [vmem:[%s2827_s1 + $0x448] sm:$0xf0]  ;;  %v1650_v1 = vor.u32 %v1859_v8, %v1647_v0 }
  0x85   :  { %1142 = vmatpush.bf16.msra.mxu1 %v1738_v51  ;;  %1111 = vmatmul.bf16.vlgmr.msrb.gmra.mxu2 %v2363_v43  ;;  %v1875_v43 = vld [vmem:[%s2827_s1 + $0x444] sm:$0xf] }
  0x86   :  { %1124 = vmatmul.bf16.vlgmr.msrb.gmra.mxu3 %v2355_v39  ;;  %v1714_v39 = vor.u32 %v1875_v43, %v1711_v36  ;;  %v166_v43 = vperm.slane %v163_v41, 1 }
  0x88   :  { %1130 = vmatpush.bf16.msra.mxu0 %v1666_v56 }
  0x89   :  { %1143 = vmatpush.bf16.msra.mxu1 %v1730_v57 }
  0x8c   :  { %1131 = vmatpush.bf16.msra.mxu0 %v1658_v62 }
  0x8d   :  { %1144 = vmatpush.bf16.msra.mxu1 %v1722_v63 }
  0x90   :  { %1132 = vmatpush.bf16.msra.mxu0 %v1650_v1 }
  0x91   :  { %1145 = vmatpush.bf16.msra.mxu1 %v1714_v39 }
  0x94   :  { %1133 = vmatpush.bf16.msra.mxu0 %v1642_v6 }
  0x95   :  { %1146 = vmatpush.bf16.msra.mxu1 %v1706_v9 }
  0x98   :  { %1134 = vmatpush.bf16.msra.mxu0 %v1634_v16 }
  0x99   :  { %1147 = vmatpush.bf16.msra.mxu1 %v1698_v18 }
  0x9c   :  { %1135 = vmatpush.bf16.msra.mxu0 %v1626_v23 }
  0x9d   :  { %1148 = vmatpush.bf16.msra.mxu1 %v1690_v24 }
  0xa0   :  { %1136 = vmatpush.bf16.msra.mxu0 %v1618_v29  ;;  %v930_v31 = vpop.f32.mrf.mxu0 }
  0xa1   :  { %1149 = vmatpush.bf16.msra.mxu1 %v1682_v30  ;;  %v943_v32 = vpop.f32.mrf.mxu1  ;;  %v931_v12 = vadd.f32 %v930_v31, %v165_v42 }
  0xa3   :  { %1137 = vmatmul.bf16.vlgmr.msra.gmra.mxu0 %v2375_v49  ;;  %v944_v45 = vadd.f32 %v943_v32, %v931_v12 }
  0xa4   :  { %1150 = vmatmul.bf16.vlgmr.msra.gmra.mxu1 %v2545_v17 }
  0xa8   :  { %v956_v34 = vpop.f32.mrf.mxu2  ;;  %v932_v35 = vpop.f32.mrf.mxu0 }
  0xa9   :  { %v969_v33 = vpop.f32.mrf.mxu3  ;;  %v945_v37 = vpop.f32.mrf.mxu1  ;;  %v957_v46 = vadd.f32 %v956_v34, %v944_v45 }
  0xab   :  { %v970_v50 = vadd.f32 %v969_v33, %v957_v46 }
  0xb0   :  { %v958_v40 = vpop.f32.mrf.mxu2 }
  0xb1   :  { %v971_v38 = vpop.f32.mrf.mxu3 }
  0xc0   :  { %v982_v44 = vpop.f32.mrf.mxu0 }
  0xc1   :  { %v995_v11 = vpop.f32.mrf.mxu1  ;;  %v983_v52 = vadd.f32 %v982_v44, %v970_v50 }
  0xc3   :  { %v996_v7 = vadd.f32 %v995_v11, %v983_v52 }
  0xc8   :  { %v1008_v49 = vpop.f32.mrf.mxu2  ;;  %v984_v17 = vpop.f32.mrf.mxu0 }
  0xc9   :  { %v1021_v47 = vpop.f32.mrf.mxu3  ;;  %v997_v48 = vpop.f32.mrf.mxu1  ;;  %v1009_v54 = vadd.f32 %v1008_v49, %v996_v7 }
  0xcb   :  { %v1022_v55 = vadd.f32 %v1021_v47, %v1009_v54 }
  0xd0   :  { %v1010_v51 = vpop.f32.mrf.mxu2 }
  0xd1   :  { %v1023_v53 = vpop.f32.mrf.mxu3 }
  0xe0   :  { %v1034_v56 = vpop.f32.mrf.mxu0 }
  0xe1   :  { %v1035_v57 = vadd.f32 %v1034_v56, %v1022_v55  ;;  %v1047_v58 = vpop.f32.mrf.mxu1 }
  0xe2   :  { %v1048_v39 = vadd.f32 %v1047_v58, %v166_v43 }
  0xe3   :  { %v1155_v59 = vmax.f32 %v1035_v57, 0.0 }
  0xe5   :  { %1157 = vst [vmem:[%s2830_s3] sm:$0xff] %v1155_v59 }
  0xe8   :  { %v1060_v60 = vpop.f32.mrf.mxu2  ;;  %v1036_v61 = vpop.f32.mrf.mxu0 }
  0xe9   :  { %v1073_v62 = vpop.f32.mrf.mxu3  ;;  %v1049_v63 = vpop.f32.mrf.mxu1  ;;  %v1061_v3 = vadd.f32 %v1060_v60, %v1048_v39 }
  0xeb   :  { %v1074_v9 = vadd.f32 %v1073_v62, %v1061_v3 }
  0xf0   :  { %v1062_v8 = vpop.f32.mrf.mxu2 }
  0xf1   :  { %v1075_v0 = vpop.f32.mrf.mxu3 }
 0x100   :  { %v1086_v36 = vpop.f32.mrf.mxu0 }
 0x101   :  { %v1099_v1 = vpop.f32.mrf.mxu1  ;;  %v1087_v13 = vadd.f32 %v1086_v36, %v1074_v9 }
 0x103   :  { %v1100_v15 = vadd.f32 %v1099_v1, %v1087_v13 }
 0x108   :  { %v1112_v2 = vpop.f32.mrf.mxu2  ;;  %v1088_v4 = vpop.f32.mrf.mxu0 }
 0x109   :  { %v1125_v5 = vpop.f32.mrf.mxu3  ;;  %v1101_v6 = vpop.f32.mrf.mxu1  ;;  %v1113_v16 = vadd.f32 %v1112_v2, %v1100_v15 }
 0x10b   :  { %v1126_v18 = vadd.f32 %v1125_v5, %v1113_v16 }
 0x110   :  { %v1114_v10 = vpop.f32.mrf.mxu2 }
 0x111   :  { %v1127_v14 = vpop.f32.mrf.mxu3 }
 0x120   :  { %v1138_v19 = vpop.f32.mrf.mxu0 }
 0x121   :  { %v1139_v20 = vadd.f32 %v1138_v19, %v1126_v18  ;;  %v1151_v21 = vpop.f32.mrf.mxu1 }
 0x123   :  { %v1152_v22 = vadd.f32 %v1151_v21, %v1139_v20 }
 0x125   :  { %v1156_v23 = vmax.f32 %v1152_v22, 0.0 }
 0x127   :  { %1158 = vst [vmem:[%s2830_s3 + $0x8] sm:$0xff] %v1156_v23 }
 0x128   :  { %v1140_v24 = vpop.f32.mrf.mxu0 }
 0x129   :  { %v1153_v25 = vpop.f32.mrf.mxu1 }

// kernel: _lambda_.44
= control target key start
LH: loop header
LB: loop body
LE: loop exit
PB: predicated region body
PF: predicated region fallthrough
CT: control target
= control target key end

     0   :  { %vm1147_vm0 = vcmask 1041408   ;;  %s2807_s1 = inlined_call_operand.vmem [shape: bf16[1152,256], index: 1, kind: input, shape index: {}]   ;;  %s2808_s0 = inlined_call_operand.vmem [shape: bf16[2,1152], index: 0, kind: input, shape index: {}]   ;;  %s2809_s2 = inlined_call_operand.vmem [shape: f32[1,256], index: 2, kind: input, shape index: {}]   ;;  %s2810_s3 = inlined_call_operand.vmem [shape: f32[2,256], index: 3, kind: output, shape index: {}]  }
   0x1   :  { %v1213_v0 = vld [vmem:[%s2807_s1 + $0x70] sm:$0xf]  ;;  %v1746_v1 = vld [vmem:[%s2807_s1 + $0x74] sm:$0xf0]  ;;  %v1205_v9 = vld [vmem:[%s2807_s1 + $0x60] sm:$0xf] }
   0x2   :  { %v1277_v2 = vld [vmem:[%s2807_s1 + $0xf0] sm:$0xf]  ;;  %v1214_v3 = vor.u32 %v1746_v1, %v1213_v0  ;;  %v1762_v4 = vld [vmem:[%s2807_s1 + $0xf4] sm:$0xf0]  ;;  %v1744_v10 = vld [vmem:[%s2807_s1 + $0x64] sm:$0xf0] }
   0x3   :  { %v1341_v5 = vld [vmem:[%s2807_s1 + $0x170] sm:$0xf]  ;;  %v1778_v6 = vld [vmem:[%s2807_s1 + $0x174] sm:$0xf0]  ;;  %v1278_v7 = vor.u32 %v1762_v4, %v1277_v2  ;;  %v1269_v11 = vld [vmem:[%s2807_s1 + $0xe0] sm:$0xf]  ;;  %v1206_v12 = vor.u32 %v1744_v10, %v1205_v9 }
   0x4   :  { %v1342_v8 = vor.u32 %v1778_v6, %v1341_v5  ;;  %908 = vmatpush.bf16.msra.mxu0 %v1214_v3  ;;  %v1760_v13 = vld [vmem:[%s2807_s1 + $0xe4] sm:$0xf0]  ;;  %v1405_v14 = vld [vmem:[%s2807_s1 + $0x1f0] sm:$0xf]  ;;  %v1794_v15 = vld [vmem:[%s2807_s1 + $0x1f4] sm:$0xf0] }
   0x5   :  { %921 = vmatpush.bf16.msra.mxu1 %v1278_v7  ;;  %v1270_v16 = vor.u32 %v1760_v13, %v1269_v11  ;;  %v1406_v17 = vor.u32 %v1794_v15, %v1405_v14  ;;  %v1333_v18 = vld [vmem:[%s2807_s1 + $0x160] sm:$0xf]  ;;  %v1776_v19 = vld [vmem:[%s2807_s1 + $0x164] sm:$0xf0]  ;;  %v1197_v20 = vld [vmem:[%s2807_s1 + $0x50] sm:$0xf] }
   0x6   :  { %934 = vmatpush.bf16.msra.mxu2 %v1342_v8  ;;  %v1334_v21 = vor.u32 %v1776_v19, %v1333_v18  ;;  %v1742_v22 = vld [vmem:[%s2807_s1 + $0x54] sm:$0xf0]  ;;  %v1261_v23 = vld [vmem:[%s2807_s1 + $0xd0] sm:$0xf]  ;;  %v1397_v25 = vld [vmem:[%s2807_s1 + $0x1e0] sm:$0xf] }
   0x7   :  { %v1758_v24 = vld [vmem:[%s2807_s1 + $0xd4] sm:$0xf0]  ;;  %947 = vmatpush.bf16.msra.mxu3 %v1406_v17  ;;  %v1792_v26 = vld [vmem:[%s2807_s1 + $0x1e4] sm:$0xf0]  ;;  %v1325_v27 = vld [vmem:[%s2807_s1 + $0x150] sm:$0xf]  ;;  %v1198_v28 = vor.u32 %v1742_v22, %v1197_v20 }
   0x8   :  { %909 = vmatpush.bf16.msra.mxu0 %v1206_v12  ;;  %v1398_v29 = vor.u32 %v1792_v26, %v1397_v25  ;;  %v1774_v30 = vld [vmem:[%s2807_s1 + $0x154] sm:$0xf0]  ;;  %v1189_v31 = vld [vmem:[%s2807_s1 + $0x40] sm:$0xf]  ;;  %v1740_v32 = vld [vmem:[%s2807_s1 + $0x44] sm:$0xf0]  ;;  %v1262_v33 = vor.u32 %v1758_v24, %v1261_v23 }
   0x9   :  { %922 = vmatpush.bf16.msra.mxu1 %v1270_v16  ;;  %v1326_v34 = vor.u32 %v1774_v30, %v1325_v27  ;;  %v1253_v35 = vld [vmem:[%s2807_s1 + $0xc0] sm:$0xf]  ;;  %v1756_v36 = vld [vmem:[%s2807_s1 + $0xc4] sm:$0xf0]  ;;  %v1389_v37 = vld [vmem:[%s2807_s1 + $0x1d0] sm:$0xf]  ;;  %v1190_v42 = vor.u32 %v1740_v32, %v1189_v31 }
   0xa   :  { %935 = vmatpush.bf16.msra.mxu2 %v1334_v21  ;;  %v1790_v38 = vld [vmem:[%s2807_s1 + $0x1d4] sm:$0xf0]  ;;  %v1317_v39 = vld [vmem:[%s2807_s1 + $0x140] sm:$0xf]  ;;  %v1772_v40 = vld [vmem:[%s2807_s1 + $0x144] sm:$0xf0]  ;;  %v1254_v45 = vor.u32 %v1756_v36, %v1253_v35 }
   0xb   :  { %948 = vmatpush.bf16.msra.mxu3 %v1398_v29  ;;  %v1390_v41 = vor.u32 %v1790_v38, %v1389_v37  ;;  %v1381_v43 = vld [vmem:[%s2807_s1 + $0x1c0] sm:$0xf]  ;;  %v1788_v44 = vld [vmem:[%s2807_s1 + $0x1c4] sm:$0xf0]  ;;  %v1318_v46 = vor.u32 %v1772_v40, %v1317_v39  ;;  %v1181_v47 = vld [vmem:[%s2807_s1 + $0x30] sm:$0xf] }
   0xc   :  { %910 = vmatpush.bf16.msra.mxu0 %v1198_v28  ;;  %v1738_v48 = vld [vmem:[%s2807_s1 + $0x34] sm:$0xf0]  ;;  %v1245_v49 = vld [vmem:[%s2807_s1 + $0xb0] sm:$0xf]  ;;  %v1382_v53 = vor.u32 %v1788_v44, %v1381_v43  ;;  %v1173_v59 = vld [vmem:[%s2807_s1 + $0x20] sm:$0xf] }
   0xd   :  { %923 = vmatpush.bf16.msra.mxu1 %v1262_v33  ;;  %v1754_v50 = vld [vmem:[%s2807_s1 + $0xb4] sm:$0xf0]  ;;  %v1309_v51 = vld [vmem:[%s2807_s1 + $0x130] sm:$0xf]  ;;  %v1182_v54 = vor.u32 %v1738_v48, %v1181_v47  ;;  %v1736_v60 = vld [vmem:[%s2807_s1 + $0x24] sm:$0xf0] }
   0xe   :  { %936 = vmatpush.bf16.msra.mxu2 %v1326_v34  ;;  %v1770_v52 = vld [vmem:[%s2807_s1 + $0x134] sm:$0xf0]  ;;  %v1373_v55 = vld [vmem:[%s2807_s1 + $0x1b0] sm:$0xf]  ;;  %v1246_v57 = vor.u32 %v1754_v50, %v1245_v49  ;;  %v1237_v61 = vld [vmem:[%s2807_s1 + $0xa0] sm:$0xf]  ;;  %v1174_v2 = vor.u32 %v1736_v60, %v1173_v59 }
   0xf   :  { %949 = vmatpush.bf16.msra.mxu3 %v1390_v41  ;;  %v1786_v56 = vld [vmem:[%s2807_s1 + $0x1b4] sm:$0xf0]  ;;  %v1310_v58 = vor.u32 %v1770_v52, %v1309_v51  ;;  %v1752_v62 = vld [vmem:[%s2807_s1 + $0xa4] sm:$0xf0]  ;;  %v1301_v63 = vld [vmem:[%s2807_s1 + $0x120] sm:$0xf] }
  0x10   :  { %911 = vmatpush.bf16.msra.mxu0 %v1190_v42  ;;  %v1768_v0 = vld [vmem:[%s2807_s1 + $0x124] sm:$0xf0]  ;;  %v1374_v1 = vor.u32 %v1786_v56, %v1373_v55  ;;  %v1365_v3 = vld [vmem:[%s2807_s1 + $0x1a0] sm:$0xf]  ;;  %v1238_v5 = vor.u32 %v1752_v62, %v1237_v61  ;;  %v1165_v7 = vld [vmem:[%s2807_s1 + $0x10] sm:$0xf] }
  0x11   :  { %924 = vmatpush.bf16.msra.mxu1 %v1254_v45  ;;  %v1784_v4 = vld [vmem:[%s2807_s1 + $0x1a4] sm:$0xf0]  ;;  %v1302_v6 = vor.u32 %v1768_v0, %v1301_v63  ;;  %v1734_v8 = vld [vmem:[%s2807_s1 + $0x14] sm:$0xf0]  ;;  %v1229_v9 = vld [vmem:[%s2807_s1 + $0x90] sm:$0xf] }
  0x12   :  { %937 = vmatpush.bf16.msra.mxu2 %v1318_v46  ;;  %v1750_v10 = vld [vmem:[%s2807_s1 + $0x94] sm:$0xf0]  ;;  %v1293_v11 = vld [vmem:[%s2807_s1 + $0x110] sm:$0xf]  ;;  %v1366_v13 = vor.u32 %v1784_v4, %v1365_v3  ;;  %v1157_v14 = vld [vmem:[%s2807_s1] sm:$0xf]  ;;  %v1166_v15 = vor.u32 %v1734_v8, %v1165_v7 }
  0x13   :  { %950 = vmatpush.bf16.msra.mxu3 %v1382_v53  ;;  %v1766_v12 = vld [vmem:[%s2807_s1 + $0x114] sm:$0xf0]  ;;  %v1732_v16 = vld [vmem:[%s2807_s1 + $0x4] sm:$0xf0]  ;;  %v1357_v17 = vld [vmem:[%s2807_s1 + $0x190] sm:$0xf]  ;;  %v1230_v19 = vor.u32 %v1750_v10, %v1229_v9 }
  0x14   :  { %912 = vmatpush.bf16.msra.mxu0 %v1182_v54  ;;  %v1782_v18 = vld [vmem:[%s2807_s1 + $0x194] sm:$0xf0]  ;;  %v1294_v20 = vor.u32 %v1766_v12, %v1293_v11  ;;  %v1221_v21 = vld [vmem:[%s2807_s1 + $0x80] sm:$0xf]  ;;  %v1748_v22 = vld [vmem:[%s2807_s1 + $0x84] sm:$0xf0]  ;;  %v1158_v31 = vor.u32 %v1732_v16, %v1157_v14 }
  0x15   :  { %925 = vmatpush.bf16.msra.mxu1 %v1246_v57  ;;  %v1469_v23 = vld [vmem:[%s2807_s1 + $0x270] sm:$0xf]  ;;  %v1810_v24 = vld [vmem:[%s2807_s1 + $0x274] sm:$0xf0]  ;;  %v1358_v27 = vor.u32 %v1782_v18, %v1357_v17  ;;  %v1285_v28 = vld [vmem:[%s2807_s1 + $0x100] sm:$0xf]  ;;  %v1222_v35 = vor.u32 %v1748_v22, %v1221_v21 }
  0x16   :  { %938 = vmatpush.bf16.msra.mxu2 %v1310_v58  ;;  %v1533_v25 = vld [vmem:[%s2807_s1 + $0x2f0] sm:$0xf]  ;;  %v1826_v26 = vld [vmem:[%s2807_s1 + $0x2f4] sm:$0xf0]  ;;  %v1764_v29 = vld [vmem:[%s2807_s1 + $0x104] sm:$0xf0]  ;;  %v1470_v36 = vor.u32 %v1810_v24, %v1469_v23 }
  0x17   :  { %951 = vmatpush.bf16.msra.mxu3 %v1374_v1  ;;  %v1597_v30 = vld [vmem:[%s2807_s1 + $0x370] sm:$0xf]  ;;  %v1842_v32 = vld [vmem:[%s2807_s1 + $0x374] sm:$0xf0]  ;;  %v1349_v33 = vld [vmem:[%s2807_s1 + $0x180] sm:$0xf]  ;;  %v1534_v39 = vor.u32 %v1826_v26, %v1533_v25  ;;  %v1286_v40 = vor.u32 %v1764_v29, %v1285_v28 }
  0x18   :  { %913 = vmatpush.bf16.msra.mxu0 %v1174_v2  ;;  %v1780_v34 = vld [vmem:[%s2807_s1 + $0x184] sm:$0xf0]  ;;  %v1661_v37 = vld [vmem:[%s2807_s1 + $0x3f0] sm:$0xf]  ;;  %v1858_v38 = vld [vmem:[%s2807_s1 + $0x3f4] sm:$0xf0]  ;;  %v1598_v43 = vor.u32 %v1842_v32, %v1597_v30 }
  0x19   :  { %926 = vmatpush.bf16.msra.mxu1 %v1238_v5  ;;  %v1461_v41 = vld [vmem:[%s2807_s1 + $0x260] sm:$0xf]  ;;  %v1808_v42 = vld [vmem:[%s2807_s1 + $0x264] sm:$0xf0]  ;;  %v1350_v44 = vor.u32 %v1780_v34, %v1349_v33  ;;  %v1662_v47 = vor.u32 %v1858_v38, %v1661_v37  ;;  %v1453_v54 = vld [vmem:[%s2807_s1 + $0x250] sm:$0xf] }
  0x1a   :  { %939 = vmatpush.bf16.msra.mxu2 %v1302_v6  ;;  %v1525_v45 = vld [vmem:[%s2807_s1 + $0x2e0] sm:$0xf]  ;;  %v1824_v46 = vld [vmem:[%s2807_s1 + $0x2e4] sm:$0xf0]  ;;  %v1462_v50 = vor.u32 %v1808_v42, %v1461_v41  ;;  %v1806_v55 = vld [vmem:[%s2807_s1 + $0x254] sm:$0xf0] }
  0x1b   :  { %952 = vmatpush.bf16.msra.mxu3 %v1366_v13  ;;  %v1589_v48 = vld [vmem:[%s2807_s1 + $0x360] sm:$0xf]  ;;  %v1840_v49 = vld [vmem:[%s2807_s1 + $0x364] sm:$0xf0]  ;;  %v1526_v53 = vor.u32 %v1824_v46, %v1525_v45  ;;  %v1517_v58 = vld [vmem:[%s2807_s1 + $0x2d0] sm:$0xf]  ;;  %v1454_v63 = vor.u32 %v1806_v55, %v1453_v54 }
  0x1c   :  { %914 = vmatpush.bf16.msra.mxu0 %v1166_v15  ;;  %v1653_v51 = vld [vmem:[%s2807_s1 + $0x3e0] sm:$0xf]  ;;  %v1856_v52 = vld [vmem:[%s2807_s1 + $0x3e4] sm:$0xf0]  ;;  %v1590_v57 = vor.u32 %v1840_v49, %v1589_v48  ;;  %v1822_v59 = vld [vmem:[%s2807_s1 + $0x2d4] sm:$0xf0] }
  0x1d   :  { %927 = vmatpush.bf16.msra.mxu1 %v1230_v19  ;;  %v14_v56 = vld [vmem:[%s2808_s0] sm:$0xff]  ;;  %v1654_v60 = vor.u32 %v1856_v52, %v1653_v51  ;;  %v1581_v61 = vld [vmem:[%s2807_s1 + $0x350] sm:$0xf]  ;;  %v1838_v62 = vld [vmem:[%s2807_s1 + $0x354] sm:$0xf0]  ;;  %v1518_v2 = vor.u32 %v1822_v59, %v1517_v58 }
  0x1e   :  { %940 = vmatpush.bf16.msra.mxu2 %v1294_v20  ;;  %167 = vst [vmem:[#allocation1] ss:$9 sm:$0xff] %v14_v56  ;;  %v1645_v0 = vld [vmem:[%s2807_s1 + $0x3d0] sm:$0xf]  ;;  %v1854_v1 = vld [vmem:[%s2807_s1 + $0x3d4] sm:$0xf0]  ;;  %v1582_v5 = vor.u32 %v1838_v62, %v1581_v61 }
  0x1f   :  { %953 = vmatpush.bf16.msra.mxu3 %v1358_v27  ;;  %v1445_v3 = vld [vmem:[%s2807_s1 + $0x240] sm:$0xf]  ;;  %v1804_v4 = vld [vmem:[%s2807_s1 + $0x244] sm:$0xf0]  ;;  %v1646_v8 = vor.u32 %v1854_v1, %v1645_v0  ;;  %v1437_v11 = vld [vmem:[%s2807_s1 + $0x230] sm:$0xf] }
  0x20   :  { %915 = vmatpush.bf16.msra.mxu0 %v1158_v31  ;;  %v1509_v6 = vld [vmem:[%s2807_s1 + $0x2c0] sm:$0xf]  ;;  %v1820_v7 = vld [vmem:[%s2807_s1 + $0x2c4] sm:$0xf0]  ;;  %v1446_v12 = vor.u32 %v1804_v4, %v1445_v3  ;;  %v1802_v13 = vld [vmem:[%s2807_s1 + $0x234] sm:$0xf0] }
  0x21   :  { %928 = vmatpush.bf16.msra.mxu1 %v1222_v35  ;;  %v1573_v9 = vld [vmem:[%s2807_s1 + $0x340] sm:$0xf]  ;;  %v1836_v10 = vld [vmem:[%s2807_s1 + $0x344] sm:$0xf0]  ;;  %v1510_v16 = vor.u32 %v1820_v7, %v1509_v6  ;;  %v1501_v21 = vld [vmem:[%s2807_s1 + $0x2b0] sm:$0xf]  ;;  %v1438_v27 = vor.u32 %v1802_v13, %v1437_v11 }
  0x22   :  { %941 = vmatpush.bf16.msra.mxu2 %v1286_v40  ;;  %v1637_v14 = vld [vmem:[%s2807_s1 + $0x3c0] sm:$0xf]  ;;  %v1852_v15 = vld [vmem:[%s2807_s1 + $0x3c4] sm:$0xf0]  ;;  %v1574_v20 = vor.u32 %v1836_v10, %v1573_v9  ;;  %v1818_v22 = vld [vmem:[%s2807_s1 + $0x2b4] sm:$0xf0] }
  0x23   :  { %954 = vmatpush.bf16.msra.mxu3 %v1350_v44  ;;  %v1638_v23 = vor.u32 %v1852_v15, %v1637_v14  ;;  %v1565_v24 = vld [vmem:[%s2807_s1 + $0x330] sm:$0xf]  ;;  %v1834_v25 = vld [vmem:[%s2807_s1 + $0x334] sm:$0xf0]  ;;  %v1502_v30 = vor.u32 %v1818_v22, %v1501_v21  ;;  %v1429_v31 = vld [vmem:[%s2807_s1 + $0x220] sm:$0xf] }
  0x24   :  { %960 = vmatpush.bf16.msrb.mxu0 %v1470_v36  ;;  %v1629_v28 = vld [vmem:[%s2807_s1 + $0x3b0] sm:$0xf]  ;;  %v1850_v29 = vld [vmem:[%s2807_s1 + $0x3b4] sm:$0xf0]  ;;  %v1800_v32 = vld [vmem:[%s2807_s1 + $0x224] sm:$0xf0]  ;;  %v1566_v33 = vor.u32 %v1834_v25, %v1565_v24 }
  0x25   :  { %973 = vmatpush.bf16.msrb.mxu1 %v1534_v39  ;;  %v2192_v17 = vld [vmem:[#allocation1 + $0x12] sm:$0xff]  ;;  %v2194_v18 = vld [vmem:[#allocation1] sm:$0xff]  ;;  %v2212_v26 = vld [vmem:[#allocation1 + $0x9] sm:$0xff]  ;;  %v1630_v36 = vor.u32 %v1850_v29, %v1629_v28  ;;  %v1430_v40 = vor.u32 %v1800_v32, %v1429_v31 }
  0x26   :  { %986 = vmatpush.bf16.msrb.mxu2 %v1598_v43  ;;  %v2196_v19 = vld [vmem:[#allocation1 + $0x1b] sm:$0xff]  ;;  %916 = vmatmul.bf16.vlgmr.msra.gmra.mxu0 %v2194_v18  ;;  %v1816_v35 = vld [vmem:[%s2807_s1 + $0x2a4] sm:$0xf0]  ;;  %v1421_v44 = vld [vmem:[%s2807_s1 + $0x210] sm:$0xf] }
  0x27   :  { %999 = vmatpush.bf16.msrb.mxu3 %v1662_v47  ;;  %942 = vmatmul.bf16.vlgmr.msra.gmra.mxu2 %v2192_v17  ;;  %v1493_v34 = vld [vmem:[%s2807_s1 + $0x2a0] sm:$0xf]  ;;  %v1832_v38 = vld [vmem:[%s2807_s1 + $0x324] sm:$0xf0]  ;;  %v1798_v45 = vld [vmem:[%s2807_s1 + $0x214] sm:$0xf0] }
  0x28   :  { %961 = vmatpush.bf16.msrb.mxu0 %v1462_v50  ;;  %955 = vmatmul.bf16.vlgmr.msra.gmra.mxu3 %v2196_v19  ;;  %v1557_v37 = vld [vmem:[%s2807_s1 + $0x320] sm:$0xf]  ;;  %v15_v39 = vld [vmem:[%s2808_s0 + $0x8] sm:$0x1]  ;;  %v1494_v43 = vor.u32 %v1816_v35, %v1493_v34  ;;  %v1485_v46 = vld [vmem:[%s2807_s1 + $0x290] sm:$0xf] }
  0x29   :  { %974 = vmatpush.bf16.msrb.mxu1 %v1526_v53  ;;  %v1621_v41 = vld [vmem:[%s2807_s1 + $0x3a0] sm:$0xf]  ;;  %v1848_v42 = vld [vmem:[%s2807_s1 + $0x3a4] sm:$0xf0]  ;;  %v1558_v47 = vor.u32 %v1832_v38, %v1557_v37  ;;  %v1814_v48 = vld [vmem:[%s2807_s1 + $0x294] sm:$0xf0] }
  0x2a   :  { %987 = vmatpush.bf16.msrb.mxu2 %v1590_v57  ;;  %929 = vmatmul.bf16.vlgmr.msra.gmra.mxu1 %v2212_v26  ;;  %v1549_v49 = vld [vmem:[%s2807_s1 + $0x310] sm:$0xf]  ;;  %v1830_v50 = vld [vmem:[%s2807_s1 + $0x314] sm:$0xf0]  ;;  %v1622_v51 = vor.u32 %v1848_v42, %v1621_v41  ;;  %v1413_v52 = vld [vmem:[%s2807_s1 + $0x200] sm:$0xf]  ;;  %v1422_v57 = vor.u32 %v1798_v45, %v1421_v44  ;;  %v1486_v62 = vor.u32 %v1814_v48, %v1485_v46 }
  0x2b   :  { %1000 = vmatpush.bf16.msrb.mxu3 %v1654_v60  ;;  %v1796_v53 = vld [vmem:[%s2807_s1 + $0x204] sm:$0xf0]  ;;  %v1613_v54 = vld [vmem:[%s2807_s1 + $0x390] sm:$0xf]  ;;  %v1846_v55 = vld [vmem:[%s2807_s1 + $0x394] sm:$0xf0]  ;;  %v1550_v1 = vor.u32 %v1830_v50, %v1549_v49 }
  0x2c   :  { %962 = vmatpush.bf16.msrb.mxu0 %v1454_v63  ;;  %v2279_v56 = vld [vmem:[#allocation1 + $0x36] sm:$0xff]  ;;  %v1477_v58 = vld [vmem:[%s2807_s1 + $0x280] sm:$0xf]  ;;  %v2284_v59 = vld [vmem:[#allocation1 + $0x24] sm:$0xff]  ;;  %v1414_v9 = vor.u32 %v1796_v53, %v1413_v52 }
  0x2d   :  { %975 = vmatpush.bf16.msrb.mxu1 %v1518_v2  ;;  %v2286_v60 = vld [vmem:[#allocation1 + $0x3f] sm:$0xff]  ;;  %v2288_v61 = vld [vmem:[#allocation1 + $0x2d] sm:$0xff]  ;;  %v1812_v63 = vld [vmem:[%s2807_s1 + $0x284] sm:$0xf0] }
  0x2e   :  { %988 = vmatpush.bf16.msrb.mxu2 %v1582_v5  ;;  %v1725_v0 = vld [vmem:[%s2807_s1 + $0x470] sm:$0xf]  ;;  %177 = vst [vmem:[#allocation1] ss:$9 sm:$0xff] %v15_v39  ;;  %v1874_v2 = vld [vmem:[%s2807_s1 + $0x474] sm:$0xf0]  ;;  %v1614_v5 = vor.u32 %v1846_v55, %v1613_v54  ;;  %v1478_v13 = vor.u32 %v1812_v63, %v1477_v58 }
  0x2f   :  { %1001 = vmatpush.bf16.msrb.mxu3 %v1646_v8  ;;  %v1745_v3 = vld [vmem:[%s2807_s1 + $0x74] sm:$0xf]  ;;  %v1215_v4 = vld [vmem:[%s2807_s1 + $0x78] sm:$0xf0]  ;;  %v1541_v6 = vld [vmem:[%s2807_s1 + $0x300] sm:$0xf]  ;;  %v1726_v14 = vor.u32 %v1874_v2, %v1725_v0 }
  0x30   :  { %963 = vmatpush.bf16.msrb.mxu0 %v1446_v12  ;;  %v1828_v7 = vld [vmem:[%s2807_s1 + $0x304] sm:$0xf0]  ;;  %v1761_v8 = vld [vmem:[%s2807_s1 + $0xf4] sm:$0xf]  ;;  %v1279_v10 = vld [vmem:[%s2807_s1 + $0xf8] sm:$0xf0] }
  0x31   :  { %976 = vmatpush.bf16.msrb.mxu1 %v1510_v16  ;;  %v1605_v11 = vld [vmem:[%s2807_s1 + $0x380] sm:$0xf]  ;;  %v1844_v12 = vld [vmem:[%s2807_s1 + $0x384] sm:$0xf0]  ;;  %v1777_v15 = vld [vmem:[%s2807_s1 + $0x174] sm:$0xf]  ;;  %v1542_v21 = vor.u32 %v1828_v7, %v1541_v6  ;;  %v1282_v24 = vor.u32 %v1761_v8, %v1279_v10 }
  0x32   :  { %989 = vmatpush.bf16.msrb.mxu2 %v1574_v20  ;;  %v1343_v16 = vld [vmem:[%s2807_s1 + $0x178] sm:$0xf0]  ;;  %v1218_v20 = vor.u32 %v1745_v3, %v1215_v4  ;;  %v1717_v22 = vld [vmem:[%s2807_s1 + $0x460] sm:$0xf]  ;;  %v1606_v25 = vor.u32 %v1844_v12, %v1605_v11  ;;  %v1207_v28 = vld [vmem:[%s2807_s1 + $0x68] sm:$0xf0] }
  0x33   :  { %1002 = vmatpush.bf16.msrb.mxu3 %v1638_v23  ;;  %v1872_v23 = vld [vmem:[%s2807_s1 + $0x464] sm:$0xf0]  ;;  %v1346_v29 = vor.u32 %v1777_v15, %v1343_v16  ;;  %v1271_v31 = vld [vmem:[%s2807_s1 + $0xe8] sm:$0xf0]  ;;  %v1870_v37 = vld [vmem:[%s2807_s1 + $0x454] sm:$0xf0] }
  0x34   :  { %964 = vmatpush.bf16.msrb.mxu0 %v1438_v27  ;;  %v1743_v27 = vld [vmem:[%s2807_s1 + $0x64] sm:$0xf]  ;;  %v1718_v32 = vor.u32 %v1872_v23, %v1717_v22  ;;  %v1335_v34 = vld [vmem:[%s2807_s1 + $0x168] sm:$0xf0]  ;;  %v1741_v39 = vld [vmem:[%s2807_s1 + $0x54] sm:$0xf] }
  0x35   :  { %977 = vmatpush.bf16.msrb.mxu1 %v1502_v30  ;;  %v1759_v30 = vld [vmem:[%s2807_s1 + $0xe4] sm:$0xf]  ;;  %v1210_v35 = vor.u32 %v1743_v27, %v1207_v28  ;;  %v1757_v42 = vld [vmem:[%s2807_s1 + $0xd4] sm:$0xf]  ;;  %v1327_v46 = vld [vmem:[%s2807_s1 + $0x158] sm:$0xf0] }
  0x36   :  { %990 = vmatpush.bf16.msrb.mxu2 %v1566_v33  ;;  %v1775_v33 = vld [vmem:[%s2807_s1 + $0x164] sm:$0xf]  ;;  %v1274_v38 = vor.u32 %v1759_v30, %v1271_v31  ;;  %v1773_v45 = vld [vmem:[%s2807_s1 + $0x154] sm:$0xf]  ;;  %v1701_v48 = vld [vmem:[%s2807_s1 + $0x440] sm:$0xf] }
  0x37   :  { %1003 = vmatpush.bf16.msrb.mxu3 %v1630_v36  ;;  %v1709_v36 = vld [vmem:[%s2807_s1 + $0x450] sm:$0xf]  ;;  %v1338_v41 = vor.u32 %v1775_v33, %v1335_v34  ;;  %v1868_v49 = vld [vmem:[%s2807_s1 + $0x444] sm:$0xf0]  ;;  %v1191_v52 = vld [vmem:[%s2807_s1 + $0x48] sm:$0xf0]  ;;  %v1330_v53 = vor.u32 %v1773_v45, %v1327_v46 }
  0x38   :  { %965 = vmatpush.bf16.msrb.mxu0 %v1430_v40  ;;  %v1199_v40 = vld [vmem:[%s2807_s1 + $0x58] sm:$0xf0]  ;;  %v1710_v44 = vor.u32 %v1870_v37, %v1709_v36  ;;  %v1755_v54 = vld [vmem:[%s2807_s1 + $0xc4] sm:$0xf]  ;;  %v1255_v55 = vld [vmem:[%s2807_s1 + $0xc8] sm:$0xf0] }
  0x39   :  { %978 = vmatpush.bf16.msrb.mxu1 %v1494_v43  ;;  %v1263_v43 = vld [vmem:[%s2807_s1 + $0xd8] sm:$0xf0]  ;;  %v1771_v58 = vld [vmem:[%s2807_s1 + $0x144] sm:$0xf]  ;;  %v1693_v0 = vld [vmem:[%s2807_s1 + $0x430] sm:$0xf]  ;;  %v1258_v2 = vor.u32 %v1755_v54, %v1255_v55 }
  0x3a   :  { %991 = vmatpush.bf16.msrb.mxu2 %v1558_v47  ;;  %v1202_v47 = vor.u32 %v1741_v39, %v1199_v40  ;;  %v1266_v50 = vor.u32 %v1757_v42, %v1263_v43  ;;  %v1737_v3 = vld [vmem:[%s2807_s1 + $0x34] sm:$0xf]  ;;  %v1183_v4 = vld [vmem:[%s2807_s1 + $0x38] sm:$0xf0]  ;;  %v1685_v12 = vld [vmem:[%s2807_s1 + $0x420] sm:$0xf] }
  0x3b   :  { %1004 = vmatpush.bf16.msrb.mxu3 %v1622_v51  ;;  %v1739_v51 = vld [vmem:[%s2807_s1 + $0x44] sm:$0xf]  ;;  %v1753_v6 = vld [vmem:[%s2807_s1 + $0xb4] sm:$0xf]  ;;  %v1247_v7 = vld [vmem:[%s2807_s1 + $0xb8] sm:$0xf0]  ;;  %v1186_v11 = vor.u32 %v1737_v3, %v1183_v4 }
  0x3c   :  { %966 = vmatpush.bf16.msrb.mxu0 %v1422_v57  ;;  %v1702_v57 = vor.u32 %v1868_v49, %v1701_v48  ;;  %v1194_v63 = vor.u32 %v1739_v51, %v1191_v52  ;;  %v1311_v10 = vld [vmem:[%s2807_s1 + $0x138] sm:$0xf0]  ;;  %v1735_v15 = vld [vmem:[%s2807_s1 + $0x24] sm:$0xf]  ;;  %v1175_v16 = vld [vmem:[%s2807_s1 + $0x28] sm:$0xf0] }
  0x3d   :  { %979 = vmatpush.bf16.msrb.mxu1 %v1486_v62  ;;  %v1319_v62 = vld [vmem:[%s2807_s1 + $0x148] sm:$0xf0]  ;;  %v1178_v27 = vor.u32 %v1735_v15, %v1175_v16  ;;  %v1677_v28 = vld [vmem:[%s2807_s1 + $0x410] sm:$0xf]  ;;  %v1733_v31 = vld [vmem:[%s2807_s1 + $0x14] sm:$0xf] }
  0x3e   :  { %992 = vmatpush.bf16.msrb.mxu2 %v1550_v1  ;;  %v1866_v1 = vld [vmem:[%s2807_s1 + $0x434] sm:$0xf0]  ;;  %v1239_v22 = vld [vmem:[%s2807_s1 + $0xa8] sm:$0xf0]  ;;  %v1749_v34 = vld [vmem:[%s2807_s1 + $0x94] sm:$0xf] }
  0x3f   :  { %1005 = vmatpush.bf16.msrb.mxu3 %v1614_v5  ;;  %v1322_v5 = vor.u32 %v1771_v58, %v1319_v62  ;;  %v1694_v8 = vor.u32 %v1866_v1, %v1693_v0  ;;  %v1669_v37 = vld [vmem:[%s2807_s1 + $0x400] sm:$0xf]  ;;  %v1295_v39 = vld [vmem:[%s2807_s1 + $0x118] sm:$0xf0]  ;;  %v1731_v42 = vld [vmem:[%s2807_s1 + $0x4] sm:$0xf] }
  0x40   :  { %967 = vmatpush.bf16.msrb.mxu0 %v1414_v9  ;;  %v1769_v9 = vld [vmem:[%s2807_s1 + $0x134] sm:$0xf]  ;;  %v1159_v43 = vld [vmem:[%s2807_s1 + $0x8] sm:$0xf0]  ;;  %v1407_v46 = vld [vmem:[%s2807_s1 + $0x1f8] sm:$0xf0] }
  0x41   :  { %980 = vmatpush.bf16.msrb.mxu1 %v1478_v13  ;;  %v1864_v13 = vld [vmem:[%s2807_s1 + $0x424] sm:$0xf0]  ;;  %v1793_v45 = vld [vmem:[%s2807_s1 + $0x1f4] sm:$0xf]  ;;  %v1471_v49 = vld [vmem:[%s2807_s1 + $0x278] sm:$0xf0]  ;;  %v1162_v55 = vor.u32 %v1731_v42, %v1159_v43 }
  0x42   :  { %993 = vmatpush.bf16.msrb.mxu2 %v1542_v21  ;;  %v1751_v21 = vld [vmem:[%s2807_s1 + $0xa4] sm:$0xf]  ;;  %v1686_v23 = vor.u32 %v1864_v13, %v1685_v12  ;;  %v1223_v51 = vld [vmem:[%s2807_s1 + $0x88] sm:$0xf0]  ;;  %v1535_v54 = vld [vmem:[%s2807_s1 + $0x2f8] sm:$0xf0] }
  0x43   :  { %1006 = vmatpush.bf16.msrb.mxu3 %v1606_v25  ;;  %968 = vmatmul.bf16.vlgmr.msrb.gmra.mxu0 %v2284_v59  ;;  %v1303_v25 = vld [vmem:[%s2807_s1 + $0x128] sm:$0xf0]  ;;  %v1242_v30 = vor.u32 %v1751_v21, %v1239_v22  ;;  %v1763_v58 = vld [vmem:[%s2807_s1 + $0x104] sm:$0xf]  ;;  %v1841_v3 = vld [vmem:[%s2807_s1 + $0x374] sm:$0xf] }
  0x44   :  { %1012 = vmatpush.bf16.msra.mxu0 %v1726_v14  ;;  %981 = vmatmul.bf16.vlgmr.msrb.gmra.mxu1 %v2288_v61  ;;  %v1250_v14 = vor.u32 %v1753_v6, %v1247_v7  ;;  %v1287_v62 = vld [vmem:[%s2807_s1 + $0x108] sm:$0xf0]  ;;  %v1599_v4 = vld [vmem:[%s2807_s1 + $0x378] sm:$0xf0]  ;;  %v1807_v6 = vld [vmem:[%s2807_s1 + $0x264] sm:$0xf] }
  0x45   :  { %1025 = vmatpush.bf16.msra.mxu1 %v1218_v20  ;;  %994 = vmatmul.bf16.vlgmr.msrb.gmra.mxu2 %v2279_v56  ;;  %v1314_v20 = vor.u32 %v1769_v9, %v1311_v10  ;;  %v1463_v7 = vld [vmem:[%s2807_s1 + $0x268] sm:$0xf0]  ;;  %v1290_v9 = vor.u32 %v1763_v58, %v1287_v62  ;;  %v1823_v10 = vld [vmem:[%s2807_s1 + $0x2e4] sm:$0xf]  ;;  %v1602_v13 = vor.u32 %v1841_v3, %v1599_v4  ;;  %v1391_v16 = vld [vmem:[%s2807_s1 + $0x1d8] sm:$0xf0] }
  0x46   :  { %1038 = vmatpush.bf16.msra.mxu2 %v1282_v24  ;;  %1007 = vmatmul.bf16.vlgmr.msrb.gmra.mxu3 %v2286_v60  ;;  %v1767_v24 = vld [vmem:[%s2807_s1 + $0x124] sm:$0xf]  ;;  %v1466_v15 = vor.u32 %v1807_v6, %v1463_v7  ;;  %v1591_v21 = vld [vmem:[%s2807_s1 + $0x368] sm:$0xf0]  ;;  %v1781_v3 = vld [vmem:[%s2807_s1 + $0x194] sm:$0xf] }
  0x47   :  { %1051 = vmatpush.bf16.msra.mxu3 %v1346_v29  ;;  %v1862_v29 = vld [vmem:[%s2807_s1 + $0x414] sm:$0xf0]  ;;  %v1306_v33 = vor.u32 %v1767_v24, %v1303_v25  ;;  %v1455_v24 = vld [vmem:[%s2807_s1 + $0x258] sm:$0xf0]  ;;  %v1821_v25 = vld [vmem:[%s2807_s1 + $0x2d4] sm:$0xf] }
  0x48   :  { %1013 = vmatpush.bf16.msra.mxu0 %v1718_v32  ;;  %v1167_v32 = vld [vmem:[%s2807_s1 + $0x18] sm:$0xf0]  ;;  %v1678_v36 = vor.u32 %v1862_v29, %v1677_v28  ;;  %v1835_v42 = vld [vmem:[%s2807_s1 + $0x344] sm:$0xf]  ;;  %v1575_v43 = vld [vmem:[%s2807_s1 + $0x348] sm:$0xf0] }
  0x49   :  { %1026 = vmatpush.bf16.msra.mxu1 %v1210_v35  ;;  %v1231_v35 = vld [vmem:[%s2807_s1 + $0x98] sm:$0xf0]  ;;  %v1170_v40 = vor.u32 %v1733_v31, %v1167_v32  ;;  %v1383_v32 = vld [vmem:[%s2807_s1 + $0x1c8] sm:$0xf0]  ;;  %v1799_v58 = vld [vmem:[%s2807_s1 + $0x224] sm:$0xf] }
  0x4a   :  { %1039 = vmatpush.bf16.msra.mxu2 %v1274_v38  ;;  %v1765_v38 = vld [vmem:[%s2807_s1 + $0x114] sm:$0xf]  ;;  %v1431_v62 = vld [vmem:[%s2807_s1 + $0x228] sm:$0xf0]  ;;  %v1831_v6 = vld [vmem:[%s2807_s1 + $0x324] sm:$0xf] }
  0x4b   :  { %1052 = vmatpush.bf16.msra.mxu3 %v1338_v41  ;;  %v1860_v41 = vld [vmem:[%s2807_s1 + $0x404] sm:$0xf0]  ;;  %v1298_v48 = vor.u32 %v1765_v38, %v1295_v39  ;;  %v1434_v4 = vor.u32 %v1799_v58, %v1431_v62  ;;  %v1559_v7 = vld [vmem:[%s2807_s1 + $0x328] sm:$0xf0]  ;;  %v1695_v58 = vld [vmem:[%s2807_s1 + $0x438] sm:$0xf0] }
  0x4c   :  { %1014 = vmatpush.bf16.msra.mxu0 %v1710_v44  ;;  %v1234_v44 = vor.u32 %v1749_v34, %v1231_v35  ;;  %v1670_v52 = vor.u32 %v1860_v41, %v1669_v37  ;;  %v1803_v35 = vld [vmem:[%s2807_s1 + $0x244] sm:$0xf] }
  0x4d   :  { %1027 = vmatpush.bf16.msra.mxu1 %v1202_v47  ;;  %v1809_v47 = vld [vmem:[%s2807_s1 + $0x274] sm:$0xf]  ;;  %v1819_v37 = vld [vmem:[%s2807_s1 + $0x2c4] sm:$0xf] }
  0x4e   :  { %1040 = vmatpush.bf16.msra.mxu2 %v1266_v50  ;;  %v1747_v50 = vld [vmem:[%s2807_s1 + $0x84] sm:$0xf]  ;;  %v1474_v0 = vor.u32 %v1809_v47, %v1471_v49  ;;  %v1817_v47 = vld [vmem:[%s2807_s1 + $0x2b4] sm:$0xf] }
  0x4f   :  { %1053 = vmatpush.bf16.msra.mxu3 %v1330_v53  ;;  %v1825_v53 = vld [vmem:[%s2807_s1 + $0x2f4] sm:$0xf]  ;;  %v1226_v1 = vor.u32 %v1747_v50, %v1223_v51  ;;  %v1578_v50 = vor.u32 %v1835_v42, %v1575_v43  ;;  %v1783_v51 = vld [vmem:[%s2807_s1 + $0x1a4] sm:$0xf]  ;;  %v1719_v42 = vld [vmem:[%s2807_s1 + $0x468] sm:$0xf0] }
  0x50   :  { %1015 = vmatpush.bf16.msra.mxu0 %v1702_v57  ;;  %v1410_v57 = vor.u32 %v1793_v45, %v1407_v46  ;;  %v1801_v45 = vld [vmem:[%s2807_s1 + $0x234] sm:$0xf]  ;;  %v1439_v46 = vld [vmem:[%s2807_s1 + $0x238] sm:$0xf0] }
  0x51   :  { %1028 = vmatpush.bf16.msra.mxu1 %v1194_v63  ;;  %v1791_v63 = vld [vmem:[%s2807_s1 + $0x1e4] sm:$0xf] }
  0x52   :  { %1041 = vmatpush.bf16.msra.mxu2 %v1258_v2  ;;  %v1399_v2 = vld [vmem:[%s2807_s1 + $0x1e8] sm:$0xf0] }
  0x53   :  { %1054 = vmatpush.bf16.msra.mxu3 %v1322_v5  ;;  %v1538_v5 = vor.u32 %v1825_v53, %v1535_v54  ;;  %v1402_v12 = vor.u32 %v1791_v63, %v1399_v2  ;;  %v1367_v53 = vld [vmem:[%s2807_s1 + $0x1a8] sm:$0xf0]  ;;  %v1833_v54 = vld [vmem:[%s2807_s1 + $0x334] sm:$0xf]  ;;  %v1815_v63 = vld [vmem:[%s2807_s1 + $0x2a4] sm:$0xf] }
  0x54   :  { %1016 = vmatpush.bf16.msra.mxu0 %v1694_v8  ;;  %v2537_v8 = vld [vmem:[#allocation1] sm:$0xff] }
  0x55   :  { %1029 = vmatpush.bf16.msra.mxu1 %v1186_v11  ;;  %v1527_v11 = vld [vmem:[%s2807_s1 + $0x2e8] sm:$0xf0] }
  0x56   :  { %1042 = vmatpush.bf16.msra.mxu2 %v1250_v14  ;;  %v1789_v14 = vld [vmem:[%s2807_s1 + $0x1d4] sm:$0xf]  ;;  %v1530_v22 = vor.u32 %v1823_v10, %v1527_v11  ;;  %v1423_v11 = vld [vmem:[%s2807_s1 + $0x218] sm:$0xf0] }
  0x57   :  { %1055 = vmatpush.bf16.msra.mxu3 %v1314_v20  ;;  %v1839_v20 = vld [vmem:[%s2807_s1 + $0x364] sm:$0xf]  ;;  %v1394_v28 = vor.u32 %v1789_v14, %v1391_v16  ;;  %v1797_v10 = vld [vmem:[%s2807_s1 + $0x214] sm:$0xf] }
  0x58   :  { %1017 = vmatpush.bf16.msra.mxu0 %v1686_v23  ;;  %v1805_v23 = vld [vmem:[%s2807_s1 + $0x254] sm:$0xf]  ;;  %v1594_v29 = vor.u32 %v1839_v20, %v1591_v21  ;;  %v1779_v16 = vld [vmem:[%s2807_s1 + $0x184] sm:$0xf]  ;;  %v1351_v20 = vld [vmem:[%s2807_s1 + $0x188] sm:$0xf0] }
  0x59   :  { %1030 = vmatpush.bf16.msra.mxu1 %v1178_v27  ;;  %v1519_v27 = vld [vmem:[%s2807_s1 + $0x2d8] sm:$0xf0]  ;;  %v1458_v31 = vor.u32 %v1805_v23, %v1455_v24  ;;  %v1795_v21 = vld [vmem:[%s2807_s1 + $0x204] sm:$0xf]  ;;  %v1415_v23 = vld [vmem:[%s2807_s1 + $0x208] sm:$0xf0] }
  0x5a   :  { %1043 = vmatpush.bf16.msra.mxu2 %v1242_v30  ;;  %v1787_v30 = vld [vmem:[%s2807_s1 + $0x1c4] sm:$0xf]  ;;  %v1522_v34 = vor.u32 %v1821_v25, %v1519_v27  ;;  %v1829_v24 = vld [vmem:[%s2807_s1 + $0x314] sm:$0xf]  ;;  %v1551_v25 = vld [vmem:[%s2807_s1 + $0x318] sm:$0xf0] }
  0x5b   :  { %1056 = vmatpush.bf16.msra.mxu3 %v1306_v33  ;;  %v1837_v33 = vld [vmem:[%s2807_s1 + $0x354] sm:$0xf]  ;;  %v1386_v38 = vor.u32 %v1787_v30, %v1383_v32  ;;  %v1811_v32 = vld [vmem:[%s2807_s1 + $0x284] sm:$0xf] }
  0x5c   :  { %1018 = vmatpush.bf16.msra.mxu0 %v1678_v36  ;;  %v1447_v36 = vld [vmem:[%s2807_s1 + $0x248] sm:$0xf0]  ;;  %v1873_v30 = vld [vmem:[%s2807_s1 + $0x474] sm:$0xf] }
  0x5d   :  { %1031 = vmatpush.bf16.msra.mxu1 %v1170_v40  ;;  %v1785_v40 = vld [vmem:[%s2807_s1 + $0x1b4] sm:$0xf]  ;;  %v1450_v41 = vor.u32 %v1803_v35, %v1447_v36  ;;  %v1418_v35 = vor.u32 %v1795_v21, %v1415_v23 }
  0x5e   :  { %1044 = vmatpush.bf16.msra.mxu2 %v1234_v44 }
  0x5f   :  { %1057 = vmatpush.bf16.msra.mxu3 %v1298_v48  ;;  %v1503_v48 = vld [vmem:[%s2807_s1 + $0x2b8] sm:$0xf0] }
  0x60   :  { %1019 = vmatpush.bf16.msra.mxu0 %v1670_v52  ;;  %v1442_v52 = vor.u32 %v1801_v45, %v1439_v46  ;;  %v1853_v46 = vld [vmem:[%s2807_s1 + $0x3d4] sm:$0xf] }
  0x61   :  { %1032 = vmatpush.bf16.msra.mxu1 %v1162_v55  ;;  %v1567_v55 = vld [vmem:[%s2807_s1 + $0x338] sm:$0xf0] }
  0x62   :  { %1045 = vmatpush.bf16.msra.mxu2 %v1226_v1  ;;  %v1370_v1 = vor.u32 %v1783_v51, %v1367_v53  ;;  %v1570_v2 = vor.u32 %v1833_v54, %v1567_v55  ;;  %v1849_v55 = vld [vmem:[%s2807_s1 + $0x3b4] sm:$0xf] }
  0x63   :  { %1020 = vmatmul.bf16.vlgmr.msra.gmra.mxu0 %v2537_v8  ;;  %1058 = vmatpush.bf16.msra.mxu3 %v1290_v9 }
  0x64   :  { %1064 = vmatpush.bf16.msrb.mxu0 %v1410_v57  ;;  %1033 = vmatmul.bf16.vlgmr.msra.gmra.mxu1 %v2194_v18  ;;  %v1583_v18 = vld [vmem:[%s2807_s1 + $0x358] sm:$0xf0]  ;;  %v1506_v57 = vor.u32 %v1817_v47, %v1503_v48  ;;  %v1869_v48 = vld [vmem:[%s2807_s1 + $0x454] sm:$0xf] }
  0x65   :  { %1077 = vmatpush.bf16.msrb.mxu1 %v1474_v0  ;;  %1046 = vmatmul.bf16.vlgmr.msra.gmra.mxu2 %v2212_v26  ;;  %v1511_v26 = vld [vmem:[%s2807_s1 + $0x2c8] sm:$0xf0]  ;;  %v1586_v39 = vor.u32 %v1837_v33, %v1583_v18  ;;  %v1354_v18 = vor.u32 %v1779_v16, %v1351_v20  ;;  %v1647_v47 = vld [vmem:[%s2807_s1 + $0x3d8] sm:$0xf0] }
  0x66   :  { %1090 = vmatpush.bf16.msrb.mxu2 %v1538_v5  ;;  %1059 = vmatmul.bf16.vlgmr.msra.gmra.mxu3 %v2192_v17  ;;  %v1375_v17 = vld [vmem:[%s2807_s1 + $0x1b8] sm:$0xf0]  ;;  %v1514_v44 = vor.u32 %v1819_v37, %v1511_v26  ;;  %v1495_v0 = vld [vmem:[%s2807_s1 + $0x2a8] sm:$0xf0]  ;;  %v1827_v37 = vld [vmem:[%s2807_s1 + $0x304] sm:$0xf] }
  0x67   :  { %1103 = vmatpush.bf16.msrb.mxu3 %v1602_v13  ;;  %v1378_v49 = vor.u32 %v1785_v40, %v1375_v17  ;;  %v1359_v5 = vld [vmem:[%s2807_s1 + $0x198] sm:$0xf0]  ;;  %v1498_v9 = vor.u32 %v1815_v63, %v1495_v0  ;;  %v1479_v33 = vld [vmem:[%s2807_s1 + $0x288] sm:$0xf0]  ;;  %v1855_v40 = vld [vmem:[%s2807_s1 + $0x3e4] sm:$0xf] }
  0x68   :  { %1065 = vmatpush.bf16.msrb.mxu0 %v1402_v12  ;;  %v1813_v12 = vld [vmem:[%s2807_s1 + $0x294] sm:$0xf]  ;;  %v1487_v13 = vld [vmem:[%s2807_s1 + $0x298] sm:$0xf0]  ;;  %v1362_v14 = vor.u32 %v1781_v3, %v1359_v5  ;;  %v1543_v26 = vld [vmem:[%s2807_s1 + $0x308] sm:$0xf0] }
  0x69   :  { %1078 = vmatpush.bf16.msrb.mxu1 %v1466_v15  ;;  %v1562_v15 = vor.u32 %v1831_v6, %v1559_v7  ;;  %v1490_v27 = vor.u32 %v1813_v12, %v1487_v13  ;;  %v1871_v17 = vld [vmem:[%s2807_s1 + $0x464] sm:$0xf]  ;;  %v1546_v43 = vor.u32 %v1827_v37, %v1543_v26  ;;  %v1687_v3 = vld [vmem:[%s2807_s1 + $0x428] sm:$0xf0]  ;;  %v1845_v6 = vld [vmem:[%s2807_s1 + $0x394] sm:$0xf] }
  0x6a   :  { %1091 = vmatpush.bf16.msrb.mxu2 %v1530_v22  ;;  %v1426_v22 = vor.u32 %v1797_v10, %v1423_v11  ;;  %v1722_v45 = vor.u32 %v1871_v17, %v1719_v42  ;;  %v1847_v0 = vld [vmem:[%s2807_s1 + $0x3a4] sm:$0xf]  ;;  %v1615_v7 = vld [vmem:[%s2807_s1 + $0x398] sm:$0xf0]  ;;  %v1671_v16 = vld [vmem:[%s2807_s1 + $0x408] sm:$0xf0] }
  0x6b   :  { %1104 = vmatpush.bf16.msrb.mxu3 %v1594_v29  ;;  %v1663_v29 = vld [vmem:[%s2807_s1 + $0x3f8] sm:$0xf0]  ;;  %v1618_v11 = vor.u32 %v1845_v6, %v1615_v7  ;;  %v1843_v13 = vld [vmem:[%s2807_s1 + $0x384] sm:$0xf] }
  0x6c   :  { %1066 = vmatpush.bf16.msrb.mxu0 %v1394_v28  ;;  %v1857_v28 = vld [vmem:[%s2807_s1 + $0x3f4] sm:$0xf]  ;;  %v1679_v10 = vld [vmem:[%s2807_s1 + $0x418] sm:$0xf0] }
  0x6d   :  { %1079 = vmatpush.bf16.msrb.mxu1 %v1458_v31  ;;  %v1727_v31 = vld [vmem:[%s2807_s1 + $0x478] sm:$0xf0]  ;;  %v1666_v36 = vor.u32 %v1857_v28, %v1663_v29 }
  0x6e   :  { %1092 = vmatpush.bf16.msrb.mxu2 %v1522_v34  ;;  %v1554_v34 = vor.u32 %v1829_v24, %v1551_v25 }
  0x6f   :  { %1105 = vmatpush.bf16.msrb.mxu3 %v1586_v39  ;;  %v1482_v39 = vor.u32 %v1811_v32, %v1479_v33 }
  0x70   :  { %1067 = vmatpush.bf16.msrb.mxu0 %v1386_v38  ;;  %v1730_v38 = vor.u32 %v1873_v30, %v1727_v31 }
  0x71   :  { %1080 = vmatpush.bf16.msrb.mxu1 %v1450_v41  ;;  %v1655_v41 = vld [vmem:[%s2807_s1 + $0x3e8] sm:$0xf0] }
  0x72   :  { %1093 = vmatpush.bf16.msrb.mxu2 %v1514_v44  ;;  %v1658_v44 = vor.u32 %v1855_v40, %v1655_v41 }
  0x73   :  { %1106 = vmatpush.bf16.msrb.mxu3 %v1578_v50  ;;  %v1650_v50 = vor.u32 %v1853_v46, %v1647_v47 }
  0x74   :  { %1068 = vmatpush.bf16.msrb.mxu0 %v1378_v49  ;;  %v1711_v49 = vld [vmem:[%s2807_s1 + $0x458] sm:$0xf0] }
  0x75   :  { %1081 = vmatpush.bf16.msrb.mxu1 %v1442_v52  ;;  %v1714_v51 = vor.u32 %v1869_v48, %v1711_v49  ;;  %v1639_v52 = vld [vmem:[%s2807_s1 + $0x3c8] sm:$0xf0] }
  0x76   :  { %1094 = vmatpush.bf16.msrb.mxu2 %v1506_v57  ;;  %v1865_v57 = vld [vmem:[%s2807_s1 + $0x434] sm:$0xf] }
  0x77   :  { %1107 = vmatpush.bf16.msrb.mxu3 %v1570_v2  ;;  %v1698_v63 = vor.u32 %v1865_v57, %v1695_v58  ;;  %v1863_v2 = vld [vmem:[%s2807_s1 + $0x424] sm:$0xf] }
  0x78   :  { %1069 = vmatpush.bf16.msrb.mxu0 %v1370_v1  ;;  %v1623_v1 = vld [vmem:[%s2807_s1 + $0x3a8] sm:$0xf0]  ;;  %v1690_v5 = vor.u32 %v1863_v2, %v1687_v3 }
  0x79   :  { %1082 = vmatpush.bf16.msrb.mxu1 %v1434_v4  ;;  %v1626_v4 = vor.u32 %v1847_v0, %v1623_v1 }
  0x7a   :  { %1095 = vmatpush.bf16.msrb.mxu2 %v1498_v9  ;;  %v1861_v9 = vld [vmem:[%s2807_s1 + $0x414] sm:$0xf] }
  0x7b   :  { %1108 = vmatpush.bf16.msrb.mxu3 %v1562_v15  ;;  %v1682_v12 = vor.u32 %v1861_v9, %v1679_v10  ;;  %v1859_v15 = vld [vmem:[%s2807_s1 + $0x404] sm:$0xf] }
  0x7c   :  { %1070 = vmatpush.bf16.msrb.mxu0 %v1362_v14  ;;  %v1607_v14 = vld [vmem:[%s2807_s1 + $0x388] sm:$0xf0]  ;;  %v1674_v21 = vor.u32 %v1859_v15, %v1671_v16 }
  0x7d   :  { %1083 = vmatpush.bf16.msrb.mxu1 %v1426_v22  ;;  %v1610_v20 = vor.u32 %v1843_v13, %v1607_v14  ;;  %v160_v22 = vld [vmem:[%s2809_s2] sm:$0x3] }
  0x7e   :  { %1096 = vmatpush.bf16.msrb.mxu2 %v1490_v27  ;;  %v162_v23 = vperm.slane %v160_v22, 0 }
  0x7f   :  { %1109 = vmatpush.bf16.msrb.mxu3 %v1554_v34 }
  0x80   :  { %1071 = vmatpush.bf16.msrb.mxu0 %v1354_v18 }
  0x81   :  { %1084 = vmatpush.bf16.msrb.mxu1 %v1418_v35 }
  0x82   :  { %1097 = vmatpush.bf16.msrb.mxu2 %v1482_v39 }
  0x83   :  { %1072 = vmatmul.bf16.vlgmr.msrb.gmra.mxu0 %v2196_v19  ;;  %1110 = vmatpush.bf16.msrb.mxu3 %v1546_v43  ;;  %v1851_v19 = vld [vmem:[%s2807_s1 + $0x3c4] sm:$0xf] }
  0x84   :  { %1116 = vmatpush.bf16.msra.mxu0 %v1666_v36  ;;  %1085 = vmatmul.bf16.vlgmr.msrb.gmra.mxu1 %v2284_v59  ;;  %v1867_v59 = vld [vmem:[%s2807_s1 + $0x444] sm:$0xf]  ;;  %v1642_v53 = vor.u32 %v1851_v19, %v1639_v52  ;;  %v163_v19 = vperm.slane %v160_v22, 1 }
  0x85   :  { %1129 = vmatpush.bf16.msra.mxu1 %v1730_v38  ;;  %1098 = vmatmul.bf16.vlgmr.msrb.gmra.mxu2 %v2288_v61  ;;  %v1703_v61 = vld [vmem:[%s2807_s1 + $0x448] sm:$0xf0] }
  0x86   :  { %1111 = vmatmul.bf16.vlgmr.msrb.gmra.mxu3 %v2279_v56  ;;  %v1706_v54 = vor.u32 %v1867_v59, %v1703_v61  ;;  %v1631_v56 = vld [vmem:[%s2807_s1 + $0x3b8] sm:$0xf0] }
  0x87   :  { %v1634_v62 = vor.u32 %v1849_v55, %v1631_v56 }
  0x88   :  { %1117 = vmatpush.bf16.msra.mxu0 %v1658_v44 }
  0x89   :  { %1130 = vmatpush.bf16.msra.mxu1 %v1722_v45 }
  0x8c   :  { %1118 = vmatpush.bf16.msra.mxu0 %v1650_v50 }
  0x8d   :  { %1131 = vmatpush.bf16.msra.mxu1 %v1714_v51 }
  0x90   :  { %1119 = vmatpush.bf16.msra.mxu0 %v1642_v53 }
  0x91   :  { %1132 = vmatpush.bf16.msra.mxu1 %v1706_v54 }
  0x94   :  { %1120 = vmatpush.bf16.msra.mxu0 %v1634_v62 }
  0x95   :  { %1133 = vmatpush.bf16.msra.mxu1 %v1698_v63 }
  0x98   :  { %1121 = vmatpush.bf16.msra.mxu0 %v1626_v4 }
  0x99   :  { %1134 = vmatpush.bf16.msra.mxu1 %v1690_v5 }
  0x9c   :  { %1122 = vmatpush.bf16.msra.mxu0 %v1618_v11 }
  0x9d   :  { %1135 = vmatpush.bf16.msra.mxu1 %v1682_v12 }
  0xa0   :  { %1123 = vmatpush.bf16.msra.mxu0 %v1610_v20 }
  0xa1   :  { %1136 = vmatpush.bf16.msra.mxu1 %v1674_v21 }
  0xa3   :  { %1124 = vmatmul.bf16.vlgmr.msra.gmra.mxu0 %v2286_v60  ;;  %v917_v24 = vpop.f32.mrf.mxu0 }
  0xa4   :  { %1137 = vmatmul.bf16.vlgmr.msra.gmra.mxu1 %v2537_v8  ;;  %v918_v25 = vadd.f32 %v917_v24, %v162_v23 }
  0xa7   :  { %v930_v27 = vpop.f32.mrf.mxu1 }
  0xa8   :  { %v931_v28 = vadd.f32 %v930_v27, %v918_v25 }
  0xaa   :  { %v943_v29 = vpop.f32.mrf.mxu2 }
  0xab   :  { %v944_v30 = vadd.f32 %v943_v29, %v931_v28  ;;  %v956_v31 = vpop.f32.mrf.mxu3  ;;  %v919_v32 = vpop.f32.mrf.mxu0 }
  0xad   :  { %v957_v33 = vadd.f32 %v956_v31, %v944_v30 }
  0xaf   :  { %v932_v18 = vpop.f32.mrf.mxu1 }
  0xb2   :  { %v945_v34 = vpop.f32.mrf.mxu2 }
  0xb3   :  { %v958_v35 = vpop.f32.mrf.mxu3 }
  0xc0   :  { %v969_v60 = vpop.f32.mrf.mxu0 }
  0xc1   :  { %v970_v36 = vadd.f32 %v969_v60, %v957_v33  ;;  %v982_v8 = vpop.f32.mrf.mxu1 }
  0xc3   :  { %v983_v37 = vadd.f32 %v982_v8, %v970_v36 }
  0xc8   :  { %v995_v26 = vpop.f32.mrf.mxu2  ;;  %v971_v40 = vpop.f32.mrf.mxu0 }
  0xc9   :  { %v996_v38 = vadd.f32 %v995_v26, %v983_v37  ;;  %v1008_v39 = vpop.f32.mrf.mxu3  ;;  %v984_v17 = vpop.f32.mrf.mxu1 }
  0xcb   :  { %v1009_v41 = vadd.f32 %v1008_v39, %v996_v38 }
  0xd0   :  { %v997_v42 = vpop.f32.mrf.mxu2 }
  0xd1   :  { %v1010_v43 = vpop.f32.mrf.mxu3 }
  0xe0   :  { %v1021_v44 = vpop.f32.mrf.mxu0 }
  0xe1   :  { %v1034_v45 = vpop.f32.mrf.mxu1  ;;  %v1022_v7 = vadd.f32 %v1021_v44, %v1009_v41 }
  0xe2   :  { %v1035_v61 = vadd.f32 %v1034_v45, %v163_v19 }
  0xe3   :  { %v1142_v11 = vmax.f32 %v1022_v7, 0.0 }
  0xe8   :  { %v1023_v46 = vpop.f32.mrf.mxu0  ;;  %v1047_v47 = vpop.f32.mrf.mxu2 }
  0xe9   :  { %v1036_v48 = vpop.f32.mrf.mxu1  ;;  %v1060_v49 = vpop.f32.mrf.mxu3  ;;  %v1048_v53 = vadd.f32 %v1047_v47, %v1035_v61 }
  0xeb   :  { %v1061_v58 = vadd.f32 %v1060_v49, %v1048_v53 }
  0xf0   :  { %v1049_v50 = vpop.f32.mrf.mxu2 }
  0xf1   :  { %v1062_v51 = vpop.f32.mrf.mxu3 }
 0x100   :  { %v1073_v52 = vpop.f32.mrf.mxu0 }
 0x101   :  { %v1086_v59 = vpop.f32.mrf.mxu1  ;;  %v1074_v62 = vadd.f32 %v1073_v52, %v1061_v58 }
 0x103   :  { %v1087_v1 = vadd.f32 %v1086_v59, %v1074_v62 }
 0x108   :  { %v1099_v54 = vpop.f32.mrf.mxu2  ;;  %v1075_v55 = vpop.f32.mrf.mxu0 }
 0x109   :  { %v1088_v56 = vpop.f32.mrf.mxu1  ;;  %v1112_v57 = vpop.f32.mrf.mxu3  ;;  %v1100_v2 = vadd.f32 %v1099_v54, %v1087_v1 }
 0x10b   :  { %v1113_v3 = vadd.f32 %v1112_v57, %v1100_v2 }
 0x110   :  { %v1101_v63 = vpop.f32.mrf.mxu2 }
 0x111   :  { %v1114_v0 = vpop.f32.mrf.mxu3 }
 0x120   :  { %v1125_v4 = vpop.f32.mrf.mxu0 }
 0x121   :  { %v1126_v5 = vadd.f32 %v1125_v4, %v1113_v3  ;;  %v1138_v6 = vpop.f32.mrf.mxu1 }
 0x123   :  { %v1139_v9 = vadd.f32 %v1138_v6, %v1126_v5 }
 0x125   :  { %v1143_v10 = vmax.f32 %v1139_v9, 0.0 }
 0x127   :  { %v1146_v12 = vrot.slane %v1143_v10, 6 }
 0x128   :  { %v1127_v13 = vpop.f32.mrf.mxu0 }
 0x129   :  { %v1148_v14 = vsel %vm1147_vm0, %v1142_v11, %v1146_v12  ;;  %v1140_v15 = vpop.f32.mrf.mxu1 }
 0x12a   :  { %1150 = vst [vmem:[%s2810_s3] sm:$0xf] %v1148_v14 }

// kernel: _lambda_.47
= control target key start
LH: loop header
LB: loop body
LE: loop exit
PB: predicated region body
PF: predicated region fallthrough
CT: control target
= control target key end

     0   :  { %s2666_s1 = inlined_call_operand.vmem [shape: bf16[2304,128], index: 1, kind: input, shape index: {}]   ;;  %s2667_s0 = inlined_call_operand.vmem [shape: bf16[2,2304], index: 0, kind: input, shape index: {}]   ;;  %s2668_s2 = inlined_call_operand.vmem [shape: f32[1,128], index: 2, kind: input, shape index: {}]   ;;  %s2669_s3 = inlined_call_operand.vmem [shape: f32[2,128], index: 3, kind: output, shape index: {}]  }
   0x1   :  { %v2037_v0 = vld [vmem:[%s2666_s1 + $0x38] sm:$0xff]  ;;  %v2036_v4 = vld [vmem:[%s2666_s1 + $0x30] sm:$0xff]  ;;  %v2035_v8 = vld [vmem:[%s2666_s1 + $0x28] sm:$0xff] }
   0x2   :  { %v2045_v1 = vld [vmem:[%s2666_s1 + $0x78] sm:$0xff]  ;;  %1215 = vmatpush.bf16.msra.mxu0 %v2037_v0  ;;  %v2044_v5 = vld [vmem:[%s2666_s1 + $0x70] sm:$0xff]  ;;  %v2043_v9 = vld [vmem:[%s2666_s1 + $0x68] sm:$0xff] }
   0x3   :  { %v2053_v2 = vld [vmem:[%s2666_s1 + $0xb8] sm:$0xff]  ;;  %1228 = vmatpush.bf16.msra.mxu1 %v2045_v1  ;;  %v2052_v6 = vld [vmem:[%s2666_s1 + $0xb0] sm:$0xff]  ;;  %v2051_v10 = vld [vmem:[%s2666_s1 + $0xa8] sm:$0xff] }
   0x4   :  { %v2061_v3 = vld [vmem:[%s2666_s1 + $0xf8] sm:$0xff]  ;;  %1241 = vmatpush.bf16.msra.mxu2 %v2053_v2  ;;  %v2060_v7 = vld [vmem:[%s2666_s1 + $0xf0] sm:$0xff]  ;;  %v2059_v11 = vld [vmem:[%s2666_s1 + $0xe8] sm:$0xff] }
   0x5   :  { %1254 = vmatpush.bf16.msra.mxu3 %v2061_v3  ;;  %v2034_v12 = vld [vmem:[%s2666_s1 + $0x20] sm:$0xff]  ;;  %v2033_v16 = vld [vmem:[%s2666_s1 + $0x18] sm:$0xff]  ;;  %v2032_v21 = vld [vmem:[%s2666_s1 + $0x10] sm:$0xff] }
   0x6   :  { %1216 = vmatpush.bf16.msra.mxu0 %v2036_v4  ;;  %v2042_v13 = vld [vmem:[%s2666_s1 + $0x60] sm:$0xff]  ;;  %v2041_v17 = vld [vmem:[%s2666_s1 + $0x58] sm:$0xff]  ;;  %v2040_v22 = vld [vmem:[%s2666_s1 + $0x50] sm:$0xff] }
   0x7   :  { %1229 = vmatpush.bf16.msra.mxu1 %v2044_v5  ;;  %v2050_v14 = vld [vmem:[%s2666_s1 + $0xa0] sm:$0xff]  ;;  %v2049_v18 = vld [vmem:[%s2666_s1 + $0x98] sm:$0xff]  ;;  %v2048_v23 = vld [vmem:[%s2666_s1 + $0x90] sm:$0xff] }
   0x8   :  { %1242 = vmatpush.bf16.msra.mxu2 %v2052_v6  ;;  %v2058_v15 = vld [vmem:[%s2666_s1 + $0xe0] sm:$0xff]  ;;  %v2057_v19 = vld [vmem:[%s2666_s1 + $0xd8] sm:$0xff]  ;;  %v2056_v24 = vld [vmem:[%s2666_s1 + $0xd0] sm:$0xff] }
   0x9   :  { %1255 = vmatpush.bf16.msra.mxu3 %v2060_v7  ;;  %v14_v20 = vld [vmem:[%s2667_s0] sm:$0xff]  ;;  %v2031_v25 = vld [vmem:[%s2666_s1 + $0x8] sm:$0xff]  ;;  %v2069_v32 = vld [vmem:[%s2666_s1 + $0x138] sm:$0xff] }
   0xa   :  { %1217 = vmatpush.bf16.msra.mxu0 %v2035_v8  ;;  %310 = vst [vmem:[#allocation1] ss:$9 sm:$0xff] %v14_v20  ;;  %v2039_v26 = vld [vmem:[%s2666_s1 + $0x48] sm:$0xff]  ;;  %v2030_v29 = vld [vmem:[%s2666_s1] sm:$0xff]  ;;  %v2077_v33 = vld [vmem:[%s2666_s1 + $0x178] sm:$0xff] }
   0xb   :  { %1230 = vmatpush.bf16.msra.mxu1 %v2043_v9  ;;  %v2047_v27 = vld [vmem:[%s2666_s1 + $0x88] sm:$0xff]  ;;  %v2038_v30 = vld [vmem:[%s2666_s1 + $0x40] sm:$0xff]  ;;  %v2085_v34 = vld [vmem:[%s2666_s1 + $0x1b8] sm:$0xff] }
   0xc   :  { %1243 = vmatpush.bf16.msra.mxu2 %v2051_v10  ;;  %v2055_v28 = vld [vmem:[%s2666_s1 + $0xc8] sm:$0xff]  ;;  %v2046_v31 = vld [vmem:[%s2666_s1 + $0x80] sm:$0xff]  ;;  %v2093_v36 = vld [vmem:[%s2666_s1 + $0x1f8] sm:$0xff] }
   0xd   :  { %1256 = vmatpush.bf16.msra.mxu3 %v2059_v11  ;;  %v2054_v35 = vld [vmem:[%s2666_s1 + $0xc0] sm:$0xff]  ;;  %v2068_v38 = vld [vmem:[%s2666_s1 + $0x130] sm:$0xff]  ;;  %v15_v44 = vld [vmem:[%s2667_s0 + $0x8] sm:$0xff] }
   0xe   :  { %1218 = vmatpush.bf16.msra.mxu0 %v2034_v12  ;;  %v2076_v40 = vld [vmem:[%s2666_s1 + $0x170] sm:$0xff]  ;;  %v2067_v45 = vld [vmem:[%s2666_s1 + $0x128] sm:$0xff]  ;;  %v2066_v54 = vld [vmem:[%s2666_s1 + $0x120] sm:$0xff] }
   0xf   :  { %1231 = vmatpush.bf16.msra.mxu1 %v2042_v13  ;;  %v2084_v41 = vld [vmem:[%s2666_s1 + $0x1b0] sm:$0xff]  ;;  %v2075_v51 = vld [vmem:[%s2666_s1 + $0x168] sm:$0xff]  ;;  %v2074_v55 = vld [vmem:[%s2666_s1 + $0x160] sm:$0xff] }
  0x10   :  { %1244 = vmatpush.bf16.msra.mxu2 %v2050_v14  ;;  %v2092_v43 = vld [vmem:[%s2666_s1 + $0x1f0] sm:$0xff]  ;;  %v2083_v52 = vld [vmem:[%s2666_s1 + $0x1a8] sm:$0xff]  ;;  %v2082_v56 = vld [vmem:[%s2666_s1 + $0x1a0] sm:$0xff] }
  0x11   :  { %1257 = vmatpush.bf16.msra.mxu3 %v2058_v15  ;;  %v311_v37 = vld [vmem:[#allocation1] sm:$0xff]  ;;  %v313_v39 = vld [vmem:[#allocation1 + $0x12] sm:$0xff]  ;;  %v312_v42 = vld [vmem:[#allocation1 + $0x9] sm:$0xff] }
  0x12   :  { %1219 = vmatpush.bf16.msra.mxu0 %v2033_v16  ;;  %v314_v46 = vld [vmem:[#allocation1 + $0x1b] sm:$0xff]  ;;  %v2326_v48 = vld [vmem:[#allocation1 + $0x24] sm:$0xff]  ;;  %v2330_v50 = vld [vmem:[#allocation1 + $0x2d] sm:$0xff] }
  0x13   :  { %1232 = vmatpush.bf16.msra.mxu1 %v2041_v17  ;;  %v2324_v47 = vld [vmem:[#allocation1 + $0x36] sm:$0xff]  ;;  %v2328_v49 = vld [vmem:[#allocation1 + $0x3f] sm:$0xff]  ;;  %v2091_v53 = vld [vmem:[%s2666_s1 + $0x1e8] sm:$0xff] }
  0x14   :  { %1245 = vmatpush.bf16.msra.mxu2 %v2049_v18  ;;  %320 = vst [vmem:[#allocation1] ss:$9 sm:$0xff] %v15_v44  ;;  %v2090_v57 = vld [vmem:[%s2666_s1 + $0x1e0] sm:$0xff]  ;;  %v2065_v58 = vld [vmem:[%s2666_s1 + $0x118] sm:$0xff]  ;;  %v2064_v62 = vld [vmem:[%s2666_s1 + $0x110] sm:$0xff] }
  0x15   :  { %1258 = vmatpush.bf16.msra.mxu3 %v2057_v19  ;;  %v2073_v59 = vld [vmem:[%s2666_s1 + $0x158] sm:$0xff]  ;;  %v2072_v63 = vld [vmem:[%s2666_s1 + $0x150] sm:$0xff]  ;;  %v2063_v2 = vld [vmem:[%s2666_s1 + $0x108] sm:$0xff] }
  0x16   :  { %1220 = vmatpush.bf16.msra.mxu0 %v2032_v21  ;;  %v2081_v60 = vld [vmem:[%s2666_s1 + $0x198] sm:$0xff]  ;;  %v2080_v0 = vld [vmem:[%s2666_s1 + $0x190] sm:$0xff]  ;;  %v2071_v3 = vld [vmem:[%s2666_s1 + $0x148] sm:$0xff] }
  0x17   :  { %1233 = vmatpush.bf16.msra.mxu1 %v2040_v22  ;;  %v2089_v61 = vld [vmem:[%s2666_s1 + $0x1d8] sm:$0xff]  ;;  %v2088_v1 = vld [vmem:[%s2666_s1 + $0x1d0] sm:$0xff]  ;;  %v2079_v4 = vld [vmem:[%s2666_s1 + $0x188] sm:$0xff] }
  0x18   :  { %1246 = vmatpush.bf16.msra.mxu2 %v2048_v23  ;;  %v2087_v5 = vld [vmem:[%s2666_s1 + $0x1c8] sm:$0xff]  ;;  %v2062_v6 = vld [vmem:[%s2666_s1 + $0x100] sm:$0xff]  ;;  %v2101_v9 = vld [vmem:[%s2666_s1 + $0x238] sm:$0xff] }
  0x19   :  { %1259 = vmatpush.bf16.msra.mxu3 %v2056_v24  ;;  %v2070_v7 = vld [vmem:[%s2666_s1 + $0x140] sm:$0xff]  ;;  %v2109_v10 = vld [vmem:[%s2666_s1 + $0x278] sm:$0xff]  ;;  %v2100_v14 = vld [vmem:[%s2666_s1 + $0x230] sm:$0xff] }
  0x1a   :  { %1221 = vmatpush.bf16.msra.mxu0 %v2031_v25  ;;  %v2078_v8 = vld [vmem:[%s2666_s1 + $0x180] sm:$0xff]  ;;  %v2117_v11 = vld [vmem:[%s2666_s1 + $0x2b8] sm:$0xff]  ;;  %v2108_v15 = vld [vmem:[%s2666_s1 + $0x270] sm:$0xff] }
  0x1b   :  { %1234 = vmatpush.bf16.msra.mxu1 %v2039_v26  ;;  %v2086_v12 = vld [vmem:[%s2666_s1 + $0x1c0] sm:$0xff]  ;;  %v2125_v13 = vld [vmem:[%s2666_s1 + $0x2f8] sm:$0xff]  ;;  %v2116_v16 = vld [vmem:[%s2666_s1 + $0x2b0] sm:$0xff] }
  0x1c   :  { %1247 = vmatpush.bf16.msra.mxu2 %v2047_v27  ;;  %v2124_v17 = vld [vmem:[%s2666_s1 + $0x2f0] sm:$0xff]  ;;  %v2099_v18 = vld [vmem:[%s2666_s1 + $0x228] sm:$0xff]  ;;  %v2098_v22 = vld [vmem:[%s2666_s1 + $0x220] sm:$0xff] }
  0x1d   :  { %1260 = vmatpush.bf16.msra.mxu3 %v2055_v28  ;;  %v2107_v19 = vld [vmem:[%s2666_s1 + $0x268] sm:$0xff]  ;;  %v2106_v23 = vld [vmem:[%s2666_s1 + $0x260] sm:$0xff]  ;;  %v2097_v26 = vld [vmem:[%s2666_s1 + $0x218] sm:$0xff] }
  0x1e   :  { %1222 = vmatpush.bf16.msra.mxu0 %v2030_v29  ;;  %v2115_v20 = vld [vmem:[%s2666_s1 + $0x2a8] sm:$0xff]  ;;  %v2114_v24 = vld [vmem:[%s2666_s1 + $0x2a0] sm:$0xff]  ;;  %v2105_v27 = vld [vmem:[%s2666_s1 + $0x258] sm:$0xff] }
  0x1f   :  { %1235 = vmatpush.bf16.msra.mxu1 %v2038_v30  ;;  %v2123_v21 = vld [vmem:[%s2666_s1 + $0x2e8] sm:$0xff]  ;;  %v2122_v25 = vld [vmem:[%s2666_s1 + $0x2e0] sm:$0xff]  ;;  %v2113_v28 = vld [vmem:[%s2666_s1 + $0x298] sm:$0xff] }
  0x20   :  { %1248 = vmatpush.bf16.msra.mxu2 %v2046_v31  ;;  %v2121_v29 = vld [vmem:[%s2666_s1 + $0x2d8] sm:$0xff]  ;;  %v2096_v30 = vld [vmem:[%s2666_s1 + $0x210] sm:$0xff] }
  0x21   :  { %1261 = vmatpush.bf16.msra.mxu3 %v2054_v35  ;;  %1223 = vmatmul.bf16.vlgmr.msra.gmra.mxu0 %v311_v37  ;;  %v2104_v31 = vld [vmem:[%s2666_s1 + $0x250] sm:$0xff]  ;;  %v2103_v35 = vld [vmem:[%s2666_s1 + $0x248] sm:$0xff]  ;;  %v2149_v44 = vld [vmem:[%s2666_s1 + $0x3b8] sm:$0xff] }
  0x22   :  { %1267 = vmatpush.bf16.msrb.mxu0 %v2069_v32  ;;  %1236 = vmatmul.bf16.vlgmr.msra.gmra.mxu1 %v312_v42  ;;  %v2112_v32 = vld [vmem:[%s2666_s1 + $0x290] sm:$0xff]  ;;  %v2119_v37 = vld [vmem:[%s2666_s1 + $0x2c8] sm:$0xff] }
  0x23   :  { %1280 = vmatpush.bf16.msrb.mxu1 %v2077_v33  ;;  %1249 = vmatmul.bf16.vlgmr.msra.gmra.mxu2 %v313_v39  ;;  %v2120_v33 = vld [vmem:[%s2666_s1 + $0x2d0] sm:$0xff]  ;;  %v2102_v39 = vld [vmem:[%s2666_s1 + $0x240] sm:$0xff] }
  0x24   :  { %1293 = vmatpush.bf16.msrb.mxu2 %v2085_v34  ;;  %1262 = vmatmul.bf16.vlgmr.msra.gmra.mxu3 %v314_v46  ;;  %v2095_v34 = vld [vmem:[%s2666_s1 + $0x208] sm:$0xff]  ;;  %v16_v42 = vld [vmem:[%s2667_s0 + $0x10] sm:$0x3]  ;;  %v321_v46 = vld [vmem:[#allocation1] sm:$0xff] }
  0x25   :  { %1306 = vmatpush.bf16.msrb.mxu3 %v2093_v36  ;;  %v2111_v36 = vld [vmem:[%s2666_s1 + $0x288] sm:$0xff] }
  0x26   :  { %1268 = vmatpush.bf16.msrb.mxu0 %v2068_v38  ;;  %v2094_v38 = vld [vmem:[%s2666_s1 + $0x200] sm:$0xff] }
  0x27   :  { %1281 = vmatpush.bf16.msrb.mxu1 %v2076_v40  ;;  %v2110_v40 = vld [vmem:[%s2666_s1 + $0x280] sm:$0xff] }
  0x28   :  { %1294 = vmatpush.bf16.msrb.mxu2 %v2084_v41  ;;  %v2133_v41 = vld [vmem:[%s2666_s1 + $0x338] sm:$0xff] }
  0x29   :  { %1307 = vmatpush.bf16.msrb.mxu3 %v2092_v43  ;;  %v2141_v43 = vld [vmem:[%s2666_s1 + $0x378] sm:$0xff] }
  0x2a   :  { %1269 = vmatpush.bf16.msrb.mxu0 %v2067_v45  ;;  %v2118_v45 = vld [vmem:[%s2666_s1 + $0x2c0] sm:$0xff] }
  0x2b   :  { %1282 = vmatpush.bf16.msrb.mxu1 %v2075_v51  ;;  %v324_v51 = vld [vmem:[#allocation1 + $0x1b] sm:$0xff] }
  0x2c   :  { %1295 = vmatpush.bf16.msrb.mxu2 %v2083_v52  ;;  %v2140_v52 = vld [vmem:[%s2666_s1 + $0x370] sm:$0xff] }
  0x2d   :  { %1308 = vmatpush.bf16.msrb.mxu3 %v2091_v53  ;;  %v2522_v53 = vld [vmem:[#allocation1 + $0x24] sm:$0xff] }
  0x2e   :  { %1270 = vmatpush.bf16.msrb.mxu0 %v2066_v54  ;;  %v2524_v54 = vld [vmem:[#allocation1 + $0x36] sm:$0xff] }
  0x2f   :  { %1283 = vmatpush.bf16.msrb.mxu1 %v2074_v55  ;;  %v2526_v55 = vld [vmem:[#allocation1 + $0x2d] sm:$0xff] }
  0x30   :  { %1296 = vmatpush.bf16.msrb.mxu2 %v2082_v56  ;;  %v2528_v56 = vld [vmem:[#allocation1 + $0x3f] sm:$0xff] }
  0x31   :  { %1309 = vmatpush.bf16.msrb.mxu3 %v2090_v57  ;;  %v2148_v57 = vld [vmem:[%s2666_s1 + $0x3b0] sm:$0xff] }
  0x32   :  { %1271 = vmatpush.bf16.msrb.mxu0 %v2065_v58  ;;  %v2156_v58 = vld [vmem:[%s2666_s1 + $0x3f0] sm:$0xff] }
  0x33   :  { %1284 = vmatpush.bf16.msrb.mxu1 %v2073_v59  ;;  %v2131_v59 = vld [vmem:[%s2666_s1 + $0x328] sm:$0xff] }
  0x34   :  { %1297 = vmatpush.bf16.msrb.mxu2 %v2081_v60  ;;  %v2139_v60 = vld [vmem:[%s2666_s1 + $0x368] sm:$0xff] }
  0x35   :  { %1310 = vmatpush.bf16.msrb.mxu3 %v2089_v61  ;;  %v2147_v61 = vld [vmem:[%s2666_s1 + $0x3a8] sm:$0xff] }
  0x36   :  { %1272 = vmatpush.bf16.msrb.mxu0 %v2064_v62  ;;  %v2155_v62 = vld [vmem:[%s2666_s1 + $0x3e8] sm:$0xff] }
  0x37   :  { %1285 = vmatpush.bf16.msrb.mxu1 %v2072_v63  ;;  %v2130_v63 = vld [vmem:[%s2666_s1 + $0x320] sm:$0xff] }
  0x38   :  { %1298 = vmatpush.bf16.msrb.mxu2 %v2080_v0  ;;  %v2138_v0 = vld [vmem:[%s2666_s1 + $0x360] sm:$0xff] }
  0x39   :  { %1311 = vmatpush.bf16.msrb.mxu3 %v2088_v1  ;;  %v2146_v1 = vld [vmem:[%s2666_s1 + $0x3a0] sm:$0xff] }
  0x3a   :  { %1273 = vmatpush.bf16.msrb.mxu0 %v2063_v2  ;;  %v2154_v2 = vld [vmem:[%s2666_s1 + $0x3e0] sm:$0xff] }
  0x3b   :  { %1286 = vmatpush.bf16.msrb.mxu1 %v2071_v3  ;;  %v2129_v3 = vld [vmem:[%s2666_s1 + $0x318] sm:$0xff] }
  0x3c   :  { %1299 = vmatpush.bf16.msrb.mxu2 %v2079_v4  ;;  %v2137_v4 = vld [vmem:[%s2666_s1 + $0x358] sm:$0xff] }
  0x3d   :  { %1312 = vmatpush.bf16.msrb.mxu3 %v2087_v5  ;;  %v2145_v5 = vld [vmem:[%s2666_s1 + $0x398] sm:$0xff] }
  0x3e   :  { %1274 = vmatpush.bf16.msrb.mxu0 %v2062_v6  ;;  %v2153_v6 = vld [vmem:[%s2666_s1 + $0x3d8] sm:$0xff] }
  0x3f   :  { %1287 = vmatpush.bf16.msrb.mxu1 %v2070_v7  ;;  %v2128_v7 = vld [vmem:[%s2666_s1 + $0x310] sm:$0xff] }
  0x40   :  { %1300 = vmatpush.bf16.msrb.mxu2 %v2078_v8  ;;  %v2136_v8 = vld [vmem:[%s2666_s1 + $0x350] sm:$0xff] }
  0x41   :  { %1313 = vmatpush.bf16.msrb.mxu3 %v2086_v12  ;;  %1275 = vmatmul.bf16.vlgmr.msrb.gmra.mxu0 %v2326_v48  ;;  %v323_v48 = vld [vmem:[#allocation1 + $0x12] sm:$0xff]  ;;  %v2135_v12 = vld [vmem:[%s2666_s1 + $0x348] sm:$0xff] }
  0x42   :  { %1319 = vmatpush.bf16.msra.mxu0 %v2101_v9  ;;  %1288 = vmatmul.bf16.vlgmr.msrb.gmra.mxu1 %v2330_v50  ;;  %v2132_v50 = vld [vmem:[%s2666_s1 + $0x330] sm:$0xff] }
  0x43   :  { %1332 = vmatpush.bf16.msra.mxu1 %v2109_v10  ;;  %1301 = vmatmul.bf16.vlgmr.msrb.gmra.mxu2 %v2324_v47  ;;  %v2157_v47 = vld [vmem:[%s2666_s1 + $0x3f8] sm:$0xff]  ;;  %v2144_v9 = vld [vmem:[%s2666_s1 + $0x390] sm:$0xff] }
  0x44   :  { %1345 = vmatpush.bf16.msra.mxu2 %v2117_v11  ;;  %1314 = vmatmul.bf16.vlgmr.msrb.gmra.mxu3 %v2328_v49  ;;  %v322_v49 = vld [vmem:[#allocation1 + $0x9] sm:$0xff] }
  0x45   :  { %1358 = vmatpush.bf16.msra.mxu3 %v2125_v13  ;;  %330 = vst [vmem:[#allocation1] ss:$9 sm:$0xff] %v16_v42  ;;  %v2152_v10 = vld [vmem:[%s2666_s1 + $0x3d0] sm:$0xff]  ;;  %v2127_v11 = vld [vmem:[%s2666_s1 + $0x308] sm:$0xff] }
  0x46   :  { %1320 = vmatpush.bf16.msra.mxu0 %v2100_v14  ;;  %v2143_v13 = vld [vmem:[%s2666_s1 + $0x388] sm:$0xff] }
  0x47   :  { %1333 = vmatpush.bf16.msra.mxu1 %v2108_v15  ;;  %v2151_v14 = vld [vmem:[%s2666_s1 + $0x3c8] sm:$0xff]  ;;  %v2126_v15 = vld [vmem:[%s2666_s1 + $0x300] sm:$0xff] }
  0x48   :  { %1346 = vmatpush.bf16.msra.mxu2 %v2116_v16  ;;  %v2134_v16 = vld [vmem:[%s2666_s1 + $0x340] sm:$0xff] }
  0x49   :  { %1359 = vmatpush.bf16.msra.mxu3 %v2124_v17  ;;  %v2165_v17 = vld [vmem:[%s2666_s1 + $0x438] sm:$0xff] }
  0x4a   :  { %1321 = vmatpush.bf16.msra.mxu0 %v2099_v18  ;;  %v2142_v18 = vld [vmem:[%s2666_s1 + $0x380] sm:$0xff] }
  0x4b   :  { %1334 = vmatpush.bf16.msra.mxu1 %v2107_v19  ;;  %v2173_v19 = vld [vmem:[%s2666_s1 + $0x478] sm:$0xff] }
  0x4c   :  { %1347 = vmatpush.bf16.msra.mxu2 %v2115_v20  ;;  %v2150_v20 = vld [vmem:[%s2666_s1 + $0x3c0] sm:$0xff] }
  0x4d   :  { %1360 = vmatpush.bf16.msra.mxu3 %v2123_v21  ;;  %v2164_v21 = vld [vmem:[%s2666_s1 + $0x430] sm:$0xff] }
  0x4e   :  { %1322 = vmatpush.bf16.msra.mxu0 %v2098_v22  ;;  %v2172_v22 = vld [vmem:[%s2666_s1 + $0x470] sm:$0xff] }
  0x4f   :  { %1335 = vmatpush.bf16.msra.mxu1 %v2106_v23  ;;  %v2163_v23 = vld [vmem:[%s2666_s1 + $0x428] sm:$0xff] }
  0x50   :  { %1348 = vmatpush.bf16.msra.mxu2 %v2114_v24  ;;  %v2171_v24 = vld [vmem:[%s2666_s1 + $0x468] sm:$0xff] }
  0x51   :  { %1361 = vmatpush.bf16.msra.mxu3 %v2122_v25  ;;  %v2162_v25 = vld [vmem:[%s2666_s1 + $0x420] sm:$0xff] }
  0x52   :  { %1323 = vmatpush.bf16.msra.mxu0 %v2097_v26  ;;  %v2170_v26 = vld [vmem:[%s2666_s1 + $0x460] sm:$0xff] }
  0x53   :  { %1336 = vmatpush.bf16.msra.mxu1 %v2105_v27  ;;  %v2161_v27 = vld [vmem:[%s2666_s1 + $0x418] sm:$0xff] }
  0x54   :  { %1349 = vmatpush.bf16.msra.mxu2 %v2113_v28  ;;  %v2169_v28 = vld [vmem:[%s2666_s1 + $0x458] sm:$0xff] }
  0x55   :  { %1362 = vmatpush.bf16.msra.mxu3 %v2121_v29  ;;  %v2160_v29 = vld [vmem:[%s2666_s1 + $0x410] sm:$0xff] }
  0x56   :  { %1324 = vmatpush.bf16.msra.mxu0 %v2096_v30  ;;  %v2168_v30 = vld [vmem:[%s2666_s1 + $0x450] sm:$0xff] }
  0x57   :  { %1337 = vmatpush.bf16.msra.mxu1 %v2104_v31  ;;  %v2159_v31 = vld [vmem:[%s2666_s1 + $0x408] sm:$0xff] }
  0x58   :  { %1350 = vmatpush.bf16.msra.mxu2 %v2112_v32  ;;  %v2167_v32 = vld [vmem:[%s2666_s1 + $0x448] sm:$0xff] }
  0x59   :  { %1363 = vmatpush.bf16.msra.mxu3 %v2120_v33  ;;  %v2158_v33 = vld [vmem:[%s2666_s1 + $0x400] sm:$0xff] }
  0x5a   :  { %1325 = vmatpush.bf16.msra.mxu0 %v2095_v34  ;;  %v2166_v34 = vld [vmem:[%s2666_s1 + $0x440] sm:$0xff] }
  0x5b   :  { %1338 = vmatpush.bf16.msra.mxu1 %v2103_v35  ;;  %v331_v35 = vld [vmem:[#allocation1] sm:$0xff] }
  0x5c   :  { %1351 = vmatpush.bf16.msra.mxu2 %v2111_v36  ;;  %v332_v36 = vld [vmem:[#allocation1 + $0x9] sm:$0xff] }
  0x5d   :  { %1364 = vmatpush.bf16.msra.mxu3 %v2119_v37  ;;  %v2174_v37 = vld [vmem:[%s2668_s2] ss:$0 sm:$0xff] }
  0x5e   :  { %1326 = vmatpush.bf16.msra.mxu0 %v2094_v38 }
  0x5f   :  { %1339 = vmatpush.bf16.msra.mxu1 %v2102_v39 }
  0x60   :  { %1352 = vmatpush.bf16.msra.mxu2 %v2110_v40 }
  0x61   :  { %1365 = vmatpush.bf16.msra.mxu3 %v2118_v45  ;;  %1327 = vmatmul.bf16.vlgmr.msra.gmra.mxu0 %v321_v46 }
  0x62   :  { %1371 = vmatpush.bf16.msrb.mxu0 %v2133_v41  ;;  %1340 = vmatmul.bf16.vlgmr.msra.gmra.mxu1 %v322_v49 }
  0x63   :  { %1384 = vmatpush.bf16.msrb.mxu1 %v2141_v43  ;;  %1353 = vmatmul.bf16.vlgmr.msra.gmra.mxu2 %v323_v48 }
  0x64   :  { %1397 = vmatpush.bf16.msrb.mxu2 %v2149_v44  ;;  %1366 = vmatmul.bf16.vlgmr.msra.gmra.mxu3 %v324_v51 }
  0x65   :  { %1410 = vmatpush.bf16.msrb.mxu3 %v2157_v47 }
  0x66   :  { %1372 = vmatpush.bf16.msrb.mxu0 %v2132_v50 }
  0x67   :  { %1385 = vmatpush.bf16.msrb.mxu1 %v2140_v52 }
  0x68   :  { %1398 = vmatpush.bf16.msrb.mxu2 %v2148_v57 }
  0x69   :  { %1411 = vmatpush.bf16.msrb.mxu3 %v2156_v58 }
  0x6a   :  { %1373 = vmatpush.bf16.msrb.mxu0 %v2131_v59 }
  0x6b   :  { %1386 = vmatpush.bf16.msrb.mxu1 %v2139_v60 }
  0x6c   :  { %1399 = vmatpush.bf16.msrb.mxu2 %v2147_v61 }
  0x6d   :  { %1412 = vmatpush.bf16.msrb.mxu3 %v2155_v62 }
  0x6e   :  { %1374 = vmatpush.bf16.msrb.mxu0 %v2130_v63 }
  0x6f   :  { %1387 = vmatpush.bf16.msrb.mxu1 %v2138_v0 }
  0x70   :  { %1400 = vmatpush.bf16.msrb.mxu2 %v2146_v1 }
  0x71   :  { %1413 = vmatpush.bf16.msrb.mxu3 %v2154_v2 }
  0x72   :  { %1375 = vmatpush.bf16.msrb.mxu0 %v2129_v3 }
  0x73   :  { %1388 = vmatpush.bf16.msrb.mxu1 %v2137_v4 }
  0x74   :  { %1401 = vmatpush.bf16.msrb.mxu2 %v2145_v5 }
  0x75   :  { %1414 = vmatpush.bf16.msrb.mxu3 %v2153_v6 }
  0x76   :  { %1376 = vmatpush.bf16.msrb.mxu0 %v2128_v7 }
  0x77   :  { %1389 = vmatpush.bf16.msrb.mxu1 %v2136_v8 }
  0x78   :  { %1402 = vmatpush.bf16.msrb.mxu2 %v2144_v9 }
  0x79   :  { %1415 = vmatpush.bf16.msrb.mxu3 %v2152_v10 }
  0x7a   :  { %1377 = vmatpush.bf16.msrb.mxu0 %v2127_v11 }
  0x7b   :  { %1390 = vmatpush.bf16.msrb.mxu1 %v2135_v12 }
  0x7c   :  { %1403 = vmatpush.bf16.msrb.mxu2 %v2143_v13 }
  0x7d   :  { %1416 = vmatpush.bf16.msrb.mxu3 %v2151_v14 }
  0x7e   :  { %1378 = vmatpush.bf16.msrb.mxu0 %v2126_v15 }
  0x7f   :  { %1391 = vmatpush.bf16.msrb.mxu1 %v2134_v16 }
  0x80   :  { %1404 = vmatpush.bf16.msrb.mxu2 %v2142_v18 }
  0x81   :  { %1417 = vmatpush.bf16.msrb.mxu3 %v2150_v20  ;;  %1379 = vmatmul.bf16.vlgmr.msrb.gmra.mxu0 %v2522_v53 }
  0x82   :  { %1423 = vmatpush.bf16.msra.mxu0 %v2165_v17  ;;  %1392 = vmatmul.bf16.vlgmr.msrb.gmra.mxu1 %v2526_v55 }
  0x83   :  { %1436 = vmatpush.bf16.msra.mxu1 %v2173_v19  ;;  %1405 = vmatmul.bf16.vlgmr.msrb.gmra.mxu2 %v2524_v54 }
  0x84   :  { %1418 = vmatmul.bf16.vlgmr.msrb.gmra.mxu3 %v2528_v56 }
  0x86   :  { %1424 = vmatpush.bf16.msra.mxu0 %v2164_v21 }
  0x87   :  { %1437 = vmatpush.bf16.msra.mxu1 %v2172_v22 }
  0x8a   :  { %1425 = vmatpush.bf16.msra.mxu0 %v2163_v23 }
  0x8b   :  { %1438 = vmatpush.bf16.msra.mxu1 %v2171_v24 }
  0x8e   :  { %1426 = vmatpush.bf16.msra.mxu0 %v2162_v25 }
  0x8f   :  { %1439 = vmatpush.bf16.msra.mxu1 %v2170_v26 }
  0x92   :  { %1427 = vmatpush.bf16.msra.mxu0 %v2161_v27 }
  0x93   :  { %1440 = vmatpush.bf16.msra.mxu1 %v2169_v28 }
  0x96   :  { %1428 = vmatpush.bf16.msra.mxu0 %v2160_v29 }
  0x97   :  { %1441 = vmatpush.bf16.msra.mxu1 %v2168_v30 }
  0x9a   :  { %1429 = vmatpush.bf16.msra.mxu0 %v2159_v31 }
  0x9b   :  { %1442 = vmatpush.bf16.msra.mxu1 %v2167_v32 }
  0x9e   :  { %1430 = vmatpush.bf16.msra.mxu0 %v2158_v33  ;;  %v1224_v38 = vpop.f32.mrf.mxu0 }
  0x9f   :  { %1443 = vmatpush.bf16.msra.mxu1 %v2166_v34  ;;  %v1225_v39 = vadd.f32 %v2174_v37, %v1224_v38  ;;  %v1237_v40 = vpop.f32.mrf.mxu1 }
  0xa1   :  { %1431 = vmatmul.bf16.vlgmr.msra.gmra.mxu0 %v331_v35  ;;  %v1238_v41 = vadd.f32 %v1237_v40, %v1225_v39 }
  0xa2   :  { %1444 = vmatmul.bf16.vlgmr.msra.gmra.mxu1 %v332_v36 }
  0xa6   :  { %v1250_v42 = vpop.f32.mrf.mxu2  ;;  %v1226_v44 = vpop.f32.mrf.mxu0 }
  0xa7   :  { %v1251_v43 = vadd.f32 %v1250_v42, %v1238_v41  ;;  %v1263_v45 = vpop.f32.mrf.mxu3  ;;  %v1239_v46 = vpop.f32.mrf.mxu1 }
  0xa9   :  { %v1264_v47 = vadd.f32 %v1263_v45, %v1251_v43 }
  0xae   :  { %v1252_v48 = vpop.f32.mrf.mxu2 }
  0xaf   :  { %v1265_v49 = vpop.f32.mrf.mxu3 }
  0xbe   :  { %v1276_v50 = vpop.f32.mrf.mxu0 }
  0xbf   :  { %v1289_v51 = vpop.f32.mrf.mxu1  ;;  %v1277_v2 = vadd.f32 %v1276_v50, %v1264_v47 }
  0xc1   :  { %v1290_v3 = vadd.f32 %v1289_v51, %v1277_v2 }
  0xc6   :  { %v1302_v52 = vpop.f32.mrf.mxu2  ;;  %v1278_v54 = vpop.f32.mrf.mxu0 }
  0xc7   :  { %v1315_v53 = vpop.f32.mrf.mxu3  ;;  %v1291_v55 = vpop.f32.mrf.mxu1  ;;  %v1303_v4 = vadd.f32 %v1302_v52, %v1290_v3 }
  0xc9   :  { %v1316_v7 = vadd.f32 %v1315_v53, %v1303_v4 }
  0xce   :  { %v1304_v56 = vpop.f32.mrf.mxu2 }
  0xcf   :  { %v1317_v57 = vpop.f32.mrf.mxu3 }
  0xde   :  { %v1328_v58 = vpop.f32.mrf.mxu0 }
  0xdf   :  { %v1341_v59 = vpop.f32.mrf.mxu1  ;;  %v1329_v8 = vadd.f32 %v1328_v58, %v1316_v7 }
  0xe1   :  { %v1342_v13 = vadd.f32 %v1341_v59, %v1329_v8 }
  0xe6   :  { %v1354_v60 = vpop.f32.mrf.mxu2  ;;  %v1330_v61 = vpop.f32.mrf.mxu0 }
  0xe7   :  { %v1367_v62 = vpop.f32.mrf.mxu3  ;;  %v1343_v63 = vpop.f32.mrf.mxu1  ;;  %v1355_v14 = vadd.f32 %v1354_v60, %v1342_v13 }
  0xe9   :  { %v1368_v15 = vadd.f32 %v1367_v62, %v1355_v14 }
  0xee   :  { %v1356_v0 = vpop.f32.mrf.mxu2 }
  0xef   :  { %v1369_v1 = vpop.f32.mrf.mxu3 }
  0xfe   :  { %v1380_v5 = vpop.f32.mrf.mxu0 }
  0xff   :  { %v1393_v6 = vpop.f32.mrf.mxu1  ;;  %v1381_v18 = vadd.f32 %v1380_v5, %v1368_v15 }
 0x101   :  { %v1394_v19 = vadd.f32 %v1393_v6, %v1381_v18 }
 0x106   :  { %v1406_v9 = vpop.f32.mrf.mxu2  ;;  %v1382_v10 = vpop.f32.mrf.mxu0 }
 0x107   :  { %v1419_v11 = vpop.f32.mrf.mxu3  ;;  %v1395_v12 = vpop.f32.mrf.mxu1  ;;  %v1407_v20 = vadd.f32 %v1406_v9, %v1394_v19 }
 0x109   :  { %v1420_v21 = vadd.f32 %v1419_v11, %v1407_v20 }
 0x10e   :  { %v1408_v16 = vpop.f32.mrf.mxu2 }
 0x10f   :  { %v1421_v17 = vpop.f32.mrf.mxu3 }
 0x11e   :  { %v1432_v22 = vpop.f32.mrf.mxu0 }
 0x11f   :  { %v1433_v23 = vadd.f32 %v1432_v22, %v1420_v21  ;;  %v1445_v24 = vpop.f32.mrf.mxu1 }
 0x121   :  { %v1446_v25 = vadd.f32 %v1445_v24, %v1433_v23 }
 0x123   :  { %1449 = vst [vmem:[%s2669_s3] sm:$0x3] %v1446_v25 }
 0x126   :  { %v1434_v26 = vpop.f32.mrf.mxu0 }
 0x127   :  { %v1447_v27 = vpop.f32.mrf.mxu1 }

// kernel: _lambda_.46
= control target key start
LH: loop header
LB: loop body
LE: loop exit
PB: predicated region body
PF: predicated region fallthrough
CT: control target
= control target key end

     0   :  { %s2687_s1 = inlined_call_operand.vmem [shape: bf16[2304,128], index: 1, kind: input, shape index: {}]   ;;  %s2688_s0 = inlined_call_operand.vmem [shape: bf16[8,2304], index: 0, kind: input, shape index: {}]   ;;  %s2689_s2 = inlined_call_operand.vmem [shape: f32[1,128], index: 2, kind: input, shape index: {}]   ;;  %s2690_s3 = inlined_call_operand.vmem [shape: f32[8,128], index: 3, kind: output, shape index: {}]  }
   0x1   :  { %v2064_v0 = vld [vmem:[%s2687_s1 + $0x38] sm:$0xff]  ;;  %v2063_v4 = vld [vmem:[%s2687_s1 + $0x30] sm:$0xff]  ;;  %v2062_v8 = vld [vmem:[%s2687_s1 + $0x28] sm:$0xff] }
   0x2   :  { %v2072_v1 = vld [vmem:[%s2687_s1 + $0x78] sm:$0xff]  ;;  %1242 = vmatpush.bf16.msra.mxu0 %v2064_v0  ;;  %v2071_v5 = vld [vmem:[%s2687_s1 + $0x70] sm:$0xff]  ;;  %v2070_v9 = vld [vmem:[%s2687_s1 + $0x68] sm:$0xff] }
   0x3   :  { %v2080_v2 = vld [vmem:[%s2687_s1 + $0xb8] sm:$0xff]  ;;  %1255 = vmatpush.bf16.msra.mxu1 %v2072_v1  ;;  %v2079_v6 = vld [vmem:[%s2687_s1 + $0xb0] sm:$0xff]  ;;  %v2078_v10 = vld [vmem:[%s2687_s1 + $0xa8] sm:$0xff] }
   0x4   :  { %v2088_v3 = vld [vmem:[%s2687_s1 + $0xf8] sm:$0xff]  ;;  %1268 = vmatpush.bf16.msra.mxu2 %v2080_v2  ;;  %v2087_v7 = vld [vmem:[%s2687_s1 + $0xf0] sm:$0xff]  ;;  %v2086_v11 = vld [vmem:[%s2687_s1 + $0xe8] sm:$0xff] }
   0x5   :  { %1281 = vmatpush.bf16.msra.mxu3 %v2088_v3  ;;  %v2061_v12 = vld [vmem:[%s2687_s1 + $0x20] sm:$0xff]  ;;  %v2060_v16 = vld [vmem:[%s2687_s1 + $0x18] sm:$0xff]  ;;  %v2059_v20 = vld [vmem:[%s2687_s1 + $0x10] sm:$0xff] }
   0x6   :  { %1243 = vmatpush.bf16.msra.mxu0 %v2063_v4  ;;  %v2069_v13 = vld [vmem:[%s2687_s1 + $0x60] sm:$0xff]  ;;  %v2068_v17 = vld [vmem:[%s2687_s1 + $0x58] sm:$0xff]  ;;  %v2067_v21 = vld [vmem:[%s2687_s1 + $0x50] sm:$0xff] }
   0x7   :  { %1256 = vmatpush.bf16.msra.mxu1 %v2071_v5  ;;  %v2077_v14 = vld [vmem:[%s2687_s1 + $0xa0] sm:$0xff]  ;;  %v2076_v18 = vld [vmem:[%s2687_s1 + $0x98] sm:$0xff]  ;;  %v2075_v22 = vld [vmem:[%s2687_s1 + $0x90] sm:$0xff] }
   0x8   :  { %1269 = vmatpush.bf16.msra.mxu2 %v2079_v6  ;;  %v2085_v15 = vld [vmem:[%s2687_s1 + $0xe0] sm:$0xff]  ;;  %v2084_v19 = vld [vmem:[%s2687_s1 + $0xd8] sm:$0xff]  ;;  %v2083_v23 = vld [vmem:[%s2687_s1 + $0xd0] sm:$0xff] }
   0x9   :  { %1282 = vmatpush.bf16.msra.mxu3 %v2087_v7  ;;  %v2058_v24 = vld [vmem:[%s2687_s1 + $0x8] sm:$0xff]  ;;  %v14_v26 = vld [vmem:[%s2688_s0] sm:$0xff]  ;;  %v2096_v35 = vld [vmem:[%s2687_s1 + $0x138] sm:$0xff] }
   0xa   :  { %1244 = vmatpush.bf16.msra.mxu0 %v2062_v8  ;;  %v2066_v25 = vld [vmem:[%s2687_s1 + $0x48] sm:$0xff]  ;;  %v324_v30 = vunpack.c.l.b16 %v14_v26  ;;  %v2057_v31 = vld [vmem:[%s2687_s1] sm:$0xff]  ;;  %v325_v36 = vunpack.c.h.b16 %v14_v26  ;;  %v2104_v37 = vld [vmem:[%s2687_s1 + $0x178] sm:$0xff] }
   0xb   :  { %1257 = vmatpush.bf16.msra.mxu1 %v2070_v9  ;;  %v2074_v27 = vld [vmem:[%s2687_s1 + $0x88] sm:$0xff]  ;;  %v2065_v32 = vld [vmem:[%s2687_s1 + $0x40] sm:$0xff]  ;;  %v2112_v38 = vld [vmem:[%s2687_s1 + $0x1b8] sm:$0xff] }
   0xc   :  { %1270 = vmatpush.bf16.msra.mxu2 %v2078_v10  ;;  %v2082_v28 = vld [vmem:[%s2687_s1 + $0xc8] sm:$0xff]  ;;  %v2073_v34 = vld [vmem:[%s2687_s1 + $0x80] sm:$0xff]  ;;  %v342_v40 = vpack.c.b16 %v324_v30, %v324_v30  ;;  %v2120_v42 = vld [vmem:[%s2687_s1 + $0x1f8] sm:$0xff]  ;;  %v343_v45 = vpack.c.b16 %v325_v36, %v325_v36 }
   0xd   :  { %1283 = vmatpush.bf16.msra.mxu3 %v2086_v11  ;;  %v15_v29 = vld [vmem:[%s2688_s0 + $0x8] sm:$0xff]  ;;  %v2081_v39 = vld [vmem:[%s2687_s1 + $0xc0] sm:$0xff]  ;;  %v2095_v44 = vld [vmem:[%s2687_s1 + $0x130] sm:$0xff] }
   0xe   :  { %1245 = vmatpush.bf16.msra.mxu0 %v2061_v12  ;;  %v326_v33 = vunpack.c.l.b16 %v15_v29  ;;  %v327_v41 = vunpack.c.h.b16 %v15_v29  ;;  %v2103_v46 = vld [vmem:[%s2687_s1 + $0x170] sm:$0xff]  ;;  %v2094_v50 = vld [vmem:[%s2687_s1 + $0x128] sm:$0xff]  ;;  %v2093_v54 = vld [vmem:[%s2687_s1 + $0x120] sm:$0xff] }
   0xf   :  { %1258 = vmatpush.bf16.msra.mxu1 %v2069_v13  ;;  %v2111_v47 = vld [vmem:[%s2687_s1 + $0x1b0] sm:$0xff]  ;;  %v2102_v51 = vld [vmem:[%s2687_s1 + $0x168] sm:$0xff]  ;;  %v2101_v55 = vld [vmem:[%s2687_s1 + $0x160] sm:$0xff] }
  0x10   :  { %1271 = vmatpush.bf16.msra.mxu2 %v2077_v14  ;;  %v344_v43 = vpack.c.b16 %v326_v33, %v326_v33  ;;  %v345_v48 = vpack.c.b16 %v327_v41, %v327_v41  ;;  %v2119_v49 = vld [vmem:[%s2687_s1 + $0x1f0] sm:$0xff]  ;;  %v2110_v52 = vld [vmem:[%s2687_s1 + $0x1a8] sm:$0xff]  ;;  %v2109_v56 = vld [vmem:[%s2687_s1 + $0x1a0] sm:$0xff] }
  0x11   :  { %1284 = vmatpush.bf16.msra.mxu3 %v2085_v15  ;;  %v2118_v53 = vld [vmem:[%s2687_s1 + $0x1e8] sm:$0xff]  ;;  %v2117_v57 = vld [vmem:[%s2687_s1 + $0x1e0] sm:$0xff]  ;;  %v2092_v58 = vld [vmem:[%s2687_s1 + $0x118] sm:$0xff] }
  0x12   :  { %1246 = vmatpush.bf16.msra.mxu0 %v2060_v16  ;;  %v2100_v59 = vld [vmem:[%s2687_s1 + $0x158] sm:$0xff]  ;;  %v2091_v62 = vld [vmem:[%s2687_s1 + $0x110] sm:$0xff]  ;;  %v2090_v2 = vld [vmem:[%s2687_s1 + $0x108] sm:$0xff] }
  0x13   :  { %1259 = vmatpush.bf16.msra.mxu1 %v2068_v17  ;;  %v2108_v60 = vld [vmem:[%s2687_s1 + $0x198] sm:$0xff]  ;;  %v2099_v63 = vld [vmem:[%s2687_s1 + $0x150] sm:$0xff]  ;;  %v2098_v3 = vld [vmem:[%s2687_s1 + $0x148] sm:$0xff] }
  0x14   :  { %1272 = vmatpush.bf16.msra.mxu2 %v2076_v18  ;;  %v2116_v61 = vld [vmem:[%s2687_s1 + $0x1d8] sm:$0xff]  ;;  %v2107_v0 = vld [vmem:[%s2687_s1 + $0x190] sm:$0xff]  ;;  %v2106_v4 = vld [vmem:[%s2687_s1 + $0x188] sm:$0xff] }
  0x15   :  { %1285 = vmatpush.bf16.msra.mxu3 %v2084_v19  ;;  %v2115_v1 = vld [vmem:[%s2687_s1 + $0x1d0] sm:$0xff]  ;;  %v17_v5 = vld [vmem:[%s2688_s0 + $0x18] sm:$0xff]  ;;  %v2114_v7 = vld [vmem:[%s2687_s1 + $0x1c8] sm:$0xff] }
  0x16   :  { %1247 = vmatpush.bf16.msra.mxu0 %v2059_v20  ;;  %v16_v6 = vld [vmem:[%s2688_s0 + $0x10] sm:$0xff]  ;;  %v2089_v8 = vld [vmem:[%s2687_s1 + $0x100] sm:$0xff]  ;;  %v330_v9 = vunpack.c.l.b16 %v17_v5  ;;  %v2128_v14 = vld [vmem:[%s2687_s1 + $0x238] sm:$0xff]  ;;  %v331_v18 = vunpack.c.h.b16 %v17_v5 }
  0x17   :  { %1260 = vmatpush.bf16.msra.mxu1 %v2067_v21  ;;  %v2097_v10 = vld [vmem:[%s2687_s1 + $0x140] sm:$0xff]  ;;  %v328_v12 = vunpack.c.l.b16 %v16_v6  ;;  %v329_v13 = vunpack.c.h.b16 %v16_v6  ;;  %v2136_v15 = vld [vmem:[%s2687_s1 + $0x278] sm:$0xff]  ;;  %v2134_v29 = vld [vmem:[%s2687_s1 + $0x268] sm:$0xff] }
  0x18   :  { %1273 = vmatpush.bf16.msra.mxu2 %v2075_v22  ;;  %v2105_v11 = vld [vmem:[%s2687_s1 + $0x180] sm:$0xff]  ;;  %v2144_v16 = vld [vmem:[%s2687_s1 + $0x2b8] sm:$0xff]  ;;  %v348_v20 = vpack.c.b16 %v330_v9, %v330_v9  ;;  %v349_v26 = vpack.c.b16 %v331_v18, %v331_v18  ;;  %v2142_v30 = vld [vmem:[%s2687_s1 + $0x2a8] sm:$0xff] }
  0x19   :  { %1286 = vmatpush.bf16.msra.mxu3 %v2083_v23  ;;  %v2113_v17 = vld [vmem:[%s2687_s1 + $0x1c0] sm:$0xff]  ;;  %v2152_v19 = vld [vmem:[%s2687_s1 + $0x2f8] sm:$0xff]  ;;  %v346_v21 = vpack.c.b16 %v328_v12, %v328_v12  ;;  %v347_v22 = vpack.c.b16 %v329_v13, %v329_v13  ;;  %v2127_v23 = vld [vmem:[%s2687_s1 + $0x230] sm:$0xff] }
  0x1a   :  { %1248 = vmatpush.bf16.msra.mxu0 %v2058_v24  ;;  %v2135_v24 = vld [vmem:[%s2687_s1 + $0x270] sm:$0xff]  ;;  %v2133_v33 = vld [vmem:[%s2687_s1 + $0x260] sm:$0xff]  ;;  %v2124_v36 = vld [vmem:[%s2687_s1 + $0x218] sm:$0xff] }
  0x1b   :  { %1261 = vmatpush.bf16.msra.mxu1 %v2066_v25  ;;  %v2143_v25 = vld [vmem:[%s2687_s1 + $0x2b0] sm:$0xff]  ;;  %v2158_v6 = vld [vmem:[%s2687_s1 + $0x328] sm:$0xff]  ;;  %v2173_v12 = vld [vmem:[%s2687_s1 + $0x3a0] sm:$0xff] }
  0x1c   :  { %1274 = vmatpush.bf16.msra.mxu2 %v2074_v27  ;;  %v2151_v27 = vld [vmem:[%s2687_s1 + $0x2f0] sm:$0xff]  ;;  %v2182_v9 = vld [vmem:[%s2687_s1 + $0x3e8] sm:$0xff]  ;;  %v2181_v13 = vld [vmem:[%s2687_s1 + $0x3e0] sm:$0xff] }
  0x1d   :  { %1287 = vmatpush.bf16.msra.mxu3 %v2082_v28  ;;  %v2126_v28 = vld [vmem:[%s2687_s1 + $0x228] sm:$0xff]  ;;  %v2131_v41 = vld [vmem:[%s2687_s1 + $0x250] sm:$0xff] }
  0x1e   :  { %1249 = vmatpush.bf16.msra.mxu0 %v2057_v31  ;;  %v2150_v31 = vld [vmem:[%s2687_s1 + $0x2e8] sm:$0xff]  ;;  %v2183_v5 = vld [vmem:[%s2687_s1 + $0x3f0] sm:$0xff] }
  0x1f   :  { %1262 = vmatpush.bf16.msra.mxu1 %v2065_v32  ;;  %v2125_v32 = vld [vmem:[%s2687_s1 + $0x220] sm:$0xff]  ;;  %v2155_v18 = vld [vmem:[%s2687_s1 + $0x310] sm:$0xff] }
  0x20   :  { %1275 = vmatpush.bf16.msra.mxu2 %v2073_v34  ;;  %v2141_v34 = vld [vmem:[%s2687_s1 + $0x2a0] sm:$0xff] }
  0x21   :  { %1288 = vmatpush.bf16.msra.mxu3 %v2081_v39  ;;  %1250 = vmatmul.bf16.vlgmr.msra.gmra.mxu0 %v342_v40  ;;  %v2148_v39 = vld [vmem:[%s2687_s1 + $0x2d8] sm:$0xff]  ;;  %v2123_v40 = vld [vmem:[%s2687_s1 + $0x210] sm:$0xff] }
  0x22   :  { %1294 = vmatpush.bf16.msrb.mxu0 %v2096_v35  ;;  %1263 = vmatmul.bf16.vlgmr.msra.gmra.mxu1 %v343_v45  ;;  %v2149_v35 = vld [vmem:[%s2687_s1 + $0x2e0] sm:$0xff]  ;;  %v2130_v45 = vld [vmem:[%s2687_s1 + $0x248] sm:$0xff] }
  0x23   :  { %1307 = vmatpush.bf16.msrb.mxu1 %v2104_v37  ;;  %1276 = vmatmul.bf16.vlgmr.msra.gmra.mxu2 %v344_v43  ;;  %v2132_v37 = vld [vmem:[%s2687_s1 + $0x258] sm:$0xff]  ;;  %v2147_v43 = vld [vmem:[%s2687_s1 + $0x2d0] sm:$0xff] }
  0x24   :  { %1320 = vmatpush.bf16.msrb.mxu2 %v2112_v38  ;;  %1289 = vmatmul.bf16.vlgmr.msra.gmra.mxu3 %v345_v48  ;;  %v2140_v38 = vld [vmem:[%s2687_s1 + $0x298] sm:$0xff]  ;;  %v19_v48 = vld [vmem:[%s2688_s0 + $0x28] sm:$0xff] }
  0x25   :  { %1333 = vmatpush.bf16.msrb.mxu3 %v2120_v42  ;;  %v2139_v42 = vld [vmem:[%s2687_s1 + $0x290] sm:$0xff] }
  0x26   :  { %1295 = vmatpush.bf16.msrb.mxu0 %v2095_v44  ;;  %v2122_v44 = vld [vmem:[%s2687_s1 + $0x208] sm:$0xff] }
  0x27   :  { %1308 = vmatpush.bf16.msrb.mxu1 %v2103_v46  ;;  %v18_v46 = vld [vmem:[%s2688_s0 + $0x20] sm:$0xff] }
  0x28   :  { %1321 = vmatpush.bf16.msrb.mxu2 %v2111_v47  ;;  %v2138_v47 = vld [vmem:[%s2687_s1 + $0x288] sm:$0xff] }
  0x29   :  { %1334 = vmatpush.bf16.msrb.mxu3 %v2119_v49  ;;  %v2146_v49 = vld [vmem:[%s2687_s1 + $0x2c8] sm:$0xff] }
  0x2a   :  { %1296 = vmatpush.bf16.msrb.mxu0 %v2094_v50  ;;  %v332_v50 = vunpack.c.l.b16 %v18_v46 }
  0x2b   :  { %1309 = vmatpush.bf16.msrb.mxu1 %v2102_v51  ;;  %v2121_v51 = vld [vmem:[%s2687_s1 + $0x200] sm:$0xff] }
  0x2c   :  { %1322 = vmatpush.bf16.msrb.mxu2 %v2110_v52  ;;  %v2129_v52 = vld [vmem:[%s2687_s1 + $0x240] sm:$0xff] }
  0x2d   :  { %1335 = vmatpush.bf16.msrb.mxu3 %v2118_v53  ;;  %v334_v53 = vunpack.c.l.b16 %v19_v48 }
  0x2e   :  { %1297 = vmatpush.bf16.msrb.mxu0 %v2093_v54  ;;  %v2137_v54 = vld [vmem:[%s2687_s1 + $0x280] sm:$0xff] }
  0x2f   :  { %1310 = vmatpush.bf16.msrb.mxu1 %v2101_v55  ;;  %v2160_v55 = vld [vmem:[%s2687_s1 + $0x338] sm:$0xff] }
  0x30   :  { %1323 = vmatpush.bf16.msrb.mxu2 %v2109_v56  ;;  %v333_v56 = vunpack.c.h.b16 %v18_v46  ;;  %v2189_v46 = vld [vmem:[%s2687_s1 + $0x420] sm:$0xff] }
  0x31   :  { %1336 = vmatpush.bf16.msrb.mxu3 %v2117_v57  ;;  %v2168_v57 = vld [vmem:[%s2687_s1 + $0x378] sm:$0xff] }
  0x32   :  { %1298 = vmatpush.bf16.msrb.mxu0 %v2092_v58  ;;  %v2176_v58 = vld [vmem:[%s2687_s1 + $0x3b8] sm:$0xff] }
  0x33   :  { %1311 = vmatpush.bf16.msrb.mxu1 %v2100_v59  ;;  %v335_v59 = vunpack.c.h.b16 %v19_v48  ;;  %v2188_v48 = vld [vmem:[%s2687_s1 + $0x418] sm:$0xff] }
  0x34   :  { %1324 = vmatpush.bf16.msrb.mxu2 %v2108_v60  ;;  %v2145_v60 = vld [vmem:[%s2687_s1 + $0x2c0] sm:$0xff] }
  0x35   :  { %1337 = vmatpush.bf16.msrb.mxu3 %v2116_v61  ;;  %v350_v61 = vpack.c.b16 %v332_v50, %v332_v50  ;;  %v2187_v50 = vld [vmem:[%s2687_s1 + $0x410] sm:$0xff] }
  0x36   :  { %1299 = vmatpush.bf16.msrb.mxu0 %v2091_v62  ;;  %v352_v62 = vpack.c.b16 %v334_v53, %v334_v53  ;;  %v22_v53 = vld [vmem:[%s2688_s0 + $0x40] sm:$0xff] }
  0x37   :  { %1312 = vmatpush.bf16.msrb.mxu1 %v2099_v63  ;;  %v2184_v63 = vld [vmem:[%s2687_s1 + $0x3f8] sm:$0xff] }
  0x38   :  { %1325 = vmatpush.bf16.msrb.mxu2 %v2107_v0  ;;  %v351_v0 = vpack.c.b16 %v333_v56, %v333_v56  ;;  %v2185_v56 = vld [vmem:[%s2687_s1 + $0x400] sm:$0xff] }
  0x39   :  { %1338 = vmatpush.bf16.msrb.mxu3 %v2115_v1  ;;  %v2159_v1 = vld [vmem:[%s2687_s1 + $0x330] sm:$0xff] }
  0x3a   :  { %1300 = vmatpush.bf16.msrb.mxu0 %v2090_v2  ;;  %v353_v2 = vpack.c.b16 %v335_v59, %v335_v59 }
  0x3b   :  { %1313 = vmatpush.bf16.msrb.mxu1 %v2098_v3  ;;  %v2167_v3 = vld [vmem:[%s2687_s1 + $0x370] sm:$0xff] }
  0x3c   :  { %1326 = vmatpush.bf16.msrb.mxu2 %v2106_v4  ;;  %v2175_v4 = vld [vmem:[%s2687_s1 + $0x3b0] sm:$0xff] }
  0x3d   :  { %1339 = vmatpush.bf16.msrb.mxu3 %v2114_v7  ;;  %v2166_v7 = vld [vmem:[%s2687_s1 + $0x368] sm:$0xff] }
  0x3e   :  { %1301 = vmatpush.bf16.msrb.mxu0 %v2089_v8  ;;  %v2174_v8 = vld [vmem:[%s2687_s1 + $0x3a8] sm:$0xff] }
  0x3f   :  { %1314 = vmatpush.bf16.msrb.mxu1 %v2097_v10  ;;  %v2157_v10 = vld [vmem:[%s2687_s1 + $0x320] sm:$0xff] }
  0x40   :  { %1327 = vmatpush.bf16.msrb.mxu2 %v2105_v11  ;;  %v2165_v11 = vld [vmem:[%s2687_s1 + $0x360] sm:$0xff] }
  0x41   :  { %1340 = vmatpush.bf16.msrb.mxu3 %v2113_v17  ;;  %1302 = vmatmul.bf16.vlgmr.msrb.gmra.mxu0 %v346_v21  ;;  %v2180_v17 = vld [vmem:[%s2687_s1 + $0x3d8] sm:$0xff]  ;;  %v2179_v21 = vld [vmem:[%s2687_s1 + $0x3d0] sm:$0xff] }
  0x42   :  { %1346 = vmatpush.bf16.msra.mxu0 %v2128_v14  ;;  %1315 = vmatmul.bf16.vlgmr.msrb.gmra.mxu1 %v347_v22  ;;  %v2156_v14 = vld [vmem:[%s2687_s1 + $0x318] sm:$0xff]  ;;  %v2154_v22 = vld [vmem:[%s2687_s1 + $0x308] sm:$0xff] }
  0x43   :  { %1359 = vmatpush.bf16.msra.mxu1 %v2136_v15  ;;  %1328 = vmatmul.bf16.vlgmr.msrb.gmra.mxu2 %v348_v20  ;;  %v2164_v15 = vld [vmem:[%s2687_s1 + $0x358] sm:$0xff]  ;;  %v2171_v20 = vld [vmem:[%s2687_s1 + $0x390] sm:$0xff] }
  0x44   :  { %1372 = vmatpush.bf16.msra.mxu2 %v2144_v16  ;;  %1341 = vmatmul.bf16.vlgmr.msrb.gmra.mxu3 %v349_v26  ;;  %v2172_v16 = vld [vmem:[%s2687_s1 + $0x398] sm:$0xff] }
  0x45   :  { %1385 = vmatpush.bf16.msra.mxu3 %v2152_v19  ;;  %v2163_v19 = vld [vmem:[%s2687_s1 + $0x350] sm:$0xff]  ;;  %v21_v26 = vld [vmem:[%s2688_s0 + $0x38] sm:$0xff] }
  0x46   :  { %1347 = vmatpush.bf16.msra.mxu0 %v2127_v23  ;;  %v20_v23 = vld [vmem:[%s2688_s0 + $0x30] sm:$0xff] }
  0x47   :  { %1360 = vmatpush.bf16.msra.mxu1 %v2135_v24  ;;  %v2162_v24 = vld [vmem:[%s2687_s1 + $0x348] sm:$0xff] }
  0x48   :  { %1373 = vmatpush.bf16.msra.mxu2 %v2143_v25  ;;  %v2170_v25 = vld [vmem:[%s2687_s1 + $0x388] sm:$0xff] }
  0x49   :  { %1386 = vmatpush.bf16.msra.mxu3 %v2151_v27  ;;  %v2178_v27 = vld [vmem:[%s2687_s1 + $0x3c8] sm:$0xff] }
  0x4a   :  { %1348 = vmatpush.bf16.msra.mxu0 %v2126_v28  ;;  %v336_v28 = vunpack.c.l.b16 %v20_v23 }
  0x4b   :  { %1361 = vmatpush.bf16.msra.mxu1 %v2134_v29  ;;  %v2153_v29 = vld [vmem:[%s2687_s1 + $0x300] sm:$0xff] }
  0x4c   :  { %1374 = vmatpush.bf16.msra.mxu2 %v2142_v30  ;;  %v337_v30 = vunpack.c.h.b16 %v20_v23 }
  0x4d   :  { %1387 = vmatpush.bf16.msra.mxu3 %v2150_v31  ;;  %v2161_v31 = vld [vmem:[%s2687_s1 + $0x340] sm:$0xff] }
  0x4e   :  { %1349 = vmatpush.bf16.msra.mxu0 %v2125_v32  ;;  %v2192_v32 = vld [vmem:[%s2687_s1 + $0x438] sm:$0xff] }
  0x4f   :  { %1362 = vmatpush.bf16.msra.mxu1 %v2133_v33  ;;  %v338_v33 = vunpack.c.l.b16 %v21_v26 }
  0x50   :  { %1375 = vmatpush.bf16.msra.mxu2 %v2141_v34  ;;  %v2169_v34 = vld [vmem:[%s2687_s1 + $0x380] sm:$0xff] }
  0x51   :  { %1388 = vmatpush.bf16.msra.mxu3 %v2149_v35  ;;  %v2200_v35 = vld [vmem:[%s2687_s1 + $0x478] sm:$0xff] }
  0x52   :  { %1350 = vmatpush.bf16.msra.mxu0 %v2124_v36  ;;  %v339_v36 = vunpack.c.h.b16 %v21_v26 }
  0x53   :  { %1363 = vmatpush.bf16.msra.mxu1 %v2132_v37  ;;  %v2177_v37 = vld [vmem:[%s2687_s1 + $0x3c0] sm:$0xff] }
  0x54   :  { %1376 = vmatpush.bf16.msra.mxu2 %v2140_v38  ;;  %v354_v38 = vpack.c.b16 %v336_v28, %v336_v28 }
  0x55   :  { %1389 = vmatpush.bf16.msra.mxu3 %v2148_v39  ;;  %v355_v39 = vpack.c.b16 %v337_v30, %v337_v30 }
  0x56   :  { %1351 = vmatpush.bf16.msra.mxu0 %v2123_v40  ;;  %v356_v40 = vpack.c.b16 %v338_v33, %v338_v33 }
  0x57   :  { %1364 = vmatpush.bf16.msra.mxu1 %v2131_v41  ;;  %v2191_v41 = vld [vmem:[%s2687_s1 + $0x430] sm:$0xff] }
  0x58   :  { %1377 = vmatpush.bf16.msra.mxu2 %v2139_v42  ;;  %v357_v42 = vpack.c.b16 %v339_v36, %v339_v36 }
  0x59   :  { %1390 = vmatpush.bf16.msra.mxu3 %v2147_v43  ;;  %v2199_v43 = vld [vmem:[%s2687_s1 + $0x470] sm:$0xff] }
  0x5a   :  { %1352 = vmatpush.bf16.msra.mxu0 %v2122_v44  ;;  %v2190_v44 = vld [vmem:[%s2687_s1 + $0x428] sm:$0xff] }
  0x5b   :  { %1365 = vmatpush.bf16.msra.mxu1 %v2130_v45  ;;  %v2198_v45 = vld [vmem:[%s2687_s1 + $0x468] sm:$0xff] }
  0x5c   :  { %1378 = vmatpush.bf16.msra.mxu2 %v2138_v47  ;;  %v2197_v47 = vld [vmem:[%s2687_s1 + $0x460] sm:$0xff] }
  0x5d   :  { %1391 = vmatpush.bf16.msra.mxu3 %v2146_v49  ;;  %v2196_v49 = vld [vmem:[%s2687_s1 + $0x458] sm:$0xff] }
  0x5e   :  { %1353 = vmatpush.bf16.msra.mxu0 %v2121_v51  ;;  %v2195_v51 = vld [vmem:[%s2687_s1 + $0x450] sm:$0xff] }
  0x5f   :  { %1366 = vmatpush.bf16.msra.mxu1 %v2129_v52  ;;  %v2186_v52 = vld [vmem:[%s2687_s1 + $0x408] sm:$0xff] }
  0x60   :  { %1379 = vmatpush.bf16.msra.mxu2 %v2137_v54  ;;  %v2194_v54 = vld [vmem:[%s2687_s1 + $0x448] sm:$0xff] }
  0x61   :  { %1392 = vmatpush.bf16.msra.mxu3 %v2145_v60  ;;  %1354 = vmatmul.bf16.vlgmr.msra.gmra.mxu0 %v350_v61  ;;  %v2201_v61 = vld [vmem:[%s2689_s2] ss:$0 sm:$0xff] }
  0x62   :  { %1398 = vmatpush.bf16.msrb.mxu0 %v2160_v55  ;;  %1367 = vmatmul.bf16.vlgmr.msra.gmra.mxu1 %v351_v0  ;;  %v340_v55 = vunpack.c.l.b16 %v22_v53 }
  0x63   :  { %1411 = vmatpush.bf16.msrb.mxu1 %v2168_v57  ;;  %1380 = vmatmul.bf16.vlgmr.msra.gmra.mxu2 %v352_v62  ;;  %v341_v57 = vunpack.c.h.b16 %v22_v53 }
  0x64   :  { %1424 = vmatpush.bf16.msrb.mxu2 %v2176_v58  ;;  %1393 = vmatmul.bf16.vlgmr.msra.gmra.mxu3 %v353_v2  ;;  %v2193_v58 = vld [vmem:[%s2687_s1 + $0x440] sm:$0xff]  ;;  %v358_v59 = vpack.c.b16 %v340_v55, %v340_v55 }
  0x65   :  { %1437 = vmatpush.bf16.msrb.mxu3 %v2184_v63  ;;  %v359_v60 = vpack.c.b16 %v341_v57, %v341_v57 }
  0x66   :  { %1399 = vmatpush.bf16.msrb.mxu0 %v2159_v1 }
  0x67   :  { %1412 = vmatpush.bf16.msrb.mxu1 %v2167_v3 }
  0x68   :  { %1425 = vmatpush.bf16.msrb.mxu2 %v2175_v4 }
  0x69   :  { %1438 = vmatpush.bf16.msrb.mxu3 %v2183_v5 }
  0x6a   :  { %1400 = vmatpush.bf16.msrb.mxu0 %v2158_v6 }
  0x6b   :  { %1413 = vmatpush.bf16.msrb.mxu1 %v2166_v7 }
  0x6c   :  { %1426 = vmatpush.bf16.msrb.mxu2 %v2174_v8 }
  0x6d   :  { %1439 = vmatpush.bf16.msrb.mxu3 %v2182_v9 }
  0x6e   :  { %1401 = vmatpush.bf16.msrb.mxu0 %v2157_v10 }
  0x6f   :  { %1414 = vmatpush.bf16.msrb.mxu1 %v2165_v11 }
  0x70   :  { %1427 = vmatpush.bf16.msrb.mxu2 %v2173_v12 }
  0x71   :  { %1440 = vmatpush.bf16.msrb.mxu3 %v2181_v13 }
  0x72   :  { %1402 = vmatpush.bf16.msrb.mxu0 %v2156_v14 }
  0x73   :  { %1415 = vmatpush.bf16.msrb.mxu1 %v2164_v15 }
  0x74   :  { %1428 = vmatpush.bf16.msrb.mxu2 %v2172_v16 }
  0x75   :  { %1441 = vmatpush.bf16.msrb.mxu3 %v2180_v17 }
  0x76   :  { %1403 = vmatpush.bf16.msrb.mxu0 %v2155_v18 }
  0x77   :  { %1416 = vmatpush.bf16.msrb.mxu1 %v2163_v19 }
  0x78   :  { %1429 = vmatpush.bf16.msrb.mxu2 %v2171_v20 }
  0x79   :  { %1442 = vmatpush.bf16.msrb.mxu3 %v2179_v21 }
  0x7a   :  { %1404 = vmatpush.bf16.msrb.mxu0 %v2154_v22 }
  0x7b   :  { %1417 = vmatpush.bf16.msrb.mxu1 %v2162_v24 }
  0x7c   :  { %1430 = vmatpush.bf16.msrb.mxu2 %v2170_v25 }
  0x7d   :  { %1443 = vmatpush.bf16.msrb.mxu3 %v2178_v27 }
  0x7e   :  { %1405 = vmatpush.bf16.msrb.mxu0 %v2153_v29 }
  0x7f   :  { %1418 = vmatpush.bf16.msrb.mxu1 %v2161_v31 }
  0x80   :  { %1431 = vmatpush.bf16.msrb.mxu2 %v2169_v34 }
  0x81   :  { %1444 = vmatpush.bf16.msrb.mxu3 %v2177_v37  ;;  %1406 = vmatmul.bf16.vlgmr.msrb.gmra.mxu0 %v354_v38 }
  0x82   :  { %1450 = vmatpush.bf16.msra.mxu0 %v2192_v32  ;;  %1419 = vmatmul.bf16.vlgmr.msrb.gmra.mxu1 %v355_v39 }
  0x83   :  { %1463 = vmatpush.bf16.msra.mxu1 %v2200_v35  ;;  %1432 = vmatmul.bf16.vlgmr.msrb.gmra.mxu2 %v356_v40 }
  0x84   :  { %1445 = vmatmul.bf16.vlgmr.msrb.gmra.mxu3 %v357_v42 }
  0x86   :  { %1451 = vmatpush.bf16.msra.mxu0 %v2191_v41 }
  0x87   :  { %1464 = vmatpush.bf16.msra.mxu1 %v2199_v43 }
  0x8a   :  { %1452 = vmatpush.bf16.msra.mxu0 %v2190_v44 }
  0x8b   :  { %1465 = vmatpush.bf16.msra.mxu1 %v2198_v45 }
  0x8e   :  { %1453 = vmatpush.bf16.msra.mxu0 %v2189_v46 }
  0x8f   :  { %1466 = vmatpush.bf16.msra.mxu1 %v2197_v47 }
  0x92   :  { %1454 = vmatpush.bf16.msra.mxu0 %v2188_v48 }
  0x93   :  { %1467 = vmatpush.bf16.msra.mxu1 %v2196_v49 }
  0x96   :  { %1455 = vmatpush.bf16.msra.mxu0 %v2187_v50 }
  0x97   :  { %1468 = vmatpush.bf16.msra.mxu1 %v2195_v51 }
  0x9a   :  { %1456 = vmatpush.bf16.msra.mxu0 %v2186_v52 }
  0x9b   :  { %1469 = vmatpush.bf16.msra.mxu1 %v2194_v54 }
  0x9e   :  { %1457 = vmatpush.bf16.msra.mxu0 %v2185_v56  ;;  %v1251_v62 = vpop.f32.mrf.mxu0 }
  0x9f   :  { %1470 = vmatpush.bf16.msra.mxu1 %v2193_v58  ;;  %v1252_v63 = vadd.f32 %v2201_v61, %v1251_v62  ;;  %v1264_v0 = vpop.f32.mrf.mxu1 }
  0xa1   :  { %1458 = vmatmul.bf16.vlgmr.msra.gmra.mxu0 %v358_v59  ;;  %v1265_v1 = vadd.f32 %v1264_v0, %v1252_v63 }
  0xa2   :  { %1471 = vmatmul.bf16.vlgmr.msra.gmra.mxu1 %v359_v60 }
  0xa6   :  { %v1277_v2 = vpop.f32.mrf.mxu2  ;;  %v1253_v4 = vpop.f32.mrf.mxu0 }
  0xa7   :  { %v1278_v3 = vadd.f32 %v1277_v2, %v1265_v1  ;;  %v1290_v5 = vpop.f32.mrf.mxu3  ;;  %v1266_v6 = vpop.f32.mrf.mxu1 }
  0xa9   :  { %v1291_v7 = vadd.f32 %v1290_v5, %v1278_v3 }
  0xae   :  { %v1279_v8 = vpop.f32.mrf.mxu2 }
  0xaf   :  { %v1292_v9 = vpop.f32.mrf.mxu3 }
  0xbe   :  { %v1303_v10 = vpop.f32.mrf.mxu0 }
  0xbf   :  { %v1316_v11 = vpop.f32.mrf.mxu1  ;;  %v1304_v26 = vadd.f32 %v1303_v10, %v1291_v7 }
  0xc1   :  { %v1317_v27 = vadd.f32 %v1316_v11, %v1304_v26 }
  0xc6   :  { %v1329_v12 = vpop.f32.mrf.mxu2  ;;  %v1305_v14 = vpop.f32.mrf.mxu0 }
  0xc7   :  { %v1342_v13 = vpop.f32.mrf.mxu3  ;;  %v1318_v15 = vpop.f32.mrf.mxu1  ;;  %v1330_v28 = vadd.f32 %v1329_v12, %v1317_v27 }
  0xc9   :  { %v1343_v31 = vadd.f32 %v1342_v13, %v1330_v28 }
  0xce   :  { %v1331_v16 = vpop.f32.mrf.mxu2 }
  0xcf   :  { %v1344_v17 = vpop.f32.mrf.mxu3 }
  0xde   :  { %v1355_v18 = vpop.f32.mrf.mxu0 }
  0xdf   :  { %v1368_v19 = vpop.f32.mrf.mxu1  ;;  %v1356_v32 = vadd.f32 %v1355_v18, %v1343_v31 }
  0xe1   :  { %v1369_v37 = vadd.f32 %v1368_v19, %v1356_v32 }
  0xe6   :  { %v1381_v20 = vpop.f32.mrf.mxu2  ;;  %v1357_v21 = vpop.f32.mrf.mxu0 }
  0xe7   :  { %v1394_v22 = vpop.f32.mrf.mxu3  ;;  %v1370_v23 = vpop.f32.mrf.mxu1  ;;  %v1382_v38 = vadd.f32 %v1381_v20, %v1369_v37 }
  0xe9   :  { %v1395_v39 = vadd.f32 %v1394_v22, %v1382_v38 }
  0xee   :  { %v1383_v24 = vpop.f32.mrf.mxu2 }
  0xef   :  { %v1396_v25 = vpop.f32.mrf.mxu3 }
  0xfe   :  { %v1407_v29 = vpop.f32.mrf.mxu0 }
  0xff   :  { %v1420_v30 = vpop.f32.mrf.mxu1  ;;  %v1408_v42 = vadd.f32 %v1407_v29, %v1395_v39 }
 0x101   :  { %v1421_v43 = vadd.f32 %v1420_v30, %v1408_v42 }
 0x106   :  { %v1433_v33 = vpop.f32.mrf.mxu2  ;;  %v1409_v34 = vpop.f32.mrf.mxu0 }
 0x107   :  { %v1446_v35 = vpop.f32.mrf.mxu3  ;;  %v1422_v36 = vpop.f32.mrf.mxu1  ;;  %v1434_v44 = vadd.f32 %v1433_v33, %v1421_v43 }
 0x109   :  { %v1447_v45 = vadd.f32 %v1446_v35, %v1434_v44 }
 0x10e   :  { %v1435_v40 = vpop.f32.mrf.mxu2 }
 0x10f   :  { %v1448_v41 = vpop.f32.mrf.mxu3 }
 0x11e   :  { %v1459_v46 = vpop.f32.mrf.mxu0 }
 0x11f   :  { %v1460_v47 = vadd.f32 %v1459_v46, %v1447_v45  ;;  %v1472_v48 = vpop.f32.mrf.mxu1 }
 0x121   :  { %v1473_v49 = vadd.f32 %v1472_v48, %v1460_v47 }
 0x123   :  { %1476 = vst [vmem:[%s2690_s3] sm:$0xff] %v1473_v49 }
 0x126   :  { %v1461_v50 = vpop.f32.mrf.mxu0 }
 0x127   :  { %v1474_v51 = vpop.f32.mrf.mxu1 }

// kernel: _lambda_.45
= control target key start
LH: loop header
LB: loop body
LE: loop exit
PB: predicated region body
PF: predicated region fallthrough
CT: control target
= control target key end

     0   :  { %s1703_s1 = inlined_call_operand.vmem [shape: bf16[1152,128], index: 1, kind: input, shape index: {}]   ;;  %s1704_s0 = inlined_call_operand.vmem [shape: bf16[32,1152], index: 0, kind: input, shape index: {}]   ;;  %s1705_s2 = inlined_call_operand.vmem [shape: f32[1,128], index: 2, kind: input, shape index: {}]   ;;  %s1706_s3 = inlined_call_operand.vmem [shape: f32[32,128], index: 3, kind: output, shape index: {}]  }
   0x1   :  { %v1270_v0 = vld [vmem:[%s1703_s1 + $0x38] sm:$0xff]  ;;  %v1269_v4 = vld [vmem:[%s1703_s1 + $0x30] sm:$0xff]  ;;  %v1268_v8 = vld [vmem:[%s1703_s1 + $0x28] sm:$0xff] }
   0x2   :  { %v1278_v1 = vld [vmem:[%s1703_s1 + $0x78] sm:$0xff]  ;;  %706 = vmatpush.bf16.msra.mxu0 %v1270_v0  ;;  %v1277_v5 = vld [vmem:[%s1703_s1 + $0x70] sm:$0xff]  ;;  %v1276_v9 = vld [vmem:[%s1703_s1 + $0x68] sm:$0xff] }
   0x3   :  { %v1286_v2 = vld [vmem:[%s1703_s1 + $0xb8] sm:$0xff]  ;;  %725 = vmatpush.bf16.msra.mxu1 %v1278_v1  ;;  %v1285_v6 = vld [vmem:[%s1703_s1 + $0xb0] sm:$0xff]  ;;  %v1284_v10 = vld [vmem:[%s1703_s1 + $0xa8] sm:$0xff] }
   0x4   :  { %v1294_v3 = vld [vmem:[%s1703_s1 + $0xf8] sm:$0xff]  ;;  %744 = vmatpush.bf16.msra.mxu2 %v1286_v2  ;;  %v1293_v7 = vld [vmem:[%s1703_s1 + $0xf0] sm:$0xff]  ;;  %v1292_v11 = vld [vmem:[%s1703_s1 + $0xe8] sm:$0xff] }
   0x5   :  { %763 = vmatpush.bf16.msra.mxu3 %v1294_v3  ;;  %v1267_v12 = vld [vmem:[%s1703_s1 + $0x20] sm:$0xff]  ;;  %v1266_v16 = vld [vmem:[%s1703_s1 + $0x18] sm:$0xff]  ;;  %v1265_v20 = vld [vmem:[%s1703_s1 + $0x10] sm:$0xff] }
   0x6   :  { %707 = vmatpush.bf16.msra.mxu0 %v1269_v4  ;;  %v1275_v13 = vld [vmem:[%s1703_s1 + $0x60] sm:$0xff]  ;;  %v1274_v17 = vld [vmem:[%s1703_s1 + $0x58] sm:$0xff]  ;;  %v1273_v21 = vld [vmem:[%s1703_s1 + $0x50] sm:$0xff] }
   0x7   :  { %726 = vmatpush.bf16.msra.mxu1 %v1277_v5  ;;  %v1283_v14 = vld [vmem:[%s1703_s1 + $0xa0] sm:$0xff]  ;;  %v1282_v18 = vld [vmem:[%s1703_s1 + $0x98] sm:$0xff]  ;;  %v1281_v22 = vld [vmem:[%s1703_s1 + $0x90] sm:$0xff] }
   0x8   :  { %745 = vmatpush.bf16.msra.mxu2 %v1285_v6  ;;  %v1291_v15 = vld [vmem:[%s1703_s1 + $0xe0] sm:$0xff]  ;;  %v1290_v19 = vld [vmem:[%s1703_s1 + $0xd8] sm:$0xff]  ;;  %v1289_v23 = vld [vmem:[%s1703_s1 + $0xd0] sm:$0xff] }
   0x9   :  { %764 = vmatpush.bf16.msra.mxu3 %v1293_v7  ;;  %v1264_v24 = vld [vmem:[%s1703_s1 + $0x8] sm:$0xff]  ;;  %v1263_v28 = vld [vmem:[%s1703_s1] sm:$0xff]  ;;  %v897_v39 = vld [vmem:[%s1704_s0 + $0x2c] sm:$0xf0] }
   0xa   :  { %708 = vmatpush.bf16.msra.mxu0 %v1268_v8  ;;  %v1272_v25 = vld [vmem:[%s1703_s1 + $0x48] sm:$0xff]  ;;  %v1271_v29 = vld [vmem:[%s1703_s1 + $0x40] sm:$0xff]  ;;  %v1302_v40 = vld [vmem:[%s1703_s1 + $0x138] sm:$0xff] }
   0xb   :  { %727 = vmatpush.bf16.msra.mxu1 %v1276_v9  ;;  %v1280_v26 = vld [vmem:[%s1703_s1 + $0x88] sm:$0xff]  ;;  %v1279_v30 = vld [vmem:[%s1703_s1 + $0x80] sm:$0xff]  ;;  %v1310_v41 = vld [vmem:[%s1703_s1 + $0x178] sm:$0xff] }
   0xc   :  { %746 = vmatpush.bf16.msra.mxu2 %v1284_v10  ;;  %v1288_v27 = vld [vmem:[%s1703_s1 + $0xc8] sm:$0xff]  ;;  %v1287_v31 = vld [vmem:[%s1703_s1 + $0xc0] sm:$0xff]  ;;  %v1318_v46 = vld [vmem:[%s1703_s1 + $0x1b8] sm:$0xff] }
   0xd   :  { %765 = vmatpush.bf16.msra.mxu3 %v1292_v11  ;;  %v887_v32 = vld [vmem:[%s1704_s0] sm:$0xf]  ;;  %v1249_v33 = vld [vmem:[%s1704_s0 + $0x20] sm:$0xf0]  ;;  %v889_v35 = vld [vmem:[%s1704_s0 + $0x24] sm:$0xf0] }
   0xe   :  { %709 = vmatpush.bf16.msra.mxu0 %v1267_v12  ;;  %v1245_v34 = vld [vmem:[%s1704_s0 + $0x4] sm:$0xf]  ;;  %v895_v36 = vld [vmem:[%s1704_s0 + $0x8] sm:$0xf]  ;;  %v1250_v37 = vld [vmem:[%s1704_s0 + $0x28] sm:$0xf0]  ;;  %v888_v42 = vor.u32 %v1249_v33, %v887_v32 }
   0xf   :  { %728 = vmatpush.bf16.msra.mxu1 %v1275_v13  ;;  %v1246_v38 = vld [vmem:[%s1704_s0 + $0xc] sm:$0xf]  ;;  %v892_v43 = vor.u32 %v1245_v34, %v889_v35  ;;  %v896_v44 = vor.u32 %v1250_v37, %v895_v36  ;;  %v1326_v47 = vld [vmem:[%s1703_s1 + $0x1f8] sm:$0xff]  ;;  %v1301_v48 = vld [vmem:[%s1703_s1 + $0x130] sm:$0xff] }
  0x10   :  { %747 = vmatpush.bf16.msra.mxu2 %v1283_v14  ;;  %v900_v45 = vor.u32 %v1246_v38, %v897_v39  ;;  %v1309_v49 = vld [vmem:[%s1703_s1 + $0x170] sm:$0xff]  ;;  %v1300_v52 = vld [vmem:[%s1703_s1 + $0x128] sm:$0xff]  ;;  %v1299_v56 = vld [vmem:[%s1703_s1 + $0x120] sm:$0xff] }
  0x11   :  { %766 = vmatpush.bf16.msra.mxu3 %v1291_v15  ;;  %v1317_v50 = vld [vmem:[%s1703_s1 + $0x1b0] sm:$0xff]  ;;  %v1308_v53 = vld [vmem:[%s1703_s1 + $0x168] sm:$0xff]  ;;  %v1307_v57 = vld [vmem:[%s1703_s1 + $0x160] sm:$0xff] }
  0x12   :  { %710 = vmatpush.bf16.msra.mxu0 %v1266_v16  ;;  %v1325_v51 = vld [vmem:[%s1703_s1 + $0x1f0] sm:$0xff]  ;;  %v1316_v54 = vld [vmem:[%s1703_s1 + $0x1a8] sm:$0xff]  ;;  %v1315_v58 = vld [vmem:[%s1703_s1 + $0x1a0] sm:$0xff] }
  0x13   :  { %729 = vmatpush.bf16.msra.mxu1 %v1274_v17  ;;  %v1324_v55 = vld [vmem:[%s1703_s1 + $0x1e8] sm:$0xff]  ;;  %v1323_v59 = vld [vmem:[%s1703_s1 + $0x1e0] sm:$0xff]  ;;  %v925_v63 = vld [vmem:[%s1704_s0 + $0x6c] sm:$0xf0] }
  0x14   :  { %748 = vmatpush.bf16.msra.mxu2 %v1282_v18  ;;  %v923_v60 = vld [vmem:[%s1704_s0 + $0x48] sm:$0xf]  ;;  %v1258_v61 = vld [vmem:[%s1704_s0 + $0x68] sm:$0xf0]  ;;  %v931_v0 = vld [vmem:[%s1704_s0 + $0x50] sm:$0xf] }
  0x15   :  { %767 = vmatpush.bf16.msra.mxu3 %v1290_v19  ;;  %v1254_v62 = vld [vmem:[%s1704_s0 + $0x4c] sm:$0xf]  ;;  %v1259_v1 = vld [vmem:[%s1704_s0 + $0x70] sm:$0xf0]  ;;  %v933_v3 = vld [vmem:[%s1704_s0 + $0x74] sm:$0xf0]  ;;  %v924_v6 = vor.u32 %v1258_v61, %v923_v60 }
  0x16   :  { %711 = vmatpush.bf16.msra.mxu0 %v1265_v20  ;;  %v1255_v2 = vld [vmem:[%s1704_s0 + $0x54] sm:$0xf]  ;;  %v1298_v4 = vld [vmem:[%s1703_s1 + $0x118] sm:$0xff]  ;;  %v928_v7 = vor.u32 %v1254_v62, %v925_v63  ;;  %v932_v8 = vor.u32 %v1259_v1, %v931_v0  ;;  %v1296_v16 = vld [vmem:[%s1703_s1 + $0x108] sm:$0xff] }
  0x17   :  { %730 = vmatpush.bf16.msra.mxu1 %v1273_v21  ;;  %v1306_v5 = vld [vmem:[%s1703_s1 + $0x158] sm:$0xff]  ;;  %v936_v9 = vor.u32 %v1255_v2, %v933_v3  ;;  %v1297_v12 = vld [vmem:[%s1703_s1 + $0x110] sm:$0xff]  ;;  %v1304_v17 = vld [vmem:[%s1703_s1 + $0x148] sm:$0xff] }
  0x18   :  { %749 = vmatpush.bf16.msra.mxu2 %v1281_v22  ;;  %v1314_v10 = vld [vmem:[%s1703_s1 + $0x198] sm:$0xff]  ;;  %v1305_v13 = vld [vmem:[%s1703_s1 + $0x150] sm:$0xff]  ;;  %v1312_v18 = vld [vmem:[%s1703_s1 + $0x188] sm:$0xff] }
  0x19   :  { %768 = vmatpush.bf16.msra.mxu3 %v1289_v23  ;;  %v1322_v11 = vld [vmem:[%s1703_s1 + $0x1d8] sm:$0xff]  ;;  %v1313_v14 = vld [vmem:[%s1703_s1 + $0x190] sm:$0xff]  ;;  %v1320_v19 = vld [vmem:[%s1703_s1 + $0x1c8] sm:$0xff] }
  0x1a   :  { %712 = vmatpush.bf16.msra.mxu0 %v1264_v24  ;;  %v1321_v15 = vld [vmem:[%s1703_s1 + $0x1d0] sm:$0xff]  ;;  %v1295_v20 = vld [vmem:[%s1703_s1 + $0x100] sm:$0xff]  ;;  %v1332_v38 = vld [vmem:[%s1703_s1 + $0x228] sm:$0xff] }
  0x1b   :  { %731 = vmatpush.bf16.msra.mxu1 %v1272_v25  ;;  %v1303_v21 = vld [vmem:[%s1703_s1 + $0x140] sm:$0xff]  ;;  %v903_v24 = vld [vmem:[%s1704_s0 + $0x10] sm:$0xf]  ;;  %v1251_v25 = vld [vmem:[%s1704_s0 + $0x30] sm:$0xf0] }
  0x1c   :  { %750 = vmatpush.bf16.msra.mxu2 %v1280_v26  ;;  %v1311_v22 = vld [vmem:[%s1703_s1 + $0x180] sm:$0xff]  ;;  %v1334_v26 = vld [vmem:[%s1703_s1 + $0x238] sm:$0xff]  ;;  %v904_v33 = vor.u32 %v1251_v25, %v903_v24  ;;  %v1333_v37 = vld [vmem:[%s1703_s1 + $0x230] sm:$0xff] }
  0x1d   :  { %769 = vmatpush.bf16.msra.mxu3 %v1288_v27  ;;  %v1319_v23 = vld [vmem:[%s1703_s1 + $0x1c0] sm:$0xff]  ;;  %v1247_v27 = vld [vmem:[%s1704_s0 + $0x14] sm:$0xf] }
  0x1e   :  { %713 = vmatpush.bf16.msra.mxu0 %v1263_v28  ;;  %v905_v28 = vld [vmem:[%s1704_s0 + $0x34] sm:$0xf0]  ;;  %v913_v32 = vld [vmem:[%s1704_s0 + $0x3c] sm:$0xf0] }
  0x1f   :  { %732 = vmatpush.bf16.msra.mxu1 %v1271_v29  ;;  %v911_v29 = vld [vmem:[%s1704_s0 + $0x18] sm:$0xf]  ;;  %v908_v34 = vor.u32 %v1247_v27, %v905_v28  ;;  %v1331_v39 = vld [vmem:[%s1703_s1 + $0x220] sm:$0xff] }
  0x20   :  { %751 = vmatpush.bf16.msra.mxu2 %v1279_v30  ;;  %v1252_v30 = vld [vmem:[%s1704_s0 + $0x38] sm:$0xf0] }
  0x21   :  { %770 = vmatpush.bf16.msra.mxu3 %v1287_v31  ;;  %714 = vmatmul.bf16.vlgmr.msra.gmra.mxu0 %v888_v42  ;;  %v1248_v31 = vld [vmem:[%s1704_s0 + $0x1c] sm:$0xf]  ;;  %v912_v35 = vor.u32 %v1252_v30, %v911_v29 }
  0x22   :  { %782 = vmatpush.bf16.msrb.mxu0 %v1302_v40  ;;  %733 = vmatmul.bf16.vlgmr.msra.gmra.mxu1 %v892_v43  ;;  %v916_v36 = vor.u32 %v1248_v31, %v913_v32  ;;  %v939_v40 = vld [vmem:[%s1704_s0 + $0x58] sm:$0xf]  ;;  %v1256_v42 = vld [vmem:[%s1704_s0 + $0x5c] sm:$0xf]  ;;  %v941_v43 = vld [vmem:[%s1704_s0 + $0x7c] sm:$0xf0] }
  0x23   :  { %801 = vmatpush.bf16.msrb.mxu1 %v1310_v41  ;;  %752 = vmatmul.bf16.vlgmr.msra.gmra.mxu2 %v896_v44  ;;  %v1260_v41 = vld [vmem:[%s1704_s0 + $0x78] sm:$0xf0]  ;;  %v947_v44 = vld [vmem:[%s1704_s0 + $0x60] sm:$0xf] }
  0x24   :  { %771 = vmatmul.bf16.vlgmr.msra.gmra.mxu3 %v900_v45  ;;  %820 = vmatpush.bf16.msrb.mxu2 %v1318_v46  ;;  %v1261_v45 = vld [vmem:[%s1704_s0 + $0x80] sm:$0xf0] }
  0x25   :  { %839 = vmatpush.bf16.msrb.mxu3 %v1326_v47  ;;  %v1257_v46 = vld [vmem:[%s1704_s0 + $0x64] sm:$0xf]  ;;  %v949_v47 = vld [vmem:[%s1704_s0 + $0x84] sm:$0xf0] }
  0x26   :  { %783 = vmatpush.bf16.msrb.mxu0 %v1301_v48  ;;  %v1330_v48 = vld [vmem:[%s1703_s1 + $0x218] sm:$0xff] }
  0x27   :  { %802 = vmatpush.bf16.msrb.mxu1 %v1309_v49  ;;  %v940_v49 = vor.u32 %v1260_v41, %v939_v40 }
  0x28   :  { %821 = vmatpush.bf16.msrb.mxu2 %v1317_v50  ;;  %v944_v50 = vor.u32 %v1256_v42, %v941_v43 }
  0x29   :  { %840 = vmatpush.bf16.msrb.mxu3 %v1325_v51  ;;  %v948_v51 = vor.u32 %v1261_v45, %v947_v44 }
  0x2a   :  { %784 = vmatpush.bf16.msrb.mxu0 %v1300_v52  ;;  %v952_v52 = vor.u32 %v1257_v46, %v949_v47 }
  0x2b   :  { %803 = vmatpush.bf16.msrb.mxu1 %v1308_v53  ;;  %v1329_v53 = vld [vmem:[%s1703_s1 + $0x210] sm:$0xff] }
  0x2c   :  { %822 = vmatpush.bf16.msrb.mxu2 %v1316_v54  ;;  %v1328_v54 = vld [vmem:[%s1703_s1 + $0x208] sm:$0xff] }
  0x2d   :  { %841 = vmatpush.bf16.msrb.mxu3 %v1324_v55  ;;  %v1327_v55 = vld [vmem:[%s1703_s1 + $0x200] sm:$0xff] }
  0x2e   :  { %785 = vmatpush.bf16.msrb.mxu0 %v1299_v56  ;;  %v919_v56 = vld [vmem:[%s1704_s0 + $0x20] sm:$0xf] }
  0x2f   :  { %804 = vmatpush.bf16.msrb.mxu1 %v1307_v57  ;;  %v1253_v57 = vld [vmem:[%s1704_s0 + $0x40] sm:$0xf0] }
  0x30   :  { %823 = vmatpush.bf16.msrb.mxu2 %v1315_v58  ;;  %v955_v58 = vld [vmem:[%s1704_s0 + $0x68] sm:$0xf]  ;;  %v920_v60 = vor.u32 %v1253_v57, %v919_v56 }
  0x31   :  { %842 = vmatpush.bf16.msrb.mxu3 %v1323_v59  ;;  %719 = vmatmul.bf16.gmra.mxu0 %v924_v6  ;;  %v1262_v59 = vld [vmem:[%s1704_s0 + $0x88] sm:$0xf0] }
  0x32   :  { %786 = vmatpush.bf16.msrb.mxu0 %v1298_v4  ;;  %738 = vmatmul.bf16.gmra.mxu1 %v928_v7  ;;  %v956_v61 = vor.u32 %v1262_v59, %v955_v58 }
  0x33   :  { %805 = vmatpush.bf16.msrb.mxu1 %v1306_v5  ;;  %757 = vmatmul.bf16.gmra.mxu2 %v932_v8 }
  0x34   :  { %776 = vmatmul.bf16.gmra.mxu3 %v936_v9  ;;  %824 = vmatpush.bf16.msrb.mxu2 %v1314_v10 }
  0x35   :  { %843 = vmatpush.bf16.msrb.mxu3 %v1322_v11 }
  0x36   :  { %787 = vmatpush.bf16.msrb.mxu0 %v1297_v12 }
  0x37   :  { %806 = vmatpush.bf16.msrb.mxu1 %v1305_v13 }
  0x38   :  { %825 = vmatpush.bf16.msrb.mxu2 %v1313_v14 }
  0x39   :  { %844 = vmatpush.bf16.msrb.mxu3 %v1321_v15 }
  0x3a   :  { %788 = vmatpush.bf16.msrb.mxu0 %v1296_v16  ;;  %v1343_v16 = vld [vmem:[%s1705_s2] ss:$0 sm:$0xff] }
  0x3b   :  { %807 = vmatpush.bf16.msrb.mxu1 %v1304_v17 }
  0x3c   :  { %826 = vmatpush.bf16.msrb.mxu2 %v1312_v18 }
  0x3d   :  { %845 = vmatpush.bf16.msrb.mxu3 %v1320_v19 }
  0x3e   :  { %789 = vmatpush.bf16.msrb.mxu0 %v1295_v20 }
  0x3f   :  { %808 = vmatpush.bf16.msrb.mxu1 %v1303_v21 }
  0x40   :  { %827 = vmatpush.bf16.msrb.mxu2 %v1311_v22 }
  0x41   :  { %846 = vmatpush.bf16.msrb.mxu3 %v1319_v23  ;;  %790 = vmatmul.bf16.vlgmr.msrb.gmra.mxu0 %v904_v33 }
  0x42   :  { %858 = vmatpush.bf16.msra.mxu0 %v1334_v26  ;;  %809 = vmatmul.bf16.vlgmr.msrb.gmra.mxu1 %v908_v34 }
  0x43   :  { %1335 = vmatpush.bf16.msra.mxu1 %v1334_v26  ;;  %828 = vmatmul.bf16.vlgmr.msrb.gmra.mxu2 %v912_v35 }
  0x44   :  { %847 = vmatmul.bf16.vlgmr.msrb.gmra.mxu3 %v916_v36 }
  0x46   :  { %859 = vmatpush.bf16.msra.mxu0 %v1333_v37 }
  0x47   :  { %1336 = vmatpush.bf16.msra.mxu1 %v1333_v37 }
  0x4a   :  { %860 = vmatpush.bf16.msra.mxu0 %v1332_v38 }
  0x4b   :  { %1337 = vmatpush.bf16.msra.mxu1 %v1332_v38 }
  0x4e   :  { %861 = vmatpush.bf16.msra.mxu0 %v1331_v39 }
  0x4f   :  { %1338 = vmatpush.bf16.msra.mxu1 %v1331_v39 }
  0x51   :  { %795 = vmatmul.bf16.gmra.mxu0 %v940_v49 }
  0x52   :  { %862 = vmatpush.bf16.msra.mxu0 %v1330_v48  ;;  %814 = vmatmul.bf16.gmra.mxu1 %v944_v50 }
  0x53   :  { %1339 = vmatpush.bf16.msra.mxu1 %v1330_v48  ;;  %833 = vmatmul.bf16.gmra.mxu2 %v948_v51 }
  0x54   :  { %852 = vmatmul.bf16.gmra.mxu3 %v952_v52 }
  0x56   :  { %863 = vmatpush.bf16.msra.mxu0 %v1329_v53 }
  0x57   :  { %1340 = vmatpush.bf16.msra.mxu1 %v1329_v53 }
  0x5a   :  { %864 = vmatpush.bf16.msra.mxu0 %v1328_v54 }
  0x5b   :  { %1341 = vmatpush.bf16.msra.mxu1 %v1328_v54 }
  0x5e   :  { %865 = vmatpush.bf16.msra.mxu0 %v1327_v55 }
  0x5f   :  { %1342 = vmatpush.bf16.msra.mxu1 %v1327_v55 }
  0x61   :  { %866 = vmatmul.bf16.vlgmr.msra.gmra.mxu0 %v920_v60 }
  0x62   :  { %871 = vmatmul.bf16.vlgmr.msra.gmra.mxu1 %v956_v61 }
  0x9e   :  { %v715_v62 = vpop.f32.mrf.mxu0 }
  0x9f   :  { %v734_v63 = vpop.f32.mrf.mxu1  ;;  %v716_v21 = vadd.f32 %v1343_v16, %v715_v62 }
  0xa1   :  { %v735_v23 = vadd.f32 %v734_v63, %v716_v21 }
  0xa6   :  { %v753_v0 = vpop.f32.mrf.mxu2  ;;  %v717_v2 = vpop.f32.mrf.mxu0 }
  0xa7   :  { %v772_v1 = vpop.f32.mrf.mxu3  ;;  %v736_v3 = vpop.f32.mrf.mxu1  ;;  %v754_v25 = vadd.f32 %v753_v0, %v735_v23  ;;  %v718_v30 = vadd.f32 %v1343_v16, %v717_v2 }
  0xa9   :  { %v773_v33 = vadd.f32 %v772_v1, %v754_v25  ;;  %v737_v35 = vadd.f32 %v736_v3, %v718_v30 }
  0xae   :  { %v755_v4 = vpop.f32.mrf.mxu2  ;;  %v720_v6 = vpop.f32.mrf.mxu0 }
  0xaf   :  { %v774_v5 = vpop.f32.mrf.mxu3  ;;  %v739_v7 = vpop.f32.mrf.mxu1  ;;  %v721_v22 = vadd.f32 %v1343_v16, %v720_v6  ;;  %v756_v39 = vadd.f32 %v755_v4, %v737_v35 }
  0xb1   :  { %v740_v24 = vadd.f32 %v739_v7, %v721_v22  ;;  %v775_v46 = vadd.f32 %v774_v5, %v756_v39 }
  0xb6   :  { %v758_v8 = vpop.f32.mrf.mxu2  ;;  %v722_v10 = vpop.f32.mrf.mxu0 }
  0xb7   :  { %v777_v9 = vpop.f32.mrf.mxu3  ;;  %v741_v11 = vpop.f32.mrf.mxu1  ;;  %v759_v26 = vadd.f32 %v758_v8, %v740_v24  ;;  %v723_v31 = vadd.f32 %v1343_v16, %v722_v10 }
  0xb9   :  { %v778_v34 = vadd.f32 %v777_v9, %v759_v26  ;;  %v742_v36 = vadd.f32 %v741_v11, %v723_v31 }
  0xbe   :  { %v760_v12 = vpop.f32.mrf.mxu2  ;;  %v791_v14 = vpop.f32.mrf.mxu0 }
  0xbf   :  { %v779_v13 = vpop.f32.mrf.mxu3  ;;  %v810_v15 = vpop.f32.mrf.mxu1  ;;  %v792_v37 = vadd.f32 %v791_v14, %v773_v33  ;;  %v761_v40 = vadd.f32 %v760_v12, %v742_v36 }
  0xc1   :  { %v811_v44 = vadd.f32 %v810_v15, %v792_v37  ;;  %v780_v47 = vadd.f32 %v779_v13, %v761_v40 }
  0xc6   :  { %v829_v17 = vpop.f32.mrf.mxu2  ;;  %v793_v19 = vpop.f32.mrf.mxu0 }
  0xc7   :  { %v848_v18 = vpop.f32.mrf.mxu3  ;;  %v812_v20 = vpop.f32.mrf.mxu1  ;;  %v830_v48 = vadd.f32 %v829_v17, %v811_v44  ;;  %v794_v51 = vadd.f32 %v793_v19, %v775_v46 }
  0xc9   :  { %v849_v53 = vadd.f32 %v848_v18, %v830_v48  ;;  %v813_v58 = vadd.f32 %v812_v20, %v794_v51 }
  0xce   :  { %v831_v27 = vpop.f32.mrf.mxu2  ;;  %v796_v28 = vpop.f32.mrf.mxu0 }
  0xcf   :  { %v815_v29 = vpop.f32.mrf.mxu1  ;;  %v850_v32 = vpop.f32.mrf.mxu3  ;;  %v797_v38 = vadd.f32 %v796_v28, %v778_v34  ;;  %v832_v62 = vadd.f32 %v831_v27, %v813_v58 }
  0xd1   :  { %v816_v45 = vadd.f32 %v815_v29, %v797_v38  ;;  %v851_v1 = vadd.f32 %v850_v32, %v832_v62 }
  0xd6   :  { %v834_v41 = vpop.f32.mrf.mxu2  ;;  %v798_v42 = vpop.f32.mrf.mxu0 }
  0xd7   :  { %v817_v43 = vpop.f32.mrf.mxu1  ;;  %v835_v49 = vadd.f32 %v834_v41, %v816_v45  ;;  %v853_v50 = vpop.f32.mrf.mxu3  ;;  %v799_v52 = vadd.f32 %v798_v42, %v780_v47 }
  0xd9   :  { %v854_v54 = vadd.f32 %v853_v50, %v835_v49  ;;  %v818_v59 = vadd.f32 %v817_v43, %v799_v52 }
  0xde   :  { %v836_v55 = vpop.f32.mrf.mxu2  ;;  %v867_v56 = vpop.f32.mrf.mxu0 }
  0xdf   :  { %v872_v57 = vpop.f32.mrf.mxu1  ;;  %v868_v60 = vadd.f32 %v867_v56, %v849_v53  ;;  %v837_v63 = vadd.f32 %v836_v55, %v818_v59  ;;  %v855_v0 = vpop.f32.mrf.mxu3 }
  0xe0   :  { %v873_v61 = vadd.f32 %v872_v57, %v854_v54 }
  0xe1   :  { %877 = vst [vmem:[%s1706_s3] sm:$0xff] %v868_v60  ;;  %v856_v2 = vadd.f32 %v855_v0, %v837_v63 }
  0xe2   :  { %879 = vst [vmem:[%s1706_s3 + $0x10] sm:$0xff] %v873_v61 }
  0xe6   :  { %v869_v3 = vpop.f32.mrf.mxu0 }
  0xe7   :  { %v874_v4 = vpop.f32.mrf.mxu1  ;;  %v870_v5 = vadd.f32 %v869_v3, %v851_v1 }
  0xe8   :  { %v875_v6 = vadd.f32 %v874_v4, %v856_v2 }
  0xe9   :  { %878 = vst [vmem:[%s1706_s3 + $0x8] sm:$0xff] %v870_v5 }
  0xea   :  { %880 = vst [vmem:[%s1706_s3 + $0x18] sm:$0xff] %v875_v6 }

</bundles_post_ra>
